<compile_context>
chip_gen: v6e
topology: v6e:2x2x1
jax: 0.10.0
libtpu: 0.0.40
codegen_flags: <defaults>
</compile_context>

<pallas_src>
import functools

import numpy as np
import jax
import jax.numpy as jnp
from jax.experimental import pallas as pl
from jax.experimental.pallas import tpu as pltpu

# Fixed config: n_downsample=1, mid_downsample=1, n_res=1, input_dim=4, dim=8,
#               norm='in', activ='relu', pad_type='zero'.
N_DOWNSAMPLE = 1
MID_DOWNSAMPLE = 1
N_RES = 1
INPUT_DIM = 4
DIM = 8


def _round_up(x, m):
    return (x + m - 1) // m * m


# ---------------------------------------------------------------------------
# In-kernel helpers
# ---------------------------------------------------------------------------
def _instance_norm(y, eps=1e-5):
    """InstanceNorm2d (affine=False, biased var, eps=1e-5) on a (rows, HW) tile.

    Rows are (n, c) instances; mean and E[y^2] come from ONE cross-lane reduce
    over concat([y, y*y]) (halves the XLU reductions on the critical path)."""
    r = y.shape[0]
    stats = jnp.mean(jnp.concatenate([y, y * y], axis=0), axis=1, keepdims=True)
    mean, msq = stats[:r], stats[r:]
    var = jnp.maximum(msq - mean * mean, 0.0)
    return (y - mean) * jax.lax.rsqrt(var + eps)


def _conv_fused(x, s_ref, w_ref, g_ref):
    """Conv2d with batch stacked on sublanes.

    x     : (N*Cin, HW_in) f32 activation (spatial on the lane axis)
    s_ref : (ntap, HW_in, HW_out) bf16 0/1 gather matrices (pad+stride baked in)
    w_ref : (N*Cout, ntap*N*Cin) bf16 block-diagonal tap-stacked weights
    g_ref : (ntap*N*Cin, HW_out) bf16 VMEM scratch for the stacked gathers

    G[t*R:(t+1)*R] = x.bf16 @ S_t  (exact: each S_t column selects one element)
    y              = W_big @ G     (single K-deep MXU matmul, f32 accumulate)
    """
    ntap = s_ref.shape[0]
    r = x.shape[0]
    xb = x.astype(jnp.bfloat16)
    for t in range(ntap):                                   # static unroll
        g_ref[pl.ds(t * r, r), :] = jnp.dot(
            xb, s_ref[t], preferred_element_type=jnp.float32
        ).astype(jnp.bfloat16)
    return jnp.dot(w_ref[...], g_ref[...], preferred_element_type=jnp.float32)


def _encoder_kernel(p0_ref, w0_ref,
                    sdown_ref, wdown_ref,
                    smid_ref, wmid_ref,
                    sres_ref, wr1_ref, wr2_ref, ws1_ref, ws2_ref,
                    out_ref,
                    gd_ref, gm_ref, gr_ref):
    hw1 = sdown_ref.shape[2]
    hw2 = smid_ref.shape[2]

    # ---- conv0: 7x7 s1 p3 (bias folded into w0 via the ones row of p0),
    #      norm='none', act='none', then LeakyReLU(0.01)
    y = jnp.dot(w0_ref[...], p0_ref[...], preferred_element_type=jnp.float32)
    y = jnp.where(y >= 0.0, y, 0.01 * y)                    # (N*C1, 256)

    # ---- downsample: 4x4 s2 p1, IN + ReLU (conv bias cancelled by affine=False IN)
    y = _conv_fused(y, sdown_ref, wdown_ref, gd_ref)        # (N*C2, 64)
    y = jnp.maximum(_instance_norm(y), 0.0)
    prev = y

    # ---- mid downsample: 4x4 s2 p1, IN + ReLU
    y = _conv_fused(y, smid_ref, wmid_ref, gm_ref)          # (N*C2, 16)
    y = jnp.maximum(_instance_norm(y), 0.0)

    # ---- domain ResBlock: (3x3 IN relu) -> (3x3 IN none) + residual
    r = y
    y = jnp.maximum(_instance_norm(_conv_fused(y, sres_ref, wr1_ref, gr_ref)), 0.0)
    y = _instance_norm(_conv_fused(y, sres_ref, wr2_ref, gr_ref)) + r
    domain = y                                              # (N*C2, 16)

    # ---- shared ResBlock: (3x3 IN lrelu0.2) -> (3x3 IN none) + residual
    r = y
    y = _instance_norm(_conv_fused(y, sres_ref, ws1_ref, gr_ref))
    y = jnp.where(y >= 0.0, y, 0.2 * y)
    y = _instance_norm(_conv_fused(y, sres_ref, ws2_ref, gr_ref)) + r
    share = y                                               # (N*C2, 16)

    # ---- lane-dense epilogue: one unmasked (N*C2, 128) store.
    pieces = [prev, domain, share]
    pad_w = out_ref.shape[1] - (hw1 + 2 * hw2)
    if pad_w > 0:
        pieces.append(jnp.zeros((out_ref.shape[0], pad_w), jnp.float32))
    out_ref[...] = jnp.concatenate(pieces, axis=1)


# ---------------------------------------------------------------------------
# Wrapper-side glue (layout only; first-layer im2col + constant 0/1 matrices)
# ---------------------------------------------------------------------------
def _im2col_stacked(x, k, stride, pad):
    """(N,C,H,W) -> (k*k*N*C, Ho*Wo), row = t*(N*C) + n*C + c, tap t = i*k+j."""
    N, C, H, W = x.shape
    xp = jnp.pad(x, ((0, 0), (0, 0), (pad, pad), (pad, pad)))
    Ho = (H + 2 * pad - k) // stride + 1
    Wo = (W + 2 * pad - k) // stride + 1
    rows = []
    for i in range(k):
        for j in range(k):
            rows.append(
                xp[:, :, i:i + stride * Ho:stride, j:j + stride * Wo:stride]
                .reshape(N * C, Ho * Wo))
    return jnp.concatenate(rows, axis=0), Ho, Wo


def _gather_mats(H, W, k, stride, pad):
    """0/1 matrices S_t (H*W, Ho*Wo), t = i*k+j, so (x @ S_t)[c,q] = xpad tap."""
    Ho = (H + 2 * pad - k) // stride + 1
    Wo = (W + 2 * pad - k) // stride + 1
    s = np.zeros((k * k, H * W, Ho * Wo), np.float32)
    for i in range(k):
        for j in range(k):
            t = i * k + j
            for oh in range(Ho):
                ih = oh * stride + i - pad
                if not (0 <= ih < H):
                    continue
                for ow in range(Wo):
                    iw = ow * stride + j - pad
                    if 0 <= iw < W:
                        s[t, ih * W + iw, oh * Wo + ow] = 1.0
    return jnp.asarray(s), Ho, Wo


def _blockdiag_taps(w, n):
    """(Cout,Cin,k,k) -> bf16 (n*Cout, k*k*n*Cin), block-diagonal over batch.

    row = b*Cout + co ; col = t*(n*Cin) + m*Cin + ci ; nonzero iff m == b."""
    cout, cin, k, _ = w.shape
    taps = jnp.transpose(w, (2, 3, 0, 1)).reshape(k * k, cout, cin)   # (T,Cout,Cin)
    eye = jnp.eye(n, dtype=w.dtype)
    big = jnp.einsum('toc,bm->botmc', taps, eye)
    return big.reshape(n * cout, k * k * n * cin).astype(jnp.bfloat16)


def _conv0_weight_bias(w, b, n, k_pad):
    """Block-diagonal conv0 weight with the bias appended as an extra column
    (paired with the ones row of the patches), zero-padded to K = k_pad."""
    cout, cin, k, _ = w.shape
    taps = jnp.transpose(w, (2, 3, 0, 1)).reshape(k * k, cout, cin)
    eye = jnp.eye(n, dtype=w.dtype)
    big = jnp.einsum('toc,bm->botmc', taps, eye).reshape(n * cout, k * k * n * cin)
    bias_col = jnp.tile(b, (n,)).reshape(n * cout, 1)
    big = jnp.concatenate([big, bias_col], axis=1)
    big = jnp.pad(big, ((0, 0), (0, k_pad - big.shape[1])))
    return big.astype(jnp.bfloat16)


def _full_spec(a):
    nd = a.ndim
    return pl.BlockSpec(a.shape, lambda i, _nd=nd: (0,) * _nd)


def content_encoder_forward(params, x, model_type='a'):
    p = params['a'] if model_type == 'a' else params['b']
    N, Cin, H, W = x.shape
    C1, C2 = DIM, 2 * DIM
    bf16 = jnp.bfloat16

    # conv0 im2col in the wrapper (its input comes from HBM anyway); ones row
    # folds the bias into the matmul; K padded to a multiple of 128.
    p0, H0, W0 = _im2col_stacked(x, 7, 1, 3)                  # (49*N*Cin, 256)
    HW0 = H0 * W0
    k0 = p0.shape[0] + 1
    K0 = _round_up(k0, 128)
    p0 = jnp.concatenate(
        [p0, jnp.ones((1, HW0), p0.dtype), jnp.zeros((K0 - k0, HW0), p0.dtype)],
        axis=0).astype(bf16)
    w0_big = _conv0_weight_bias(p['w0'], p['b0'], N, K0)

    wd, _ = p['down'][0]              # biases feeding affine=False IN are dead
    s_down, H1, W1 = _gather_mats(H0, W0, 4, 2, 1)
    wm, _ = p['mid'][0]
    s_mid, H2, W2 = _gather_mats(H1, W1, 4, 2, 1)
    wr1, _, wr2, _ = p['res'][0]
    s_res, _, _ = _gather_mats(H2, W2, 3, 1, 1)
    ws1, _, ws2, _ = params['share']

    HW1, HW2 = H1 * W1, H2 * W2
    out_w = _round_up(HW1 + 2 * HW2, 128)

    inputs = [
        p0, w0_big,
        s_down.astype(bf16), _blockdiag_taps(wd, N),
        s_mid.astype(bf16), _blockdiag_taps(wm, N),
        s_res.astype(bf16), _blockdiag_taps(wr1, N), _blockdiag_taps(wr2, N),
        _blockdiag_taps(ws1, N), _blockdiag_taps(ws2, N),
    ]
    in_specs = [_full_spec(a) for a in inputs]

    # VMEM scratch for the tap-stacked gather results (bf16 is exact here).
    scratch_shapes = [
        pltpu.VMEM((16 * N * C1, HW1), bf16),    # 4x4 down conv
        pltpu.VMEM((16 * N * C2, HW2), bf16),    # 4x4 mid conv
        pltpu.VMEM((9 * N * C2, HW2), bf16),     # 3x3 res convs (reused 4x)
    ]

    def mm(m, k, n_):
        return 2 * m * k * n_

    flops = mm(N * C1, K0, HW0)
    flops += 16 * mm(N * C1, HW0, HW1) + mm(N * C2, 16 * N * C1, HW1)
    flops += 16 * mm(N * C2, HW1, HW2) + mm(N * C2, 16 * N * C2, HW2)
    flops += 4 * (9 * mm(N * C2, HW2, HW2) + mm(N * C2, 9 * N * C2, HW2))
    bytes_accessed = sum(int(a.size) * a.dtype.itemsize for a in inputs)
    bytes_accessed += N * C2 * out_w * 4

    out = pl.pallas_call(
        _encoder_kernel,
        out_shape=jax.ShapeDtypeStruct((N * C2, out_w), jnp.float32),
        grid=(1,),
        in_specs=in_specs,
        out_specs=pl.BlockSpec((N * C2, out_w), lambda i: (0, 0)),
        scratch_shapes=scratch_shapes,
        compiler_params=pltpu.CompilerParams(dimension_semantics=("arbitrary",)),
        cost_estimate=pl.CostEstimate(flops=int(flops), transcendentals=0,
                                      bytes_accessed=int(bytes_accessed)),
    )(*inputs)

    # Rows are already (n, c)-major; splitting the lane slab is reshape-only.
    prevlayer = out[:, :HW1].reshape(N, C2, H1, W1)
    domain_out = out[:, HW1:HW1 + HW2].reshape(N, C2, H2, W2)
    share_out = out[:, HW1 + HW2:HW1 + 2 * HW2].reshape(N, C2, H2, W2)
    return share_out, domain_out, prevlayer


# ---------------------------------------------------------------------------
# Parameters (PyTorch-shaped) + plain-XLA reference for a numerical cross-check
# ---------------------------------------------------------------------------
def _conv_params(key, cout, cin, k, scale=0.1):
    kw, kb = jax.random.split(key)
    w = scale * jax.random.normal(kw, (cout, cin, k, k), jnp.float32)
    b = scale * jax.random.normal(kb, (cout,), jnp.float32)
    return w, b


def init_params(key):
    def make_domain(key):
        keys = jax.random.split(key, 8)
        d = {}
        d['w0'], d['b0'] = _conv_params(keys[0], DIM, INPUT_DIM, 7)
        cdim = DIM
        d['down'] = []
        for i in range(N_DOWNSAMPLE):
            w, b = _conv_params(keys[1 + i], 2 * cdim, cdim, 4)
            d['down'].append((w, b))
            cdim *= 2
        d['mid'] = []
        for i in range(MID_DOWNSAMPLE):
            w, b = _conv_params(keys[3 + i], cdim, cdim, 4)
            d['mid'].append((w, b))
        d['res'] = []
        for i in range(N_RES):
            w1, b1 = _conv_params(keys[5 + 2 * i], cdim, cdim, 3)
            w2, b2 = _conv_params(keys[6 + 2 * i], cdim, cdim, 3)
            d['res'].append((w1, b1, w2, b2))
        return d

    final_dim = DIM * (2 ** N_DOWNSAMPLE)
    ka, kb_, ks = jax.random.split(key, 3)
    params = {'a': make_domain(ka), 'b': make_domain(kb_)}
    ks1, ks2 = jax.random.split(ks)
    sw1, sb1 = _conv_params(ks1, final_dim, final_dim, 3)
    sw2, sb2 = _conv_params(ks2, final_dim, final_dim, 3)
    params['share'] = (sw1, sb1, sw2, sb2)
    return params


def _conv2d_ref(x, w, b, stride, pad):
    y = jax.lax.conv_general_dilated(
        x, w, window_strides=(stride, stride),
        padding=[(pad, pad), (pad, pad)],
        dimension_numbers=('NCHW', 'OIHW', 'NCHW'),
        precision=jax.lax.Precision.HIGHEST)
    return y + b.reshape(1, -1, 1, 1)


def _in_ref(y, eps=1e-5):
    m = y.mean(axis=(2, 3), keepdims=True)
    v = ((y - m) ** 2).mean(axis=(2, 3), keepdims=True)
    return (y - m) * jax.lax.rsqrt(v + eps)


def content_encoder_reference(params, x, model_type='a'):
    p = params['a'] if model_type == 'a' else params['b']
    h = _conv2d_ref(x, p['w0'], p['b0'], 1, 3)
    h = jnp.where(h >= 0, h, 0.01 * h)
    for (w, b) in p['down']:
        h = jnp.maximum(_in_ref(_conv2d_ref(h, w, b, 2, 1)), 0.0)
    prev = h
    for (w, b) in p['mid']:
        h = jnp.maximum(_in_ref(_conv2d_ref(h, w, b, 2, 1)), 0.0)
    for (w1, b1, w2, b2) in p['res']:
        r = h
        h = jnp.maximum(_in_ref(_conv2d_ref(h, w1, b1, 1, 1)), 0.0)
        h = _in_ref(_conv2d_ref(h, w2, b2, 1, 1)) + r
    dom = h
    sw1, sb1, sw2, sb2 = params['share']
    r = dom
    s = _in_ref(_conv2d_ref(dom, sw1, sb1, 1, 1))
    s = jnp.where(s >= 0, s, 0.2 * s)
    s = _in_ref(_conv2d_ref(s, sw2, sb2, 1, 1)) + r
    return s, dom, prev


if __name__ == "__main__":
    key = jax.random.PRNGKey(0)
    kp, kx = jax.random.split(key)
    params = init_params(kp)

    # NCHW input, matching the PyTorch convention.
    x = jax.random.normal(kx, (2, INPUT_DIM, 16, 16), jnp.float32)

    fwd = jax.jit(functools.partial(content_encoder_forward, params, model_type='a'))
    share_out, domain_out, prevlayer = fwd(x)
    jax.block_until_ready((share_out, domain_out, prevlayer))

    assert share_out.shape == (2, 16, 4, 4), share_out.shape
    assert domain_out.shape == (2, 16, 4, 4), domain_out.shape
    assert prevlayer.shape == (2, 16, 8, 8), prevlayer.shape
    assert bool(jnp.all(jnp.isfinite(share_out)))

    # Numerical cross-check vs a plain-XLA f32 reference of the same module.
    # Tolerance relaxed vs the 5e-3 f32 path solely because MXU operands are
    # bf16 (f32 accumulate) across 7 chained conv layers.
    ref_s, ref_d, ref_p = content_encoder_reference(params, x, 'a')
    assert bool(jnp.allclose(share_out, ref_s, atol=5e-2, rtol=5e-2)), \
        float(jnp.max(jnp.abs(share_out - ref_s)))
    assert bool(jnp.allclose(domain_out, ref_d, atol=5e-2, rtol=5e-2)), \
        float(jnp.max(jnp.abs(domain_out - ref_d)))
    assert bool(jnp.allclose(prevlayer, ref_p, atol=5e-2, rtol=5e-2)), \
        float(jnp.max(jnp.abs(prevlayer - ref_p)))

    print("KERNEL_OK")
</pallas_src>

<mosaic_0001>
module attributes {stable_mosaic.version = 11 : i64} {
  func.func @_encoder_kernel(%arg0: i32, %arg1: memref<512x256xbf16, #tpu.memory_space<vmem>>, %arg2: memref<16x512xbf16, #tpu.memory_space<vmem>>, %arg3: memref<16x256x64xbf16, #tpu.memory_space<vmem>>, %arg4: memref<32x256xbf16, #tpu.memory_space<vmem>>, %arg5: memref<16x64x16xbf16, #tpu.memory_space<vmem>>, %arg6: memref<32x512xbf16, #tpu.memory_space<vmem>>, %arg7: memref<9x16x16xbf16, #tpu.memory_space<vmem>>, %arg8: memref<32x288xbf16, #tpu.memory_space<vmem>>, %arg9: memref<32x288xbf16, #tpu.memory_space<vmem>>, %arg10: memref<32x288xbf16, #tpu.memory_space<vmem>>, %arg11: memref<32x288xbf16, #tpu.memory_space<vmem>>, %arg12: memref<32x128xf32, #tpu.memory_space<vmem>>, %arg13: memref<256x64xbf16, #tpu.memory_space<vmem>>, %arg14: memref<512x16xbf16, #tpu.memory_space<vmem>>, %arg15: memref<288x16xbf16, #tpu.memory_space<vmem>>) attributes {dimension_semantics = [#tpu.dimension_semantics<arbitrary>], iteration_bounds = array<i64: 1>, scalar_prefetch = 0 : i64, scratch_operands = 3 : i64, tpu.core_type = #tpu.core_type<tc>, window_params = [{pipeline_mode = #tpu.pipeline_mode<synchronous>, transform_indices = @transform_0, window_bounds = array<i64: 512, 256>}, {pipeline_mode = #tpu.pipeline_mode<synchronous>, transform_indices = @transform_1, window_bounds = array<i64: 16, 512>}, {pipeline_mode = #tpu.pipeline_mode<synchronous>, transform_indices = @transform_2, window_bounds = array<i64: 16, 256, 64>}, {pipeline_mode = #tpu.pipeline_mode<synchronous>, transform_indices = @transform_3, window_bounds = array<i64: 32, 256>}, {pipeline_mode = #tpu.pipeline_mode<synchronous>, transform_indices = @transform_4, window_bounds = array<i64: 16, 64, 16>}, {pipeline_mode = #tpu.pipeline_mode<synchronous>, transform_indices = @transform_5, window_bounds = array<i64: 32, 512>}, {pipeline_mode = #tpu.pipeline_mode<synchronous>, transform_indices = @transform_6, window_bounds = array<i64: 9, 16, 16>}, {pipeline_mode = #tpu.pipeline_mode<synchronous>, transform_indices = @transform_7, window_bounds = array<i64: 32, 288>}, {pipeline_mode = #tpu.pipeline_mode<synchronous>, transform_indices = @transform_8, window_bounds = array<i64: 32, 288>}, {pipeline_mode = #tpu.pipeline_mode<synchronous>, transform_indices = @transform_9, window_bounds = array<i64: 32, 288>}, {pipeline_mode = #tpu.pipeline_mode<synchronous>, transform_indices = @transform_10, window_bounds = array<i64: 32, 288>}, {pipeline_mode = #tpu.pipeline_mode<synchronous>, transform_indices = @transform_11, window_bounds = array<i64: 32, 128>}]} {
    %c0 = arith.constant 0 : index
    %c0_0 = arith.constant 0 : index
    %0 = vector.load %arg2[%c0, %c0_0] : memref<16x512xbf16, #tpu.memory_space<vmem>>, vector<16x512xbf16>
    %c0_1 = arith.constant 0 : index
    %c0_2 = arith.constant 0 : index
    %1 = vector.load %arg1[%c0_1, %c0_2] : memref<512x256xbf16, #tpu.memory_space<vmem>>, vector<512x256xbf16>
    %cst = arith.constant dense<0.000000e+00> : vector<16x256xf32>
    %2 = tpu.matmul %0, %1, %cst {dimension_numbers = #tpu.dot_dimension_numbers<[1], [0], [0], [1], [0, 0, 1, 1], [], []>} : vector<16x512xbf16>, vector<512x256xbf16>, vector<16x256xf32> -> vector<16x256xf32>
    %cst_3 = arith.constant 0.000000e+00 : f32
    %3 = vector.broadcast %cst_3 : f32 to vector<16x256xf32>
    %4 = arith.cmpf oge, %2, %3 : vector<16x256xf32>
    %cst_4 = arith.constant 0.00999999977 : f32
    %5 = vector.broadcast %cst_4 : f32 to vector<16x256xf32>
    %6 = arith.mulf %5, %2 : vector<16x256xf32>
    %7 = arith.select %4, %2, %6 : vector<16x256xi1>, vector<16x256xf32>
    %8 = arith.truncf %7 : vector<16x256xf32> to vector<16x256xbf16>
    %c0_5 = arith.constant 0 : index
    %c0_6 = arith.constant 0 : index
    %c0_7 = arith.constant 0 : index
    %9 = vector.load %arg3[%c0_5, %c0_6, %c0_7] : memref<16x256x64xbf16, #tpu.memory_space<vmem>>, vector<1x256x64xbf16>
    %10 = vector.shape_cast %9 : vector<1x256x64xbf16> to vector<256x64xbf16>
    %cst_8 = arith.constant dense<0.000000e+00> : vector<16x64xf32>
    %11 = tpu.matmul %8, %10, %cst_8 {dimension_numbers = #tpu.dot_dimension_numbers<[1], [0], [0], [1], [0, 0, 1, 1], [], []>} : vector<16x256xbf16>, vector<256x64xbf16>, vector<16x64xf32> -> vector<16x64xf32>
    %12 = arith.truncf %11 : vector<16x64xf32> to vector<16x64xbf16>
    %c0_9 = arith.constant 0 : index
    %c0_10 = arith.constant 0 : index
    %13 = vector.load %arg13[%c0_9, %c0_10] : memref<256x64xbf16, #tpu.memory_space<vmem>>, vector<16x64xbf16>
    tpu.vector_store %arg13[%c0_9, %c0_10], %12 {strides = array<i32>} : memref<256x64xbf16, #tpu.memory_space<vmem>>, vector<16x64xbf16>,
    %c1 = arith.constant 1 : index
    %c0_11 = arith.constant 0 : index
    %c0_12 = arith.constant 0 : index
    %14 = vector.load %arg3[%c1, %c0_11, %c0_12] : memref<16x256x64xbf16, #tpu.memory_space<vmem>>, vector<1x256x64xbf16>
    %15 = vector.shape_cast %14 : vector<1x256x64xbf16> to vector<256x64xbf16>
    %cst_13 = arith.constant dense<0.000000e+00> : vector<16x64xf32>
    %16 = tpu.matmul %8, %15, %cst_13 {dimension_numbers = #tpu.dot_dimension_numbers<[1], [0], [0], [1], [0, 0, 1, 1], [], []>} : vector<16x256xbf16>, vector<256x64xbf16>, vector<16x64xf32> -> vector<16x64xf32>
    %17 = arith.truncf %16 : vector<16x64xf32> to vector<16x64xbf16>
    %c16 = arith.constant 16 : index
    %c0_14 = arith.constant 0 : index
    %18 = vector.load %arg13[%c16, %c0_14] : memref<256x64xbf16, #tpu.memory_space<vmem>>, vector<16x64xbf16>
    tpu.vector_store %arg13[%c16, %c0_14], %17 {strides = array<i32>} : memref<256x64xbf16, #tpu.memory_space<vmem>>, vector<16x64xbf16>,
    %c2 = arith.constant 2 : index
    %c0_15 = arith.constant 0 : index
    %c0_16 = arith.constant 0 : index
    %19 = vector.load %arg3[%c2, %c0_15, %c0_16] : memref<16x256x64xbf16, #tpu.memory_space<vmem>>, vector<1x256x64xbf16>
    %20 = vector.shape_cast %19 : vector<1x256x64xbf16> to vector<256x64xbf16>
    %cst_17 = arith.constant dense<0.000000e+00> : vector<16x64xf32>
    %21 = tpu.matmul %8, %20, %cst_17 {dimension_numbers = #tpu.dot_dimension_numbers<[1], [0], [0], [1], [0, 0, 1, 1], [], []>} : vector<16x256xbf16>, vector<256x64xbf16>, vector<16x64xf32> -> vector<16x64xf32>
    %22 = arith.truncf %21 : vector<16x64xf32> to vector<16x64xbf16>
    %c32 = arith.constant 32 : index
    %c0_18 = arith.constant 0 : index
    %23 = vector.load %arg13[%c32, %c0_18] : memref<256x64xbf16, #tpu.memory_space<vmem>>, vector<16x64xbf16>
    tpu.vector_store %arg13[%c32, %c0_18], %22 {strides = array<i32>} : memref<256x64xbf16, #tpu.memory_space<vmem>>, vector<16x64xbf16>,
    %c3 = arith.constant 3 : index
    %c0_19 = arith.constant 0 : index
    %c0_20 = arith.constant 0 : index
    %24 = vector.load %arg3[%c3, %c0_19, %c0_20] : memref<16x256x64xbf16, #tpu.memory_space<vmem>>, vector<1x256x64xbf16>
    %25 = vector.shape_cast %24 : vector<1x256x64xbf16> to vector<256x64xbf16>
    %cst_21 = arith.constant dense<0.000000e+00> : vector<16x64xf32>
    %26 = tpu.matmul %8, %25, %cst_21 {dimension_numbers = #tpu.dot_dimension_numbers<[1], [0], [0], [1], [0, 0, 1, 1], [], []>} : vector<16x256xbf16>, vector<256x64xbf16>, vector<16x64xf32> -> vector<16x64xf32>
    %27 = arith.truncf %26 : vector<16x64xf32> to vector<16x64xbf16>
    %c48 = arith.constant 48 : index
    %c0_22 = arith.constant 0 : index
    %28 = vector.load %arg13[%c48, %c0_22] : memref<256x64xbf16, #tpu.memory_space<vmem>>, vector<16x64xbf16>
    tpu.vector_store %arg13[%c48, %c0_22], %27 {strides = array<i32>} : memref<256x64xbf16, #tpu.memory_space<vmem>>, vector<16x64xbf16>,
    %c4 = arith.constant 4 : index
    %c0_23 = arith.constant 0 : index
    %c0_24 = arith.constant 0 : index
    %29 = vector.load %arg3[%c4, %c0_23, %c0_24] : memref<16x256x64xbf16, #tpu.memory_space<vmem>>, vector<1x256x64xbf16>
    %30 = vector.shape_cast %29 : vector<1x256x64xbf16> to vector<256x64xbf16>
    %cst_25 = arith.constant dense<0.000000e+00> : vector<16x64xf32>
    %31 = tpu.matmul %8, %30, %cst_25 {dimension_numbers = #tpu.dot_dimension_numbers<[1], [0], [0], [1], [0, 0, 1, 1], [], []>} : vector<16x256xbf16>, vector<256x64xbf16>, vector<16x64xf32> -> vector<16x64xf32>
    %32 = arith.truncf %31 : vector<16x64xf32> to vector<16x64xbf16>
    %c64 = arith.constant 64 : index
    %c0_26 = arith.constant 0 : index
    %33 = vector.load %arg13[%c64, %c0_26] : memref<256x64xbf16, #tpu.memory_space<vmem>>, vector<16x64xbf16>
    tpu.vector_store %arg13[%c64, %c0_26], %32 {strides = array<i32>} : memref<256x64xbf16, #tpu.memory_space<vmem>>, vector<16x64xbf16>,
    %c5 = arith.constant 5 : index
    %c0_27 = arith.constant 0 : index
    %c0_28 = arith.constant 0 : index
    %34 = vector.load %arg3[%c5, %c0_27, %c0_28] : memref<16x256x64xbf16, #tpu.memory_space<vmem>>, vector<1x256x64xbf16>
    %35 = vector.shape_cast %34 : vector<1x256x64xbf16> to vector<256x64xbf16>
    %cst_29 = arith.constant dense<0.000000e+00> : vector<16x64xf32>
    %36 = tpu.matmul %8, %35, %cst_29 {dimension_numbers = #tpu.dot_dimension_numbers<[1], [0], [0], [1], [0, 0, 1, 1], [], []>} : vector<16x256xbf16>, vector<256x64xbf16>, vector<16x64xf32> -> vector<16x64xf32>
    %37 = arith.truncf %36 : vector<16x64xf32> to vector<16x64xbf16>
    %c80 = arith.constant 80 : index
    %c0_30 = arith.constant 0 : index
    %38 = vector.load %arg13[%c80, %c0_30] : memref<256x64xbf16, #tpu.memory_space<vmem>>, vector<16x64xbf16>
    tpu.vector_store %arg13[%c80, %c0_30], %37 {strides = array<i32>} : memref<256x64xbf16, #tpu.memory_space<vmem>>, vector<16x64xbf16>,
    %c6 = arith.constant 6 : index
    %c0_31 = arith.constant 0 : index
    %c0_32 = arith.constant 0 : index
    %39 = vector.load %arg3[%c6, %c0_31, %c0_32] : memref<16x256x64xbf16, #tpu.memory_space<vmem>>, vector<1x256x64xbf16>
    %40 = vector.shape_cast %39 : vector<1x256x64xbf16> to vector<256x64xbf16>
    %cst_33 = arith.constant dense<0.000000e+00> : vector<16x64xf32>
    %41 = tpu.matmul %8, %40, %cst_33 {dimension_numbers = #tpu.dot_dimension_numbers<[1], [0], [0], [1], [0, 0, 1, 1], [], []>} : vector<16x256xbf16>, vector<256x64xbf16>, vector<16x64xf32> -> vector<16x64xf32>
    %42 = arith.truncf %41 : vector<16x64xf32> to vector<16x64xbf16>
    %c96 = arith.constant 96 : index
    %c0_34 = arith.constant 0 : index
    %43 = vector.load %arg13[%c96, %c0_34] : memref<256x64xbf16, #tpu.memory_space<vmem>>, vector<16x64xbf16>
    tpu.vector_store %arg13[%c96, %c0_34], %42 {strides = array<i32>} : memref<256x64xbf16, #tpu.memory_space<vmem>>, vector<16x64xbf16>,
    %c7 = arith.constant 7 : index
    %c0_35 = arith.constant 0 : index
    %c0_36 = arith.constant 0 : index
    %44 = vector.load %arg3[%c7, %c0_35, %c0_36] : memref<16x256x64xbf16, #tpu.memory_space<vmem>>, vector<1x256x64xbf16>
    %45 = vector.shape_cast %44 : vector<1x256x64xbf16> to vector<256x64xbf16>
    %cst_37 = arith.constant dense<0.000000e+00> : vector<16x64xf32>
    %46 = tpu.matmul %8, %45, %cst_37 {dimension_numbers = #tpu.dot_dimension_numbers<[1], [0], [0], [1], [0, 0, 1, 1], [], []>} : vector<16x256xbf16>, vector<256x64xbf16>, vector<16x64xf32> -> vector<16x64xf32>
    %47 = arith.truncf %46 : vector<16x64xf32> to vector<16x64xbf16>
    %c112 = arith.constant 112 : index
    %c0_38 = arith.constant 0 : index
    %48 = vector.load %arg13[%c112, %c0_38] : memref<256x64xbf16, #tpu.memory_space<vmem>>, vector<16x64xbf16>
    tpu.vector_store %arg13[%c112, %c0_38], %47 {strides = array<i32>} : memref<256x64xbf16, #tpu.memory_space<vmem>>, vector<16x64xbf16>,
    %c8 = arith.constant 8 : index
    %c0_39 = arith.constant 0 : index
    %c0_40 = arith.constant 0 : index
    %49 = vector.load %arg3[%c8, %c0_39, %c0_40] : memref<16x256x64xbf16, #tpu.memory_space<vmem>>, vector<1x256x64xbf16>
    %50 = vector.shape_cast %49 : vector<1x256x64xbf16> to vector<256x64xbf16>
    %cst_41 = arith.constant dense<0.000000e+00> : vector<16x64xf32>
    %51 = tpu.matmul %8, %50, %cst_41 {dimension_numbers = #tpu.dot_dimension_numbers<[1], [0], [0], [1], [0, 0, 1, 1], [], []>} : vector<16x256xbf16>, vector<256x64xbf16>, vector<16x64xf32> -> vector<16x64xf32>
    %52 = arith.truncf %51 : vector<16x64xf32> to vector<16x64xbf16>
    %c128 = arith.constant 128 : index
    %c0_42 = arith.constant 0 : index
    %53 = vector.load %arg13[%c128, %c0_42] : memref<256x64xbf16, #tpu.memory_space<vmem>>, vector<16x64xbf16>
    tpu.vector_store %arg13[%c128, %c0_42], %52 {strides = array<i32>} : memref<256x64xbf16, #tpu.memory_space<vmem>>, vector<16x64xbf16>,
    %c9 = arith.constant 9 : index
    %c0_43 = arith.constant 0 : index
    %c0_44 = arith.constant 0 : index
    %54 = vector.load %arg3[%c9, %c0_43, %c0_44] : memref<16x256x64xbf16, #tpu.memory_space<vmem>>, vector<1x256x64xbf16>
    %55 = vector.shape_cast %54 : vector<1x256x64xbf16> to vector<256x64xbf16>
    %cst_45 = arith.constant dense<0.000000e+00> : vector<16x64xf32>
    %56 = tpu.matmul %8, %55, %cst_45 {dimension_numbers = #tpu.dot_dimension_numbers<[1], [0], [0], [1], [0, 0, 1, 1], [], []>} : vector<16x256xbf16>, vector<256x64xbf16>, vector<16x64xf32> -> vector<16x64xf32>
    %57 = arith.truncf %56 : vector<16x64xf32> to vector<16x64xbf16>
    %c144 = arith.constant 144 : index
    %c0_46 = arith.constant 0 : index
    %58 = vector.load %arg13[%c144, %c0_46] : memref<256x64xbf16, #tpu.memory_space<vmem>>, vector<16x64xbf16>
    tpu.vector_store %arg13[%c144, %c0_46], %57 {strides = array<i32>} : memref<256x64xbf16, #tpu.memory_space<vmem>>, vector<16x64xbf16>,
    %c10 = arith.constant 10 : index
    %c0_47 = arith.constant 0 : index
    %c0_48 = arith.constant 0 : index
    %59 = vector.load %arg3[%c10, %c0_47, %c0_48] : memref<16x256x64xbf16, #tpu.memory_space<vmem>>, vector<1x256x64xbf16>
    %60 = vector.shape_cast %59 : vector<1x256x64xbf16> to vector<256x64xbf16>
    %cst_49 = arith.constant dense<0.000000e+00> : vector<16x64xf32>
    %61 = tpu.matmul %8, %60, %cst_49 {dimension_numbers = #tpu.dot_dimension_numbers<[1], [0], [0], [1], [0, 0, 1, 1], [], []>} : vector<16x256xbf16>, vector<256x64xbf16>, vector<16x64xf32> -> vector<16x64xf32>
    %62 = arith.truncf %61 : vector<16x64xf32> to vector<16x64xbf16>
    %c160 = arith.constant 160 : index
    %c0_50 = arith.constant 0 : index
    %63 = vector.load %arg13[%c160, %c0_50] : memref<256x64xbf16, #tpu.memory_space<vmem>>, vector<16x64xbf16>
    tpu.vector_store %arg13[%c160, %c0_50], %62 {strides = array<i32>} : memref<256x64xbf16, #tpu.memory_space<vmem>>, vector<16x64xbf16>,
    %c11 = arith.constant 11 : index
    %c0_51 = arith.constant 0 : index
    %c0_52 = arith.constant 0 : index
    %64 = vector.load %arg3[%c11, %c0_51, %c0_52] : memref<16x256x64xbf16, #tpu.memory_space<vmem>>, vector<1x256x64xbf16>
    %65 = vector.shape_cast %64 : vector<1x256x64xbf16> to vector<256x64xbf16>
    %cst_53 = arith.constant dense<0.000000e+00> : vector<16x64xf32>
    %66 = tpu.matmul %8, %65, %cst_53 {dimension_numbers = #tpu.dot_dimension_numbers<[1], [0], [0], [1], [0, 0, 1, 1], [], []>} : vector<16x256xbf16>, vector<256x64xbf16>, vector<16x64xf32> -> vector<16x64xf32>
    %67 = arith.truncf %66 : vector<16x64xf32> to vector<16x64xbf16>
    %c176 = arith.constant 176 : index
    %c0_54 = arith.constant 0 : index
    %68 = vector.load %arg13[%c176, %c0_54] : memref<256x64xbf16, #tpu.memory_space<vmem>>, vector<16x64xbf16>
    tpu.vector_store %arg13[%c176, %c0_54], %67 {strides = array<i32>} : memref<256x64xbf16, #tpu.memory_space<vmem>>, vector<16x64xbf16>,
    %c12 = arith.constant 12 : index
    %c0_55 = arith.constant 0 : index
    %c0_56 = arith.constant 0 : index
    %69 = vector.load %arg3[%c12, %c0_55, %c0_56] : memref<16x256x64xbf16, #tpu.memory_space<vmem>>, vector<1x256x64xbf16>
    %70 = vector.shape_cast %69 : vector<1x256x64xbf16> to vector<256x64xbf16>
    %cst_57 = arith.constant dense<0.000000e+00> : vector<16x64xf32>
    %71 = tpu.matmul %8, %70, %cst_57 {dimension_numbers = #tpu.dot_dimension_numbers<[1], [0], [0], [1], [0, 0, 1, 1], [], []>} : vector<16x256xbf16>, vector<256x64xbf16>, vector<16x64xf32> -> vector<16x64xf32>
    %72 = arith.truncf %71 : vector<16x64xf32> to vector<16x64xbf16>
    %c192 = arith.constant 192 : index
    %c0_58 = arith.constant 0 : index
    %73 = vector.load %arg13[%c192, %c0_58] : memref<256x64xbf16, #tpu.memory_space<vmem>>, vector<16x64xbf16>
    tpu.vector_store %arg13[%c192, %c0_58], %72 {strides = array<i32>} : memref<256x64xbf16, #tpu.memory_space<vmem>>, vector<16x64xbf16>,
    %c13 = arith.constant 13 : index
    %c0_59 = arith.constant 0 : index
    %c0_60 = arith.constant 0 : index
    %74 = vector.load %arg3[%c13, %c0_59, %c0_60] : memref<16x256x64xbf16, #tpu.memory_space<vmem>>, vector<1x256x64xbf16>
    %75 = vector.shape_cast %74 : vector<1x256x64xbf16> to vector<256x64xbf16>
    %cst_61 = arith.constant dense<0.000000e+00> : vector<16x64xf32>
    %76 = tpu.matmul %8, %75, %cst_61 {dimension_numbers = #tpu.dot_dimension_numbers<[1], [0], [0], [1], [0, 0, 1, 1], [], []>} : vector<16x256xbf16>, vector<256x64xbf16>, vector<16x64xf32> -> vector<16x64xf32>
    %77 = arith.truncf %76 : vector<16x64xf32> to vector<16x64xbf16>
    %c208 = arith.constant 208 : index
    %c0_62 = arith.constant 0 : index
    %78 = vector.load %arg13[%c208, %c0_62] : memref<256x64xbf16, #tpu.memory_space<vmem>>, vector<16x64xbf16>
    tpu.vector_store %arg13[%c208, %c0_62], %77 {strides = array<i32>} : memref<256x64xbf16, #tpu.memory_space<vmem>>, vector<16x64xbf16>,
    %c14 = arith.constant 14 : index
    %c0_63 = arith.constant 0 : index
    %c0_64 = arith.constant 0 : index
    %79 = vector.load %arg3[%c14, %c0_63, %c0_64] : memref<16x256x64xbf16, #tpu.memory_space<vmem>>, vector<1x256x64xbf16>
    %80 = vector.shape_cast %79 : vector<1x256x64xbf16> to vector<256x64xbf16>
    %cst_65 = arith.constant dense<0.000000e+00> : vector<16x64xf32>
    %81 = tpu.matmul %8, %80, %cst_65 {dimension_numbers = #tpu.dot_dimension_numbers<[1], [0], [0], [1], [0, 0, 1, 1], [], []>} : vector<16x256xbf16>, vector<256x64xbf16>, vector<16x64xf32> -> vector<16x64xf32>
    %82 = arith.truncf %81 : vector<16x64xf32> to vector<16x64xbf16>
    %c224 = arith.constant 224 : index
    %c0_66 = arith.constant 0 : index
    %83 = vector.load %arg13[%c224, %c0_66] : memref<256x64xbf16, #tpu.memory_space<vmem>>, vector<16x64xbf16>
    tpu.vector_store %arg13[%c224, %c0_66], %82 {strides = array<i32>} : memref<256x64xbf16, #tpu.memory_space<vmem>>, vector<16x64xbf16>,
    %c15 = arith.constant 15 : index
    %c0_67 = arith.constant 0 : index
    %c0_68 = arith.constant 0 : index
    %84 = vector.load %arg3[%c15, %c0_67, %c0_68] : memref<16x256x64xbf16, #tpu.memory_space<vmem>>, vector<1x256x64xbf16>
    %85 = vector.shape_cast %84 : vector<1x256x64xbf16> to vector<256x64xbf16>
    %cst_69 = arith.constant dense<0.000000e+00> : vector<16x64xf32>
    %86 = tpu.matmul %8, %85, %cst_69 {dimension_numbers = #tpu.dot_dimension_numbers<[1], [0], [0], [1], [0, 0, 1, 1], [], []>} : vector<16x256xbf16>, vector<256x64xbf16>, vector<16x64xf32> -> vector<16x64xf32>
    %87 = arith.truncf %86 : vector<16x64xf32> to vector<16x64xbf16>
    %c240 = arith.constant 240 : index
    %c0_70 = arith.constant 0 : index
    %88 = vector.load %arg13[%c240, %c0_70] : memref<256x64xbf16, #tpu.memory_space<vmem>>, vector<16x64xbf16>
    tpu.vector_store %arg13[%c240, %c0_70], %87 {strides = array<i32>} : memref<256x64xbf16, #tpu.memory_space<vmem>>, vector<16x64xbf16>,
    %c0_71 = arith.constant 0 : index
    %c0_72 = arith.constant 0 : index
    %89 = vector.load %arg4[%c0_71, %c0_72] : memref<32x256xbf16, #tpu.memory_space<vmem>>, vector<32x256xbf16>
    %c0_73 = arith.constant 0 : index
    %c0_74 = arith.constant 0 : index
    %90 = vector.load %arg13[%c0_73, %c0_74] : memref<256x64xbf16, #tpu.memory_space<vmem>>, vector<256x64xbf16>
    %cst_75 = arith.constant dense<0.000000e+00> : vector<32x64xf32>
    %91 = tpu.matmul %89, %90, %cst_75 {dimension_numbers = #tpu.dot_dimension_numbers<[1], [0], [0], [1], [0, 0, 1, 1], [], []>} : vector<32x256xbf16>, vector<256x64xbf16>, vector<32x64xf32> -> vector<32x64xf32>
    %92 = arith.mulf %91, %91 : vector<32x64xf32>
    %93 = tpu.concatenate %91, %92 in 0 : vector<32x64xf32>, vector<32x64xf32> -> vector<64x64xf32>
    %cst_76 = arith.constant dense<0.000000e+00> : vector<64xf32>
    %94 = vector.multi_reduction <add>, %93, %cst_76 [1] : vector<64x64xf32> to vector<64xf32>
    %95 = vector.shape_cast %94 : vector<64xf32> to vector<64x1xf32>
    %cst_77 = arith.constant 6.400000e+01 : f32
    %96 = vector.broadcast %cst_77 : f32 to vector<64x1xf32>
    %97 = arith.divf %95, %96 : vector<64x1xf32>
    %98 = vector.extract_strided_slice %97 {offsets = [0, 0], sizes = [32, 1], strides = [1, 1]} : vector<64x1xf32> to vector<32x1xf32>
    %99 = vector.extract_strided_slice %97 {offsets = [32, 0], sizes = [32, 1], strides = [1, 1]} : vector<64x1xf32> to vector<32x1xf32>
    %100 = arith.mulf %98, %98 : vector<32x1xf32>
    %101 = arith.subf %99, %100 : vector<32x1xf32>
    %cst_78 = arith.constant 0.000000e+00 : f32
    %102 = vector.broadcast %cst_78 : f32 to vector<32x1xf32>
    %103 = arith.maximumf %101, %102 : vector<32x1xf32>
    %104 = vector.broadcast %98 : vector<32x1xf32> to vector<32x64xf32>
    %105 = arith.subf %91, %104 : vector<32x64xf32>
    %cst_79 = arith.constant 9.99999974E-6 : f32
    %106 = vector.broadcast %cst_79 : f32 to vector<32x1xf32>
    %107 = arith.addf %103, %106 : vector<32x1xf32>
    %108 = math.rsqrt %107 : vector<32x1xf32>
    %109 = vector.broadcast %108 : vector<32x1xf32> to vector<32x64xf32>
    %110 = arith.mulf %105, %109 : vector<32x64xf32>
    %cst_80 = arith.constant 0.000000e+00 : f32
    %111 = vector.broadcast %cst_80 : f32 to vector<32x64xf32>
    %112 = arith.maximumf %110, %111 : vector<32x64xf32>
    %113 = arith.truncf %112 : vector<32x64xf32> to vector<32x64xbf16>
    %c0_81 = arith.constant 0 : index
    %c0_82 = arith.constant 0 : index
    %c0_83 = arith.constant 0 : index
    %114 = vector.load %arg5[%c0_81, %c0_82, %c0_83] : memref<16x64x16xbf16, #tpu.memory_space<vmem>>, vector<1x64x16xbf16>
    %115 = vector.shape_cast %114 : vector<1x64x16xbf16> to vector<64x16xbf16>
    %cst_84 = arith.constant dense<0.000000e+00> : vector<32x16xf32>
    %116 = tpu.matmul %113, %115, %cst_84 {dimension_numbers = #tpu.dot_dimension_numbers<[1], [0], [0], [1], [0, 0, 1, 1], [], []>} : vector<32x64xbf16>, vector<64x16xbf16>, vector<32x16xf32> -> vector<32x16xf32>
    %117 = arith.truncf %116 : vector<32x16xf32> to vector<32x16xbf16>
    %c0_85 = arith.constant 0 : index
    %c0_86 = arith.constant 0 : index
    %118 = vector.load %arg14[%c0_85, %c0_86] : memref<512x16xbf16, #tpu.memory_space<vmem>>, vector<32x16xbf16>
    tpu.vector_store %arg14[%c0_85, %c0_86], %117 {strides = array<i32>} : memref<512x16xbf16, #tpu.memory_space<vmem>>, vector<32x16xbf16>,
    %c1_87 = arith.constant 1 : index
    %c0_88 = arith.constant 0 : index
    %c0_89 = arith.constant 0 : index
    %119 = vector.load %arg5[%c1_87, %c0_88, %c0_89] : memref<16x64x16xbf16, #tpu.memory_space<vmem>>, vector<1x64x16xbf16>
    %120 = vector.shape_cast %119 : vector<1x64x16xbf16> to vector<64x16xbf16>
    %cst_90 = arith.constant dense<0.000000e+00> : vector<32x16xf32>
    %121 = tpu.matmul %113, %120, %cst_90 {dimension_numbers = #tpu.dot_dimension_numbers<[1], [0], [0], [1], [0, 0, 1, 1], [], []>} : vector<32x64xbf16>, vector<64x16xbf16>, vector<32x16xf32> -> vector<32x16xf32>
    %122 = arith.truncf %121 : vector<32x16xf32> to vector<32x16xbf16>
    %c32_91 = arith.constant 32 : index
    %c0_92 = arith.constant 0 : index
    %123 = vector.load %arg14[%c32_91, %c0_92] : memref<512x16xbf16, #tpu.memory_space<vmem>>, vector<32x16xbf16>
    tpu.vector_store %arg14[%c32_91, %c0_92], %122 {strides = array<i32>} : memref<512x16xbf16, #tpu.memory_space<vmem>>, vector<32x16xbf16>,
    %c2_93 = arith.constant 2 : index
    %c0_94 = arith.constant 0 : index
    %c0_95 = arith.constant 0 : index
    %124 = vector.load %arg5[%c2_93, %c0_94, %c0_95] : memref<16x64x16xbf16, #tpu.memory_space<vmem>>, vector<1x64x16xbf16>
    %125 = vector.shape_cast %124 : vector<1x64x16xbf16> to vector<64x16xbf16>
    %cst_96 = arith.constant dense<0.000000e+00> : vector<32x16xf32>
    %126 = tpu.matmul %113, %125, %cst_96 {dimension_numbers = #tpu.dot_dimension_numbers<[1], [0], [0], [1], [0, 0, 1, 1], [], []>} : vector<32x64xbf16>, vector<64x16xbf16>, vector<32x16xf32> -> vector<32x16xf32>
    %127 = arith.truncf %126 : vector<32x16xf32> to vector<32x16xbf16>
    %c64_97 = arith.constant 64 : index
    %c0_98 = arith.constant 0 : index
    %128 = vector.load %arg14[%c64_97, %c0_98] : memref<512x16xbf16, #tpu.memory_space<vmem>>, vector<32x16xbf16>
    tpu.vector_store %arg14[%c64_97, %c0_98], %127 {strides = array<i32>} : memref<512x16xbf16, #tpu.memory_space<vmem>>, vector<32x16xbf16>,
    %c3_99 = arith.constant 3 : index
    %c0_100 = arith.constant 0 : index
    %c0_101 = arith.constant 0 : index
    %129 = vector.load %arg5[%c3_99, %c0_100, %c0_101] : memref<16x64x16xbf16, #tpu.memory_space<vmem>>, vector<1x64x16xbf16>
    %130 = vector.shape_cast %129 : vector<1x64x16xbf16> to vector<64x16xbf16>
    %cst_102 = arith.constant dense<0.000000e+00> : vector<32x16xf32>
    %131 = tpu.matmul %113, %130, %cst_102 {dimension_numbers = #tpu.dot_dimension_numbers<[1], [0], [0], [1], [0, 0, 1, 1], [], []>} : vector<32x64xbf16>, vector<64x16xbf16>, vector<32x16xf32> -> vector<32x16xf32>
    %132 = arith.truncf %131 : vector<32x16xf32> to vector<32x16xbf16>
    %c96_103 = arith.constant 96 : index
    %c0_104 = arith.constant 0 : index
    %133 = vector.load %arg14[%c96_103, %c0_104] : memref<512x16xbf16, #tpu.memory_space<vmem>>, vector<32x16xbf16>
    tpu.vector_store %arg14[%c96_103, %c0_104], %132 {strides = array<i32>} : memref<512x16xbf16, #tpu.memory_space<vmem>>, vector<32x16xbf16>,
    %c4_105 = arith.constant 4 : index
    %c0_106 = arith.constant 0 : index
    %c0_107 = arith.constant 0 : index
    %134 = vector.load %arg5[%c4_105, %c0_106, %c0_107] : memref<16x64x16xbf16, #tpu.memory_space<vmem>>, vector<1x64x16xbf16>
    %135 = vector.shape_cast %134 : vector<1x64x16xbf16> to vector<64x16xbf16>
    %cst_108 = arith.constant dense<0.000000e+00> : vector<32x16xf32>
    %136 = tpu.matmul %113, %135, %cst_108 {dimension_numbers = #tpu.dot_dimension_numbers<[1], [0], [0], [1], [0, 0, 1, 1], [], []>} : vector<32x64xbf16>, vector<64x16xbf16>, vector<32x16xf32> -> vector<32x16xf32>
    %137 = arith.truncf %136 : vector<32x16xf32> to vector<32x16xbf16>
    %c128_109 = arith.constant 128 : index
    %c0_110 = arith.constant 0 : index
    %138 = vector.load %arg14[%c128_109, %c0_110] : memref<512x16xbf16, #tpu.memory_space<vmem>>, vector<32x16xbf16>
    tpu.vector_store %arg14[%c128_109, %c0_110], %137 {strides = array<i32>} : memref<512x16xbf16, #tpu.memory_space<vmem>>, vector<32x16xbf16>,
    %c5_111 = arith.constant 5 : index
    %c0_112 = arith.constant 0 : index
    %c0_113 = arith.constant 0 : index
    %139 = vector.load %arg5[%c5_111, %c0_112, %c0_113] : memref<16x64x16xbf16, #tpu.memory_space<vmem>>, vector<1x64x16xbf16>
    %140 = vector.shape_cast %139 : vector<1x64x16xbf16> to vector<64x16xbf16>
    %cst_114 = arith.constant dense<0.000000e+00> : vector<32x16xf32>
    %141 = tpu.matmul %113, %140, %cst_114 {dimension_numbers = #tpu.dot_dimension_numbers<[1], [0], [0], [1], [0, 0, 1, 1], [], []>} : vector<32x64xbf16>, vector<64x16xbf16>, vector<32x16xf32> -> vector<32x16xf32>
    %142 = arith.truncf %141 : vector<32x16xf32> to vector<32x16xbf16>
    %c160_115 = arith.constant 160 : index
    %c0_116 = arith.constant 0 : index
    %143 = vector.load %arg14[%c160_115, %c0_116] : memref<512x16xbf16, #tpu.memory_space<vmem>>, vector<32x16xbf16>
    tpu.vector_store %arg14[%c160_115, %c0_116], %142 {strides = array<i32>} : memref<512x16xbf16, #tpu.memory_space<vmem>>, vector<32x16xbf16>,
    %c6_117 = arith.constant 6 : index
    %c0_118 = arith.constant 0 : index
    %c0_119 = arith.constant 0 : index
    %144 = vector.load %arg5[%c6_117, %c0_118, %c0_119] : memref<16x64x16xbf16, #tpu.memory_space<vmem>>, vector<1x64x16xbf16>
    %145 = vector.shape_cast %144 : vector<1x64x16xbf16> to vector<64x16xbf16>
    %cst_120 = arith.constant dense<0.000000e+00> : vector<32x16xf32>
    %146 = tpu.matmul %113, %145, %cst_120 {dimension_numbers = #tpu.dot_dimension_numbers<[1], [0], [0], [1], [0, 0, 1, 1], [], []>} : vector<32x64xbf16>, vector<64x16xbf16>, vector<32x16xf32> -> vector<32x16xf32>
    %147 = arith.truncf %146 : vector<32x16xf32> to vector<32x16xbf16>
    %c192_121 = arith.constant 192 : index
    %c0_122 = arith.constant 0 : index
    %148 = vector.load %arg14[%c192_121, %c0_122] : memref<512x16xbf16, #tpu.memory_space<vmem>>, vector<32x16xbf16>
    tpu.vector_store %arg14[%c192_121, %c0_122], %147 {strides = array<i32>} : memref<512x16xbf16, #tpu.memory_space<vmem>>, vector<32x16xbf16>,
    %c7_123 = arith.constant 7 : index
    %c0_124 = arith.constant 0 : index
    %c0_125 = arith.constant 0 : index
    %149 = vector.load %arg5[%c7_123, %c0_124, %c0_125] : memref<16x64x16xbf16, #tpu.memory_space<vmem>>, vector<1x64x16xbf16>
    %150 = vector.shape_cast %149 : vector<1x64x16xbf16> to vector<64x16xbf16>
    %cst_126 = arith.constant dense<0.000000e+00> : vector<32x16xf32>
    %151 = tpu.matmul %113, %150, %cst_126 {dimension_numbers = #tpu.dot_dimension_numbers<[1], [0], [0], [1], [0, 0, 1, 1], [], []>} : vector<32x64xbf16>, vector<64x16xbf16>, vector<32x16xf32> -> vector<32x16xf32>
    %152 = arith.truncf %151 : vector<32x16xf32> to vector<32x16xbf16>
    %c224_127 = arith.constant 224 : index
    %c0_128 = arith.constant 0 : index
    %153 = vector.load %arg14[%c224_127, %c0_128] : memref<512x16xbf16, #tpu.memory_space<vmem>>, vector<32x16xbf16>
    tpu.vector_store %arg14[%c224_127, %c0_128], %152 {strides = array<i32>} : memref<512x16xbf16, #tpu.memory_space<vmem>>, vector<32x16xbf16>,
    %c8_129 = arith.constant 8 : index
    %c0_130 = arith.constant 0 : index
    %c0_131 = arith.constant 0 : index
    %154 = vector.load %arg5[%c8_129, %c0_130, %c0_131] : memref<16x64x16xbf16, #tpu.memory_space<vmem>>, vector<1x64x16xbf16>
    %155 = vector.shape_cast %154 : vector<1x64x16xbf16> to vector<64x16xbf16>
    %cst_132 = arith.constant dense<0.000000e+00> : vector<32x16xf32>
    %156 = tpu.matmul %113, %155, %cst_132 {dimension_numbers = #tpu.dot_dimension_numbers<[1], [0], [0], [1], [0, 0, 1, 1], [], []>} : vector<32x64xbf16>, vector<64x16xbf16>, vector<32x16xf32> -> vector<32x16xf32>
    %157 = arith.truncf %156 : vector<32x16xf32> to vector<32x16xbf16>
    %c256 = arith.constant 256 : index
    %c0_133 = arith.constant 0 : index
    %158 = vector.load %arg14[%c256, %c0_133] : memref<512x16xbf16, #tpu.memory_space<vmem>>, vector<32x16xbf16>
    tpu.vector_store %arg14[%c256, %c0_133], %157 {strides = array<i32>} : memref<512x16xbf16, #tpu.memory_space<vmem>>, vector<32x16xbf16>,
    %c9_134 = arith.constant 9 : index
    %c0_135 = arith.constant 0 : index
    %c0_136 = arith.constant 0 : index
    %159 = vector.load %arg5[%c9_134, %c0_135, %c0_136] : memref<16x64x16xbf16, #tpu.memory_space<vmem>>, vector<1x64x16xbf16>
    %160 = vector.shape_cast %159 : vector<1x64x16xbf16> to vector<64x16xbf16>
    %cst_137 = arith.constant dense<0.000000e+00> : vector<32x16xf32>
    %161 = tpu.matmul %113, %160, %cst_137 {dimension_numbers = #tpu.dot_dimension_numbers<[1], [0], [0], [1], [0, 0, 1, 1], [], []>} : vector<32x64xbf16>, vector<64x16xbf16>, vector<32x16xf32> -> vector<32x16xf32>
    %162 = arith.truncf %161 : vector<32x16xf32> to vector<32x16xbf16>
    %c288 = arith.constant 288 : index
    %c0_138 = arith.constant 0 : index
    %163 = vector.load %arg14[%c288, %c0_138] : memref<512x16xbf16, #tpu.memory_space<vmem>>, vector<32x16xbf16>
    tpu.vector_store %arg14[%c288, %c0_138], %162 {strides = array<i32>} : memref<512x16xbf16, #tpu.memory_space<vmem>>, vector<32x16xbf16>,
    %c10_139 = arith.constant 10 : index
    %c0_140 = arith.constant 0 : index
    %c0_141 = arith.constant 0 : index
    %164 = vector.load %arg5[%c10_139, %c0_140, %c0_141] : memref<16x64x16xbf16, #tpu.memory_space<vmem>>, vector<1x64x16xbf16>
    %165 = vector.shape_cast %164 : vector<1x64x16xbf16> to vector<64x16xbf16>
    %cst_142 = arith.constant dense<0.000000e+00> : vector<32x16xf32>
    %166 = tpu.matmul %113, %165, %cst_142 {dimension_numbers = #tpu.dot_dimension_numbers<[1], [0], [0], [1], [0, 0, 1, 1], [], []>} : vector<32x64xbf16>, vector<64x16xbf16>, vector<32x16xf32> -> vector<32x16xf32>
    %167 = arith.truncf %166 : vector<32x16xf32> to vector<32x16xbf16>
    %c320 = arith.constant 320 : index
    %c0_143 = arith.constant 0 : index
    %168 = vector.load %arg14[%c320, %c0_143] : memref<512x16xbf16, #tpu.memory_space<vmem>>, vector<32x16xbf16>
    tpu.vector_store %arg14[%c320, %c0_143], %167 {strides = array<i32>} : memref<512x16xbf16, #tpu.memory_space<vmem>>, vector<32x16xbf16>,
    %c11_144 = arith.constant 11 : index
    %c0_145 = arith.constant 0 : index
    %c0_146 = arith.constant 0 : index
    %169 = vector.load %arg5[%c11_144, %c0_145, %c0_146] : memref<16x64x16xbf16, #tpu.memory_space<vmem>>, vector<1x64x16xbf16>
    %170 = vector.shape_cast %169 : vector<1x64x16xbf16> to vector<64x16xbf16>
    %cst_147 = arith.constant dense<0.000000e+00> : vector<32x16xf32>
    %171 = tpu.matmul %113, %170, %cst_147 {dimension_numbers = #tpu.dot_dimension_numbers<[1], [0], [0], [1], [0, 0, 1, 1], [], []>} : vector<32x64xbf16>, vector<64x16xbf16>, vector<32x16xf32> -> vector<32x16xf32>
    %172 = arith.truncf %171 : vector<32x16xf32> to vector<32x16xbf16>
    %c352 = arith.constant 352 : index
    %c0_148 = arith.constant 0 : index
    %173 = vector.load %arg14[%c352, %c0_148] : memref<512x16xbf16, #tpu.memory_space<vmem>>, vector<32x16xbf16>
    tpu.vector_store %arg14[%c352, %c0_148], %172 {strides = array<i32>} : memref<512x16xbf16, #tpu.memory_space<vmem>>, vector<32x16xbf16>,
    %c12_149 = arith.constant 12 : index
    %c0_150 = arith.constant 0 : index
    %c0_151 = arith.constant 0 : index
    %174 = vector.load %arg5[%c12_149, %c0_150, %c0_151] : memref<16x64x16xbf16, #tpu.memory_space<vmem>>, vector<1x64x16xbf16>
    %175 = vector.shape_cast %174 : vector<1x64x16xbf16> to vector<64x16xbf16>
    %cst_152 = arith.constant dense<0.000000e+00> : vector<32x16xf32>
    %176 = tpu.matmul %113, %175, %cst_152 {dimension_numbers = #tpu.dot_dimension_numbers<[1], [0], [0], [1], [0, 0, 1, 1], [], []>} : vector<32x64xbf16>, vector<64x16xbf16>, vector<32x16xf32> -> vector<32x16xf32>
    %177 = arith.truncf %176 : vector<32x16xf32> to vector<32x16xbf16>
    %c384 = arith.constant 384 : index
    %c0_153 = arith.constant 0 : index
    %178 = vector.load %arg14[%c384, %c0_153] : memref<512x16xbf16, #tpu.memory_space<vmem>>, vector<32x16xbf16>
    tpu.vector_store %arg14[%c384, %c0_153], %177 {strides = array<i32>} : memref<512x16xbf16, #tpu.memory_space<vmem>>, vector<32x16xbf16>,
    %c13_154 = arith.constant 13 : index
    %c0_155 = arith.constant 0 : index
    %c0_156 = arith.constant 0 : index
    %179 = vector.load %arg5[%c13_154, %c0_155, %c0_156] : memref<16x64x16xbf16, #tpu.memory_space<vmem>>, vector<1x64x16xbf16>
    %180 = vector.shape_cast %179 : vector<1x64x16xbf16> to vector<64x16xbf16>
    %cst_157 = arith.constant dense<0.000000e+00> : vector<32x16xf32>
    %181 = tpu.matmul %113, %180, %cst_157 {dimension_numbers = #tpu.dot_dimension_numbers<[1], [0], [0], [1], [0, 0, 1, 1], [], []>} : vector<32x64xbf16>, vector<64x16xbf16>, vector<32x16xf32> -> vector<32x16xf32>
    %182 = arith.truncf %181 : vector<32x16xf32> to vector<32x16xbf16>
    %c416 = arith.constant 416 : index
    %c0_158 = arith.constant 0 : index
    %183 = vector.load %arg14[%c416, %c0_158] : memref<512x16xbf16, #tpu.memory_space<vmem>>, vector<32x16xbf16>
    tpu.vector_store %arg14[%c416, %c0_158], %182 {strides = array<i32>} : memref<512x16xbf16, #tpu.memory_space<vmem>>, vector<32x16xbf16>,
    %c14_159 = arith.constant 14 : index
    %c0_160 = arith.constant 0 : index
    %c0_161 = arith.constant 0 : index
    %184 = vector.load %arg5[%c14_159, %c0_160, %c0_161] : memref<16x64x16xbf16, #tpu.memory_space<vmem>>, vector<1x64x16xbf16>
    %185 = vector.shape_cast %184 : vector<1x64x16xbf16> to vector<64x16xbf16>
    %cst_162 = arith.constant dense<0.000000e+00> : vector<32x16xf32>
    %186 = tpu.matmul %113, %185, %cst_162 {dimension_numbers = #tpu.dot_dimension_numbers<[1], [0], [0], [1], [0, 0, 1, 1], [], []>} : vector<32x64xbf16>, vector<64x16xbf16>, vector<32x16xf32> -> vector<32x16xf32>
    %187 = arith.truncf %186 : vector<32x16xf32> to vector<32x16xbf16>
    %c448 = arith.constant 448 : index
    %c0_163 = arith.constant 0 : index
    %188 = vector.load %arg14[%c448, %c0_163] : memref<512x16xbf16, #tpu.memory_space<vmem>>, vector<32x16xbf16>
    tpu.vector_store %arg14[%c448, %c0_163], %187 {strides = array<i32>} : memref<512x16xbf16, #tpu.memory_space<vmem>>, vector<32x16xbf16>,
    %c15_164 = arith.constant 15 : index
    %c0_165 = arith.constant 0 : index
    %c0_166 = arith.constant 0 : index
    %189 = vector.load %arg5[%c15_164, %c0_165, %c0_166] : memref<16x64x16xbf16, #tpu.memory_space<vmem>>, vector<1x64x16xbf16>
    %190 = vector.shape_cast %189 : vector<1x64x16xbf16> to vector<64x16xbf16>
    %cst_167 = arith.constant dense<0.000000e+00> : vector<32x16xf32>
    %191 = tpu.matmul %113, %190, %cst_167 {dimension_numbers = #tpu.dot_dimension_numbers<[1], [0], [0], [1], [0, 0, 1, 1], [], []>} : vector<32x64xbf16>, vector<64x16xbf16>, vector<32x16xf32> -> vector<32x16xf32>
    %192 = arith.truncf %191 : vector<32x16xf32> to vector<32x16xbf16>
    %c480 = arith.constant 480 : index
    %c0_168 = arith.constant 0 : index
    %193 = vector.load %arg14[%c480, %c0_168] : memref<512x16xbf16, #tpu.memory_space<vmem>>, vector<32x16xbf16>
    tpu.vector_store %arg14[%c480, %c0_168], %192 {strides = array<i32>} : memref<512x16xbf16, #tpu.memory_space<vmem>>, vector<32x16xbf16>,
    %c0_169 = arith.constant 0 : index
    %c0_170 = arith.constant 0 : index
    %194 = vector.load %arg6[%c0_169, %c0_170] : memref<32x512xbf16, #tpu.memory_space<vmem>>, vector<32x512xbf16>
    %c0_171 = arith.constant 0 : index
    %c0_172 = arith.constant 0 : index
    %195 = vector.load %arg14[%c0_171, %c0_172] : memref<512x16xbf16, #tpu.memory_space<vmem>>, vector<512x16xbf16>
    %cst_173 = arith.constant dense<0.000000e+00> : vector<32x16xf32>
    %196 = tpu.matmul %194, %195, %cst_173 {dimension_numbers = #tpu.dot_dimension_numbers<[1], [0], [0], [1], [0, 0, 1, 1], [], []>} : vector<32x512xbf16>, vector<512x16xbf16>, vector<32x16xf32> -> vector<32x16xf32>
    %197 = arith.mulf %196, %196 : vector<32x16xf32>
    %198 = tpu.concatenate %196, %197 in 0 : vector<32x16xf32>, vector<32x16xf32> -> vector<64x16xf32>
    %cst_174 = arith.constant dense<0.000000e+00> : vector<64xf32>
    %199 = vector.multi_reduction <add>, %198, %cst_174 [1] : vector<64x16xf32> to vector<64xf32>
    %200 = vector.shape_cast %199 : vector<64xf32> to vector<64x1xf32>
    %cst_175 = arith.constant 1.600000e+01 : f32
    %201 = vector.broadcast %cst_175 : f32 to vector<64x1xf32>
    %202 = arith.divf %200, %201 : vector<64x1xf32>
    %203 = vector.extract_strided_slice %202 {offsets = [0, 0], sizes = [32, 1], strides = [1, 1]} : vector<64x1xf32> to vector<32x1xf32>
    %204 = vector.extract_strided_slice %202 {offsets = [32, 0], sizes = [32, 1], strides = [1, 1]} : vector<64x1xf32> to vector<32x1xf32>
    %205 = arith.mulf %203, %203 : vector<32x1xf32>
    %206 = arith.subf %204, %205 : vector<32x1xf32>
    %cst_176 = arith.constant 0.000000e+00 : f32
    %207 = vector.broadcast %cst_176 : f32 to vector<32x1xf32>
    %208 = arith.maximumf %206, %207 : vector<32x1xf32>
    %209 = vector.broadcast %203 : vector<32x1xf32> to vector<32x16xf32>
    %210 = arith.subf %196, %209 : vector<32x16xf32>
    %cst_177 = arith.constant 9.99999974E-6 : f32
    %211 = vector.broadcast %cst_177 : f32 to vector<32x1xf32>
    %212 = arith.addf %208, %211 : vector<32x1xf32>
    %213 = math.rsqrt %212 : vector<32x1xf32>
    %214 = vector.broadcast %213 : vector<32x1xf32> to vector<32x16xf32>
    %215 = arith.mulf %210, %214 : vector<32x16xf32>
    %cst_178 = arith.constant 0.000000e+00 : f32
    %216 = vector.broadcast %cst_178 : f32 to vector<32x16xf32>
    %217 = arith.maximumf %215, %216 : vector<32x16xf32>
    %218 = arith.truncf %217 : vector<32x16xf32> to vector<32x16xbf16>
    %c0_179 = arith.constant 0 : index
    %c0_180 = arith.constant 0 : index
    %c0_181 = arith.constant 0 : index
    %219 = vector.load %arg7[%c0_179, %c0_180, %c0_181] : memref<9x16x16xbf16, #tpu.memory_space<vmem>>, vector<1x16x16xbf16>
    %220 = vector.shape_cast %219 : vector<1x16x16xbf16> to vector<16x16xbf16>
    %cst_182 = arith.constant dense<0.000000e+00> : vector<32x16xf32>
    %221 = tpu.matmul %218, %220, %cst_182 {dimension_numbers = #tpu.dot_dimension_numbers<[1], [0], [0], [1], [0, 0, 1, 1], [], []>} : vector<32x16xbf16>, vector<16x16xbf16>, vector<32x16xf32> -> vector<32x16xf32>
    %222 = arith.truncf %221 : vector<32x16xf32> to vector<32x16xbf16>
    %c0_183 = arith.constant 0 : index
    %c0_184 = arith.constant 0 : index
    %223 = vector.load %arg15[%c0_183, %c0_184] : memref<288x16xbf16, #tpu.memory_space<vmem>>, vector<32x16xbf16>
    tpu.vector_store %arg15[%c0_183, %c0_184], %222 {strides = array<i32>} : memref<288x16xbf16, #tpu.memory_space<vmem>>, vector<32x16xbf16>,
    %c1_185 = arith.constant 1 : index
    %c0_186 = arith.constant 0 : index
    %c0_187 = arith.constant 0 : index
    %224 = vector.load %arg7[%c1_185, %c0_186, %c0_187] : memref<9x16x16xbf16, #tpu.memory_space<vmem>>, vector<1x16x16xbf16>
    %225 = vector.shape_cast %224 : vector<1x16x16xbf16> to vector<16x16xbf16>
    %cst_188 = arith.constant dense<0.000000e+00> : vector<32x16xf32>
    %226 = tpu.matmul %218, %225, %cst_188 {dimension_numbers = #tpu.dot_dimension_numbers<[1], [0], [0], [1], [0, 0, 1, 1], [], []>} : vector<32x16xbf16>, vector<16x16xbf16>, vector<32x16xf32> -> vector<32x16xf32>
    %227 = arith.truncf %226 : vector<32x16xf32> to vector<32x16xbf16>
    %c32_189 = arith.constant 32 : index
    %c0_190 = arith.constant 0 : index
    %228 = vector.load %arg15[%c32_189, %c0_190] : memref<288x16xbf16, #tpu.memory_space<vmem>>, vector<32x16xbf16>
    tpu.vector_store %arg15[%c32_189, %c0_190], %227 {strides = array<i32>} : memref<288x16xbf16, #tpu.memory_space<vmem>>, vector<32x16xbf16>,
    %c2_191 = arith.constant 2 : index
    %c0_192 = arith.constant 0 : index
    %c0_193 = arith.constant 0 : index
    %229 = vector.load %arg7[%c2_191, %c0_192, %c0_193] : memref<9x16x16xbf16, #tpu.memory_space<vmem>>, vector<1x16x16xbf16>
    %230 = vector.shape_cast %229 : vector<1x16x16xbf16> to vector<16x16xbf16>
    %cst_194 = arith.constant dense<0.000000e+00> : vector<32x16xf32>
    %231 = tpu.matmul %218, %230, %cst_194 {dimension_numbers = #tpu.dot_dimension_numbers<[1], [0], [0], [1], [0, 0, 1, 1], [], []>} : vector<32x16xbf16>, vector<16x16xbf16>, vector<32x16xf32> -> vector<32x16xf32>
    %232 = arith.truncf %231 : vector<32x16xf32> to vector<32x16xbf16>
    %c64_195 = arith.constant 64 : index
    %c0_196 = arith.constant 0 : index
    %233 = vector.load %arg15[%c64_195, %c0_196] : memref<288x16xbf16, #tpu.memory_space<vmem>>, vector<32x16xbf16>
    tpu.vector_store %arg15[%c64_195, %c0_196], %232 {strides = array<i32>} : memref<288x16xbf16, #tpu.memory_space<vmem>>, vector<32x16xbf16>,
    %c3_197 = arith.constant 3 : index
    %c0_198 = arith.constant 0 : index
    %c0_199 = arith.constant 0 : index
    %234 = vector.load %arg7[%c3_197, %c0_198, %c0_199] : memref<9x16x16xbf16, #tpu.memory_space<vmem>>, vector<1x16x16xbf16>
    %235 = vector.shape_cast %234 : vector<1x16x16xbf16> to vector<16x16xbf16>
    %cst_200 = arith.constant dense<0.000000e+00> : vector<32x16xf32>
    %236 = tpu.matmul %218, %235, %cst_200 {dimension_numbers = #tpu.dot_dimension_numbers<[1], [0], [0], [1], [0, 0, 1, 1], [], []>} : vector<32x16xbf16>, vector<16x16xbf16>, vector<32x16xf32> -> vector<32x16xf32>
    %237 = arith.truncf %236 : vector<32x16xf32> to vector<32x16xbf16>
    %c96_201 = arith.constant 96 : index
    %c0_202 = arith.constant 0 : index
    %238 = vector.load %arg15[%c96_201, %c0_202] : memref<288x16xbf16, #tpu.memory_space<vmem>>, vector<32x16xbf16>
    tpu.vector_store %arg15[%c96_201, %c0_202], %237 {strides = array<i32>} : memref<288x16xbf16, #tpu.memory_space<vmem>>, vector<32x16xbf16>,
    %c4_203 = arith.constant 4 : index
    %c0_204 = arith.constant 0 : index
    %c0_205 = arith.constant 0 : index
    %239 = vector.load %arg7[%c4_203, %c0_204, %c0_205] : memref<9x16x16xbf16, #tpu.memory_space<vmem>>, vector<1x16x16xbf16>
    %240 = vector.shape_cast %239 : vector<1x16x16xbf16> to vector<16x16xbf16>
    %cst_206 = arith.constant dense<0.000000e+00> : vector<32x16xf32>
    %241 = tpu.matmul %218, %240, %cst_206 {dimension_numbers = #tpu.dot_dimension_numbers<[1], [0], [0], [1], [0, 0, 1, 1], [], []>} : vector<32x16xbf16>, vector<16x16xbf16>, vector<32x16xf32> -> vector<32x16xf32>
    %242 = arith.truncf %241 : vector<32x16xf32> to vector<32x16xbf16>
    %c128_207 = arith.constant 128 : index
    %c0_208 = arith.constant 0 : index
    %243 = vector.load %arg15[%c128_207, %c0_208] : memref<288x16xbf16, #tpu.memory_space<vmem>>, vector<32x16xbf16>
    tpu.vector_store %arg15[%c128_207, %c0_208], %242 {strides = array<i32>} : memref<288x16xbf16, #tpu.memory_space<vmem>>, vector<32x16xbf16>,
    %c5_209 = arith.constant 5 : index
    %c0_210 = arith.constant 0 : index
    %c0_211 = arith.constant 0 : index
    %244 = vector.load %arg7[%c5_209, %c0_210, %c0_211] : memref<9x16x16xbf16, #tpu.memory_space<vmem>>, vector<1x16x16xbf16>
    %245 = vector.shape_cast %244 : vector<1x16x16xbf16> to vector<16x16xbf16>
    %cst_212 = arith.constant dense<0.000000e+00> : vector<32x16xf32>
    %246 = tpu.matmul %218, %245, %cst_212 {dimension_numbers = #tpu.dot_dimension_numbers<[1], [0], [0], [1], [0, 0, 1, 1], [], []>} : vector<32x16xbf16>, vector<16x16xbf16>, vector<32x16xf32> -> vector<32x16xf32>
    %247 = arith.truncf %246 : vector<32x16xf32> to vector<32x16xbf16>
    %c160_213 = arith.constant 160 : index
    %c0_214 = arith.constant 0 : index
    %248 = vector.load %arg15[%c160_213, %c0_214] : memref<288x16xbf16, #tpu.memory_space<vmem>>, vector<32x16xbf16>
    tpu.vector_store %arg15[%c160_213, %c0_214], %247 {strides = array<i32>} : memref<288x16xbf16, #tpu.memory_space<vmem>>, vector<32x16xbf16>,
    %c6_215 = arith.constant 6 : index
    %c0_216 = arith.constant 0 : index
    %c0_217 = arith.constant 0 : index
    %249 = vector.load %arg7[%c6_215, %c0_216, %c0_217] : memref<9x16x16xbf16, #tpu.memory_space<vmem>>, vector<1x16x16xbf16>
    %250 = vector.shape_cast %249 : vector<1x16x16xbf16> to vector<16x16xbf16>
    %cst_218 = arith.constant dense<0.000000e+00> : vector<32x16xf32>
    %251 = tpu.matmul %218, %250, %cst_218 {dimension_numbers = #tpu.dot_dimension_numbers<[1], [0], [0], [1], [0, 0, 1, 1], [], []>} : vector<32x16xbf16>, vector<16x16xbf16>, vector<32x16xf32> -> vector<32x16xf32>
    %252 = arith.truncf %251 : vector<32x16xf32> to vector<32x16xbf16>
    %c192_219 = arith.constant 192 : index
    %c0_220 = arith.constant 0 : index
    %253 = vector.load %arg15[%c192_219, %c0_220] : memref<288x16xbf16, #tpu.memory_space<vmem>>, vector<32x16xbf16>
    tpu.vector_store %arg15[%c192_219, %c0_220], %252 {strides = array<i32>} : memref<288x16xbf16, #tpu.memory_space<vmem>>, vector<32x16xbf16>,
    %c7_221 = arith.constant 7 : index
    %c0_222 = arith.constant 0 : index
    %c0_223 = arith.constant 0 : index
    %254 = vector.load %arg7[%c7_221, %c0_222, %c0_223] : memref<9x16x16xbf16, #tpu.memory_space<vmem>>, vector<1x16x16xbf16>
    %255 = vector.shape_cast %254 : vector<1x16x16xbf16> to vector<16x16xbf16>
    %cst_224 = arith.constant dense<0.000000e+00> : vector<32x16xf32>
    %256 = tpu.matmul %218, %255, %cst_224 {dimension_numbers = #tpu.dot_dimension_numbers<[1], [0], [0], [1], [0, 0, 1, 1], [], []>} : vector<32x16xbf16>, vector<16x16xbf16>, vector<32x16xf32> -> vector<32x16xf32>
    %257 = arith.truncf %256 : vector<32x16xf32> to vector<32x16xbf16>
    %c224_225 = arith.constant 224 : index
    %c0_226 = arith.constant 0 : index
    %258 = vector.load %arg15[%c224_225, %c0_226] : memref<288x16xbf16, #tpu.memory_space<vmem>>, vector<32x16xbf16>
    tpu.vector_store %arg15[%c224_225, %c0_226], %257 {strides = array<i32>} : memref<288x16xbf16, #tpu.memory_space<vmem>>, vector<32x16xbf16>,
    %c8_227 = arith.constant 8 : index
    %c0_228 = arith.constant 0 : index
    %c0_229 = arith.constant 0 : index
    %259 = vector.load %arg7[%c8_227, %c0_228, %c0_229] : memref<9x16x16xbf16, #tpu.memory_space<vmem>>, vector<1x16x16xbf16>
    %260 = vector.shape_cast %259 : vector<1x16x16xbf16> to vector<16x16xbf16>
    %cst_230 = arith.constant dense<0.000000e+00> : vector<32x16xf32>
    %261 = tpu.matmul %218, %260, %cst_230 {dimension_numbers = #tpu.dot_dimension_numbers<[1], [0], [0], [1], [0, 0, 1, 1], [], []>} : vector<32x16xbf16>, vector<16x16xbf16>, vector<32x16xf32> -> vector<32x16xf32>
    %262 = arith.truncf %261 : vector<32x16xf32> to vector<32x16xbf16>
    %c256_231 = arith.constant 256 : index
    %c0_232 = arith.constant 0 : index
    %263 = vector.load %arg15[%c256_231, %c0_232] : memref<288x16xbf16, #tpu.memory_space<vmem>>, vector<32x16xbf16>
    tpu.vector_store %arg15[%c256_231, %c0_232], %262 {strides = array<i32>} : memref<288x16xbf16, #tpu.memory_space<vmem>>, vector<32x16xbf16>,
    %c0_233 = arith.constant 0 : index
    %c0_234 = arith.constant 0 : index
    %264 = vector.load %arg8[%c0_233, %c0_234] : memref<32x288xbf16, #tpu.memory_space<vmem>>, vector<32x288xbf16>
    %c0_235 = arith.constant 0 : index
    %c0_236 = arith.constant 0 : index
    %265 = vector.load %arg15[%c0_235, %c0_236] : memref<288x16xbf16, #tpu.memory_space<vmem>>, vector<288x16xbf16>
    %cst_237 = arith.constant dense<0.000000e+00> : vector<32x16xf32>
    %266 = tpu.matmul %264, %265, %cst_237 {dimension_numbers = #tpu.dot_dimension_numbers<[1], [0], [0], [1], [0, 0, 1, 1], [], []>} : vector<32x288xbf16>, vector<288x16xbf16>, vector<32x16xf32> -> vector<32x16xf32>
    %267 = arith.mulf %266, %266 : vector<32x16xf32>
    %268 = tpu.concatenate %266, %267 in 0 : vector<32x16xf32>, vector<32x16xf32> -> vector<64x16xf32>
    %cst_238 = arith.constant dense<0.000000e+00> : vector<64xf32>
    %269 = vector.multi_reduction <add>, %268, %cst_238 [1] : vector<64x16xf32> to vector<64xf32>
    %270 = vector.shape_cast %269 : vector<64xf32> to vector<64x1xf32>
    %cst_239 = arith.constant 1.600000e+01 : f32
    %271 = vector.broadcast %cst_239 : f32 to vector<64x1xf32>
    %272 = arith.divf %270, %271 : vector<64x1xf32>
    %273 = vector.extract_strided_slice %272 {offsets = [0, 0], sizes = [32, 1], strides = [1, 1]} : vector<64x1xf32> to vector<32x1xf32>
    %274 = vector.extract_strided_slice %272 {offsets = [32, 0], sizes = [32, 1], strides = [1, 1]} : vector<64x1xf32> to vector<32x1xf32>
    %275 = arith.mulf %273, %273 : vector<32x1xf32>
    %276 = arith.subf %274, %275 : vector<32x1xf32>
    %cst_240 = arith.constant 0.000000e+00 : f32
    %277 = vector.broadcast %cst_240 : f32 to vector<32x1xf32>
    %278 = arith.maximumf %276, %277 : vector<32x1xf32>
    %279 = vector.broadcast %273 : vector<32x1xf32> to vector<32x16xf32>
    %280 = arith.subf %266, %279 : vector<32x16xf32>
    %cst_241 = arith.constant 9.99999974E-6 : f32
    %281 = vector.broadcast %cst_241 : f32 to vector<32x1xf32>
    %282 = arith.addf %278, %281 : vector<32x1xf32>
    %283 = math.rsqrt %282 : vector<32x1xf32>
    %284 = vector.broadcast %283 : vector<32x1xf32> to vector<32x16xf32>
    %285 = arith.mulf %280, %284 : vector<32x16xf32>
    %cst_242 = arith.constant 0.000000e+00 : f32
    %286 = vector.broadcast %cst_242 : f32 to vector<32x16xf32>
    %287 = arith.maximumf %285, %286 : vector<32x16xf32>
    %288 = arith.truncf %287 : vector<32x16xf32> to vector<32x16xbf16>
    %c0_243 = arith.constant 0 : index
    %c0_244 = arith.constant 0 : index
    %c0_245 = arith.constant 0 : index
    %289 = vector.load %arg7[%c0_243, %c0_244, %c0_245] : memref<9x16x16xbf16, #tpu.memory_space<vmem>>, vector<1x16x16xbf16>
    %290 = vector.shape_cast %289 : vector<1x16x16xbf16> to vector<16x16xbf16>
    %cst_246 = arith.constant dense<0.000000e+00> : vector<32x16xf32>
    %291 = tpu.matmul %288, %290, %cst_246 {dimension_numbers = #tpu.dot_dimension_numbers<[1], [0], [0], [1], [0, 0, 1, 1], [], []>} : vector<32x16xbf16>, vector<16x16xbf16>, vector<32x16xf32> -> vector<32x16xf32>
    %292 = arith.truncf %291 : vector<32x16xf32> to vector<32x16xbf16>
    %c0_247 = arith.constant 0 : index
    %c0_248 = arith.constant 0 : index
    %293 = vector.load %arg15[%c0_247, %c0_248] : memref<288x16xbf16, #tpu.memory_space<vmem>>, vector<32x16xbf16>
    tpu.vector_store %arg15[%c0_247, %c0_248], %292 {strides = array<i32>} : memref<288x16xbf16, #tpu.memory_space<vmem>>, vector<32x16xbf16>,
    %c1_249 = arith.constant 1 : index
    %c0_250 = arith.constant 0 : index
    %c0_251 = arith.constant 0 : index
    %294 = vector.load %arg7[%c1_249, %c0_250, %c0_251] : memref<9x16x16xbf16, #tpu.memory_space<vmem>>, vector<1x16x16xbf16>
    %295 = vector.shape_cast %294 : vector<1x16x16xbf16> to vector<16x16xbf16>
    %cst_252 = arith.constant dense<0.000000e+00> : vector<32x16xf32>
    %296 = tpu.matmul %288, %295, %cst_252 {dimension_numbers = #tpu.dot_dimension_numbers<[1], [0], [0], [1], [0, 0, 1, 1], [], []>} : vector<32x16xbf16>, vector<16x16xbf16>, vector<32x16xf32> -> vector<32x16xf32>
    %297 = arith.truncf %296 : vector<32x16xf32> to vector<32x16xbf16>
    %c32_253 = arith.constant 32 : index
    %c0_254 = arith.constant 0 : index
    %298 = vector.load %arg15[%c32_253, %c0_254] : memref<288x16xbf16, #tpu.memory_space<vmem>>, vector<32x16xbf16>
    tpu.vector_store %arg15[%c32_253, %c0_254], %297 {strides = array<i32>} : memref<288x16xbf16, #tpu.memory_space<vmem>>, vector<32x16xbf16>,
    %c2_255 = arith.constant 2 : index
    %c0_256 = arith.constant 0 : index
    %c0_257 = arith.constant 0 : index
    %299 = vector.load %arg7[%c2_255, %c0_256, %c0_257] : memref<9x16x16xbf16, #tpu.memory_space<vmem>>, vector<1x16x16xbf16>
    %300 = vector.shape_cast %299 : vector<1x16x16xbf16> to vector<16x16xbf16>
    %cst_258 = arith.constant dense<0.000000e+00> : vector<32x16xf32>
    %301 = tpu.matmul %288, %300, %cst_258 {dimension_numbers = #tpu.dot_dimension_numbers<[1], [0], [0], [1], [0, 0, 1, 1], [], []>} : vector<32x16xbf16>, vector<16x16xbf16>, vector<32x16xf32> -> vector<32x16xf32>
    %302 = arith.truncf %301 : vector<32x16xf32> to vector<32x16xbf16>
    %c64_259 = arith.constant 64 : index
    %c0_260 = arith.constant 0 : index
    %303 = vector.load %arg15[%c64_259, %c0_260] : memref<288x16xbf16, #tpu.memory_space<vmem>>, vector<32x16xbf16>
    tpu.vector_store %arg15[%c64_259, %c0_260], %302 {strides = array<i32>} : memref<288x16xbf16, #tpu.memory_space<vmem>>, vector<32x16xbf16>,
    %c3_261 = arith.constant 3 : index
    %c0_262 = arith.constant 0 : index
    %c0_263 = arith.constant 0 : index
    %304 = vector.load %arg7[%c3_261, %c0_262, %c0_263] : memref<9x16x16xbf16, #tpu.memory_space<vmem>>, vector<1x16x16xbf16>
    %305 = vector.shape_cast %304 : vector<1x16x16xbf16> to vector<16x16xbf16>
    %cst_264 = arith.constant dense<0.000000e+00> : vector<32x16xf32>
    %306 = tpu.matmul %288, %305, %cst_264 {dimension_numbers = #tpu.dot_dimension_numbers<[1], [0], [0], [1], [0, 0, 1, 1], [], []>} : vector<32x16xbf16>, vector<16x16xbf16>, vector<32x16xf32> -> vector<32x16xf32>
    %307 = arith.truncf %306 : vector<32x16xf32> to vector<32x16xbf16>
    %c96_265 = arith.constant 96 : index
    %c0_266 = arith.constant 0 : index
    %308 = vector.load %arg15[%c96_265, %c0_266] : memref<288x16xbf16, #tpu.memory_space<vmem>>, vector<32x16xbf16>
    tpu.vector_store %arg15[%c96_265, %c0_266], %307 {strides = array<i32>} : memref<288x16xbf16, #tpu.memory_space<vmem>>, vector<32x16xbf16>,
    %c4_267 = arith.constant 4 : index
    %c0_268 = arith.constant 0 : index
    %c0_269 = arith.constant 0 : index
    %309 = vector.load %arg7[%c4_267, %c0_268, %c0_269] : memref<9x16x16xbf16, #tpu.memory_space<vmem>>, vector<1x16x16xbf16>
    %310 = vector.shape_cast %309 : vector<1x16x16xbf16> to vector<16x16xbf16>
    %cst_270 = arith.constant dense<0.000000e+00> : vector<32x16xf32>
    %311 = tpu.matmul %288, %310, %cst_270 {dimension_numbers = #tpu.dot_dimension_numbers<[1], [0], [0], [1], [0, 0, 1, 1], [], []>} : vector<32x16xbf16>, vector<16x16xbf16>, vector<32x16xf32> -> vector<32x16xf32>
    %312 = arith.truncf %311 : vector<32x16xf32> to vector<32x16xbf16>
    %c128_271 = arith.constant 128 : index
    %c0_272 = arith.constant 0 : index
    %313 = vector.load %arg15[%c128_271, %c0_272] : memref<288x16xbf16, #tpu.memory_space<vmem>>, vector<32x16xbf16>
    tpu.vector_store %arg15[%c128_271, %c0_272], %312 {strides = array<i32>} : memref<288x16xbf16, #tpu.memory_space<vmem>>, vector<32x16xbf16>,
    %c5_273 = arith.constant 5 : index
    %c0_274 = arith.constant 0 : index
    %c0_275 = arith.constant 0 : index
    %314 = vector.load %arg7[%c5_273, %c0_274, %c0_275] : memref<9x16x16xbf16, #tpu.memory_space<vmem>>, vector<1x16x16xbf16>
    %315 = vector.shape_cast %314 : vector<1x16x16xbf16> to vector<16x16xbf16>
    %cst_276 = arith.constant dense<0.000000e+00> : vector<32x16xf32>
    %316 = tpu.matmul %288, %315, %cst_276 {dimension_numbers = #tpu.dot_dimension_numbers<[1], [0], [0], [1], [0, 0, 1, 1], [], []>} : vector<32x16xbf16>, vector<16x16xbf16>, vector<32x16xf32> -> vector<32x16xf32>
    %317 = arith.truncf %316 : vector<32x16xf32> to vector<32x16xbf16>
    %c160_277 = arith.constant 160 : index
    %c0_278 = arith.constant 0 : index
    %318 = vector.load %arg15[%c160_277, %c0_278] : memref<288x16xbf16, #tpu.memory_space<vmem>>, vector<32x16xbf16>
    tpu.vector_store %arg15[%c160_277, %c0_278], %317 {strides = array<i32>} : memref<288x16xbf16, #tpu.memory_space<vmem>>, vector<32x16xbf16>,
    %c6_279 = arith.constant 6 : index
    %c0_280 = arith.constant 0 : index
    %c0_281 = arith.constant 0 : index
    %319 = vector.load %arg7[%c6_279, %c0_280, %c0_281] : memref<9x16x16xbf16, #tpu.memory_space<vmem>>, vector<1x16x16xbf16>
    %320 = vector.shape_cast %319 : vector<1x16x16xbf16> to vector<16x16xbf16>
    %cst_282 = arith.constant dense<0.000000e+00> : vector<32x16xf32>
    %321 = tpu.matmul %288, %320, %cst_282 {dimension_numbers = #tpu.dot_dimension_numbers<[1], [0], [0], [1], [0, 0, 1, 1], [], []>} : vector<32x16xbf16>, vector<16x16xbf16>, vector<32x16xf32> -> vector<32x16xf32>
    %322 = arith.truncf %321 : vector<32x16xf32> to vector<32x16xbf16>
    %c192_283 = arith.constant 192 : index
    %c0_284 = arith.constant 0 : index
    %323 = vector.load %arg15[%c192_283, %c0_284] : memref<288x16xbf16, #tpu.memory_space<vmem>>, vector<32x16xbf16>
    tpu.vector_store %arg15[%c192_283, %c0_284], %322 {strides = array<i32>} : memref<288x16xbf16, #tpu.memory_space<vmem>>, vector<32x16xbf16>,
    %c7_285 = arith.constant 7 : index
    %c0_286 = arith.constant 0 : index
    %c0_287 = arith.constant 0 : index
    %324 = vector.load %arg7[%c7_285, %c0_286, %c0_287] : memref<9x16x16xbf16, #tpu.memory_space<vmem>>, vector<1x16x16xbf16>
    %325 = vector.shape_cast %324 : vector<1x16x16xbf16> to vector<16x16xbf16>
    %cst_288 = arith.constant dense<0.000000e+00> : vector<32x16xf32>
    %326 = tpu.matmul %288, %325, %cst_288 {dimension_numbers = #tpu.dot_dimension_numbers<[1], [0], [0], [1], [0, 0, 1, 1], [], []>} : vector<32x16xbf16>, vector<16x16xbf16>, vector<32x16xf32> -> vector<32x16xf32>
    %327 = arith.truncf %326 : vector<32x16xf32> to vector<32x16xbf16>
    %c224_289 = arith.constant 224 : index
    %c0_290 = arith.constant 0 : index
    %328 = vector.load %arg15[%c224_289, %c0_290] : memref<288x16xbf16, #tpu.memory_space<vmem>>, vector<32x16xbf16>
    tpu.vector_store %arg15[%c224_289, %c0_290], %327 {strides = array<i32>} : memref<288x16xbf16, #tpu.memory_space<vmem>>, vector<32x16xbf16>,
    %c8_291 = arith.constant 8 : index
    %c0_292 = arith.constant 0 : index
    %c0_293 = arith.constant 0 : index
    %329 = vector.load %arg7[%c8_291, %c0_292, %c0_293] : memref<9x16x16xbf16, #tpu.memory_space<vmem>>, vector<1x16x16xbf16>
    %330 = vector.shape_cast %329 : vector<1x16x16xbf16> to vector<16x16xbf16>
    %cst_294 = arith.constant dense<0.000000e+00> : vector<32x16xf32>
    %331 = tpu.matmul %288, %330, %cst_294 {dimension_numbers = #tpu.dot_dimension_numbers<[1], [0], [0], [1], [0, 0, 1, 1], [], []>} : vector<32x16xbf16>, vector<16x16xbf16>, vector<32x16xf32> -> vector<32x16xf32>
    %332 = arith.truncf %331 : vector<32x16xf32> to vector<32x16xbf16>
    %c256_295 = arith.constant 256 : index
    %c0_296 = arith.constant 0 : index
    %333 = vector.load %arg15[%c256_295, %c0_296] : memref<288x16xbf16, #tpu.memory_space<vmem>>, vector<32x16xbf16>
    tpu.vector_store %arg15[%c256_295, %c0_296], %332 {strides = array<i32>} : memref<288x16xbf16, #tpu.memory_space<vmem>>, vector<32x16xbf16>,
    %c0_297 = arith.constant 0 : index
    %c0_298 = arith.constant 0 : index
    %334 = vector.load %arg9[%c0_297, %c0_298] : memref<32x288xbf16, #tpu.memory_space<vmem>>, vector<32x288xbf16>
    %c0_299 = arith.constant 0 : index
    %c0_300 = arith.constant 0 : index
    %335 = vector.load %arg15[%c0_299, %c0_300] : memref<288x16xbf16, #tpu.memory_space<vmem>>, vector<288x16xbf16>
    %cst_301 = arith.constant dense<0.000000e+00> : vector<32x16xf32>
    %336 = tpu.matmul %334, %335, %cst_301 {dimension_numbers = #tpu.dot_dimension_numbers<[1], [0], [0], [1], [0, 0, 1, 1], [], []>} : vector<32x288xbf16>, vector<288x16xbf16>, vector<32x16xf32> -> vector<32x16xf32>
    %337 = arith.mulf %336, %336 : vector<32x16xf32>
    %338 = tpu.concatenate %336, %337 in 0 : vector<32x16xf32>, vector<32x16xf32> -> vector<64x16xf32>
    %cst_302 = arith.constant dense<0.000000e+00> : vector<64xf32>
    %339 = vector.multi_reduction <add>, %338, %cst_302 [1] : vector<64x16xf32> to vector<64xf32>
    %340 = vector.shape_cast %339 : vector<64xf32> to vector<64x1xf32>
    %cst_303 = arith.constant 1.600000e+01 : f32
    %341 = vector.broadcast %cst_303 : f32 to vector<64x1xf32>
    %342 = arith.divf %340, %341 : vector<64x1xf32>
    %343 = vector.extract_strided_slice %342 {offsets = [0, 0], sizes = [32, 1], strides = [1, 1]} : vector<64x1xf32> to vector<32x1xf32>
    %344 = vector.extract_strided_slice %342 {offsets = [32, 0], sizes = [32, 1], strides = [1, 1]} : vector<64x1xf32> to vector<32x1xf32>
    %345 = arith.mulf %343, %343 : vector<32x1xf32>
    %346 = arith.subf %344, %345 : vector<32x1xf32>
    %cst_304 = arith.constant 0.000000e+00 : f32
    %347 = vector.broadcast %cst_304 : f32 to vector<32x1xf32>
    %348 = arith.maximumf %346, %347 : vector<32x1xf32>
    %349 = vector.broadcast %343 : vector<32x1xf32> to vector<32x16xf32>
    %350 = arith.subf %336, %349 : vector<32x16xf32>
    %cst_305 = arith.constant 9.99999974E-6 : f32
    %351 = vector.broadcast %cst_305 : f32 to vector<32x1xf32>
    %352 = arith.addf %348, %351 : vector<32x1xf32>
    %353 = math.rsqrt %352 : vector<32x1xf32>
    %354 = vector.broadcast %353 : vector<32x1xf32> to vector<32x16xf32>
    %355 = arith.mulf %350, %354 : vector<32x16xf32>
    %356 = arith.addf %355, %217 : vector<32x16xf32>
    %357 = arith.truncf %356 : vector<32x16xf32> to vector<32x16xbf16>
    %c0_306 = arith.constant 0 : index
    %c0_307 = arith.constant 0 : index
    %c0_308 = arith.constant 0 : index
    %358 = vector.load %arg7[%c0_306, %c0_307, %c0_308] : memref<9x16x16xbf16, #tpu.memory_space<vmem>>, vector<1x16x16xbf16>
    %359 = vector.shape_cast %358 : vector<1x16x16xbf16> to vector<16x16xbf16>
    %cst_309 = arith.constant dense<0.000000e+00> : vector<32x16xf32>
    %360 = tpu.matmul %357, %359, %cst_309 {dimension_numbers = #tpu.dot_dimension_numbers<[1], [0], [0], [1], [0, 0, 1, 1], [], []>} : vector<32x16xbf16>, vector<16x16xbf16>, vector<32x16xf32> -> vector<32x16xf32>
    %361 = arith.truncf %360 : vector<32x16xf32> to vector<32x16xbf16>
    %c0_310 = arith.constant 0 : index
    %c0_311 = arith.constant 0 : index
    %362 = vector.load %arg15[%c0_310, %c0_311] : memref<288x16xbf16, #tpu.memory_space<vmem>>, vector<32x16xbf16>
    tpu.vector_store %arg15[%c0_310, %c0_311], %361 {strides = array<i32>} : memref<288x16xbf16, #tpu.memory_space<vmem>>, vector<32x16xbf16>,
    %c1_312 = arith.constant 1 : index
    %c0_313 = arith.constant 0 : index
    %c0_314 = arith.constant 0 : index
    %363 = vector.load %arg7[%c1_312, %c0_313, %c0_314] : memref<9x16x16xbf16, #tpu.memory_space<vmem>>, vector<1x16x16xbf16>
    %364 = vector.shape_cast %363 : vector<1x16x16xbf16> to vector<16x16xbf16>
    %cst_315 = arith.constant dense<0.000000e+00> : vector<32x16xf32>
    %365 = tpu.matmul %357, %364, %cst_315 {dimension_numbers = #tpu.dot_dimension_numbers<[1], [0], [0], [1], [0, 0, 1, 1], [], []>} : vector<32x16xbf16>, vector<16x16xbf16>, vector<32x16xf32> -> vector<32x16xf32>
    %366 = arith.truncf %365 : vector<32x16xf32> to vector<32x16xbf16>
    %c32_316 = arith.constant 32 : index
    %c0_317 = arith.constant 0 : index
    %367 = vector.load %arg15[%c32_316, %c0_317] : memref<288x16xbf16, #tpu.memory_space<vmem>>, vector<32x16xbf16>
    tpu.vector_store %arg15[%c32_316, %c0_317], %366 {strides = array<i32>} : memref<288x16xbf16, #tpu.memory_space<vmem>>, vector<32x16xbf16>,
    %c2_318 = arith.constant 2 : index
    %c0_319 = arith.constant 0 : index
    %c0_320 = arith.constant 0 : index
    %368 = vector.load %arg7[%c2_318, %c0_319, %c0_320] : memref<9x16x16xbf16, #tpu.memory_space<vmem>>, vector<1x16x16xbf16>
    %369 = vector.shape_cast %368 : vector<1x16x16xbf16> to vector<16x16xbf16>
    %cst_321 = arith.constant dense<0.000000e+00> : vector<32x16xf32>
    %370 = tpu.matmul %357, %369, %cst_321 {dimension_numbers = #tpu.dot_dimension_numbers<[1], [0], [0], [1], [0, 0, 1, 1], [], []>} : vector<32x16xbf16>, vector<16x16xbf16>, vector<32x16xf32> -> vector<32x16xf32>
    %371 = arith.truncf %370 : vector<32x16xf32> to vector<32x16xbf16>
    %c64_322 = arith.constant 64 : index
    %c0_323 = arith.constant 0 : index
    %372 = vector.load %arg15[%c64_322, %c0_323] : memref<288x16xbf16, #tpu.memory_space<vmem>>, vector<32x16xbf16>
    tpu.vector_store %arg15[%c64_322, %c0_323], %371 {strides = array<i32>} : memref<288x16xbf16, #tpu.memory_space<vmem>>, vector<32x16xbf16>,
    %c3_324 = arith.constant 3 : index
    %c0_325 = arith.constant 0 : index
    %c0_326 = arith.constant 0 : index
    %373 = vector.load %arg7[%c3_324, %c0_325, %c0_326] : memref<9x16x16xbf16, #tpu.memory_space<vmem>>, vector<1x16x16xbf16>
    %374 = vector.shape_cast %373 : vector<1x16x16xbf16> to vector<16x16xbf16>
    %cst_327 = arith.constant dense<0.000000e+00> : vector<32x16xf32>
    %375 = tpu.matmul %357, %374, %cst_327 {dimension_numbers = #tpu.dot_dimension_numbers<[1], [0], [0], [1], [0, 0, 1, 1], [], []>} : vector<32x16xbf16>, vector<16x16xbf16>, vector<32x16xf32> -> vector<32x16xf32>
    %376 = arith.truncf %375 : vector<32x16xf32> to vector<32x16xbf16>
    %c96_328 = arith.constant 96 : index
    %c0_329 = arith.constant 0 : index
    %377 = vector.load %arg15[%c96_328, %c0_329] : memref<288x16xbf16, #tpu.memory_space<vmem>>, vector<32x16xbf16>
    tpu.vector_store %arg15[%c96_328, %c0_329], %376 {strides = array<i32>} : memref<288x16xbf16, #tpu.memory_space<vmem>>, vector<32x16xbf16>,
    %c4_330 = arith.constant 4 : index
    %c0_331 = arith.constant 0 : index
    %c0_332 = arith.constant 0 : index
    %378 = vector.load %arg7[%c4_330, %c0_331, %c0_332] : memref<9x16x16xbf16, #tpu.memory_space<vmem>>, vector<1x16x16xbf16>
    %379 = vector.shape_cast %378 : vector<1x16x16xbf16> to vector<16x16xbf16>
    %cst_333 = arith.constant dense<0.000000e+00> : vector<32x16xf32>
    %380 = tpu.matmul %357, %379, %cst_333 {dimension_numbers = #tpu.dot_dimension_numbers<[1], [0], [0], [1], [0, 0, 1, 1], [], []>} : vector<32x16xbf16>, vector<16x16xbf16>, vector<32x16xf32> -> vector<32x16xf32>
    %381 = arith.truncf %380 : vector<32x16xf32> to vector<32x16xbf16>
    %c128_334 = arith.constant 128 : index
    %c0_335 = arith.constant 0 : index
    %382 = vector.load %arg15[%c128_334, %c0_335] : memref<288x16xbf16, #tpu.memory_space<vmem>>, vector<32x16xbf16>
    tpu.vector_store %arg15[%c128_334, %c0_335], %381 {strides = array<i32>} : memref<288x16xbf16, #tpu.memory_space<vmem>>, vector<32x16xbf16>,
    %c5_336 = arith.constant 5 : index
    %c0_337 = arith.constant 0 : index
    %c0_338 = arith.constant 0 : index
    %383 = vector.load %arg7[%c5_336, %c0_337, %c0_338] : memref<9x16x16xbf16, #tpu.memory_space<vmem>>, vector<1x16x16xbf16>
    %384 = vector.shape_cast %383 : vector<1x16x16xbf16> to vector<16x16xbf16>
    %cst_339 = arith.constant dense<0.000000e+00> : vector<32x16xf32>
    %385 = tpu.matmul %357, %384, %cst_339 {dimension_numbers = #tpu.dot_dimension_numbers<[1], [0], [0], [1], [0, 0, 1, 1], [], []>} : vector<32x16xbf16>, vector<16x16xbf16>, vector<32x16xf32> -> vector<32x16xf32>
    %386 = arith.truncf %385 : vector<32x16xf32> to vector<32x16xbf16>
    %c160_340 = arith.constant 160 : index
    %c0_341 = arith.constant 0 : index
    %387 = vector.load %arg15[%c160_340, %c0_341] : memref<288x16xbf16, #tpu.memory_space<vmem>>, vector<32x16xbf16>
    tpu.vector_store %arg15[%c160_340, %c0_341], %386 {strides = array<i32>} : memref<288x16xbf16, #tpu.memory_space<vmem>>, vector<32x16xbf16>,
    %c6_342 = arith.constant 6 : index
    %c0_343 = arith.constant 0 : index
    %c0_344 = arith.constant 0 : index
    %388 = vector.load %arg7[%c6_342, %c0_343, %c0_344] : memref<9x16x16xbf16, #tpu.memory_space<vmem>>, vector<1x16x16xbf16>
    %389 = vector.shape_cast %388 : vector<1x16x16xbf16> to vector<16x16xbf16>
    %cst_345 = arith.constant dense<0.000000e+00> : vector<32x16xf32>
    %390 = tpu.matmul %357, %389, %cst_345 {dimension_numbers = #tpu.dot_dimension_numbers<[1], [0], [0], [1], [0, 0, 1, 1], [], []>} : vector<32x16xbf16>, vector<16x16xbf16>, vector<32x16xf32> -> vector<32x16xf32>
    %391 = arith.truncf %390 : vector<32x16xf32> to vector<32x16xbf16>
    %c192_346 = arith.constant 192 : index
    %c0_347 = arith.constant 0 : index
    %392 = vector.load %arg15[%c192_346, %c0_347] : memref<288x16xbf16, #tpu.memory_space<vmem>>, vector<32x16xbf16>
    tpu.vector_store %arg15[%c192_346, %c0_347], %391 {strides = array<i32>} : memref<288x16xbf16, #tpu.memory_space<vmem>>, vector<32x16xbf16>,
    %c7_348 = arith.constant 7 : index
    %c0_349 = arith.constant 0 : index
    %c0_350 = arith.constant 0 : index
    %393 = vector.load %arg7[%c7_348, %c0_349, %c0_350] : memref<9x16x16xbf16, #tpu.memory_space<vmem>>, vector<1x16x16xbf16>
    %394 = vector.shape_cast %393 : vector<1x16x16xbf16> to vector<16x16xbf16>
    %cst_351 = arith.constant dense<0.000000e+00> : vector<32x16xf32>
    %395 = tpu.matmul %357, %394, %cst_351 {dimension_numbers = #tpu.dot_dimension_numbers<[1], [0], [0], [1], [0, 0, 1, 1], [], []>} : vector<32x16xbf16>, vector<16x16xbf16>, vector<32x16xf32> -> vector<32x16xf32>
    %396 = arith.truncf %395 : vector<32x16xf32> to vector<32x16xbf16>
    %c224_352 = arith.constant 224 : index
    %c0_353 = arith.constant 0 : index
    %397 = vector.load %arg15[%c224_352, %c0_353] : memref<288x16xbf16, #tpu.memory_space<vmem>>, vector<32x16xbf16>
    tpu.vector_store %arg15[%c224_352, %c0_353], %396 {strides = array<i32>} : memref<288x16xbf16, #tpu.memory_space<vmem>>, vector<32x16xbf16>,
    %c8_354 = arith.constant 8 : index
    %c0_355 = arith.constant 0 : index
    %c0_356 = arith.constant 0 : index
    %398 = vector.load %arg7[%c8_354, %c0_355, %c0_356] : memref<9x16x16xbf16, #tpu.memory_space<vmem>>, vector<1x16x16xbf16>
    %399 = vector.shape_cast %398 : vector<1x16x16xbf16> to vector<16x16xbf16>
    %cst_357 = arith.constant dense<0.000000e+00> : vector<32x16xf32>
    %400 = tpu.matmul %357, %399, %cst_357 {dimension_numbers = #tpu.dot_dimension_numbers<[1], [0], [0], [1], [0, 0, 1, 1], [], []>} : vector<32x16xbf16>, vector<16x16xbf16>, vector<32x16xf32> -> vector<32x16xf32>
    %401 = arith.truncf %400 : vector<32x16xf32> to vector<32x16xbf16>
    %c256_358 = arith.constant 256 : index
    %c0_359 = arith.constant 0 : index
    %402 = vector.load %arg15[%c256_358, %c0_359] : memref<288x16xbf16, #tpu.memory_space<vmem>>, vector<32x16xbf16>
    tpu.vector_store %arg15[%c256_358, %c0_359], %401 {strides = array<i32>} : memref<288x16xbf16, #tpu.memory_space<vmem>>, vector<32x16xbf16>,
    %c0_360 = arith.constant 0 : index
    %c0_361 = arith.constant 0 : index
    %403 = vector.load %arg10[%c0_360, %c0_361] : memref<32x288xbf16, #tpu.memory_space<vmem>>, vector<32x288xbf16>
    %c0_362 = arith.constant 0 : index
    %c0_363 = arith.constant 0 : index
    %404 = vector.load %arg15[%c0_362, %c0_363] : memref<288x16xbf16, #tpu.memory_space<vmem>>, vector<288x16xbf16>
    %cst_364 = arith.constant dense<0.000000e+00> : vector<32x16xf32>
    %405 = tpu.matmul %403, %404, %cst_364 {dimension_numbers = #tpu.dot_dimension_numbers<[1], [0], [0], [1], [0, 0, 1, 1], [], []>} : vector<32x288xbf16>, vector<288x16xbf16>, vector<32x16xf32> -> vector<32x16xf32>
    %406 = arith.mulf %405, %405 : vector<32x16xf32>
    %407 = tpu.concatenate %405, %406 in 0 : vector<32x16xf32>, vector<32x16xf32> -> vector<64x16xf32>
    %cst_365 = arith.constant dense<0.000000e+00> : vector<64xf32>
    %408 = vector.multi_reduction <add>, %407, %cst_365 [1] : vector<64x16xf32> to vector<64xf32>
    %409 = vector.shape_cast %408 : vector<64xf32> to vector<64x1xf32>
    %cst_366 = arith.constant 1.600000e+01 : f32
    %410 = vector.broadcast %cst_366 : f32 to vector<64x1xf32>
    %411 = arith.divf %409, %410 : vector<64x1xf32>
    %412 = vector.extract_strided_slice %411 {offsets = [0, 0], sizes = [32, 1], strides = [1, 1]} : vector<64x1xf32> to vector<32x1xf32>
    %413 = vector.extract_strided_slice %411 {offsets = [32, 0], sizes = [32, 1], strides = [1, 1]} : vector<64x1xf32> to vector<32x1xf32>
    %414 = arith.mulf %412, %412 : vector<32x1xf32>
    %415 = arith.subf %413, %414 : vector<32x1xf32>
    %cst_367 = arith.constant 0.000000e+00 : f32
    %416 = vector.broadcast %cst_367 : f32 to vector<32x1xf32>
    %417 = arith.maximumf %415, %416 : vector<32x1xf32>
    %418 = vector.broadcast %412 : vector<32x1xf32> to vector<32x16xf32>
    %419 = arith.subf %405, %418 : vector<32x16xf32>
    %cst_368 = arith.constant 9.99999974E-6 : f32
    %420 = vector.broadcast %cst_368 : f32 to vector<32x1xf32>
    %421 = arith.addf %417, %420 : vector<32x1xf32>
    %422 = math.rsqrt %421 : vector<32x1xf32>
    %423 = vector.broadcast %422 : vector<32x1xf32> to vector<32x16xf32>
    %424 = arith.mulf %419, %423 : vector<32x16xf32>
    %cst_369 = arith.constant 0.000000e+00 : f32
    %425 = vector.broadcast %cst_369 : f32 to vector<32x16xf32>
    %426 = arith.cmpf oge, %424, %425 : vector<32x16xf32>
    %cst_370 = arith.constant 2.000000e-01 : f32
    %427 = vector.broadcast %cst_370 : f32 to vector<32x16xf32>
    %428 = arith.mulf %427, %424 : vector<32x16xf32>
    %429 = arith.select %426, %424, %428 : vector<32x16xi1>, vector<32x16xf32>
    %430 = arith.truncf %429 : vector<32x16xf32> to vector<32x16xbf16>
    %c0_371 = arith.constant 0 : index
    %c0_372 = arith.constant 0 : index
    %c0_373 = arith.constant 0 : index
    %431 = vector.load %arg7[%c0_371, %c0_372, %c0_373] : memref<9x16x16xbf16, #tpu.memory_space<vmem>>, vector<1x16x16xbf16>
    %432 = vector.shape_cast %431 : vector<1x16x16xbf16> to vector<16x16xbf16>
    %cst_374 = arith.constant dense<0.000000e+00> : vector<32x16xf32>
    %433 = tpu.matmul %430, %432, %cst_374 {dimension_numbers = #tpu.dot_dimension_numbers<[1], [0], [0], [1], [0, 0, 1, 1], [], []>} : vector<32x16xbf16>, vector<16x16xbf16>, vector<32x16xf32> -> vector<32x16xf32>
    %434 = arith.truncf %433 : vector<32x16xf32> to vector<32x16xbf16>
    %c0_375 = arith.constant 0 : index
    %c0_376 = arith.constant 0 : index
    %435 = vector.load %arg15[%c0_375, %c0_376] : memref<288x16xbf16, #tpu.memory_space<vmem>>, vector<32x16xbf16>
    tpu.vector_store %arg15[%c0_375, %c0_376], %434 {strides = array<i32>} : memref<288x16xbf16, #tpu.memory_space<vmem>>, vector<32x16xbf16>,
    %c1_377 = arith.constant 1 : index
    %c0_378 = arith.constant 0 : index
    %c0_379 = arith.constant 0 : index
    %436 = vector.load %arg7[%c1_377, %c0_378, %c0_379] : memref<9x16x16xbf16, #tpu.memory_space<vmem>>, vector<1x16x16xbf16>
    %437 = vector.shape_cast %436 : vector<1x16x16xbf16> to vector<16x16xbf16>
    %cst_380 = arith.constant dense<0.000000e+00> : vector<32x16xf32>
    %438 = tpu.matmul %430, %437, %cst_380 {dimension_numbers = #tpu.dot_dimension_numbers<[1], [0], [0], [1], [0, 0, 1, 1], [], []>} : vector<32x16xbf16>, vector<16x16xbf16>, vector<32x16xf32> -> vector<32x16xf32>
    %439 = arith.truncf %438 : vector<32x16xf32> to vector<32x16xbf16>
    %c32_381 = arith.constant 32 : index
    %c0_382 = arith.constant 0 : index
    %440 = vector.load %arg15[%c32_381, %c0_382] : memref<288x16xbf16, #tpu.memory_space<vmem>>, vector<32x16xbf16>
    tpu.vector_store %arg15[%c32_381, %c0_382], %439 {strides = array<i32>} : memref<288x16xbf16, #tpu.memory_space<vmem>>, vector<32x16xbf16>,
    %c2_383 = arith.constant 2 : index
    %c0_384 = arith.constant 0 : index
    %c0_385 = arith.constant 0 : index
    %441 = vector.load %arg7[%c2_383, %c0_384, %c0_385] : memref<9x16x16xbf16, #tpu.memory_space<vmem>>, vector<1x16x16xbf16>
    %442 = vector.shape_cast %441 : vector<1x16x16xbf16> to vector<16x16xbf16>
    %cst_386 = arith.constant dense<0.000000e+00> : vector<32x16xf32>
    %443 = tpu.matmul %430, %442, %cst_386 {dimension_numbers = #tpu.dot_dimension_numbers<[1], [0], [0], [1], [0, 0, 1, 1], [], []>} : vector<32x16xbf16>, vector<16x16xbf16>, vector<32x16xf32> -> vector<32x16xf32>
    %444 = arith.truncf %443 : vector<32x16xf32> to vector<32x16xbf16>
    %c64_387 = arith.constant 64 : index
    %c0_388 = arith.constant 0 : index
    %445 = vector.load %arg15[%c64_387, %c0_388] : memref<288x16xbf16, #tpu.memory_space<vmem>>, vector<32x16xbf16>
    tpu.vector_store %arg15[%c64_387, %c0_388], %444 {strides = array<i32>} : memref<288x16xbf16, #tpu.memory_space<vmem>>, vector<32x16xbf16>,
    %c3_389 = arith.constant 3 : index
    %c0_390 = arith.constant 0 : index
    %c0_391 = arith.constant 0 : index
    %446 = vector.load %arg7[%c3_389, %c0_390, %c0_391] : memref<9x16x16xbf16, #tpu.memory_space<vmem>>, vector<1x16x16xbf16>
    %447 = vector.shape_cast %446 : vector<1x16x16xbf16> to vector<16x16xbf16>
    %cst_392 = arith.constant dense<0.000000e+00> : vector<32x16xf32>
    %448 = tpu.matmul %430, %447, %cst_392 {dimension_numbers = #tpu.dot_dimension_numbers<[1], [0], [0], [1], [0, 0, 1, 1], [], []>} : vector<32x16xbf16>, vector<16x16xbf16>, vector<32x16xf32> -> vector<32x16xf32>
    %449 = arith.truncf %448 : vector<32x16xf32> to vector<32x16xbf16>
    %c96_393 = arith.constant 96 : index
    %c0_394 = arith.constant 0 : index
    %450 = vector.load %arg15[%c96_393, %c0_394] : memref<288x16xbf16, #tpu.memory_space<vmem>>, vector<32x16xbf16>
    tpu.vector_store %arg15[%c96_393, %c0_394], %449 {strides = array<i32>} : memref<288x16xbf16, #tpu.memory_space<vmem>>, vector<32x16xbf16>,
    %c4_395 = arith.constant 4 : index
    %c0_396 = arith.constant 0 : index
    %c0_397 = arith.constant 0 : index
    %451 = vector.load %arg7[%c4_395, %c0_396, %c0_397] : memref<9x16x16xbf16, #tpu.memory_space<vmem>>, vector<1x16x16xbf16>
    %452 = vector.shape_cast %451 : vector<1x16x16xbf16> to vector<16x16xbf16>
    %cst_398 = arith.constant dense<0.000000e+00> : vector<32x16xf32>
    %453 = tpu.matmul %430, %452, %cst_398 {dimension_numbers = #tpu.dot_dimension_numbers<[1], [0], [0], [1], [0, 0, 1, 1], [], []>} : vector<32x16xbf16>, vector<16x16xbf16>, vector<32x16xf32> -> vector<32x16xf32>
    %454 = arith.truncf %453 : vector<32x16xf32> to vector<32x16xbf16>
    %c128_399 = arith.constant 128 : index
    %c0_400 = arith.constant 0 : index
    %455 = vector.load %arg15[%c128_399, %c0_400] : memref<288x16xbf16, #tpu.memory_space<vmem>>, vector<32x16xbf16>
    tpu.vector_store %arg15[%c128_399, %c0_400], %454 {strides = array<i32>} : memref<288x16xbf16, #tpu.memory_space<vmem>>, vector<32x16xbf16>,
    %c5_401 = arith.constant 5 : index
    %c0_402 = arith.constant 0 : index
    %c0_403 = arith.constant 0 : index
    %456 = vector.load %arg7[%c5_401, %c0_402, %c0_403] : memref<9x16x16xbf16, #tpu.memory_space<vmem>>, vector<1x16x16xbf16>
    %457 = vector.shape_cast %456 : vector<1x16x16xbf16> to vector<16x16xbf16>
    %cst_404 = arith.constant dense<0.000000e+00> : vector<32x16xf32>
    %458 = tpu.matmul %430, %457, %cst_404 {dimension_numbers = #tpu.dot_dimension_numbers<[1], [0], [0], [1], [0, 0, 1, 1], [], []>} : vector<32x16xbf16>, vector<16x16xbf16>, vector<32x16xf32> -> vector<32x16xf32>
    %459 = arith.truncf %458 : vector<32x16xf32> to vector<32x16xbf16>
    %c160_405 = arith.constant 160 : index
    %c0_406 = arith.constant 0 : index
    %460 = vector.load %arg15[%c160_405, %c0_406] : memref<288x16xbf16, #tpu.memory_space<vmem>>, vector<32x16xbf16>
    tpu.vector_store %arg15[%c160_405, %c0_406], %459 {strides = array<i32>} : memref<288x16xbf16, #tpu.memory_space<vmem>>, vector<32x16xbf16>,
    %c6_407 = arith.constant 6 : index
    %c0_408 = arith.constant 0 : index
    %c0_409 = arith.constant 0 : index
    %461 = vector.load %arg7[%c6_407, %c0_408, %c0_409] : memref<9x16x16xbf16, #tpu.memory_space<vmem>>, vector<1x16x16xbf16>
    %462 = vector.shape_cast %461 : vector<1x16x16xbf16> to vector<16x16xbf16>
    %cst_410 = arith.constant dense<0.000000e+00> : vector<32x16xf32>
    %463 = tpu.matmul %430, %462, %cst_410 {dimension_numbers = #tpu.dot_dimension_numbers<[1], [0], [0], [1], [0, 0, 1, 1], [], []>} : vector<32x16xbf16>, vector<16x16xbf16>, vector<32x16xf32> -> vector<32x16xf32>
    %464 = arith.truncf %463 : vector<32x16xf32> to vector<32x16xbf16>
    %c192_411 = arith.constant 192 : index
    %c0_412 = arith.constant 0 : index
    %465 = vector.load %arg15[%c192_411, %c0_412] : memref<288x16xbf16, #tpu.memory_space<vmem>>, vector<32x16xbf16>
    tpu.vector_store %arg15[%c192_411, %c0_412], %464 {strides = array<i32>} : memref<288x16xbf16, #tpu.memory_space<vmem>>, vector<32x16xbf16>,
    %c7_413 = arith.constant 7 : index
    %c0_414 = arith.constant 0 : index
    %c0_415 = arith.constant 0 : index
    %466 = vector.load %arg7[%c7_413, %c0_414, %c0_415] : memref<9x16x16xbf16, #tpu.memory_space<vmem>>, vector<1x16x16xbf16>
    %467 = vector.shape_cast %466 : vector<1x16x16xbf16> to vector<16x16xbf16>
    %cst_416 = arith.constant dense<0.000000e+00> : vector<32x16xf32>
    %468 = tpu.matmul %430, %467, %cst_416 {dimension_numbers = #tpu.dot_dimension_numbers<[1], [0], [0], [1], [0, 0, 1, 1], [], []>} : vector<32x16xbf16>, vector<16x16xbf16>, vector<32x16xf32> -> vector<32x16xf32>
    %469 = arith.truncf %468 : vector<32x16xf32> to vector<32x16xbf16>
    %c224_417 = arith.constant 224 : index
    %c0_418 = arith.constant 0 : index
    %470 = vector.load %arg15[%c224_417, %c0_418] : memref<288x16xbf16, #tpu.memory_space<vmem>>, vector<32x16xbf16>
    tpu.vector_store %arg15[%c224_417, %c0_418], %469 {strides = array<i32>} : memref<288x16xbf16, #tpu.memory_space<vmem>>, vector<32x16xbf16>,
    %c8_419 = arith.constant 8 : index
    %c0_420 = arith.constant 0 : index
    %c0_421 = arith.constant 0 : index
    %471 = vector.load %arg7[%c8_419, %c0_420, %c0_421] : memref<9x16x16xbf16, #tpu.memory_space<vmem>>, vector<1x16x16xbf16>
    %472 = vector.shape_cast %471 : vector<1x16x16xbf16> to vector<16x16xbf16>
    %cst_422 = arith.constant dense<0.000000e+00> : vector<32x16xf32>
    %473 = tpu.matmul %430, %472, %cst_422 {dimension_numbers = #tpu.dot_dimension_numbers<[1], [0], [0], [1], [0, 0, 1, 1], [], []>} : vector<32x16xbf16>, vector<16x16xbf16>, vector<32x16xf32> -> vector<32x16xf32>
    %474 = arith.truncf %473 : vector<32x16xf32> to vector<32x16xbf16>
    %c256_423 = arith.constant 256 : index
    %c0_424 = arith.constant 0 : index
    %475 = vector.load %arg15[%c256_423, %c0_424] : memref<288x16xbf16, #tpu.memory_space<vmem>>, vector<32x16xbf16>
    tpu.vector_store %arg15[%c256_423, %c0_424], %474 {strides = array<i32>} : memref<288x16xbf16, #tpu.memory_space<vmem>>, vector<32x16xbf16>,
    %c0_425 = arith.constant 0 : index
    %c0_426 = arith.constant 0 : index
    %476 = vector.load %arg11[%c0_425, %c0_426] : memref<32x288xbf16, #tpu.memory_space<vmem>>, vector<32x288xbf16>
    %c0_427 = arith.constant 0 : index
    %c0_428 = arith.constant 0 : index
    %477 = vector.load %arg15[%c0_427, %c0_428] : memref<288x16xbf16, #tpu.memory_space<vmem>>, vector<288x16xbf16>
    %cst_429 = arith.constant dense<0.000000e+00> : vector<32x16xf32>
    %478 = tpu.matmul %476, %477, %cst_429 {dimension_numbers = #tpu.dot_dimension_numbers<[1], [0], [0], [1], [0, 0, 1, 1], [], []>} : vector<32x288xbf16>, vector<288x16xbf16>, vector<32x16xf32> -> vector<32x16xf32>
    %479 = arith.mulf %478, %478 : vector<32x16xf32>
    %480 = tpu.concatenate %478, %479 in 0 : vector<32x16xf32>, vector<32x16xf32> -> vector<64x16xf32>
    %cst_430 = arith.constant dense<0.000000e+00> : vector<64xf32>
    %481 = vector.multi_reduction <add>, %480, %cst_430 [1] : vector<64x16xf32> to vector<64xf32>
    %482 = vector.shape_cast %481 : vector<64xf32> to vector<64x1xf32>
    %cst_431 = arith.constant 1.600000e+01 : f32
    %483 = vector.broadcast %cst_431 : f32 to vector<64x1xf32>
    %484 = arith.divf %482, %483 : vector<64x1xf32>
    %485 = vector.extract_strided_slice %484 {offsets = [0, 0], sizes = [32, 1], strides = [1, 1]} : vector<64x1xf32> to vector<32x1xf32>
    %486 = vector.extract_strided_slice %484 {offsets = [32, 0], sizes = [32, 1], strides = [1, 1]} : vector<64x1xf32> to vector<32x1xf32>
    %487 = arith.mulf %485, %485 : vector<32x1xf32>
    %488 = arith.subf %486, %487 : vector<32x1xf32>
    %cst_432 = arith.constant 0.000000e+00 : f32
    %489 = vector.broadcast %cst_432 : f32 to vector<32x1xf32>
    %490 = arith.maximumf %488, %489 : vector<32x1xf32>
    %491 = vector.broadcast %485 : vector<32x1xf32> to vector<32x16xf32>
    %492 = arith.subf %478, %491 : vector<32x16xf32>
    %cst_433 = arith.constant 9.99999974E-6 : f32
    %493 = vector.broadcast %cst_433 : f32 to vector<32x1xf32>
    %494 = arith.addf %490, %493 : vector<32x1xf32>
    %495 = math.rsqrt %494 : vector<32x1xf32>
    %496 = vector.broadcast %495 : vector<32x1xf32> to vector<32x16xf32>
    %497 = arith.mulf %492, %496 : vector<32x16xf32>
    %498 = arith.addf %497, %356 : vector<32x16xf32>
    %cst_434 = arith.constant 0.000000e+00 : f32
    %499 = vector.broadcast %cst_434 : f32 to vector<32x32xf32>
    %500 = tpu.concatenate %112, %356, %498, %499 in 1 : vector<32x64xf32>, vector<32x16xf32>, vector<32x16xf32>, vector<32x32xf32> -> vector<32x128xf32>
    %c0_435 = arith.constant 0 : index
    %c0_436 = arith.constant 0 : index
    %501 = vector.load %arg12[%c0_435, %c0_436] : memref<32x128xf32, #tpu.memory_space<vmem>>, vector<32x128xf32>
    tpu.vector_store %arg12[%c0_435, %c0_436], %500 {strides = array<i32>} : memref<32x128xf32, #tpu.memory_space<vmem>>, vector<32x128xf32>,
    return
  }
  func.func @transform_0(%arg0: i32) -> (i32, i32) {
    %c0_i32 = arith.constant 0 : i32
    %c0_i32_0 = arith.constant 0 : i32
    %c0_i32_1 = arith.constant 0 : i32
    return %c0_i32, %c0_i32_0 : i32, i32
  }
  func.func @transform_1(%arg0: i32) -> (i32, i32) {
    %c0_i32 = arith.constant 0 : i32
    %c0_i32_0 = arith.constant 0 : i32
    %c0_i32_1 = arith.constant 0 : i32
    return %c0_i32, %c0_i32_0 : i32, i32
  }
  func.func @transform_2(%arg0: i32) -> (i32, i32, i32) {
    %c0_i32 = arith.constant 0 : i32
    %c0_i32_0 = arith.constant 0 : i32
    %c0_i32_1 = arith.constant 0 : i32
    %c0_i32_2 = arith.constant 0 : i32
    return %c0_i32, %c0_i32_0, %c0_i32_1 : i32, i32, i32
  }
  func.func @transform_3(%arg0: i32) -> (i32, i32) {
    %c0_i32 = arith.constant 0 : i32
    %c0_i32_0 = arith.constant 0 : i32
    %c0_i32_1 = arith.constant 0 : i32
    return %c0_i32, %c0_i32_0 : i32, i32
  }
  func.func @transform_4(%arg0: i32) -> (i32, i32, i32) {
    %c0_i32 = arith.constant 0 : i32
    %c0_i32_0 = arith.constant 0 : i32
    %c0_i32_1 = arith.constant 0 : i32
    %c0_i32_2 = arith.constant 0 : i32
    return %c0_i32, %c0_i32_0, %c0_i32_1 : i32, i32, i32
  }
  func.func @transform_5(%arg0: i32) -> (i32, i32) {
    %c0_i32 = arith.constant 0 : i32
    %c0_i32_0 = arith.constant 0 : i32
    %c0_i32_1 = arith.constant 0 : i32
    return %c0_i32, %c0_i32_0 : i32, i32
  }
  func.func @transform_6(%arg0: i32) -> (i32, i32, i32) {
    %c0_i32 = arith.constant 0 : i32
    %c0_i32_0 = arith.constant 0 : i32
    %c0_i32_1 = arith.constant 0 : i32
    %c0_i32_2 = arith.constant 0 : i32
    return %c0_i32, %c0_i32_0, %c0_i32_1 : i32, i32, i32
  }
  func.func @transform_7(%arg0: i32) -> (i32, i32) {
    %c0_i32 = arith.constant 0 : i32
    %c0_i32_0 = arith.constant 0 : i32
    %c0_i32_1 = arith.constant 0 : i32
    return %c0_i32, %c0_i32_0 : i32, i32
  }
  func.func @transform_8(%arg0: i32) -> (i32, i32) {
    %c0_i32 = arith.constant 0 : i32
    %c0_i32_0 = arith.constant 0 : i32
    %c0_i32_1 = arith.constant 0 : i32
    return %c0_i32, %c0_i32_0 : i32, i32
  }
  func.func @transform_9(%arg0: i32) -> (i32, i32) {
    %c0_i32 = arith.constant 0 : i32
    %c0_i32_0 = arith.constant 0 : i32
    %c0_i32_1 = arith.constant 0 : i32
    return %c0_i32, %c0_i32_0 : i32, i32
  }
  func.func @transform_10(%arg0: i32) -> (i32, i32) {
    %c0_i32 = arith.constant 0 : i32
    %c0_i32_0 = arith.constant 0 : i32
    %c0_i32_1 = arith.constant 0 : i32
    return %c0_i32, %c0_i32_0 : i32, i32
  }
  func.func @transform_11(%arg0: i32) -> (i32, i32) {
    %c0_i32 = arith.constant 0 : i32
    %c0_i32_0 = arith.constant 0 : i32
    %c0_i32_1 = arith.constant 0 : i32
    return %c0_i32, %c0_i32_0 : i32, i32
  }
}

</mosaic_0001>

<bundles_post_ra>
// kernel: tile.1
= control target key start
LH: loop header
LB: loop body
LE: loop exit
PB: predicated region body
PF: predicated region fallthrough
CT: control target
= control target key end

     0   :  { %s95_s8 = smov 125   ;;  %vm20_vm0 = vcmask 7168   ;;  %s96_s9 = smov 126   ;;  %s125_s0 = inlined_call_operand.vmem [shape: bf16[2,8], index: 0, kind: input, shape index: {}]   ;;  %s126_s1 = inlined_call_operand.vmem [shape: bf16[16,1], index: 1, kind: output, shape index: {}]  }
   0x1   :  { %v15_v0 = vld [vmem:[%s125_s0] sm:$0x1]  ;;  %s94_s0 = smov 127   ;;  %s97_s10 = smov 124  }
   0x2   :  { %v16_v1 = vunpack.c.l.bf16 %v15_v0  ;;  %s98_s11 = smov 123   ;;  %s99_s12 = smov 122  }
   0x3   :  { %s100_s13 = smov 121  }
   0x4   :  { %18 = vst [vmem:[#allocation1] sm:$0x3] %v16_v1 }
   0xb   :  { %v22_v2 = vld [vmem:[#allocation1] sm:$0x3]  }
   0xc   :  { %v34_v3 = vld [vmem:[#allocation1] sm:$0x3]   ;;  %23 = vrot.lane.b32.xlu0 %v22_v2, %s94_s0 }
   0xd   :  { %35 = vrot.lane.b32.xlu1 %v34_v3, %s95_s8  ;;  %v28_v4 = vld [vmem:[#allocation1] sm:$0x3]  }
   0xe   :  { %v40_v5 = vld [vmem:[#allocation1] sm:$0x3]  }
   0xf   :  { %v19_v6 = vld [vmem:[#allocation1] sm:$0x3]  }
  0x10   :  { %21 = vst.msk [vmem:[#allocation0] ss:$8 sm:$0x3] %vm20_vm0, %v19_v6   ;;  %29 = vrot.lane.b32.xlu0 %v28_v4, %s96_s9  ;;  %v46_v7 = vld [vmem:[#allocation1] sm:$0x3]  }
  0x11   :  { %41 = vrot.lane.b32.xlu1 %v40_v5, %s97_s10  ;;  %v52_v8 = vld [vmem:[#allocation1] sm:$0x3]  }
  0x12   :  { %v58_v9 = vld [vmem:[#allocation1] sm:$0x3]  }
  0x14   :  { %47 = vrot.lane.b32.xlu0 %v46_v7, %s98_s11 }
  0x15   :  { %53 = vrot.lane.b32.xlu1 %v52_v8, %s99_s12 }
  0x18   :  { %59 = vrot.lane.b32.xlu0 %v58_v9, %s100_s13 }
  0x7e   :  { %v24_v10 = vpop.permute.xlu0 %23  }
  0x7f   :  { %v36_v11 = vpop.permute.xlu1 %35   ;;  %27 = vst.msk [vmem:[#allocation0 + $0x1] ss:$8 sm:$0x3] %vm20_vm0, %v24_v10  }
  0x80   :  { %39 = vst.msk [vmem:[#allocation0 + $0x3] ss:$8 sm:$0x3] %vm20_vm0, %v36_v11  }
  0x82   :  { %v30_v12 = vpop.permute.xlu0 %29  }
  0x83   :  { %v42_v13 = vpop.permute.xlu1 %41   ;;  %33 = vst.msk [vmem:[#allocation0 + $0x2] ss:$8 sm:$0x3] %vm20_vm0, %v30_v12  }
  0x84   :  { %45 = vst.msk [vmem:[#allocation0 + $0x4] ss:$8 sm:$0x3] %vm20_vm0, %v42_v13  }
  0x86   :  { %v48_v14 = vpop.permute.xlu0 %47  }
  0x87   :  { %v54_v15 = vpop.permute.xlu1 %53   ;;  %51 = vst.msk [vmem:[#allocation0 + $0x5] ss:$8 sm:$0x3] %vm20_vm0, %v48_v14  }
  0x88   :  { %57 = vst.msk [vmem:[#allocation0 + $0x6] ss:$8 sm:$0x3] %vm20_vm0, %v54_v15  }
  0x8a   :  { %v60_v16 = vpop.permute.xlu0 %59  }
  0x8b   :  { %63 = vst.msk [vmem:[#allocation0 + $0x7] ss:$8 sm:$0x3] %vm20_vm0, %v60_v16  }
  0x92   :  { %v69_v17 = vld [vmem:[#allocation0] sm:$0xff]  ;;  %v75_v18 = vld [vmem:[#allocation0 + $0x8] sm:$0xff] }
  0x93   :  { %v85_v19 = vpack.c.bf16 %v75_v18, %v69_v17 }
  0x95   :  { %86 = vst [vmem:[%s126_s1] sm:$0xff] %v85_v19  }

// kernel: content_encoder_forward.1
= control target key start
LH: loop header
LB: loop body
LE: loop exit
PB: predicated region body
PF: predicated region fallthrough
CT: control target
= control target key end

     0   :  { %vm724_vm4 = vcmask 519168   ;;  %vm3632_vm5 = vcmask 523264   ;;  %vm3803_vm6 = vcmask 125952   ;;  %vm5744_vm7 = vcmask 130048   ;;  %s13824_s25 = smov 80   ;;  %s16021_s0 = inlined_call_operand.vmem [shape: bf16[512,256], index: 0, kind: input, shape index: {}]   ;;  %s16022_s1 = inlined_call_operand.vmem [shape: bf16[16,512], index: 1, kind: input, shape index: {}]   ;;  %s16023_s2 = inlined_call_operand.vmem [shape: bf16[16,256,64], index: 2, kind: input, shape index: {}]   ;;  %s16024_s3 = inlined_call_operand.vmem [shape: bf16[32,256], index: 3, kind: input, shape index: {}]   ;;  %s16025_s4 = inlined_call_operand.vmem [shape: bf16[16,64,16], index: 4, kind: input, shape index: {}]   ;;  %s16026_s5 = inlined_call_operand.vmem [shape: bf16[32,512], index: 5, kind: input, shape index: {}]   ;;  %s16027_s6 = inlined_call_operand.vmem [shape: bf16[9,16,16], index: 6, kind: input, shape index: {}]   ;;  %s16028_s7 = inlined_call_operand.vmem [shape: bf16[32,288], index: 7, kind: input, shape index: {}]   ;;  %s16029_s8 = inlined_call_operand.vmem [shape: bf16[32,288], index: 8, kind: input, shape index: {}]   ;;  %s16030_s9 = inlined_call_operand.vmem [shape: bf16[32,288], index: 9, kind: input, shape index: {}]   ;;  %s16031_s10 = inlined_call_operand.vmem [shape: bf16[32,288], index: 10, kind: input, shape index: {}]   ;;  %s16032_s11 = inlined_call_operand.vmem [shape: f32[32,128], index: 11, kind: output, shape index: {}]  }
   0x1   :  { %v13147_v0 = vld [vmem:[%s16021_s0 + $0x74] ss:$8 sps:$4 sm:$0xff]   ;;  %v13151_v2 = vld [vmem:[%s16021_s0 + $0x70] ss:$8 sps:$4 sm:$0xff]   ;;  %v13153_v4 = vld [vmem:[%s16021_s0 + $0x64] ss:$8 sps:$4 sm:$0xff]  }
   0x2   :  { %v13149_v1 = vld [vmem:[%s16021_s0 + $0x174] ss:$8 sps:$4 sm:$0xff]   ;;  %447 = vmatprep.subr.bf16.mxu0 %v13147_v0  ;;  %v13152_v3 = vld [vmem:[%s16021_s0 + $0x170] ss:$8 sps:$4 sm:$0xff]   ;;  %v13155_v5 = vld [vmem:[%s16021_s0 + $0x164] ss:$8 sps:$4 sm:$0xff]  }
   0x3   :  { %490 = vmatprep.subr.bf16.mxu1 %v13149_v1  ;;  %448 = vmatpush1.bf16.msra.mxu0 %v13151_v2  ;;  %v13157_v6 = vld [vmem:[%s16021_s0 + $0x60] ss:$8 sps:$4 sm:$0xff]   ;;  %v13159_v8 = vld [vmem:[%s16021_s0 + $0x54] ss:$8 sps:$4 sm:$0xff]   ;;  %v13163_v10 = vld [vmem:[%s16021_s0 + $0x50] ss:$8 sps:$4 sm:$0xff]  }
   0x4   :  { %491 = vmatpush1.bf16.msra.mxu1 %v13152_v3  ;;  %449 = vmatprep.subr.bf16.mxu0 %v13153_v4  ;;  %v13158_v7 = vld [vmem:[%s16021_s0 + $0x160] ss:$8 sps:$4 sm:$0xff]   ;;  %v13161_v9 = vld [vmem:[%s16021_s0 + $0x154] ss:$8 sps:$4 sm:$0xff]   ;;  %v13164_v11 = vld [vmem:[%s16021_s0 + $0x150] ss:$8 sps:$4 sm:$0xff]  }
   0x5   :  { %492 = vmatprep.subr.bf16.mxu1 %v13155_v5  ;;  %v13165_v12 = vld [vmem:[%s16021_s0 + $0x44] ss:$8 sps:$4 sm:$0xff]   ;;  %v13169_v14 = vld [vmem:[%s16021_s0 + $0x40] ss:$8 sps:$4 sm:$0xff]   ;;  %v13171_v16 = vld [vmem:[%s16021_s0 + $0x34] ss:$8 sps:$4 sm:$0xff]  }
   0x6   :  { %v13167_v13 = vld [vmem:[%s16021_s0 + $0x144] ss:$8 sps:$4 sm:$0xff]   ;;  %v13170_v15 = vld [vmem:[%s16021_s0 + $0x140] ss:$8 sps:$4 sm:$0xff]   ;;  %v13173_v17 = vld [vmem:[%s16021_s0 + $0x134] ss:$8 sps:$4 sm:$0xff]  }
   0x7   :  { %450 = vmatpush1.bf16.msra.mxu0 %v13157_v6  ;;  %v13175_v18 = vld [vmem:[%s16021_s0 + $0x30] ss:$8 sps:$4 sm:$0xff]   ;;  %v13177_v20 = vld [vmem:[%s16021_s0 + $0x24] ss:$8 sps:$4 sm:$0xff]   ;;  %v13181_v22 = vld [vmem:[%s16021_s0 + $0x20] ss:$8 sps:$4 sm:$0xff]  }
   0x8   :  { %493 = vmatpush1.bf16.msra.mxu1 %v13158_v7  ;;  %451 = vmatprep.subr.bf16.mxu0 %v13159_v8  ;;  %v13176_v19 = vld [vmem:[%s16021_s0 + $0x130] ss:$8 sps:$4 sm:$0xff]   ;;  %v13179_v21 = vld [vmem:[%s16021_s0 + $0x124] ss:$8 sps:$4 sm:$0xff]   ;;  %v13182_v23 = vld [vmem:[%s16021_s0 + $0x120] ss:$8 sps:$4 sm:$0xff]  }
   0x9   :  { %494 = vmatprep.subr.bf16.mxu1 %v13161_v9  ;;  %v13183_v24 = vld [vmem:[%s16021_s0 + $0x14] ss:$8 sps:$4 sm:$0xff]   ;;  %v13187_v26 = vld [vmem:[%s16021_s0 + $0x10] ss:$8 sps:$4 sm:$0xff]   ;;  %v13189_v28 = vld [vmem:[%s16021_s0 + $0x4] ss:$8 sps:$4 sm:$0xff]  }
   0xa   :  { %v13185_v25 = vld [vmem:[%s16021_s0 + $0x114] ss:$8 sps:$4 sm:$0xff]   ;;  %v13188_v27 = vld [vmem:[%s16021_s0 + $0x110] ss:$8 sps:$4 sm:$0xff]   ;;  %v13191_v29 = vld [vmem:[%s16021_s0 + $0x104] ss:$8 sps:$4 sm:$0xff]  }
   0xb   :  { %452 = vmatpush1.bf16.msra.mxu0 %v13163_v10  ;;  %v13193_v30 = vld [vmem:[%s16021_s0] ss:$8 sps:$4 sm:$0xff]   ;;  %v13195_v32 = vld [vmem:[%s16021_s0 + $0xf4] ss:$8 sps:$4 sm:$0xff]   ;;  %v13199_v34 = vld [vmem:[%s16021_s0 + $0xf0] ss:$8 sps:$4 sm:$0xff]  }
   0xc   :  { %495 = vmatpush1.bf16.msra.mxu1 %v13164_v11  ;;  %453 = vmatprep.subr.bf16.mxu0 %v13165_v12  ;;  %v13194_v31 = vld [vmem:[%s16021_s0 + $0x100] ss:$8 sps:$4 sm:$0xff]   ;;  %v13197_v33 = vld [vmem:[%s16021_s0 + $0x1f4] ss:$8 sps:$4 sm:$0xff]   ;;  %v13200_v35 = vld [vmem:[%s16021_s0 + $0x1f0] ss:$8 sps:$4 sm:$0xff]  }
   0xd   :  { %496 = vmatprep.subr.bf16.mxu1 %v13167_v13  ;;  %v13201_v36 = vld [vmem:[%s16021_s0 + $0xe4] ss:$8 sps:$4 sm:$0xff]   ;;  %v13205_v38 = vld [vmem:[%s16021_s0 + $0xe0] ss:$8 sps:$4 sm:$0xff]   ;;  %v13207_v40 = vld [vmem:[%s16021_s0 + $0xd4] ss:$8 sps:$4 sm:$0xff]  }
   0xe   :  { %v13203_v37 = vld [vmem:[%s16021_s0 + $0x1e4] ss:$8 sps:$4 sm:$0xff]   ;;  %v13206_v39 = vld [vmem:[%s16021_s0 + $0x1e0] ss:$8 sps:$4 sm:$0xff]   ;;  %v13209_v41 = vld [vmem:[%s16021_s0 + $0x1d4] ss:$8 sps:$4 sm:$0xff]  }
   0xf   :  { %454 = vmatpush1.bf16.msra.mxu0 %v13169_v14  ;;  %v13211_v42 = vld [vmem:[%s16021_s0 + $0xd0] ss:$8 sps:$4 sm:$0xff]   ;;  %v13213_v44 = vld [vmem:[%s16021_s0 + $0xc4] ss:$8 sps:$4 sm:$0xff]   ;;  %v13217_v46 = vld [vmem:[%s16021_s0 + $0xc0] ss:$8 sps:$4 sm:$0xff]  }
  0x10   :  { %497 = vmatpush1.bf16.msra.mxu1 %v13170_v15  ;;  %455 = vmatprep.subr.bf16.mxu0 %v13171_v16  ;;  %v13212_v43 = vld [vmem:[%s16021_s0 + $0x1d0] ss:$8 sps:$4 sm:$0xff]   ;;  %v13215_v45 = vld [vmem:[%s16021_s0 + $0x1c4] ss:$8 sps:$4 sm:$0xff]   ;;  %v13218_v47 = vld [vmem:[%s16021_s0 + $0x1c0] ss:$8 sps:$4 sm:$0xff]  }
  0x11   :  { %498 = vmatprep.subr.bf16.mxu1 %v13173_v17  ;;  %v13219_v48 = vld [vmem:[%s16021_s0 + $0xb4] ss:$8 sps:$4 sm:$0xff]   ;;  %v13223_v52 = vld [vmem:[%s16021_s0 + $0xb0] ss:$8 sps:$4 sm:$0xff]   ;;  %v13225_v54 = vld [vmem:[%s16021_s0 + $0xa4] ss:$8 sps:$4 sm:$0xff]  }
  0x12   :  { %v13245_v49 = vld [vmem:[%s16022_s1 + $0x4] ss:$16 sps:$4 sm:$0xff]   ;;  %v13248_v51 = vld [vmem:[%s16022_s1 + $0xc] ss:$16 sps:$4 sm:$0xff]   ;;  %v13224_v53 = vld [vmem:[%s16021_s0 + $0x1b0] ss:$8 sps:$4 sm:$0xff]  }
  0x13   :  { %456 = vmatpush1.bf16.msra.mxu0 %v13175_v18  ;;  %v13221_v50 = vld [vmem:[%s16021_s0 + $0x1b4] ss:$8 sps:$4 sm:$0xff]   ;;  %479 = vmatprep.mubr.bf16.mxu0 %v13245_v49  ;;  %v13227_v55 = vld [vmem:[%s16021_s0 + $0x1a4] ss:$8 sps:$4 sm:$0xff]   ;;  %v13229_v56 = vld [vmem:[%s16021_s0 + $0xa0] ss:$8 sps:$4 sm:$0xff]  }
  0x14   :  { %499 = vmatpush1.bf16.msra.mxu1 %v13176_v19  ;;  %457 = vmatprep.subr.bf16.mxu0 %v13177_v20  ;;  %v13230_v57 = vld [vmem:[%s16021_s0 + $0x1a0] ss:$8 sps:$4 sm:$0xff]   ;;  %v13231_v58 = vld [vmem:[%s16021_s0 + $0x94] ss:$8 sps:$4 sm:$0xff]   ;;  %v13235_v60 = vld [vmem:[%s16021_s0 + $0x90] ss:$8 sps:$4 sm:$0xff]  }
  0x15   :  { %500 = vmatprep.subr.bf16.mxu1 %v13179_v21  ;;  %522 = vmatprep.mubr.bf16.mxu1 %v13248_v51  ;;  %v13233_v59 = vld [vmem:[%s16021_s0 + $0x194] ss:$8 sps:$4 sm:$0xff]   ;;  %v13236_v61 = vld [vmem:[%s16021_s0 + $0x190] ss:$8 sps:$4 sm:$0xff]   ;;  %v13237_v62 = vld [vmem:[%s16021_s0 + $0x84] ss:$8 sps:$4 sm:$0xff]  }
  0x16   :  { %v13239_v63 = vld [vmem:[%s16021_s0 + $0x184] ss:$8 sps:$4 sm:$0xff]   ;;  %v13241_v0 = vld [vmem:[%s16021_s0 + $0x80] ss:$8 sps:$4 sm:$0xff]   ;;  %v13249_v2 = vld [vmem:[%s16023_s2 + $0x78] sm:$0xff]   ;;  %vm6701_vm8 = vcmask 261120  }
  0x17   :  { %458 = vmatpush1.bf16.msra.mxu0 %v13181_v22  ;;  %v13242_v1 = vld [vmem:[%s16021_s0 + $0x180] ss:$8 sps:$4 sm:$0xff]   ;;  %v13250_v5 = vld [vmem:[%s16023_s2 + $0xf8] sm:$0xff]   ;;  %v13253_v8 = vld [vmem:[%s16023_s2 + $0x70] sm:$0xff]   ;;  %vm10083_vm13 = vcmask 654336   ;;  %vm10088_vm14 = vcmask 785408  }
  0x18   :  { %501 = vmatpush1.bf16.msra.mxu1 %v13182_v23  ;;  %459 = vmatprep.subr.bf16.mxu0 %v13183_v24  ;;  %v13243_v3 = vld [vmem:[%s16022_s1] ss:$16 sps:$4 sm:$0xff]   ;;  %v13246_v4 = vld [vmem:[%s16022_s1 + $0x8] ss:$16 sps:$4 sm:$0xff]  }
  0x19   :  { %502 = vmatprep.subr.bf16.mxu1 %v13185_v25  ;;  %v13251_v6 = vld [vmem:[%s16023_s2 + $0x38] sm:$0xff]   ;;  %v13254_v9 = vld [vmem:[%s16023_s2 + $0xf0] sm:$0xff]   ;;  %v13257_v12 = vld [vmem:[%s16023_s2 + $0x68] sm:$0xff]  }
  0x1a   :  { %v13252_v7 = vld [vmem:[%s16023_s2 + $0xb8] sm:$0xff]   ;;  %v13255_v10 = vld [vmem:[%s16023_s2 + $0x30] sm:$0xff]   ;;  %v13258_v13 = vld [vmem:[%s16023_s2 + $0xe8] sm:$0xff]  }
  0x1b   :  { %460 = vmatpush1.bf16.msra.mxu0 %v13187_v26  ;;  %v13256_v11 = vld [vmem:[%s16023_s2 + $0xb0] sm:$0xff]   ;;  %v13259_v14 = vld [vmem:[%s16023_s2 + $0x28] sm:$0xff]   ;;  %v13261_v16 = vld [vmem:[%s16023_s2 + $0x60] sm:$0xff]  }
  0x1c   :  { %503 = vmatpush1.bf16.msra.mxu1 %v13188_v27  ;;  %461 = vmatprep.subr.bf16.mxu0 %v13189_v28  ;;  %v13260_v15 = vld [vmem:[%s16023_s2 + $0xa8] sm:$0xff]   ;;  %v13262_v17 = vld [vmem:[%s16023_s2 + $0xe0] sm:$0xff]   ;;  %v13265_v20 = vld [vmem:[%s16023_s2 + $0x58] sm:$0xff]  }
  0x1d   :  { %504 = vmatprep.subr.bf16.mxu1 %v13191_v29  ;;  %v13263_v18 = vld [vmem:[%s16023_s2 + $0x20] sm:$0xff]   ;;  %v13266_v21 = vld [vmem:[%s16023_s2 + $0xd8] sm:$0xff]   ;;  %v13269_v24 = vld [vmem:[%s16023_s2 + $0x50] sm:$0xff]  }
  0x1e   :  { %v13264_v19 = vld [vmem:[%s16023_s2 + $0xa0] sm:$0xff]   ;;  %v13267_v22 = vld [vmem:[%s16023_s2 + $0x18] sm:$0xff]   ;;  %v13270_v25 = vld [vmem:[%s16023_s2 + $0xd0] sm:$0xff]  }
  0x1f   :  { %462 = vmatpush1.bf16.msra.mxu0 %v13193_v30  ;;  %v13268_v23 = vld [vmem:[%s16023_s2 + $0x98] sm:$0xff]   ;;  %v13271_v26 = vld [vmem:[%s16023_s2 + $0x10] sm:$0xff]   ;;  %v13273_v28 = vld [vmem:[%s16023_s2 + $0x48] sm:$0xff]  }
  0x20   :  { %505 = vmatpush1.bf16.msra.mxu1 %v13194_v31  ;;  %463 = vmatprep.subr.bf16.mxu0 %v13195_v32  ;;  %v13272_v27 = vld [vmem:[%s16023_s2 + $0x90] sm:$0xff]   ;;  %v13274_v29 = vld [vmem:[%s16023_s2 + $0xc8] sm:$0xff]   ;;  %v13277_v32 = vld [vmem:[%s16023_s2 + $0x40] sm:$0xff]  }
  0x21   :  { %506 = vmatprep.subr.bf16.mxu1 %v13197_v33  ;;  %v13275_v30 = vld [vmem:[%s16023_s2 + $0x8] sm:$0xff]   ;;  %v13278_v33 = vld [vmem:[%s16023_s2 + $0xc0] sm:$0xff]  }
  0x22   :  { %v13276_v31 = vld [vmem:[%s16023_s2 + $0x88] sm:$0xff]  }
  0x23   :  { %464 = vmatpush2.bf16.msra.mxu0 %v13199_v34  ;;  %v13279_v34 = vld [vmem:[%s16023_s2] sm:$0xff]  }
  0x24   :  { %507 = vmatpush2.bf16.msra.mxu1 %v13200_v35  ;;  %465 = vmatprep.subr.bf16.mxu0 %v13201_v36  ;;  %v13280_v35 = vld [vmem:[%s16023_s2 + $0x80] sm:$0xff]   ;;  %v13281_v36 = vld [vmem:[%s16023_s2 + $0x178] sm:$0xff]  }
  0x25   :  { %508 = vmatprep.subr.bf16.mxu1 %v13203_v37  ;;  %v13282_v37 = vld [vmem:[%s16023_s2 + $0x1f8] sm:$0xff]  }
  0x27   :  { %466 = vmatpush2.bf16.msra.mxu0 %v13205_v38 }
  0x28   :  { %509 = vmatpush2.bf16.msra.mxu1 %v13206_v39  ;;  %467 = vmatprep.subr.bf16.mxu0 %v13207_v40 }
  0x29   :  { %510 = vmatprep.subr.bf16.mxu1 %v13209_v41 }
  0x2b   :  { %468 = vmatpush2.bf16.msra.mxu0 %v13211_v42 }
  0x2c   :  { %511 = vmatpush2.bf16.msra.mxu1 %v13212_v43  ;;  %469 = vmatprep.subr.bf16.mxu0 %v13213_v44 }
  0x2d   :  { %512 = vmatprep.subr.bf16.mxu1 %v13215_v45 }
  0x2f   :  { %470 = vmatpush2.bf16.msra.mxu0 %v13217_v46 }
  0x30   :  { %513 = vmatpush2.bf16.msra.mxu1 %v13218_v47  ;;  %471 = vmatprep.subr.bf16.mxu0 %v13219_v48 }
  0x31   :  { %514 = vmatprep.subr.bf16.mxu1 %v13221_v50 }
  0x33   :  { %472 = vmatpush2.bf16.msra.mxu0 %v13223_v52 }
  0x34   :  { %515 = vmatpush2.bf16.msra.mxu1 %v13224_v53  ;;  %473 = vmatprep.subr.bf16.mxu0 %v13225_v54 }
  0x35   :  { %516 = vmatprep.subr.bf16.mxu1 %v13227_v55 }
  0x37   :  { %474 = vmatpush2.bf16.msra.mxu0 %v13229_v56 }
  0x38   :  { %517 = vmatpush2.bf16.msra.mxu1 %v13230_v57  ;;  %475 = vmatprep.subr.bf16.mxu0 %v13231_v58 }
  0x39   :  { %518 = vmatprep.subr.bf16.mxu1 %v13233_v59  ;;  %v13283_v59 = vld [vmem:[%s16023_s2 + $0x138] sm:$0xff]  }
  0x3b   :  { %476 = vmatpush2.bf16.msra.mxu0 %v13235_v60  ;;  %v13284_v60 = vld [vmem:[%s16023_s2 + $0x1b8] sm:$0xff]  }
  0x3c   :  { %519 = vmatpush2.bf16.msra.mxu1 %v13236_v61  ;;  %477 = vmatprep.subr.bf16.mxu0 %v13237_v62  ;;  %v13285_v62 = vld [vmem:[%s16023_s2 + $0x170] sm:$0xff]  }
  0x3d   :  { %520 = vmatprep.subr.bf16.mxu1 %v13239_v63  ;;  %v13286_v63 = vld [vmem:[%s16023_s2 + $0x1f0] sm:$0xff]  }
  0x3f   :  { %478 = vmatpush2.bf16.msra.mxu0 %v13241_v0  ;;  %v13287_v0 = vld [vmem:[%s16023_s2 + $0x130] sm:$0xff]  }
  0x40   :  { %521 = vmatpush2.bf16.msra.mxu1 %v13242_v1  ;;  %11937 = vmatprep.subr.bf16.mxu0 %v13249_v2  ;;  %v13288_v1 = vld [vmem:[%s16023_s2 + $0x1b0] sm:$0xff]   ;;  %v13289_v2 = vld [vmem:[%s16023_s2 + $0x168] sm:$0xff]  }
  0x41   :  { %11959 = vmatprep.subr.bf16.mxu1 %v13250_v5  ;;  %v13292_v5 = vld [vmem:[%s16023_s2 + $0x1a8] sm:$0xff]  }
  0x42   :  { %480 = vmatmul.mubr.bf16.vlgmr.msra.gmra.mxu0 %v13243_v3  ;;  %v13290_v3 = vld [vmem:[%s16023_s2 + $0x1e8] sm:$0xff]  }
  0x43   :  { %523 = vmatmul.mubr.bf16.vlgmr.msra.gmra.mxu1 %v13246_v4  ;;  %11938 = vmatpush3.bf16.msra.mxu0 %v13251_v6  ;;  %v13291_v4 = vld [vmem:[%s16023_s2 + $0x128] sm:$0xff]   ;;  %v13293_v6 = vld [vmem:[%s16023_s2 + $0x160] sm:$0xff]  }
  0x44   :  { %11960 = vmatpush3.bf16.msra.mxu1 %v13252_v7  ;;  %11939 = vmatprep.subr.bf16.mxu0 %v13253_v8  ;;  %v13294_v7 = vld [vmem:[%s16023_s2 + $0x1e0] sm:$0xff]  }
  0x45   :  { %11961 = vmatprep.subr.bf16.mxu1 %v13254_v9  ;;  %v13295_v8 = vld [vmem:[%s16023_s2 + $0x120] sm:$0xff]  }
  0x46   :  { %v13296_v9 = vld [vmem:[%s16023_s2 + $0x1a0] sm:$0xff]  }
  0x47   :  { %11940 = vmatpush3.bf16.msra.mxu0 %v13255_v10  ;;  %v13297_v10 = vld [vmem:[%s16023_s2 + $0x158] sm:$0xff]  }
  0x48   :  { %11962 = vmatpush3.bf16.msra.mxu1 %v13256_v11  ;;  %11941 = vmatprep.subr.bf16.mxu0 %v13257_v12  ;;  %v13298_v11 = vld [vmem:[%s16023_s2 + $0x1d8] sm:$0xff]  }
  0x49   :  { %11963 = vmatprep.subr.bf16.mxu1 %v13258_v13  ;;  %v13299_v12 = vld [vmem:[%s16023_s2 + $0x118] sm:$0xff]  }
  0x4a   :  { %v13300_v13 = vld [vmem:[%s16023_s2 + $0x198] sm:$0xff]  }
  0x4b   :  { %11942 = vmatpush3.bf16.msra.mxu0 %v13259_v14  ;;  %v13301_v14 = vld [vmem:[%s16023_s2 + $0x150] sm:$0xff]  }
  0x4c   :  { %11964 = vmatpush3.bf16.msra.mxu1 %v13260_v15  ;;  %11943 = vmatprep.subr.bf16.mxu0 %v13261_v16  ;;  %v13302_v15 = vld [vmem:[%s16023_s2 + $0x1d0] sm:$0xff]  }
  0x4d   :  { %11965 = vmatprep.subr.bf16.mxu1 %v13262_v17  ;;  %v13303_v16 = vld [vmem:[%s16023_s2 + $0x110] sm:$0xff]  }
  0x4e   :  { %v13304_v17 = vld [vmem:[%s16023_s2 + $0x190] sm:$0xff]  }
  0x4f   :  { %11944 = vmatpush3.bf16.msra.mxu0 %v13263_v18  ;;  %v13305_v18 = vld [vmem:[%s16023_s2 + $0x148] sm:$0xff]  }
  0x50   :  { %11966 = vmatpush3.bf16.msra.mxu1 %v13264_v19  ;;  %11945 = vmatprep.subr.bf16.mxu0 %v13265_v20  ;;  %v13306_v19 = vld [vmem:[%s16023_s2 + $0x1c8] sm:$0xff]  }
  0x51   :  { %11967 = vmatprep.subr.bf16.mxu1 %v13266_v21  ;;  %v13307_v20 = vld [vmem:[%s16023_s2 + $0x108] sm:$0xff]  }
  0x52   :  { %v13308_v21 = vld [vmem:[%s16023_s2 + $0x188] sm:$0xff]  }
  0x53   :  { %11946 = vmatpush3.bf16.msra.mxu0 %v13267_v22  ;;  %v13309_v22 = vld [vmem:[%s16023_s2 + $0x140] sm:$0xff]  }
  0x54   :  { %11968 = vmatpush3.bf16.msra.mxu1 %v13268_v23  ;;  %11947 = vmatprep.subr.bf16.mxu0 %v13269_v24  ;;  %v13310_v23 = vld [vmem:[%s16023_s2 + $0x1c0] sm:$0xff]  }
  0x55   :  { %11969 = vmatprep.subr.bf16.mxu1 %v13270_v25  ;;  %v13311_v24 = vld [vmem:[%s16023_s2 + $0x100] sm:$0xff]  }
  0x56   :  { %v13312_v25 = vld [vmem:[%s16023_s2 + $0x180] sm:$0xff]  }
  0x57   :  { %11948 = vmatpush3.bf16.msra.mxu0 %v13271_v26  ;;  %v13313_v26 = vld [vmem:[%s16023_s2 + $0x278] sm:$0xff]  }
  0x58   :  { %11970 = vmatpush3.bf16.msra.mxu1 %v13272_v27  ;;  %11949 = vmatprep.subr.bf16.mxu0 %v13273_v28  ;;  %v13314_v27 = vld [vmem:[%s16023_s2 + $0x2f8] sm:$0xff]  }
  0x59   :  { %11971 = vmatprep.subr.bf16.mxu1 %v13274_v29  ;;  %v13315_v28 = vld [vmem:[%s16023_s2 + $0x238] sm:$0xff]  }
  0x5a   :  { %v13316_v29 = vld [vmem:[%s16023_s2 + $0x2b8] sm:$0xff]  }
  0x5b   :  { %11950 = vmatpush3.bf16.msra.mxu0 %v13275_v30  ;;  %v13317_v30 = vld [vmem:[%s16023_s2 + $0x270] sm:$0xff]  }
  0x5c   :  { %11972 = vmatpush3.bf16.msra.mxu1 %v13276_v31  ;;  %11951 = vmatprep.subr.bf16.mxu0 %v13277_v32  ;;  %v13318_v31 = vld [vmem:[%s16023_s2 + $0x2f0] sm:$0xff]  }
  0x5d   :  { %11973 = vmatprep.subr.bf16.mxu1 %v13278_v33  ;;  %v13319_v32 = vld [vmem:[%s16023_s2 + $0x230] sm:$0xff]  }
  0x5e   :  { %v13320_v33 = vld [vmem:[%s16023_s2 + $0x2b0] sm:$0xff]  }
  0x5f   :  { %11952 = vmatpush3.bf16.msra.mxu0 %v13279_v34  ;;  %v13321_v34 = vld [vmem:[%s16023_s2 + $0x268] sm:$0xff]  }
  0x60   :  { %11974 = vmatpush3.bf16.msra.mxu1 %v13280_v35  ;;  %11981 = vmatprep.subr.bf16.mxu0 %v13281_v36  ;;  %v13322_v35 = vld [vmem:[%s16023_s2 + $0x2e8] sm:$0xff]  }
  0x61   :  { %12003 = vmatprep.subr.bf16.mxu1 %v13282_v37  ;;  %v13323_v36 = vld [vmem:[%s16023_s2 + $0x228] sm:$0xff]  }
  0x62   :  { %v13324_v37 = vld [vmem:[%s16023_s2 + $0x2a8] sm:$0xff]  }
 0x102   :  { %v481_v38 = vpop.f32.mrf.mxu0 }
 0x103   :  { %v524_v39 = vpop.f32.mrf.mxu1 }
 0x104   :  { %v525_v40 = vadd.f32 %v524_v39, %v481_v38  ;;  %v483_v41 = vpop.f32.mrf.mxu0  ;;  %v13325_v38 = vld [vmem:[%s16023_s2 + $0x260] sm:$0xff]  }
 0x105   :  { %v526_v42 = vpop.f32.mrf.mxu1  ;;  %v13326_v39 = vld [vmem:[%s16023_s2 + $0x2e0] sm:$0xff]  }
 0x106   :  { %v527_v43 = vadd.f32 %v526_v42, %v483_v41  ;;  %v485_v44 = vpop.f32.mrf.mxu0  ;;  %v537_v46 = vmul.f32 0.01, %v525_v40  ;;  %vm533_vm2 = vcmp.ge.f32.partialorder %v525_v40, 0.0  ;;  %v13328_v41 = vld [vmem:[%s16023_s2 + $0x2a0] sm:$0xff]   ;;  %v13329_v42 = vld [vmem:[%s16023_s2 + $0x258] sm:$0xff]  }
 0x107   :  { %v528_v45 = vpop.f32.mrf.mxu1 }
 0x108   :  { %v529_v47 = vadd.f32 %v528_v45, %v485_v44  ;;  %v538_v48 = vmul.f32 0.01, %v527_v43  ;;  %v487_v49 = vpop.f32.mrf.mxu0  ;;  %vm534_vm1 = vcmp.ge.f32.partialorder %v527_v43, 0.0  ;;  %v541_v57 = vsel %vm533_vm2, %v525_v40, %v537_v46  ;;  %v13327_v40 = vld [vmem:[%s16023_s2 + $0x220] sm:$0xff]   ;;  %v13331_v44 = vld [vmem:[%s16023_s2 + $0x218] sm:$0xff]   ;;  %v13333_v46 = vld [vmem:[%s16023_s2 + $0x250] sm:$0xff]  }
 0x109   :  { %v530_v50 = vpop.f32.mrf.mxu1  ;;  %v13332_v45 = vld [vmem:[%s16023_s2 + $0x298] sm:$0xff]  }
 0x10a   :  { %vm535_vm0 = vcmp.ge.f32.partialorder %v529_v47, 0.0  ;;  %v539_v51 = vmul.f32 0.01, %v529_v47  ;;  %v531_v52 = vadd.f32 %v530_v50, %v487_v49  ;;  %v542_v55 = vsel %vm534_vm1, %v527_v43, %v538_v48  ;;  %v13330_v43 = vld [vmem:[%s16023_s2 + $0x2d8] sm:$0xff]   ;;  %v13335_v48 = vld [vmem:[%s16023_s2 + $0x210] sm:$0xff]   ;;  %v13337_v50 = vld [vmem:[%s16023_s2 + $0x248] sm:$0xff]  }
 0x10b   :  { %v13336_v49 = vld [vmem:[%s16023_s2 + $0x290] sm:$0xff]  }
 0x10c   :  { %vm536_vm3 = vcmp.ge.f32.partialorder %v531_v52, 0.0  ;;  %v540_v53 = vmul.f32 0.01, %v531_v52  ;;  %v543_v54 = vsel %vm535_vm0, %v529_v47, %v539_v51  ;;  %v13334_v47 = vld [vmem:[%s16023_s2 + $0x2d0] sm:$0xff]   ;;  %v13338_v51 = vld [vmem:[%s16023_s2 + $0x2c8] sm:$0xff]  }
 0x10d   :  { %v14199_v61 = vpack.c.bf16 %v543_v54, %v541_v57  ;;  %v13341_v54 = vld [vmem:[%s16023_s2 + $0x240] sm:$0xff]  }
 0x10e   :  { %v544_v56 = vsel %vm536_vm3, %v531_v52, %v540_v53  ;;  %v13339_v52 = vld [vmem:[%s16023_s2 + $0x208] sm:$0xff]   ;;  %v13344_v57 = vld [vmem:[%s16023_s2 + $0x280] sm:$0xff]  }
 0x10f   :  { %v14191_v58 = vpack.c.bf16 %v544_v56, %v542_v55  ;;  %v13340_v53 = vld [vmem:[%s16023_s2 + $0x288] sm:$0xff]   ;;  %v13342_v55 = vld [vmem:[%s16023_s2 + $0x2c0] sm:$0xff]  }
 0x110   :  { %v13343_v56 = vld [vmem:[%s16023_s2 + $0x200] sm:$0xff]  }
 0x111   :  { %707 = vmatprep.mubr.bf16.mxu0 %v14191_v58  ;;  %888 = vmatprep.mubr.bf16.mxu1 %v14191_v58 }
 0x112   :  { %708 = vmatmul.mubr.bf16.vlgmr.msra.gmra.mxu0 %v14199_v61  ;;  %889 = vmatmul.mubr.bf16.vlgmr.msra.gmra.mxu1 %v14199_v61 }
 0x113   :  { %11982 = vmatpush3.bf16.msra.mxu0 %v13283_v59  ;;  %12004 = vmatpush3.bf16.msra.mxu1 %v13284_v60  ;;  %v13345_v59 = vld [vmem:[%s16023_s2 + $0x378] sm:$0xff]  }
 0x114   :  { %1068 = vmatprep.mubr.bf16.mxu0 %v14191_v58  ;;  %1248 = vmatprep.mubr.bf16.mxu1 %v14191_v58  ;;  %v13346_v60 = vld [vmem:[%s16023_s2 + $0x3f8] sm:$0xff]  }
 0x115   :  { %11983 = vmatprep.subr.bf16.mxu0 %v13285_v62  ;;  %12005 = vmatprep.subr.bf16.mxu1 %v13286_v63  ;;  %v13347_v62 = vld [vmem:[%s16023_s2 + $0x338] sm:$0xff]  }
 0x116   :  { %v13348_v63 = vld [vmem:[%s16023_s2 + $0x3b8] sm:$0xff]  }
 0x117   :  { %11984 = vmatpush3.bf16.msra.mxu0 %v13287_v0  ;;  %12006 = vmatpush3.bf16.msra.mxu1 %v13288_v1  ;;  %v13349_v0 = vld [vmem:[%s16023_s2 + $0x370] sm:$0xff]  }
 0x118   :  { %11985 = vmatprep.subr.bf16.mxu0 %v13289_v2  ;;  %12007 = vmatprep.subr.bf16.mxu1 %v13290_v3  ;;  %v13350_v1 = vld [vmem:[%s16023_s2 + $0x3f0] sm:$0xff]  }
 0x119   :  { %v13351_v2 = vld [vmem:[%s16023_s2 + $0x330] sm:$0xff]  }
 0x11a   :  { %v13352_v3 = vld [vmem:[%s16023_s2 + $0x3b0] sm:$0xff]  }
 0x11b   :  { %11986 = vmatpush3.bf16.msra.mxu0 %v13291_v4  ;;  %12008 = vmatpush3.bf16.msra.mxu1 %v13292_v5  ;;  %v13353_v4 = vld [vmem:[%s16023_s2 + $0x368] sm:$0xff]  }
 0x11c   :  { %11987 = vmatprep.subr.bf16.mxu0 %v13293_v6  ;;  %12009 = vmatprep.subr.bf16.mxu1 %v13294_v7  ;;  %v13354_v5 = vld [vmem:[%s16023_s2 + $0x3e8] sm:$0xff]  }
 0x11d   :  { %v13355_v6 = vld [vmem:[%s16023_s2 + $0x328] sm:$0xff]  }
 0x11e   :  { %v13356_v7 = vld [vmem:[%s16023_s2 + $0x3a8] sm:$0xff]  }
 0x11f   :  { %11988 = vmatpush3.bf16.msra.mxu0 %v13295_v8  ;;  %12010 = vmatpush3.bf16.msra.mxu1 %v13296_v9  ;;  %v13357_v8 = vld [vmem:[%s16023_s2 + $0x360] sm:$0xff]  }
 0x120   :  { %11989 = vmatprep.subr.bf16.mxu0 %v13297_v10  ;;  %12011 = vmatprep.subr.bf16.mxu1 %v13298_v11  ;;  %v13358_v9 = vld [vmem:[%s16023_s2 + $0x3e0] sm:$0xff]  }
 0x121   :  { %v13359_v10 = vld [vmem:[%s16023_s2 + $0x320] sm:$0xff]  }
 0x122   :  { %v13360_v11 = vld [vmem:[%s16023_s2 + $0x3a0] sm:$0xff]  }
 0x123   :  { %11990 = vmatpush3.bf16.msra.mxu0 %v13299_v12  ;;  %12012 = vmatpush3.bf16.msra.mxu1 %v13300_v13  ;;  %v13361_v12 = vld [vmem:[%s16023_s2 + $0x358] sm:$0xff]  }
 0x124   :  { %11991 = vmatprep.subr.bf16.mxu0 %v13301_v14  ;;  %12013 = vmatprep.subr.bf16.mxu1 %v13302_v15  ;;  %v13362_v13 = vld [vmem:[%s16023_s2 + $0x3d8] sm:$0xff]  }
 0x125   :  { %v13363_v14 = vld [vmem:[%s16023_s2 + $0x318] sm:$0xff]  }
 0x126   :  { %v13364_v15 = vld [vmem:[%s16023_s2 + $0x398] sm:$0xff]  }
 0x127   :  { %11992 = vmatpush3.bf16.msra.mxu0 %v13303_v16  ;;  %12014 = vmatpush3.bf16.msra.mxu1 %v13304_v17  ;;  %v13365_v16 = vld [vmem:[%s16023_s2 + $0x350] sm:$0xff]  }
 0x128   :  { %11993 = vmatprep.subr.bf16.mxu0 %v13305_v18  ;;  %12015 = vmatprep.subr.bf16.mxu1 %v13306_v19  ;;  %v13366_v17 = vld [vmem:[%s16023_s2 + $0x3d0] sm:$0xff]  }
 0x129   :  { %v13367_v18 = vld [vmem:[%s16023_s2 + $0x310] sm:$0xff]  }
 0x12a   :  { %v13368_v19 = vld [vmem:[%s16023_s2 + $0x390] sm:$0xff]  }
 0x12b   :  { %11994 = vmatpush3.bf16.msra.mxu0 %v13307_v20  ;;  %12016 = vmatpush3.bf16.msra.mxu1 %v13308_v21  ;;  %v13369_v20 = vld [vmem:[%s16023_s2 + $0x348] sm:$0xff]  }
 0x12c   :  { %11995 = vmatprep.subr.bf16.mxu0 %v13309_v22  ;;  %12017 = vmatprep.subr.bf16.mxu1 %v13310_v23  ;;  %v13370_v21 = vld [vmem:[%s16023_s2 + $0x3c8] sm:$0xff]  }
 0x12d   :  { %v13371_v22 = vld [vmem:[%s16023_s2 + $0x308] sm:$0xff]  }
 0x12e   :  { %v13372_v23 = vld [vmem:[%s16023_s2 + $0x388] sm:$0xff]  }
 0x12f   :  { %11996 = vmatpush3.bf16.msra.mxu0 %v13311_v24  ;;  %12018 = vmatpush3.bf16.msra.mxu1 %v13312_v25  ;;  %v13373_v24 = vld [vmem:[%s16023_s2 + $0x340] sm:$0xff]  }
 0x130   :  { %12025 = vmatprep.subr.bf16.mxu0 %v13313_v26  ;;  %12047 = vmatprep.subr.bf16.mxu1 %v13314_v27  ;;  %v13374_v25 = vld [vmem:[%s16023_s2 + $0x3c0] sm:$0xff]  }
 0x131   :  { %v13375_v26 = vld [vmem:[%s16023_s2 + $0x300] sm:$0xff]  }
 0x132   :  { %1069 = vmatmul.mubr.bf16.vlgmr.msra.gmra.mxu0 %v14199_v61  ;;  %1249 = vmatmul.mubr.bf16.vlgmr.msra.gmra.mxu1 %v14199_v61  ;;  %v13376_v27 = vld [vmem:[%s16023_s2 + $0x380] sm:$0xff]  }
 0x133   :  { %12026 = vmatpush3.bf16.msra.mxu0 %v13315_v28  ;;  %1428 = vmatprep.mubr.bf16.mxu0 %v14191_v58  ;;  %v13377_v28 = vld [vmem:[%s16023_s2 + $0x478] sm:$0xff]  }
 0x134   :  { %12048 = vmatpush3.bf16.msra.mxu1 %v13316_v29  ;;  %1608 = vmatprep.mubr.bf16.mxu1 %v14191_v58  ;;  %v13378_v29 = vld [vmem:[%s16023_s2 + $0x4f8] sm:$0xff]  }
 0x135   :  { %12027 = vmatprep.subr.bf16.mxu0 %v13317_v30  ;;  %12049 = vmatprep.subr.bf16.mxu1 %v13318_v31  ;;  %v13379_v30 = vld [vmem:[%s16023_s2 + $0x438] sm:$0xff]  }
 0x136   :  { %v13380_v31 = vld [vmem:[%s16023_s2 + $0x4b8] sm:$0xff]  }
 0x137   :  { %12028 = vmatpush3.bf16.msra.mxu0 %v13319_v32  ;;  %v13381_v32 = vld [vmem:[%s16023_s2 + $0x470] sm:$0xff]  }
 0x138   :  { %12050 = vmatpush3.bf16.msra.mxu1 %v13320_v33  ;;  %12029 = vmatprep.subr.bf16.mxu0 %v13321_v34  ;;  %v13382_v33 = vld [vmem:[%s16023_s2 + $0x4f0] sm:$0xff]  }
 0x139   :  { %12051 = vmatprep.subr.bf16.mxu1 %v13322_v35  ;;  %v13383_v34 = vld [vmem:[%s16023_s2 + $0x430] sm:$0xff]  }
 0x13a   :  { %v13384_v35 = vld [vmem:[%s16023_s2 + $0x4b0] sm:$0xff]  }
 0x13b   :  { %12030 = vmatpush3.bf16.msra.mxu0 %v13323_v36  ;;  %v13385_v36 = vld [vmem:[%s16023_s2 + $0x468] sm:$0xff]  }
 0x13c   :  { %12052 = vmatpush3.bf16.msra.mxu1 %v13324_v37  ;;  %12031 = vmatprep.subr.bf16.mxu0 %v13325_v38  ;;  %v13386_v37 = vld [vmem:[%s16023_s2 + $0x4e8] sm:$0xff]  }
 0x13d   :  { %12053 = vmatprep.subr.bf16.mxu1 %v13326_v39  ;;  %v13387_v38 = vld [vmem:[%s16023_s2 + $0x428] sm:$0xff]  }
 0x13e   :  { %v13388_v39 = vld [vmem:[%s16023_s2 + $0x4a8] sm:$0xff]  }
 0x13f   :  { %12032 = vmatpush3.bf16.msra.mxu0 %v13327_v40  ;;  %v13389_v40 = vld [vmem:[%s16023_s2 + $0x460] sm:$0xff]  }
 0x140   :  { %12054 = vmatpush3.bf16.msra.mxu1 %v13328_v41  ;;  %12033 = vmatprep.subr.bf16.mxu0 %v13329_v42  ;;  %v13390_v41 = vld [vmem:[%s16023_s2 + $0x4e0] sm:$0xff]  }
 0x141   :  { %12055 = vmatprep.subr.bf16.mxu1 %v13330_v43  ;;  %v13391_v42 = vld [vmem:[%s16023_s2 + $0x420] sm:$0xff]  }
 0x142   :  { %v13392_v43 = vld [vmem:[%s16023_s2 + $0x4a0] sm:$0xff]  }
 0x143   :  { %12034 = vmatpush3.bf16.msra.mxu0 %v13331_v44  ;;  %v13393_v44 = vld [vmem:[%s16023_s2 + $0x458] sm:$0xff]  }
 0x144   :  { %12056 = vmatpush3.bf16.msra.mxu1 %v13332_v45  ;;  %12035 = vmatprep.subr.bf16.mxu0 %v13333_v46  ;;  %v13394_v45 = vld [vmem:[%s16023_s2 + $0x4d8] sm:$0xff]  }
 0x145   :  { %12057 = vmatprep.subr.bf16.mxu1 %v13334_v47  ;;  %v13395_v46 = vld [vmem:[%s16023_s2 + $0x418] sm:$0xff]  }
 0x146   :  { %v13396_v47 = vld [vmem:[%s16023_s2 + $0x498] sm:$0xff]  }
 0x147   :  { %12036 = vmatpush3.bf16.msra.mxu0 %v13335_v48  ;;  %v13397_v48 = vld [vmem:[%s16023_s2 + $0x450] sm:$0xff]  }
 0x148   :  { %12058 = vmatpush3.bf16.msra.mxu1 %v13336_v49  ;;  %12037 = vmatprep.subr.bf16.mxu0 %v13337_v50  ;;  %v13398_v49 = vld [vmem:[%s16023_s2 + $0x4d0] sm:$0xff]  }
 0x149   :  { %12059 = vmatprep.subr.bf16.mxu1 %v13338_v51  ;;  %v13399_v50 = vld [vmem:[%s16023_s2 + $0x410] sm:$0xff]  }
 0x14a   :  { %v13400_v51 = vld [vmem:[%s16023_s2 + $0x490] sm:$0xff]  }
 0x14b   :  { %12038 = vmatpush3.bf16.msra.mxu0 %v13339_v52  ;;  %v13401_v52 = vld [vmem:[%s16023_s2 + $0x448] sm:$0xff]  }
 0x14c   :  { %12060 = vmatpush3.bf16.msra.mxu1 %v13340_v53  ;;  %12039 = vmatprep.subr.bf16.mxu0 %v13341_v54  ;;  %v13402_v53 = vld [vmem:[%s16023_s2 + $0x4c8] sm:$0xff]  }
 0x14d   :  { %12061 = vmatprep.subr.bf16.mxu1 %v13342_v55  ;;  %v13403_v54 = vld [vmem:[%s16023_s2 + $0x408] sm:$0xff]  }
 0x14e   :  { %v13404_v55 = vld [vmem:[%s16023_s2 + $0x488] sm:$0xff]  }
 0x14f   :  { %12040 = vmatpush3.bf16.msra.mxu0 %v13343_v56  ;;  %v13405_v56 = vld [vmem:[%s16023_s2 + $0x440] sm:$0xff]  }
 0x150   :  { %12062 = vmatpush3.bf16.msra.mxu1 %v13344_v57  ;;  %12069 = vmatprep.subr.bf16.mxu0 %v13345_v59  ;;  %v13406_v57 = vld [vmem:[%s16023_s2 + $0x4c0] sm:$0xff]  }
 0x151   :  { %12091 = vmatprep.subr.bf16.mxu1 %v13346_v60  ;;  %v13407_v59 = vld [vmem:[%s16023_s2 + $0x400] sm:$0xff]  }
 0x152   :  { %1429 = vmatmul.mubr.bf16.vlgmr.msra.gmra.mxu0 %v14199_v61  ;;  %v13408_v60 = vld [vmem:[%s16023_s2 + $0x480] sm:$0xff]  }
 0x153   :  { %1609 = vmatmul.mubr.bf16.vlgmr.msra.gmra.mxu1 %v14199_v61  ;;  %12070 = vmatpush3.bf16.msra.mxu0 %v13347_v62  ;;  %v13409_v62 = vld [vmem:[%s16023_s2 + $0x578] sm:$0xff]  }
 0x154   :  { %1788 = vmatprep.mubr.bf16.mxu0 %v14191_v58  ;;  %12092 = vmatpush3.bf16.msra.mxu1 %v13348_v63  ;;  %v13410_v63 = vld [vmem:[%s16023_s2 + $0x5f8] sm:$0xff]  }
 0x155   :  { %1968 = vmatprep.mubr.bf16.mxu1 %v14191_v58  ;;  %12071 = vmatprep.subr.bf16.mxu0 %v13349_v0  ;;  %v13411_v0 = vld [vmem:[%s16023_s2 + $0x538] sm:$0xff]  }
 0x156   :  { %12093 = vmatprep.subr.bf16.mxu1 %v13350_v1  ;;  %v13412_v1 = vld [vmem:[%s16023_s2 + $0x5b8] sm:$0xff]  }
 0x157   :  { %12072 = vmatpush3.bf16.msra.mxu0 %v13351_v2  ;;  %v13413_v2 = vld [vmem:[%s16023_s2 + $0x570] sm:$0xff]  }
 0x158   :  { %12094 = vmatpush3.bf16.msra.mxu1 %v13352_v3  ;;  %12073 = vmatprep.subr.bf16.mxu0 %v13353_v4  ;;  %v13414_v3 = vld [vmem:[%s16023_s2 + $0x5f0] sm:$0xff]  }
 0x159   :  { %12095 = vmatprep.subr.bf16.mxu1 %v13354_v5  ;;  %v13415_v4 = vld [vmem:[%s16023_s2 + $0x530] sm:$0xff]  }
 0x15a   :  { %v13416_v5 = vld [vmem:[%s16023_s2 + $0x5b0] sm:$0xff]  }
 0x15b   :  { %12074 = vmatpush3.bf16.msra.mxu0 %v13355_v6  ;;  %v13417_v6 = vld [vmem:[%s16023_s2 + $0x568] sm:$0xff]  }
 0x15c   :  { %12096 = vmatpush3.bf16.msra.mxu1 %v13356_v7  ;;  %12075 = vmatprep.subr.bf16.mxu0 %v13357_v8  ;;  %v13418_v7 = vld [vmem:[%s16023_s2 + $0x5e8] sm:$0xff]  }
 0x15d   :  { %12097 = vmatprep.subr.bf16.mxu1 %v13358_v9  ;;  %v13419_v8 = vld [vmem:[%s16023_s2 + $0x528] sm:$0xff]  }
 0x15e   :  { %v13420_v9 = vld [vmem:[%s16023_s2 + $0x5a8] sm:$0xff]  }
 0x15f   :  { %12076 = vmatpush3.bf16.msra.mxu0 %v13359_v10  ;;  %v13421_v10 = vld [vmem:[%s16023_s2 + $0x560] sm:$0xff]  }
 0x160   :  { %12098 = vmatpush3.bf16.msra.mxu1 %v13360_v11  ;;  %12077 = vmatprep.subr.bf16.mxu0 %v13361_v12  ;;  %v13422_v11 = vld [vmem:[%s16023_s2 + $0x5e0] sm:$0xff]  }
 0x161   :  { %12099 = vmatprep.subr.bf16.mxu1 %v13362_v13  ;;  %v13423_v12 = vld [vmem:[%s16023_s2 + $0x520] sm:$0xff]  }
 0x162   :  { %v13424_v13 = vld [vmem:[%s16023_s2 + $0x5a0] sm:$0xff]  }
 0x163   :  { %12078 = vmatpush3.bf16.msra.mxu0 %v13363_v14  ;;  %v13425_v14 = vld [vmem:[%s16023_s2 + $0x558] sm:$0xff]  }
 0x164   :  { %12100 = vmatpush3.bf16.msra.mxu1 %v13364_v15  ;;  %12079 = vmatprep.subr.bf16.mxu0 %v13365_v16  ;;  %v13426_v15 = vld [vmem:[%s16023_s2 + $0x5d8] sm:$0xff]  }
 0x165   :  { %12101 = vmatprep.subr.bf16.mxu1 %v13366_v17  ;;  %v13427_v16 = vld [vmem:[%s16023_s2 + $0x518] sm:$0xff]  }
 0x166   :  { %v13428_v17 = vld [vmem:[%s16023_s2 + $0x598] sm:$0xff]  }
 0x167   :  { %12080 = vmatpush3.bf16.msra.mxu0 %v13367_v18  ;;  %v13429_v18 = vld [vmem:[%s16023_s2 + $0x550] sm:$0xff]  }
 0x168   :  { %12102 = vmatpush3.bf16.msra.mxu1 %v13368_v19  ;;  %12081 = vmatprep.subr.bf16.mxu0 %v13369_v20  ;;  %v13430_v19 = vld [vmem:[%s16023_s2 + $0x5d0] sm:$0xff]  }
 0x169   :  { %12103 = vmatprep.subr.bf16.mxu1 %v13370_v21  ;;  %v13431_v20 = vld [vmem:[%s16023_s2 + $0x510] sm:$0xff]  }
 0x16a   :  { %v13432_v21 = vld [vmem:[%s16023_s2 + $0x590] sm:$0xff]  }
 0x16b   :  { %12082 = vmatpush3.bf16.msra.mxu0 %v13371_v22  ;;  %v13433_v22 = vld [vmem:[%s16023_s2 + $0x548] sm:$0xff]  }
 0x16c   :  { %12104 = vmatpush3.bf16.msra.mxu1 %v13372_v23  ;;  %12083 = vmatprep.subr.bf16.mxu0 %v13373_v24  ;;  %v13434_v23 = vld [vmem:[%s16023_s2 + $0x5c8] sm:$0xff]  }
 0x16d   :  { %12105 = vmatprep.subr.bf16.mxu1 %v13374_v25  ;;  %v13435_v24 = vld [vmem:[%s16023_s2 + $0x508] sm:$0xff]  }
 0x16e   :  { %v13436_v25 = vld [vmem:[%s16023_s2 + $0x588] sm:$0xff]  }
 0x16f   :  { %12084 = vmatpush3.bf16.msra.mxu0 %v13375_v26  ;;  %v13437_v26 = vld [vmem:[%s16023_s2 + $0x540] sm:$0xff]  }
 0x170   :  { %12106 = vmatpush3.bf16.msra.mxu1 %v13376_v27  ;;  %12113 = vmatprep.subr.bf16.mxu0 %v13377_v28  ;;  %v13438_v27 = vld [vmem:[%s16023_s2 + $0x5c0] sm:$0xff]  }
 0x171   :  { %12135 = vmatprep.subr.bf16.mxu1 %v13378_v29  ;;  %v13439_v28 = vld [vmem:[%s16023_s2 + $0x500] sm:$0xff]  }
 0x172   :  { %1789 = vmatmul.mubr.bf16.vlgmr.msra.gmra.mxu0 %v14199_v61  ;;  %v13440_v29 = vld [vmem:[%s16023_s2 + $0x580] sm:$0xff]  }
 0x173   :  { %1969 = vmatmul.mubr.bf16.vlgmr.msra.gmra.mxu1 %v14199_v61  ;;  %12114 = vmatpush3.bf16.msra.mxu0 %v13379_v30  ;;  %v13441_v30 = vld [vmem:[%s16023_s2 + $0x678] sm:$0xff]  }
 0x174   :  { %2148 = vmatprep.mubr.bf16.mxu0 %v14191_v58  ;;  %12136 = vmatpush3.bf16.msra.mxu1 %v13380_v31  ;;  %v13442_v31 = vld [vmem:[%s16023_s2 + $0x6f8] sm:$0xff]  }
 0x175   :  { %2328 = vmatprep.mubr.bf16.mxu1 %v14191_v58  ;;  %12115 = vmatprep.subr.bf16.mxu0 %v13381_v32  ;;  %v13443_v32 = vld [vmem:[%s16023_s2 + $0x638] sm:$0xff]  }
 0x176   :  { %12137 = vmatprep.subr.bf16.mxu1 %v13382_v33  ;;  %v13444_v33 = vld [vmem:[%s16023_s2 + $0x6b8] sm:$0xff]  }
 0x177   :  { %12116 = vmatpush3.bf16.msra.mxu0 %v13383_v34  ;;  %v13445_v34 = vld [vmem:[%s16023_s2 + $0x670] sm:$0xff]  }
 0x178   :  { %12138 = vmatpush3.bf16.msra.mxu1 %v13384_v35  ;;  %12117 = vmatprep.subr.bf16.mxu0 %v13385_v36  ;;  %v13446_v35 = vld [vmem:[%s16023_s2 + $0x6f0] sm:$0xff]  }
 0x179   :  { %12139 = vmatprep.subr.bf16.mxu1 %v13386_v37  ;;  %v13447_v36 = vld [vmem:[%s16023_s2 + $0x630] sm:$0xff]  }
 0x17a   :  { %v13448_v37 = vld [vmem:[%s16023_s2 + $0x6b0] sm:$0xff]  }
 0x17b   :  { %12118 = vmatpush3.bf16.msra.mxu0 %v13387_v38  ;;  %v13449_v38 = vld [vmem:[%s16023_s2 + $0x668] sm:$0xff]  }
 0x17c   :  { %12140 = vmatpush3.bf16.msra.mxu1 %v13388_v39  ;;  %12119 = vmatprep.subr.bf16.mxu0 %v13389_v40  ;;  %v13450_v39 = vld [vmem:[%s16023_s2 + $0x6e8] sm:$0xff]  }
 0x17d   :  { %12141 = vmatprep.subr.bf16.mxu1 %v13390_v41  ;;  %v13451_v40 = vld [vmem:[%s16023_s2 + $0x628] sm:$0xff]  }
 0x17e   :  { %v13452_v41 = vld [vmem:[%s16023_s2 + $0x6a8] sm:$0xff]  }
 0x17f   :  { %12120 = vmatpush3.bf16.msra.mxu0 %v13391_v42  ;;  %v13453_v42 = vld [vmem:[%s16023_s2 + $0x660] sm:$0xff]  }
 0x180   :  { %12142 = vmatpush3.bf16.msra.mxu1 %v13392_v43  ;;  %12121 = vmatprep.subr.bf16.mxu0 %v13393_v44  ;;  %v13454_v43 = vld [vmem:[%s16023_s2 + $0x6e0] sm:$0xff]  }
 0x181   :  { %12143 = vmatprep.subr.bf16.mxu1 %v13394_v45  ;;  %v13455_v44 = vld [vmem:[%s16023_s2 + $0x620] sm:$0xff]  }
 0x182   :  { %v13456_v45 = vld [vmem:[%s16023_s2 + $0x6a0] sm:$0xff]  }
 0x183   :  { %12122 = vmatpush3.bf16.msra.mxu0 %v13395_v46  ;;  %v13457_v46 = vld [vmem:[%s16023_s2 + $0x658] sm:$0xff]  }
 0x184   :  { %12144 = vmatpush3.bf16.msra.mxu1 %v13396_v47  ;;  %12123 = vmatprep.subr.bf16.mxu0 %v13397_v48  ;;  %v13458_v47 = vld [vmem:[%s16023_s2 + $0x6d8] sm:$0xff]  }
 0x185   :  { %12145 = vmatprep.subr.bf16.mxu1 %v13398_v49  ;;  %v13459_v48 = vld [vmem:[%s16023_s2 + $0x618] sm:$0xff]  }
 0x186   :  { %v13460_v49 = vld [vmem:[%s16023_s2 + $0x698] sm:$0xff]  }
 0x187   :  { %12124 = vmatpush3.bf16.msra.mxu0 %v13399_v50  ;;  %v13461_v50 = vld [vmem:[%s16023_s2 + $0x650] sm:$0xff]  }
 0x188   :  { %12146 = vmatpush3.bf16.msra.mxu1 %v13400_v51  ;;  %12125 = vmatprep.subr.bf16.mxu0 %v13401_v52  ;;  %v13462_v51 = vld [vmem:[%s16023_s2 + $0x6d0] sm:$0xff]  }
 0x189   :  { %12147 = vmatprep.subr.bf16.mxu1 %v13402_v53  ;;  %v13463_v52 = vld [vmem:[%s16023_s2 + $0x610] sm:$0xff]  }
 0x18a   :  { %v13464_v53 = vld [vmem:[%s16023_s2 + $0x690] sm:$0xff]  }
 0x18b   :  { %12126 = vmatpush3.bf16.msra.mxu0 %v13403_v54  ;;  %v13465_v54 = vld [vmem:[%s16023_s2 + $0x648] sm:$0xff]  }
 0x18c   :  { %12148 = vmatpush3.bf16.msra.mxu1 %v13404_v55  ;;  %12127 = vmatprep.subr.bf16.mxu0 %v13405_v56  ;;  %v13466_v55 = vld [vmem:[%s16023_s2 + $0x6c8] sm:$0xff]  }
 0x18d   :  { %12149 = vmatprep.subr.bf16.mxu1 %v13406_v57  ;;  %v13467_v56 = vld [vmem:[%s16023_s2 + $0x608] sm:$0xff]  }
 0x18e   :  { %v13468_v57 = vld [vmem:[%s16023_s2 + $0x688] sm:$0xff]  }
 0x18f   :  { %12128 = vmatpush3.bf16.msra.mxu0 %v13407_v59  ;;  %v13469_v59 = vld [vmem:[%s16023_s2 + $0x640] sm:$0xff]  }
 0x190   :  { %12150 = vmatpush3.bf16.msra.mxu1 %v13408_v60  ;;  %12157 = vmatprep.subr.bf16.mxu0 %v13409_v62  ;;  %v13470_v60 = vld [vmem:[%s16023_s2 + $0x6c0] sm:$0xff]  }
 0x191   :  { %12179 = vmatprep.subr.bf16.mxu1 %v13410_v63  ;;  %v13471_v62 = vld [vmem:[%s16023_s2 + $0x600] sm:$0xff]  }
 0x192   :  { %2149 = vmatmul.mubr.bf16.vlgmr.msra.gmra.mxu0 %v14199_v61  ;;  %v13472_v63 = vld [vmem:[%s16023_s2 + $0x680] sm:$0xff]  }
 0x193   :  { %2329 = vmatmul.mubr.bf16.vlgmr.msra.gmra.mxu1 %v14199_v61  ;;  %12158 = vmatpush3.bf16.msra.mxu0 %v13411_v0  ;;  %v13473_v0 = vld [vmem:[%s16023_s2 + $0x778] sm:$0xff]  }
 0x194   :  { %2508 = vmatprep.mubr.bf16.mxu0 %v14191_v58  ;;  %12180 = vmatpush3.bf16.msra.mxu1 %v13412_v1  ;;  %v13474_v1 = vld [vmem:[%s16023_s2 + $0x7f8] sm:$0xff]  }
 0x195   :  { %2688 = vmatprep.mubr.bf16.mxu1 %v14191_v58  ;;  %12159 = vmatprep.subr.bf16.mxu0 %v13413_v2  ;;  %v13475_v2 = vld [vmem:[%s16023_s2 + $0x738] sm:$0xff]  }
 0x196   :  { %12181 = vmatprep.subr.bf16.mxu1 %v13414_v3  ;;  %v13476_v3 = vld [vmem:[%s16023_s2 + $0x7b8] sm:$0xff]  }
 0x197   :  { %12160 = vmatpush3.bf16.msra.mxu0 %v13415_v4  ;;  %v13477_v4 = vld [vmem:[%s16023_s2 + $0x770] sm:$0xff]  }
 0x198   :  { %12182 = vmatpush3.bf16.msra.mxu1 %v13416_v5  ;;  %12161 = vmatprep.subr.bf16.mxu0 %v13417_v6 }
 0x199   :  { %12183 = vmatprep.subr.bf16.mxu1 %v13418_v7  ;;  %v13478_v7 = vld [vmem:[%s16023_s2 + $0x7f0] sm:$0xff]  }
 0x19b   :  { %12162 = vmatpush3.bf16.msra.mxu0 %v13419_v8  ;;  %v13479_v8 = vld [vmem:[%s16023_s2 + $0x730] sm:$0xff]  }
 0x19c   :  { %12184 = vmatpush3.bf16.msra.mxu1 %v13420_v9  ;;  %12163 = vmatprep.subr.bf16.mxu0 %v13421_v10 }
 0x19d   :  { %12185 = vmatprep.subr.bf16.mxu1 %v13422_v11  ;;  %v13480_v11 = vld [vmem:[%s16023_s2 + $0x7b0] sm:$0xff]  }
 0x19f   :  { %12164 = vmatpush3.bf16.msra.mxu0 %v13423_v12  ;;  %v13481_v12 = vld [vmem:[%s16023_s2 + $0x768] sm:$0xff]  }
 0x1a0   :  { %12186 = vmatpush3.bf16.msra.mxu1 %v13424_v13  ;;  %12165 = vmatprep.subr.bf16.mxu0 %v13425_v14 }
 0x1a1   :  { %12187 = vmatprep.subr.bf16.mxu1 %v13426_v15  ;;  %v13482_v15 = vld [vmem:[%s16023_s2 + $0x7e8] sm:$0xff]  }
 0x1a3   :  { %12166 = vmatpush3.bf16.msra.mxu0 %v13427_v16 }
 0x1a4   :  { %12188 = vmatpush3.bf16.msra.mxu1 %v13428_v17  ;;  %12167 = vmatprep.subr.bf16.mxu0 %v13429_v18 }
 0x1a5   :  { %12189 = vmatprep.subr.bf16.mxu1 %v13430_v19 }
 0x1a7   :  { %12168 = vmatpush3.bf16.msra.mxu0 %v13431_v20  ;;  %v13483_v20 = vld [vmem:[%s16023_s2 + $0x728] sm:$0xff]  }
 0x1a8   :  { %12190 = vmatpush3.bf16.msra.mxu1 %v13432_v21  ;;  %12169 = vmatprep.subr.bf16.mxu0 %v13433_v22  ;;  %v13484_v22 = vld [vmem:[%s16023_s2 + $0x7a8] sm:$0xff]  }
 0x1a9   :  { %12191 = vmatprep.subr.bf16.mxu1 %v13434_v23  ;;  %v13485_v23 = vld [vmem:[%s16023_s2 + $0x760] sm:$0xff]  }
 0x1ab   :  { %12170 = vmatpush3.bf16.msra.mxu0 %v13435_v24 }
 0x1ac   :  { %12192 = vmatpush3.bf16.msra.mxu1 %v13436_v25  ;;  %12171 = vmatprep.subr.bf16.mxu0 %v13437_v26  ;;  %v13486_v26 = vld [vmem:[%s16023_s2 + $0x7e0] sm:$0xff]  }
 0x1ad   :  { %12193 = vmatprep.subr.bf16.mxu1 %v13438_v27 }
 0x1af   :  { %12172 = vmatpush3.bf16.msra.mxu0 %v13439_v28 }
 0x1b0   :  { %12194 = vmatpush3.bf16.msra.mxu1 %v13440_v29  ;;  %12201 = vmatprep.subr.bf16.mxu0 %v13441_v30  ;;  %v13487_v29 = vld [vmem:[%s16023_s2 + $0x720] sm:$0xff]  }
 0x1b1   :  { %12223 = vmatprep.subr.bf16.mxu1 %v13442_v31  ;;  %v13488_v30 = vld [vmem:[%s16023_s2 + $0x7a0] sm:$0xff]   ;;  %v13489_v31 = vld [vmem:[%s16023_s2 + $0x758] sm:$0xff]  }
 0x1b2   :  { %2509 = vmatmul.mubr.bf16.vlgmr.msra.gmra.mxu0 %v14199_v61 }
 0x1b3   :  { %2689 = vmatmul.mubr.bf16.vlgmr.msra.gmra.mxu1 %v14199_v61  ;;  %12202 = vmatpush3.bf16.msra.mxu0 %v13443_v32  ;;  %v13490_v32 = vld [vmem:[%s16023_s2 + $0x7d8] sm:$0xff]  }
 0x1b4   :  { %2868 = vmatprep.mubr.bf16.mxu0 %v14191_v58  ;;  %12224 = vmatpush3.bf16.msra.mxu1 %v13444_v33  ;;  %v13491_v33 = vld [vmem:[%s16023_s2 + $0x718] sm:$0xff]  }
 0x1b5   :  { %3048 = vmatprep.mubr.bf16.mxu1 %v14191_v58  ;;  %12203 = vmatprep.subr.bf16.mxu0 %v13445_v34  ;;  %v13492_v34 = vld [vmem:[%s16023_s2 + $0x798] sm:$0xff]  }
 0x1b6   :  { %12225 = vmatprep.subr.bf16.mxu1 %v13446_v35  ;;  %v13493_v35 = vld [vmem:[%s16023_s2 + $0x750] sm:$0xff]  }
 0x1b7   :  { %12204 = vmatpush3.bf16.msra.mxu0 %v13447_v36  ;;  %v13494_v36 = vld [vmem:[%s16023_s2 + $0x7d0] sm:$0xff]  }
 0x1b8   :  { %12226 = vmatpush3.bf16.msra.mxu1 %v13448_v37  ;;  %12205 = vmatprep.subr.bf16.mxu0 %v13449_v38  ;;  %v13495_v37 = vld [vmem:[%s16023_s2 + $0x710] sm:$0xff]  }
 0x1b9   :  { %12227 = vmatprep.subr.bf16.mxu1 %v13450_v39  ;;  %v13496_v38 = vld [vmem:[%s16023_s2 + $0x790] sm:$0xff]   ;;  %v13497_v39 = vld [vmem:[%s16023_s2 + $0x748] sm:$0xff]  }
 0x1bb   :  { %12206 = vmatpush3.bf16.msra.mxu0 %v13451_v40  ;;  %v13498_v40 = vld [vmem:[%s16023_s2 + $0x7c8] sm:$0xff]  }
 0x1bc   :  { %12228 = vmatpush3.bf16.msra.mxu1 %v13452_v41  ;;  %12207 = vmatprep.subr.bf16.mxu0 %v13453_v42  ;;  %v13499_v41 = vld [vmem:[%s16023_s2 + $0x708] sm:$0xff]  }
 0x1bd   :  { %12229 = vmatprep.subr.bf16.mxu1 %v13454_v43  ;;  %v13500_v42 = vld [vmem:[%s16023_s2 + $0x788] sm:$0xff]   ;;  %v13501_v43 = vld [vmem:[%s16023_s2 + $0x740] sm:$0xff]  }
 0x1bf   :  { %12208 = vmatpush3.bf16.msra.mxu0 %v13455_v44  ;;  %v13502_v44 = vld [vmem:[%s16023_s2 + $0x7c0] sm:$0xff]  }
 0x1c0   :  { %12230 = vmatpush3.bf16.msra.mxu1 %v13456_v45  ;;  %12209 = vmatprep.subr.bf16.mxu0 %v13457_v46  ;;  %v13503_v45 = vld [vmem:[%s16023_s2 + $0x700] sm:$0xff]  }
 0x1c1   :  { %12231 = vmatprep.subr.bf16.mxu1 %v13458_v47  ;;  %v13504_v46 = vld [vmem:[%s16023_s2 + $0x780] sm:$0xff]  }
 0x1c3   :  { %12210 = vmatpush3.bf16.msra.mxu0 %v13459_v48 }
 0x1c4   :  { %12232 = vmatpush3.bf16.msra.mxu1 %v13460_v49  ;;  %12211 = vmatprep.subr.bf16.mxu0 %v13461_v50 }
 0x1c5   :  { %12233 = vmatprep.subr.bf16.mxu1 %v13462_v51 }
 0x1c7   :  { %12212 = vmatpush3.bf16.msra.mxu0 %v13463_v52 }
 0x1c8   :  { %12234 = vmatpush3.bf16.msra.mxu1 %v13464_v53  ;;  %12213 = vmatprep.subr.bf16.mxu0 %v13465_v54 }
 0x1c9   :  { %12235 = vmatprep.subr.bf16.mxu1 %v13466_v55 }
 0x1cb   :  { %12214 = vmatpush3.bf16.msra.mxu0 %v13467_v56 }
 0x1cc   :  { %12236 = vmatpush3.bf16.msra.mxu1 %v13468_v57  ;;  %12215 = vmatprep.subr.bf16.mxu0 %v13469_v59 }
 0x1cd   :  { %12237 = vmatprep.subr.bf16.mxu1 %v13470_v60 }
 0x1cf   :  { %12216 = vmatpush3.bf16.msra.mxu0 %v13471_v62 }
 0x1d0   :  { %12238 = vmatpush3.bf16.msra.mxu1 %v13472_v63  ;;  %12245 = vmatprep.subr.bf16.mxu0 %v13473_v0 }
 0x1d1   :  { %12267 = vmatprep.subr.bf16.mxu1 %v13474_v1 }
 0x1d2   :  { %2869 = vmatmul.mubr.bf16.vlgmr.msra.gmra.mxu0 %v14199_v61  ;;  %v11953_v5 = vpop.f32.mrf.mxu0  ;;  %v11975_v6 = vpop.f32.mrf.mxu1 }
 0x1d3   :  { %3049 = vmatmul.mubr.bf16.vlgmr.msra.gmra.mxu1 %v14199_v61  ;;  %12246 = vmatpush3.bf16.msra.mxu0 %v13475_v2 }
 0x1d4   :  { %3228 = vmatprep.mubr.bf16.mxu0 %v14191_v58  ;;  %12268 = vmatpush3.bf16.msra.mxu1 %v13476_v3  ;;  %v11954_v9 = vpop.f32.mrf.mxu0  ;;  %v11976_v10 = vpop.f32.mrf.mxu1 }
 0x1d5   :  { %3408 = vmatprep.mubr.bf16.mxu1 %v14191_v58  ;;  %v11955_v13 = vadd.f32 %v11954_v9, %v11953_v5  ;;  %v11977_v14 = vadd.f32 %v11976_v10, %v11975_v6  ;;  %12247 = vmatprep.subr.bf16.mxu0 %v13477_v4 }
 0x1d6   :  { %12269 = vmatprep.subr.bf16.mxu1 %v13478_v7  ;;  %v11956_v16 = vpop.f32.mrf.mxu0  ;;  %v11978_v17 = vpop.f32.mrf.mxu1 }
 0x1d7   :  { %v11697_v18 = vpack.c.bf16 %v11955_v13, %v11955_v13  ;;  %v11699_v19 = vpack.c.bf16 %v11977_v14, %v11977_v14  ;;  %12248 = vmatpush3.bf16.msra.mxu0 %v13479_v8 }
 0x1d8   :  { %12270 = vmatpush3.bf16.msra.mxu1 %v13480_v11  ;;  %v11957_v58 = vpop.f32.mrf.mxu0  ;;  %v11979_v21 = vpop.f32.mrf.mxu1  ;;  %12249 = vmatprep.subr.bf16.mxu0 %v13481_v12 }
 0x1d9   :  { %725 = vst.msk [vmem:[#allocation2] sm:$0xf] %vm724_vm4, %v11697_v18  ;;  %905 = vst.msk [vmem:[#allocation2 + $0x8] sm:$0xf] %vm724_vm4, %v11699_v19  ;;  %v11958_v24 = vadd.f32 %v11957_v58, %v11956_v16  ;;  %v11980_v25 = vadd.f32 %v11979_v21, %v11978_v17  ;;  %12271 = vmatprep.subr.bf16.mxu1 %v13482_v15 }
 0x1db   :  { %v11698_v27 = vpack.c.bf16 %v11958_v24, %v11958_v24  ;;  %v11700_v28 = vpack.c.bf16 %v11980_v25, %v11980_v25  ;;  %12250 = vmatpush3.bf16.msra.mxu0 %v13483_v20 }
 0x1dc   :  { %12272 = vmatpush3.bf16.msra.mxu1 %v13484_v22  ;;  %12251 = vmatprep.subr.bf16.mxu0 %v13485_v23 }
 0x1dd   :  { %726 = vst.msk [vmem:[#allocation2 + $0x4] sm:$0xf] %vm724_vm4, %v11698_v27  ;;  %906 = vst.msk [vmem:[#allocation2 + $0xc] sm:$0xf] %vm724_vm4, %v11700_v28  ;;  %12273 = vmatprep.subr.bf16.mxu1 %v13486_v26 }
 0x1df   :  { %12252 = vmatpush3.bf16.msra.mxu0 %v13487_v29 }
 0x1e0   :  { %12274 = vmatpush3.bf16.msra.mxu1 %v13488_v30  ;;  %12253 = vmatprep.subr.bf16.mxu0 %v13489_v31 }
 0x1e1   :  { %12275 = vmatprep.subr.bf16.mxu1 %v13490_v32 }
 0x1e3   :  { %12254 = vmatpush3.bf16.msra.mxu0 %v13491_v33 }
 0x1e4   :  { %12276 = vmatpush3.bf16.msra.mxu1 %v13492_v34  ;;  %12255 = vmatprep.subr.bf16.mxu0 %v13493_v35 }
 0x1e5   :  { %12277 = vmatprep.subr.bf16.mxu1 %v13494_v36 }
 0x1e7   :  { %12256 = vmatpush3.bf16.msra.mxu0 %v13495_v37 }
 0x1e8   :  { %12278 = vmatpush3.bf16.msra.mxu1 %v13496_v38  ;;  %12257 = vmatprep.subr.bf16.mxu0 %v13497_v39 }
 0x1e9   :  { %12279 = vmatprep.subr.bf16.mxu1 %v13498_v40 }
 0x1eb   :  { %12258 = vmatpush3.bf16.msra.mxu0 %v13499_v41 }
 0x1ec   :  { %12280 = vmatpush3.bf16.msra.mxu1 %v13500_v42  ;;  %12259 = vmatprep.subr.bf16.mxu0 %v13501_v43 }
 0x1ed   :  { %12281 = vmatprep.subr.bf16.mxu1 %v13502_v44 }
 0x1ef   :  { %12260 = vmatpush3.bf16.msra.mxu0 %v13503_v45 }
 0x1f0   :  { %12282 = vmatpush3.bf16.msra.mxu1 %v13504_v46 }
 0x1f2   :  { %v11997_v47 = vpop.f32.mrf.mxu0  ;;  %v12019_v48 = vpop.f32.mrf.mxu1  ;;  %3229 = vmatmul.mubr.bf16.vlgmr.msra.gmra.mxu0 %v14199_v61 }
 0x1f3   :  { %3409 = vmatmul.mubr.bf16.vlgmr.msra.gmra.mxu1 %v14199_v61 }
 0x1f4   :  { %v11998_v49 = vpop.f32.mrf.mxu0  ;;  %v12020_v50 = vpop.f32.mrf.mxu1 }
 0x1f5   :  { %v11999_v51 = vadd.f32 %v11998_v49, %v11997_v47  ;;  %v12021_v52 = vadd.f32 %v12020_v50, %v12019_v48  ;;  %v13523_v47 = vld [vmem:[%s16024_s3 + $0x4] ss:$8 sps:$4 sm:$0xff]  }
 0x1f6   :  { %v12000_v53 = vpop.f32.mrf.mxu0  ;;  %v12022_v54 = vpop.f32.mrf.mxu1  ;;  %3611 = vmatprep.mubr.bf16.mxu0 %v13523_v47  ;;  %v13520_v47 = vld [vmem:[#allocation2] sm:$0xff]  }
 0x1f7   :  { %v11701_v55 = vpack.c.bf16 %v11999_v51, %v11999_v51  ;;  %v11703_v56 = vpack.c.bf16 %v12021_v52, %v12021_v52 }
 0x1f8   :  { %v12001_v57 = vpop.f32.mrf.mxu0  ;;  %v12023_v59 = vpop.f32.mrf.mxu1 }
 0x1f9   :  { %1085 = vst.msk [vmem:[#allocation2 + $0x10] sm:$0xf] %vm724_vm4, %v11701_v55  ;;  %1265 = vst.msk [vmem:[#allocation2 + $0x18] sm:$0xf] %vm724_vm4, %v11703_v56  ;;  %v12002_v60 = vadd.f32 %v12001_v57, %v12000_v53  ;;  %v12024_v62 = vadd.f32 %v12023_v59, %v12022_v54 }
 0x1fb   :  { %v11702_v63 = vpack.c.bf16 %v12002_v60, %v12002_v60  ;;  %v11704_v0 = vpack.c.bf16 %v12024_v62, %v12024_v62 }
 0x1fd   :  { %1086 = vst.msk [vmem:[#allocation2 + $0x14] sm:$0xf] %vm724_vm4, %v11702_v63  ;;  %1266 = vst.msk [vmem:[#allocation2 + $0x1c] sm:$0xf] %vm724_vm4, %v11704_v0 }
 0x212   :  { %v12041_v61 = vpop.f32.mrf.mxu0 }
 0x213   :  { %v12063_v1 = vpop.f32.mrf.mxu1 }
 0x214   :  { %v12042_v2 = vpop.f32.mrf.mxu0 }
 0x215   :  { %v12043_v3 = vadd.f32 %v12042_v2, %v12041_v61  ;;  %v12064_v4 = vpop.f32.mrf.mxu1 }
 0x216   :  { %v12065_v5 = vadd.f32 %v12064_v4, %v12063_v1  ;;  %v12044_v6 = vpop.f32.mrf.mxu0 }
 0x217   :  { %v11705_v7 = vpack.c.bf16 %v12043_v3, %v12043_v3  ;;  %v12066_v8 = vpop.f32.mrf.mxu1 }
 0x218   :  { %v11707_v9 = vpack.c.bf16 %v12065_v5, %v12065_v5  ;;  %v12045_v10 = vpop.f32.mrf.mxu0 }
 0x219   :  { %1445 = vst.msk [vmem:[#allocation2 + $0x20] sm:$0xf] %vm724_vm4, %v11705_v7  ;;  %v12046_v11 = vadd.f32 %v12045_v10, %v12044_v6  ;;  %v12067_v12 = vpop.f32.mrf.mxu1 }
 0x21a   :  { %1625 = vst.msk [vmem:[#allocation2 + $0x28] sm:$0xf] %vm724_vm4, %v11707_v9  ;;  %v12068_v13 = vadd.f32 %v12067_v12, %v12066_v8 }
 0x21b   :  { %v11706_v14 = vpack.c.bf16 %v12046_v11, %v12046_v11 }
 0x21c   :  { %v11708_v15 = vpack.c.bf16 %v12068_v13, %v12068_v13 }
 0x21d   :  { %1446 = vst.msk [vmem:[#allocation2 + $0x24] sm:$0xf] %vm724_vm4, %v11706_v14 }
 0x21e   :  { %1626 = vst.msk [vmem:[#allocation2 + $0x2c] sm:$0xf] %vm724_vm4, %v11708_v15 }
 0x232   :  { %v12085_v16 = vpop.f32.mrf.mxu0 }
 0x233   :  { %v12107_v17 = vpop.f32.mrf.mxu1 }
 0x234   :  { %v12086_v18 = vpop.f32.mrf.mxu0 }
 0x235   :  { %v12087_v19 = vadd.f32 %v12086_v18, %v12085_v16  ;;  %v12108_v20 = vpop.f32.mrf.mxu1 }
 0x236   :  { %v12109_v58 = vadd.f32 %v12108_v20, %v12107_v17  ;;  %v12088_v21 = vpop.f32.mrf.mxu0 }
 0x237   :  { %v11709_v22 = vpack.c.bf16 %v12087_v19, %v12087_v19  ;;  %v12110_v23 = vpop.f32.mrf.mxu1 }
 0x238   :  { %v11711_v24 = vpack.c.bf16 %v12109_v58, %v12109_v58  ;;  %v12089_v25 = vpop.f32.mrf.mxu0 }
 0x239   :  { %1805 = vst.msk [vmem:[#allocation2 + $0x30] sm:$0xf] %vm724_vm4, %v11709_v22  ;;  %v12090_v26 = vadd.f32 %v12089_v25, %v12088_v21  ;;  %v12111_v27 = vpop.f32.mrf.mxu1 }
 0x23a   :  { %1985 = vst.msk [vmem:[#allocation2 + $0x38] sm:$0xf] %vm724_vm4, %v11711_v24  ;;  %v12112_v28 = vadd.f32 %v12111_v27, %v12110_v23 }
 0x23b   :  { %v11710_v29 = vpack.c.bf16 %v12090_v26, %v12090_v26 }
 0x23c   :  { %v11712_v30 = vpack.c.bf16 %v12112_v28, %v12112_v28 }
 0x23d   :  { %1806 = vst.msk [vmem:[#allocation2 + $0x34] sm:$0xf] %vm724_vm4, %v11710_v29 }
 0x23e   :  { %1986 = vst.msk [vmem:[#allocation2 + $0x3c] sm:$0xf] %vm724_vm4, %v11712_v30 }
 0x252   :  { %v12129_v31 = vpop.f32.mrf.mxu0 }
 0x253   :  { %v12151_v32 = vpop.f32.mrf.mxu1 }
 0x254   :  { %v12130_v33 = vpop.f32.mrf.mxu0 }
 0x255   :  { %v12131_v34 = vadd.f32 %v12130_v33, %v12129_v31  ;;  %v12152_v35 = vpop.f32.mrf.mxu1  ;;  %v13506_v33 = vld [vmem:[#allocation2 + $0x38] sm:$0xff]  }
 0x256   :  { %v12153_v36 = vadd.f32 %v12152_v35, %v12151_v32  ;;  %v12132_v37 = vpop.f32.mrf.mxu0  ;;  %v13508_v35 = vld [vmem:[#allocation2 + $0x30] sm:$0xff]  }
 0x257   :  { %v11713_v38 = vpack.c.bf16 %v12131_v34, %v12131_v34  ;;  %v12154_v39 = vpop.f32.mrf.mxu1 }
 0x258   :  { %v11715_v40 = vpack.c.bf16 %v12153_v36, %v12153_v36  ;;  %v12133_v41 = vpop.f32.mrf.mxu0 }
 0x259   :  { %2165 = vst.msk [vmem:[#allocation2 + $0x40] sm:$0xf] %vm724_vm4, %v11713_v38  ;;  %v12134_v42 = vadd.f32 %v12133_v41, %v12132_v37  ;;  %v12155_v43 = vpop.f32.mrf.mxu1  ;;  %v13510_v37 = vld [vmem:[#allocation2 + $0x28] sm:$0xff]   ;;  %v13514_v41 = vld [vmem:[#allocation2 + $0x18] sm:$0xff]  }
 0x25a   :  { %2345 = vst.msk [vmem:[#allocation2 + $0x48] sm:$0xf] %vm724_vm4, %v11715_v40  ;;  %v12156_v44 = vadd.f32 %v12155_v43, %v12154_v39  ;;  %v13512_v39 = vld [vmem:[#allocation2 + $0x20] sm:$0xff]   ;;  %v13516_v43 = vld [vmem:[#allocation2 + $0x10] sm:$0xff]  }
 0x25b   :  { %v11714_v45 = vpack.c.bf16 %v12134_v42, %v12134_v42 }
 0x25c   :  { %v11716_v46 = vpack.c.bf16 %v12156_v44, %v12156_v44 }
 0x25d   :  { %2166 = vst.msk [vmem:[#allocation2 + $0x44] sm:$0xf] %vm724_vm4, %v11714_v45  ;;  %v13518_v45 = vld [vmem:[#allocation2 + $0x8] sm:$0xff]  }
 0x25e   :  { %2346 = vst.msk [vmem:[#allocation2 + $0x4c] sm:$0xf] %vm724_vm4, %v11716_v46 }
 0x264   :  { %v13519_v46 = vld [vmem:[#allocation2 + $0x40] sm:$0xff]  }
 0x265   :  { %v13517_v44 = vld [vmem:[#allocation2 + $0x48] sm:$0xff]  }
 0x272   :  { %v12173_v48 = vpop.f32.mrf.mxu0 }
 0x273   :  { %v12195_v49 = vpop.f32.mrf.mxu1 }
 0x274   :  { %v12174_v50 = vpop.f32.mrf.mxu0 }
 0x275   :  { %v12175_v51 = vadd.f32 %v12174_v50, %v12173_v48  ;;  %v12196_v52 = vpop.f32.mrf.mxu1  ;;  %v13521_v48 = vld [vmem:[%s16024_s3] ss:$8 sps:$4 sm:$0xff]   ;;  %v13526_v50 = vld [vmem:[%s16024_s3 + $0x10] ss:$8 sps:$4 sm:$0xff]  }
 0x276   :  { %v12197_v53 = vadd.f32 %v12196_v52, %v12195_v49  ;;  %v12176_v54 = vpop.f32.mrf.mxu0  ;;  %v13524_v49 = vld [vmem:[%s16024_s3 + $0x14] ss:$8 sps:$4 sm:$0xff]  }
 0x277   :  { %v11717_v55 = vpack.c.bf16 %v12175_v51, %v12175_v51  ;;  %v12198_v56 = vpop.f32.mrf.mxu1 }
 0x278   :  { %v11719_v57 = vpack.c.bf16 %v12197_v53, %v12197_v53  ;;  %v12177_v59 = vpop.f32.mrf.mxu0 }
 0x279   :  { %2525 = vst.msk [vmem:[#allocation2 + $0x50] sm:$0xf] %vm724_vm4, %v11717_v55  ;;  %v12178_v60 = vadd.f32 %v12177_v59, %v12176_v54  ;;  %v12199_v62 = vpop.f32.mrf.mxu1 }
 0x27a   :  { %2705 = vst.msk [vmem:[#allocation2 + $0x58] sm:$0xf] %vm724_vm4, %v11719_v57  ;;  %v12200_v63 = vadd.f32 %v12199_v62, %v12198_v56 }
 0x27b   :  { %v11718_v0 = vpack.c.bf16 %v12178_v60, %v12178_v60 }
 0x27c   :  { %v11720_v61 = vpack.c.bf16 %v12200_v63, %v12200_v63 }
 0x27d   :  { %2526 = vst.msk [vmem:[#allocation2 + $0x54] sm:$0xf] %vm724_vm4, %v11718_v0 }
 0x27e   :  { %2706 = vst.msk [vmem:[#allocation2 + $0x5c] sm:$0xf] %vm724_vm4, %v11720_v61 }
 0x284   :  { %v13515_v42 = vld [vmem:[#allocation2 + $0x50] sm:$0xff]  }
 0x285   :  { %v13513_v40 = vld [vmem:[#allocation2 + $0x58] sm:$0xff]  }
 0x292   :  { %v12217_v1 = vpop.f32.mrf.mxu0 }
 0x293   :  { %v12239_v2 = vpop.f32.mrf.mxu1 }
 0x294   :  { %v12218_v3 = vpop.f32.mrf.mxu0 }
 0x295   :  { %v12219_v4 = vadd.f32 %v12218_v3, %v12217_v1  ;;  %v12240_v5 = vpop.f32.mrf.mxu1 }
 0x296   :  { %v12241_v6 = vadd.f32 %v12240_v5, %v12239_v2  ;;  %v12220_v7 = vpop.f32.mrf.mxu0 }
 0x297   :  { %v11721_v8 = vpack.c.bf16 %v12219_v4, %v12219_v4  ;;  %v12242_v9 = vpop.f32.mrf.mxu1 }
 0x298   :  { %v11723_v10 = vpack.c.bf16 %v12241_v6, %v12241_v6  ;;  %v12221_v11 = vpop.f32.mrf.mxu0 }
 0x299   :  { %2885 = vst.msk [vmem:[#allocation2 + $0x60] sm:$0xf] %vm724_vm4, %v11721_v8  ;;  %v12222_v12 = vadd.f32 %v12221_v11, %v12220_v7  ;;  %v12243_v13 = vpop.f32.mrf.mxu1 }
 0x29a   :  { %3065 = vst.msk [vmem:[#allocation2 + $0x68] sm:$0xf] %vm724_vm4, %v11723_v10  ;;  %v12244_v14 = vadd.f32 %v12243_v13, %v12242_v9  ;;  %v13528_v13 = vld [vmem:[%s16025_s4 + $0x98] sm:$0xff]  }
 0x29b   :  { %v11722_v15 = vpack.c.bf16 %v12222_v12, %v12222_v12  ;;  %v13527_v12 = vld [vmem:[%s16025_s4 + $0x18] sm:$0xff]  }
 0x29c   :  { %v11724_v16 = vpack.c.bf16 %v12244_v14, %v12244_v14  ;;  %12705 = vmatprep.subr.bf16.mxu1 %v13527_v12  ;;  %v13529_v14 = vld [vmem:[%s16025_s4 + $0x10] sm:$0xff]  }
 0x29d   :  { %2886 = vst.msk [vmem:[#allocation2 + $0x64] sm:$0xf] %vm724_vm4, %v11722_v15  ;;  %12706 = vmatpush3.bf16.msra.mxu1 %v13527_v12  ;;  %v13530_v15 = vld [vmem:[%s16025_s4 + $0x90] sm:$0xff]   ;;  %v13541_v12 = vld [vmem:[%s16025_s4 + $0x20] sm:$0xff]  }
 0x29e   :  { %3066 = vst.msk [vmem:[#allocation2 + $0x6c] sm:$0xf] %vm724_vm4, %v11724_v16  ;;  %12707 = vmatprep.subr.bf16.mxu1 %v13529_v14  ;;  %v13531_v16 = vld [vmem:[%s16025_s4 + $0x8] sm:$0xff]  }
 0x2a1   :  { %12708 = vmatpush3.bf16.msra.mxu1 %v13529_v14  ;;  %v13543_v14 = vld [vmem:[%s16025_s4 + $0x58] sm:$0xff]  }
 0x2a2   :  { %12709 = vmatprep.subr.bf16.mxu1 %v13531_v16 }
 0x2a4   :  { %v13511_v38 = vld [vmem:[#allocation2 + $0x60] sm:$0xff]  }
 0x2a5   :  { %v13509_v36 = vld [vmem:[#allocation2 + $0x68] sm:$0xff]   ;;  %12710 = vmatpush3.bf16.msra.mxu1 %v13531_v16  ;;  %v13545_v16 = vld [vmem:[%s16025_s4 + $0x50] sm:$0xff]  }
 0x2b2   :  { %v12261_v17 = vpop.f32.mrf.mxu0 }
 0x2b3   :  { %v12283_v18 = vpop.f32.mrf.mxu1 }
 0x2b4   :  { %v12262_v19 = vpop.f32.mrf.mxu0 }
 0x2b5   :  { %v12263_v20 = vadd.f32 %v12262_v19, %v12261_v17  ;;  %v12284_v58 = vpop.f32.mrf.mxu1  ;;  %v13532_v17 = vld [vmem:[%s16025_s4 + $0x88] sm:$0xff]   ;;  %v13534_v19 = vld [vmem:[%s16025_s4 + $0x80] sm:$0xff]  }
 0x2b6   :  { %v12285_v21 = vadd.f32 %v12284_v58, %v12283_v18  ;;  %v12264_v22 = vpop.f32.mrf.mxu0  ;;  %v13533_v18 = vld [vmem:[%s16025_s4] sm:$0xff]   ;;  %v14997_v58 = vld [vmem:[%s16025_s4 + $0xd8] sm:$0xff]  }
 0x2b7   :  { %v11725_v23 = vpack.c.bf16 %v12263_v20, %v12263_v20  ;;  %v12286_v24 = vpop.f32.mrf.mxu1  ;;  %12711 = vmatprep.subr.bf16.mxu1 %v13533_v18  ;;  %v14992_v20 = vld [vmem:[%s16025_s4 + $0x38] sm:$0xff]  }
 0x2b8   :  { %v11727_v25 = vpack.c.bf16 %v12285_v21, %v12285_v21  ;;  %v12265_v26 = vpop.f32.mrf.mxu0  ;;  %12712 = vmatpush3.bf16.msra.mxu1 %v13533_v18  ;;  %v13547_v18 = vld [vmem:[%s16025_s4 + $0x48] sm:$0xff]  }
 0x2b9   :  { %3245 = vst.msk [vmem:[#allocation2 + $0x70] sm:$0xf] %vm724_vm4, %v11725_v23  ;;  %v12266_v27 = vadd.f32 %v12265_v26, %v12264_v22  ;;  %v12287_v28 = vpop.f32.mrf.mxu1  ;;  %12717 = vmatprep.subr.bf16.mxu1 %v14992_v20 }
 0x2ba   :  { %3425 = vst.msk [vmem:[#allocation2 + $0x78] sm:$0xf] %vm724_vm4, %v11727_v25  ;;  %v12288_v29 = vadd.f32 %v12287_v28, %v12286_v24 }
 0x2bb   :  { %v11726_v30 = vpack.c.bf16 %v12266_v27, %v12266_v27 }
 0x2bc   :  { %v11728_v31 = vpack.c.bf16 %v12288_v29, %v12288_v29 }
 0x2bd   :  { %3246 = vst.msk [vmem:[#allocation2 + $0x74] sm:$0xf] %vm724_vm4, %v11726_v30 }
 0x2be   :  { %3426 = vst.msk [vmem:[#allocation2 + $0x7c] sm:$0xf] %vm724_vm4, %v11728_v31 }
 0x2c4   :  { %v13507_v34 = vld [vmem:[#allocation2 + $0x70] sm:$0xff]  }
 0x2c5   :  { %v13505_v32 = vld [vmem:[#allocation2 + $0x78] sm:$0xff]  }
 0x2c6   :  { %12289 = vmatprep.subr.bf16.mxu0 %v13505_v32 }
 0x2c7   :  { %12290 = vmatpush3.bf16.msra.mxu0 %v13506_v33 }
 0x2c8   :  { %12291 = vmatprep.subr.bf16.mxu0 %v13507_v34 }
 0x2cb   :  { %12292 = vmatpush3.bf16.msra.mxu0 %v13508_v35 }
 0x2cc   :  { %12293 = vmatprep.subr.bf16.mxu0 %v13509_v36 }
 0x2cf   :  { %12294 = vmatpush3.bf16.msra.mxu0 %v13510_v37 }
 0x2d0   :  { %12295 = vmatprep.subr.bf16.mxu0 %v13511_v38 }
 0x2d3   :  { %12296 = vmatpush3.bf16.msra.mxu0 %v13512_v39 }
 0x2d4   :  { %12297 = vmatprep.subr.bf16.mxu0 %v13513_v40 }
 0x2d7   :  { %12298 = vmatpush3.bf16.msra.mxu0 %v13514_v41 }
 0x2d8   :  { %12299 = vmatprep.subr.bf16.mxu0 %v13515_v42 }
 0x2db   :  { %12300 = vmatpush3.bf16.msra.mxu0 %v13516_v43 }
 0x2dc   :  { %12301 = vmatprep.subr.bf16.mxu0 %v13517_v44 }
 0x2df   :  { %12302 = vmatpush3.bf16.msra.mxu0 %v13518_v45 }
 0x2e0   :  { %12303 = vmatprep.subr.bf16.mxu0 %v13519_v46 }
 0x2e3   :  { %12304 = vmatpush3.bf16.msra.mxu0 %v13520_v47 }
 0x2e4   :  { %12753 = vmatprep.subr.bf16.mxu0 %v13528_v13 }
 0x2e6   :  { %3612 = vmatmul.mubr.bf16.vlgmr.msra.gmra.mxu0 %v13521_v48 }
 0x2e7   :  { %3619 = vmatprep.mubr.bf16.mxu0 %v13524_v49  ;;  %12754 = vmatpush3.bf16.msra.mxu0 %v13528_v13  ;;  %v13542_v13 = vld [vmem:[%s16025_s4 + $0xc0] sm:$0xff]  }
 0x2e8   :  { %12755 = vmatprep.subr.bf16.mxu0 %v13530_v15 }
 0x2eb   :  { %12756 = vmatpush3.bf16.msra.mxu0 %v13530_v15  ;;  %v13544_v15 = vld [vmem:[%s16025_s4 + $0x118] sm:$0xff]  }
 0x2ec   :  { %12757 = vmatprep.subr.bf16.mxu0 %v13532_v17 }
 0x2ee   :  { %3620 = vmatmul.mubr.bf16.gmra.mxu0 %v13526_v50 }
 0x2ef   :  { %12758 = vmatpush3.bf16.msra.mxu0 %v13532_v17  ;;  %v13546_v17 = vld [vmem:[%s16025_s4 + $0x110] sm:$0xff]  }
 0x2f0   :  { %12759 = vmatprep.subr.bf16.mxu0 %v13534_v19 }
 0x2f3   :  { %12760 = vmatpush3.bf16.msra.mxu0 %v13534_v19  ;;  %v13548_v19 = vld [vmem:[%s16025_s4 + $0x108] sm:$0xff]  }
 0x2f4   :  { %12777 = vmatprep.subr.bf16.mxu0 %v14997_v58 }
 0x3a6   :  { %v12305_v51 = vpop.f32.mrf.mxu0 }
 0x3a8   :  { %v12306_v52 = vpop.f32.mrf.mxu0 }
 0x3a9   :  { %v14937_v53 = vadd.f32 %v12306_v52, %v12305_v51 }
 0x3aa   :  { %v12308_v54 = vpop.f32.mrf.mxu0 }
 0x3ab   :  { %v3633_v55 = vsel %vm3632_vm5, %v14937_v53, 0.0  ;;  %v3628_v56 = vmul.f32 %v14937_v53, %v14937_v53 }
 0x3ac   :  { %v12309_v57 = vpop.f32.mrf.mxu0  ;;  %3634 = vadd.xlane.f32.xlu0 %v3633_v55 }
 0x3ad   :  { %v14943_v59 = vadd.f32 %v12309_v57, %v12308_v54  ;;  %v3645_v62 = vsel %vm3632_vm5, %v3628_v56, 0.0 }
 0x3ae   :  { %v12311_v60 = vpop.f32.mrf.mxu0 }
 0x3af   :  { %v3629_v63 = vmul.f32 %v14943_v59, %v14943_v59  ;;  %v3636_v3 = vsel %vm3632_vm5, %v14943_v59, 0.0 }
 0x3b0   :  { %v12312_v0 = vpop.f32.mrf.mxu0  ;;  %3646 = vadd.xlane.f32.xlu0 %v3645_v62 }
 0x3b1   :  { %v14948_v61 = vadd.f32 %v12312_v0, %v12311_v60  ;;  %v3648_v1 = vsel %vm3632_vm5, %v3629_v63, 0.0 }
 0x3b2   :  { %v12314_v2 = vpop.f32.mrf.mxu0  ;;  %3649 = vadd.xlane.f32.xlu1 %v3648_v1 }
 0x3b3   :  { %v3630_v4 = vmul.f32 %v14948_v61, %v14948_v61  ;;  %v3639_v7 = vsel %vm3632_vm5, %v14948_v61, 0.0 }
 0x3b4   :  { %v12315_v5 = vpop.f32.mrf.mxu0  ;;  %3637 = vadd.xlane.f32.xlu0 %v3636_v3 }
 0x3b5   :  { %v14955_v6 = vadd.f32 %v12315_v5, %v12314_v2  ;;  %v3651_v8 = vsel %vm3632_vm5, %v3630_v4, 0.0 }
 0x3b6   :  { %3640 = vadd.xlane.f32.xlu1 %v3639_v7 }
 0x3b7   :  { %v3642_v9 = vsel %vm3632_vm5, %v14955_v6, 0.0  ;;  %v3631_v10 = vmul.f32 %v14955_v6, %v14955_v6 }
 0x3b8   :  { %3652 = vadd.xlane.f32.xlu0 %v3651_v8 }
 0x3b9   :  { %v3654_v11 = vsel %vm3632_vm5, %v3631_v10, 0.0  ;;  %v13539_v10 = vld [vmem:[%s16025_s4 + $0x28] sm:$0xff]  }
 0x3ba   :  { %3643 = vadd.xlane.f32.xlu1 %v3642_v9  ;;  %v13538_v9 = vld [vmem:[%s16025_s4 + $0xd0] sm:$0xff]  }
 0x3be   :  { %3655 = vadd.xlane.f32.xlu1 %v3654_v11  ;;  %v13540_v11 = vld [vmem:[%s16025_s4 + $0xc8] sm:$0xff]  }
 0x435   :  { %v3635_v21 = vpop.xlane.xlu0 %3634 }
 0x436   :  { %v3658_v22 = vmul.f32 0.015625, %v3635_v21  ;;  %v13551_v21 = vld [vmem:[%s16025_s4 + $0x78] sm:$0xff]  }
 0x438   :  { %v3666_v24 = vmul.f32 %v3658_v22, %v3658_v22  ;;  %v3678_v55 = vsub.f32 %v14937_v53, %v3658_v22  ;;  %v13552_v22 = vld [vmem:[%s16025_s4 + $0x158] sm:$0xff]  }
 0x439   :  { %v3647_v23 = vpop.xlane.xlu0 %3646 }
 0x43a   :  { %v3662_v25 = vmul.f32 0.015625, %v3647_v23  ;;  %v13553_v23 = vld [vmem:[%s16025_s4 + $0x70] sm:$0xff]  }
 0x43b   :  { %v3650_v26 = vpop.xlane.xlu1 %3649 }
 0x43c   :  { %v3670_v27 = vsub.f32 %v3662_v25, %v3666_v24  ;;  %v3663_v33 = vmul.f32 0.015625, %v3650_v26  ;;  %v13554_v24 = vld [vmem:[%s16025_s4 + $0x150] sm:$0xff]   ;;  %v13555_v25 = vld [vmem:[%s16025_s4 + $0x68] sm:$0xff]  }
 0x43d   :  { %v3638_v28 = vpop.xlane.xlu0 %3637  ;;  %v13556_v26 = vld [vmem:[%s16025_s4 + $0x148] sm:$0xff]  }
 0x43e   :  { %v3674_v29 = vmax.f32 %v3670_v27, 0.0  ;;  %v3659_v30 = vmul.f32 0.015625, %v3638_v28  ;;  %v13557_v27 = vld [vmem:[%s16025_s4 + $0x60] sm:$0xff]  }
 0x43f   :  { %v3641_v31 = vpop.xlane.xlu1 %3640  ;;  %v13558_v28 = vld [vmem:[%s16025_s4 + $0x140] sm:$0xff]  }
 0x440   :  { %v3682_v32 = vadd.f32 1e-05, %v3674_v29  ;;  %v3667_v34 = vmul.f32 %v3659_v30, %v3659_v30  ;;  %v3660_v35 = vmul.f32 0.015625, %v3641_v31  ;;  %v3679_v57 = vsub.f32 %v14943_v59, %v3659_v30  ;;  %v13559_v29 = vld [vmem:[%s16025_s4 + $0xb8] sm:$0xff]   ;;  %v13561_v31 = vld [vmem:[%s16025_s4 + $0xb0] sm:$0xff]  }
 0x441   :  { %v3653_v36 = vpop.xlane.xlu0 %3652  ;;  %v13560_v30 = vld [vmem:[%s16025_s4 + $0x198] sm:$0xff]  }
 0x442   :  { %v3671_v37 = vsub.f32 %v3663_v33, %v3667_v34  ;;  %v3668_v38 = vmul.f32 %v3660_v35, %v3660_v35  ;;  %v3664_v39 = vmul.f32 0.015625, %v3653_v36  ;;  %13775 = vrsqrt.f32 %v3682_v32  ;;  %v13562_v32 = vld [vmem:[%s16025_s4 + $0x190] sm:$0xff]   ;;  %v13563_v33 = vld [vmem:[%s16025_s4 + $0xa8] sm:$0xff]   ;;  %v13566_v36 = vld [vmem:[%s16025_s4 + $0x180] sm:$0xff]  }
 0x443   :  { %v3644_v40 = vpop.xlane.xlu1 %3643  ;;  %v3680_v53 = vsub.f32 %v14948_v61, %v3660_v35  ;;  %v13564_v34 = vld [vmem:[%s16025_s4 + $0x188] sm:$0xff]   ;;  %v13565_v35 = vld [vmem:[%s16025_s4 + $0xa0] sm:$0xff]  }
 0x444   :  { %v3675_v41 = vmax.f32 %v3671_v37, 0.0  ;;  %v3661_v42 = vmul.f32 0.015625, %v3644_v40  ;;  %v3672_v43 = vsub.f32 %v3664_v39, %v3668_v38  ;;  %v13567_v37 = vld [vmem:[%s16025_s4 + $0xf8] sm:$0xff]   ;;  %v13569_v39 = vld [vmem:[%s16025_s4 + $0xf0] sm:$0xff]  }
 0x445   :  { %v13568_v38 = vld [vmem:[%s16025_s4 + $0x1d8] sm:$0xff]   ;;  %v13570_v40 = vld [vmem:[%s16025_s4 + $0x1d0] sm:$0xff]  }
 0x446   :  { %v3683_v44 = vadd.f32 1e-05, %v3675_v41  ;;  %v3676_v45 = vmax.f32 %v3672_v43, 0.0  ;;  %v3669_v47 = vmul.f32 %v3661_v42, %v3661_v42  ;;  %v3681_v59 = vsub.f32 %v14955_v6, %v3661_v42  ;;  %v13537_v6 = vld [vmem:[%s16025_s4 + $0x30] sm:$0xff]   ;;  %v13571_v41 = vld [vmem:[%s16025_s4 + $0xe8] sm:$0xff]   ;;  %v13573_v43 = vld [vmem:[%s16025_s4 + $0xe0] sm:$0xff]  }
 0x447   :  { %v3656_v46 = vpop.xlane.xlu1 %3655  ;;  %v13572_v42 = vld [vmem:[%s16025_s4 + $0x1c8] sm:$0xff]  }
 0x448   :  { %13777 = vrsqrt.f32 %v3683_v44  ;;  %v3665_v48 = vmul.f32 0.015625, %v3656_v46  ;;  %v3684_v49 = vadd.f32 1e-05, %v3676_v45  ;;  %v13574_v44 = vld [vmem:[%s16025_s4 + $0x1c0] sm:$0xff]   ;;  %v13575_v45 = vld [vmem:[%s16025_s4 + $0x138] sm:$0xff]   ;;  %v13576_v46 = vld [vmem:[%s16025_s4 + $0x130] sm:$0xff]  }
 0x44a   :  { %v3673_v50 = vsub.f32 %v3665_v48, %v3669_v47  ;;  %13779 = vrsqrt.f32 %v3684_v49  ;;  %v13577_v47 = vld [vmem:[%s16025_s4 + $0x128] sm:$0xff]   ;;  %v13578_v48 = vld [vmem:[%s16025_s4 + $0x120] sm:$0xff]   ;;  %v13579_v49 = vld [vmem:[%s16025_s4 + $0x178] sm:$0xff]  }
 0x44c   :  { %v3677_v51 = vmax.f32 %v3673_v50, 0.0  ;;  %v13580_v50 = vld [vmem:[%s16025_s4 + $0x170] sm:$0xff]  }
 0x44e   :  { %v3685_v52 = vadd.f32 1e-05, %v3677_v51  ;;  %v13581_v51 = vld [vmem:[%s16025_s4 + $0x168] sm:$0xff]  }
 0x44f   :  { %v13776_v54 = vpop.eup %13775 }
 0x450   :  { %13781 = vrsqrt.f32 %v3685_v52  ;;  %v15002_v56 = vmul.f32 %v13776_v54, %v3678_v55  ;;  %v13582_v52 = vld [vmem:[%s16025_s4 + $0x160] sm:$0xff]   ;;  %v13583_v54 = vld [vmem:[%s16025_s4 + $0x1b8] sm:$0xff]   ;;  %v13584_v55 = vld [vmem:[%s16025_s4 + $0x1b0] sm:$0xff]  }
 0x452   :  { %v3694_v63 = vmax.f32 %v15002_v56, 0.0 }
 0x455   :  { %v13778_v60 = vpop.eup %13777 }
 0x456   :  { %v15005_v62 = vmul.f32 %v13778_v60, %v3679_v57  ;;  %v13585_v57 = vld [vmem:[%s16025_s4 + $0x1a8] sm:$0xff]   ;;  %v13586_v60 = vld [vmem:[%s16025_s4 + $0x1a0] sm:$0xff]  }
 0x457   :  { %v13780_v1 = vpop.eup %13779 }
 0x458   :  { %v3695_v0 = vmax.f32 %v15005_v62, 0.0  ;;  %v15016_v3 = vmul.f32 %v13780_v1, %v3680_v53  ;;  %v13587_v1 = vld [vmem:[%s16025_s4 + $0x1f8] sm:$0xff]   ;;  %v13588_v53 = vld [vmem:[%s16025_s4 + $0x1f0] sm:$0xff]  }
 0x45a   :  { %v15013_v2 = vpack.c.bf16 %v3695_v0, %v3694_v63  ;;  %v3696_v7 = vmax.f32 %v15016_v3, 0.0 }
 0x45c   :  { %12713 = vmatprep.mubr.msk.bf16.mxu1 %vm3632_vm5, %v15013_v2  ;;  %12761 = vmatprep.mubr.msk.bf16.mxu0 %vm3632_vm5, %v15013_v2 }
 0x45d   :  { %v13782_v4 = vpop.eup %13781 }
 0x45e   :  { %v15023_v5 = vmul.f32 %v13782_v4, %v3681_v59  ;;  %v13589_v59 = vld [vmem:[%s16025_s4 + $0x1e8] sm:$0xff]   ;;  %v13590_v4 = vld [vmem:[%s16025_s4 + $0x1e0] sm:$0xff]  }
 0x460   :  { %v3697_v8 = vmax.f32 %v15023_v5, 0.0 }
 0x462   :  { %v15031_v61 = vpack.c.bf16 %v3697_v8, %v3696_v7 }
 0x464   :  { %12714 = vmatmul.mubr.msk.bf16.vlgmr.msra.gmra.mxu1 %vm3632_vm5, %v15031_v61  ;;  %12762 = vmatmul.mubr.msk.bf16.vlgmr.msra.gmra.mxu0 %vm3632_vm5, %v15031_v61 }
 0x465   :  { %12718 = vmatpush3.bf16.msra.mxu1 %v14992_v20  ;;  %12778 = vmatpush3.bf16.msra.mxu0 %v14997_v58  ;;  %v13549_v20 = vld [vmem:[%s16025_s4 + $0x40] sm:$0xff]  }
 0x466   :  { %12725 = vmatprep.mubr.msk.bf16.mxu1 %vm3632_vm5, %v15013_v2  ;;  %12785 = vmatprep.mubr.msk.bf16.mxu0 %vm3632_vm5, %v15013_v2  ;;  %v13550_v58 = vld [vmem:[%s16025_s4 + $0x100] sm:$0xff]  }
 0x467   :  { %12719 = vmatprep.subr.bf16.mxu1 %v13537_v6  ;;  %12779 = vmatprep.subr.bf16.mxu0 %v13538_v9 }
 0x469   :  { %12720 = vmatpush3.bf16.msra.mxu1 %v13537_v6  ;;  %12780 = vmatpush3.bf16.msra.mxu0 %v13538_v9 }
 0x46a   :  { %12721 = vmatprep.subr.bf16.mxu1 %v13539_v10  ;;  %12781 = vmatprep.subr.bf16.mxu0 %v13540_v11 }
 0x46d   :  { %12722 = vmatpush3.bf16.msra.mxu1 %v13539_v10  ;;  %12782 = vmatpush3.bf16.msra.mxu0 %v13540_v11 }
 0x46e   :  { %12723 = vmatprep.subr.bf16.mxu1 %v13541_v12  ;;  %12783 = vmatprep.subr.bf16.mxu0 %v13542_v13 }
 0x471   :  { %12724 = vmatpush3.bf16.msra.mxu1 %v13541_v12  ;;  %12784 = vmatpush3.bf16.msra.mxu0 %v13542_v13 }
 0x472   :  { %12729 = vmatprep.subr.bf16.mxu1 %v13543_v14  ;;  %12801 = vmatprep.subr.bf16.mxu0 %v13544_v15 }
 0x474   :  { %12726 = vmatmul.mubr.msk.bf16.vlgmr.msra.gmra.mxu1 %vm3632_vm5, %v15031_v61  ;;  %12786 = vmatmul.mubr.msk.bf16.vlgmr.msra.gmra.mxu0 %vm3632_vm5, %v15031_v61 }
 0x475   :  { %12730 = vmatpush3.bf16.msra.mxu1 %v13543_v14  ;;  %12737 = vmatprep.mubr.msk.bf16.mxu1 %vm3632_vm5, %v15013_v2 }
 0x476   :  { %12802 = vmatpush3.bf16.msra.mxu0 %v13544_v15  ;;  %12809 = vmatprep.mubr.msk.bf16.mxu0 %vm3632_vm5, %v15013_v2 }
 0x477   :  { %12731 = vmatprep.subr.bf16.mxu1 %v13545_v16  ;;  %12803 = vmatprep.subr.bf16.mxu0 %v13546_v17 }
 0x479   :  { %12732 = vmatpush3.bf16.msra.mxu1 %v13545_v16 }
 0x47a   :  { %12804 = vmatpush3.bf16.msra.mxu0 %v13546_v17  ;;  %12733 = vmatprep.subr.bf16.mxu1 %v13547_v18 }
 0x47b   :  { %12805 = vmatprep.subr.bf16.mxu0 %v13548_v19 }
 0x47d   :  { %12734 = vmatpush3.bf16.msra.mxu1 %v13547_v18 }
 0x47e   :  { %12806 = vmatpush3.bf16.msra.mxu0 %v13548_v19  ;;  %12735 = vmatprep.subr.bf16.mxu1 %v13549_v20 }
 0x47f   :  { %12807 = vmatprep.subr.bf16.mxu0 %v13550_v58 }
 0x481   :  { %12736 = vmatpush3.bf16.msra.mxu1 %v13549_v20 }
 0x482   :  { %12808 = vmatpush3.bf16.msra.mxu0 %v13550_v58  ;;  %12741 = vmatprep.subr.bf16.mxu1 %v13551_v21 }
 0x483   :  { %12825 = vmatprep.subr.bf16.mxu0 %v13552_v22 }
 0x484   :  { %12738 = vmatmul.mubr.msk.bf16.vlgmr.msra.gmra.mxu1 %vm3632_vm5, %v15031_v61 }
 0x485   :  { %12810 = vmatmul.mubr.msk.bf16.vlgmr.msra.gmra.mxu0 %vm3632_vm5, %v15031_v61  ;;  %12742 = vmatpush3.bf16.msra.mxu1 %v13551_v21 }
 0x486   :  { %12749 = vmatprep.mubr.msk.bf16.mxu1 %vm3632_vm5, %v15013_v2  ;;  %12826 = vmatpush3.bf16.msra.mxu0 %v13552_v22 }
 0x487   :  { %12833 = vmatprep.mubr.msk.bf16.mxu0 %vm3632_vm5, %v15013_v2  ;;  %12743 = vmatprep.subr.bf16.mxu1 %v13553_v23 }
 0x488   :  { %12827 = vmatprep.subr.bf16.mxu0 %v13554_v24 }
 0x489   :  { %12744 = vmatpush3.bf16.msra.mxu1 %v13553_v23 }
 0x48a   :  { %12828 = vmatpush3.bf16.msra.mxu0 %v13554_v24  ;;  %12745 = vmatprep.subr.bf16.mxu1 %v13555_v25 }
 0x48b   :  { %12829 = vmatprep.subr.bf16.mxu0 %v13556_v26 }
 0x48d   :  { %12746 = vmatpush3.bf16.msra.mxu1 %v13555_v25 }
 0x48e   :  { %12830 = vmatpush3.bf16.msra.mxu0 %v13556_v26  ;;  %12747 = vmatprep.subr.bf16.mxu1 %v13557_v27 }
 0x48f   :  { %12831 = vmatprep.subr.bf16.mxu0 %v13558_v28 }
 0x491   :  { %12748 = vmatpush3.bf16.msra.mxu1 %v13557_v27 }
 0x492   :  { %12832 = vmatpush3.bf16.msra.mxu0 %v13558_v28  ;;  %12765 = vmatprep.subr.bf16.mxu1 %v13559_v29 }
 0x493   :  { %12849 = vmatprep.subr.bf16.mxu0 %v13560_v30 }
 0x494   :  { %12750 = vmatmul.mubr.msk.bf16.vlgmr.msra.gmra.mxu1 %vm3632_vm5, %v15031_v61 }
 0x495   :  { %12834 = vmatmul.mubr.msk.bf16.vlgmr.msra.gmra.mxu0 %vm3632_vm5, %v15031_v61  ;;  %12766 = vmatpush3.bf16.msra.mxu1 %v13559_v29 }
 0x496   :  { %12773 = vmatprep.mubr.msk.bf16.mxu1 %vm3632_vm5, %v15013_v2  ;;  %12850 = vmatpush3.bf16.msra.mxu0 %v13560_v30 }
 0x497   :  { %12857 = vmatprep.mubr.msk.bf16.mxu0 %vm3632_vm5, %v15013_v2  ;;  %12767 = vmatprep.subr.bf16.mxu1 %v13561_v31 }
 0x498   :  { %12851 = vmatprep.subr.bf16.mxu0 %v13562_v32 }
 0x499   :  { %12768 = vmatpush3.bf16.msra.mxu1 %v13561_v31 }
 0x49a   :  { %12852 = vmatpush3.bf16.msra.mxu0 %v13562_v32  ;;  %12769 = vmatprep.subr.bf16.mxu1 %v13563_v33 }
 0x49b   :  { %12853 = vmatprep.subr.bf16.mxu0 %v13564_v34 }
 0x49d   :  { %12770 = vmatpush3.bf16.msra.mxu1 %v13563_v33 }
 0x49e   :  { %12854 = vmatpush3.bf16.msra.mxu0 %v13564_v34  ;;  %12771 = vmatprep.subr.bf16.mxu1 %v13565_v35 }
 0x49f   :  { %12855 = vmatprep.subr.bf16.mxu0 %v13566_v36 }
 0x4a1   :  { %12772 = vmatpush3.bf16.msra.mxu1 %v13565_v35 }
 0x4a2   :  { %12856 = vmatpush3.bf16.msra.mxu0 %v13566_v36  ;;  %12789 = vmatprep.subr.bf16.mxu1 %v13567_v37 }
 0x4a3   :  { %12873 = vmatprep.subr.bf16.mxu0 %v13568_v38 }
 0x4a4   :  { %12774 = vmatmul.mubr.msk.bf16.vlgmr.msra.gmra.mxu1 %vm3632_vm5, %v15031_v61 }
 0x4a5   :  { %12858 = vmatmul.mubr.msk.bf16.vlgmr.msra.gmra.mxu0 %vm3632_vm5, %v15031_v61  ;;  %12790 = vmatpush3.bf16.msra.mxu1 %v13567_v37 }
 0x4a6   :  { %12797 = vmatprep.mubr.msk.bf16.mxu1 %vm3632_vm5, %v15013_v2  ;;  %12874 = vmatpush3.bf16.msra.mxu0 %v13568_v38 }
 0x4a7   :  { %12881 = vmatprep.mubr.msk.bf16.mxu0 %vm3632_vm5, %v15013_v2  ;;  %12791 = vmatprep.subr.bf16.mxu1 %v13569_v39 }
 0x4a8   :  { %12875 = vmatprep.subr.bf16.mxu0 %v13570_v40 }
 0x4a9   :  { %12792 = vmatpush3.bf16.msra.mxu1 %v13569_v39 }
 0x4aa   :  { %12876 = vmatpush3.bf16.msra.mxu0 %v13570_v40  ;;  %12793 = vmatprep.subr.bf16.mxu1 %v13571_v41 }
 0x4ab   :  { %12877 = vmatprep.subr.bf16.mxu0 %v13572_v42 }
 0x4ad   :  { %12794 = vmatpush3.bf16.msra.mxu1 %v13571_v41 }
 0x4ae   :  { %12878 = vmatpush3.bf16.msra.mxu0 %v13572_v42  ;;  %12795 = vmatprep.subr.bf16.mxu1 %v13573_v43 }
 0x4af   :  { %12879 = vmatprep.subr.bf16.mxu0 %v13574_v44 }
 0x4b1   :  { %12796 = vmatpush3.bf16.msra.mxu1 %v13573_v43 }
 0x4b2   :  { %12880 = vmatpush3.bf16.msra.mxu0 %v13574_v44  ;;  %12813 = vmatprep.subr.bf16.mxu1 %v13575_v45 }
 0x4b4   :  { %12798 = vmatmul.mubr.msk.bf16.vlgmr.msra.gmra.mxu1 %vm3632_vm5, %v15031_v61 }
 0x4b5   :  { %12882 = vmatmul.mubr.msk.bf16.vlgmr.msra.gmra.mxu0 %vm3632_vm5, %v15031_v61  ;;  %12814 = vmatpush3.bf16.msra.mxu1 %v13575_v45 }
 0x4b6   :  { %12821 = vmatprep.mubr.msk.bf16.mxu1 %vm3632_vm5, %v15013_v2  ;;  %12815 = vmatprep.subr.bf16.mxu1 %v13576_v46 }
 0x4b9   :  { %12816 = vmatpush3.bf16.msra.mxu1 %v13576_v46 }
 0x4ba   :  { %12817 = vmatprep.subr.bf16.mxu1 %v13577_v47 }
 0x4bd   :  { %12818 = vmatpush3.bf16.msra.mxu1 %v13577_v47 }
 0x4be   :  { %12819 = vmatprep.subr.bf16.mxu1 %v13578_v48 }
 0x4c1   :  { %12820 = vmatpush3.bf16.msra.mxu1 %v13578_v48 }
 0x4c2   :  { %12837 = vmatprep.subr.bf16.mxu1 %v13579_v49 }
 0x4c4   :  { %12822 = vmatmul.mubr.msk.bf16.vlgmr.msra.gmra.mxu1 %vm3632_vm5, %v15031_v61 }
 0x4c5   :  { %12838 = vmatpush3.bf16.msra.mxu1 %v13579_v49  ;;  %12845 = vmatprep.mubr.msk.bf16.mxu1 %vm3632_vm5, %v15013_v2 }
 0x4c6   :  { %12839 = vmatprep.subr.bf16.mxu1 %v13580_v50 }
 0x4c9   :  { %12840 = vmatpush3.bf16.msra.mxu1 %v13580_v50 }
 0x4ca   :  { %12841 = vmatprep.subr.bf16.mxu1 %v13581_v51 }
 0x4cd   :  { %12842 = vmatpush3.bf16.msra.mxu1 %v13581_v51 }
 0x4ce   :  { %12843 = vmatprep.subr.bf16.mxu1 %v13582_v52 }
 0x4d1   :  { %12844 = vmatpush3.bf16.msra.mxu1 %v13582_v52 }
 0x4d2   :  { %12861 = vmatprep.subr.bf16.mxu1 %v13583_v54 }
 0x4d4   :  { %12846 = vmatmul.mubr.msk.bf16.vlgmr.msra.gmra.mxu1 %vm3632_vm5, %v15031_v61 }
 0x4d5   :  { %12862 = vmatpush3.bf16.msra.mxu1 %v13583_v54  ;;  %12869 = vmatprep.mubr.msk.bf16.mxu1 %vm3632_vm5, %v15013_v2 }
 0x4d6   :  { %12863 = vmatprep.subr.bf16.mxu1 %v13584_v55 }
 0x4d9   :  { %12864 = vmatpush3.bf16.msra.mxu1 %v13584_v55 }
 0x4da   :  { %12865 = vmatprep.subr.bf16.mxu1 %v13585_v57 }
 0x4dd   :  { %12866 = vmatpush3.bf16.msra.mxu1 %v13585_v57 }
 0x4de   :  { %12867 = vmatprep.subr.bf16.mxu1 %v13586_v60 }
 0x4e1   :  { %12868 = vmatpush3.bf16.msra.mxu1 %v13586_v60 }
 0x4e2   :  { %12885 = vmatprep.subr.bf16.mxu1 %v13587_v1 }
 0x4e4   :  { %12870 = vmatmul.mubr.msk.bf16.vlgmr.msra.gmra.mxu1 %vm3632_vm5, %v15031_v61 }
 0x4e5   :  { %12886 = vmatpush3.bf16.msra.mxu1 %v13587_v1  ;;  %12893 = vmatprep.mubr.msk.bf16.mxu1 %vm3632_vm5, %v15013_v2 }
 0x4e6   :  { %12887 = vmatprep.subr.bf16.mxu1 %v13588_v53 }
 0x4e9   :  { %12888 = vmatpush3.bf16.msra.mxu1 %v13588_v53 }
 0x4ea   :  { %12889 = vmatprep.subr.bf16.mxu1 %v13589_v59 }
 0x4ed   :  { %12890 = vmatpush3.bf16.msra.mxu1 %v13589_v59 }
 0x4ee   :  { %12891 = vmatprep.subr.bf16.mxu1 %v13590_v4 }
 0x4f1   :  { %12892 = vmatpush3.bf16.msra.mxu1 %v13590_v4 }
 0x4f4   :  { %12894 = vmatmul.mubr.msk.bf16.vlgmr.msra.gmra.mxu1 %vm3632_vm5, %v15031_v61 }
 0x524   :  { %v12715_v6 = vpop.f32.mrf.mxu1  ;;  %v12763_v2 = vpop.f32.mrf.mxu0 }
 0x525   :  { %v11731_v9 = vpack.c.bf16 %v12715_v6, %v12715_v6  ;;  %v11747_v10 = vpack.c.bf16 %v12763_v2, %v12763_v2 }
 0x526   :  { %v3772_v11 = vpop.f32.mrf.mxu1  ;;  %v4181_v12 = vpop.f32.mrf.mxu0 }
 0x527   :  { %3806 = vst.msk [vmem:[#allocation3 + $0x8] sm:$0xf] %vm3803_vm6, %v11731_v9  ;;  %4214 = vst.msk [vmem:[#allocation3 + $0x48] sm:$0xf] %vm3803_vm6, %v11747_v10  ;;  %v11729_v13 = vpack.c.bf16 %v3772_v11, %v3772_v11  ;;  %v11745_v14 = vpack.c.bf16 %v4181_v12, %v4181_v12 }
 0x528   :  { %v12716_v15 = vpop.f32.mrf.mxu1  ;;  %v12764_v16 = vpop.f32.mrf.mxu0 }
 0x529   :  { %3804 = vst.msk [vmem:[#allocation3] sm:$0xf] %vm3803_vm6, %v11729_v13  ;;  %4212 = vst.msk [vmem:[#allocation3 + $0x40] sm:$0xf] %vm3803_vm6, %v11745_v14  ;;  %v11732_v61 = vpack.c.bf16 %v12716_v15, %v12716_v15  ;;  %v11748_v17 = vpack.c.bf16 %v12764_v16, %v12764_v16  ;;  %v13622_v15 = vld [vmem:[%s16026_s5 + $0x4] ss:$16 sps:$4 sm:$0xff]  }
 0x52a   :  { %v3775_v18 = vpop.f32.mrf.mxu1  ;;  %v4184_v19 = vpop.f32.mrf.mxu0  ;;  %5674 = vmatprep.mubr.bf16.mxu0 %v13622_v15  ;;  %v13628_v16 = vld [vmem:[%s16026_s5 + $0xc] ss:$16 sps:$4 sm:$0xff]  }
 0x52b   :  { %3807 = vst.msk [vmem:[#allocation3 + $0xc] sm:$0xf] %vm3803_vm6, %v11732_v61  ;;  %4215 = vst.msk [vmem:[#allocation3 + $0x4c] sm:$0xf] %vm3803_vm6, %v11748_v17  ;;  %v11730_v20 = vpack.c.bf16 %v3775_v18, %v3775_v18  ;;  %v11746_v58 = vpack.c.bf16 %v4184_v19, %v4184_v19  ;;  %5723 = vmatprep.mubr.bf16.mxu1 %v13628_v16 }
 0x52d   :  { %3805 = vst.msk [vmem:[#allocation3 + $0x4] sm:$0xf] %vm3803_vm6, %v11730_v20  ;;  %4213 = vst.msk [vmem:[#allocation3 + $0x44] sm:$0xf] %vm3803_vm6, %v11746_v58 }
 0x534   :  { %v12727_v21 = vpop.f32.mrf.mxu1  ;;  %v12787_v22 = vpop.f32.mrf.mxu0 }
 0x535   :  { %v11735_v23 = vpack.c.bf16 %v12727_v21, %v12727_v21  ;;  %v11755_v24 = vpack.c.bf16 %v12787_v22, %v12787_v22 }
 0x536   :  { %v3875_v25 = vpop.f32.mrf.mxu1  ;;  %v4385_v26 = vpop.f32.mrf.mxu0 }
 0x537   :  { %3908 = vst.msk [vmem:[#allocation3 + $0x18] sm:$0xf] %vm3803_vm6, %v11735_v23  ;;  %4418 = vst.msk [vmem:[#allocation3 + $0x68] sm:$0xf] %vm3803_vm6, %v11755_v24  ;;  %v11733_v27 = vpack.c.bf16 %v3875_v25, %v3875_v25  ;;  %v11753_v28 = vpack.c.bf16 %v4385_v26, %v4385_v26 }
 0x538   :  { %v12728_v29 = vpop.f32.mrf.mxu1  ;;  %v12788_v30 = vpop.f32.mrf.mxu0 }
 0x539   :  { %3906 = vst.msk [vmem:[#allocation3 + $0x10] sm:$0xf] %vm3803_vm6, %v11733_v27  ;;  %4416 = vst.msk [vmem:[#allocation3 + $0x60] sm:$0xf] %vm3803_vm6, %v11753_v28  ;;  %v11736_v31 = vpack.c.bf16 %v12728_v29, %v12728_v29  ;;  %v11756_v32 = vpack.c.bf16 %v12788_v30, %v12788_v30 }
 0x53a   :  { %v3878_v33 = vpop.f32.mrf.mxu1  ;;  %v4388_v34 = vpop.f32.mrf.mxu0 }
 0x53b   :  { %3909 = vst.msk [vmem:[#allocation3 + $0x1c] sm:$0xf] %vm3803_vm6, %v11736_v31  ;;  %4419 = vst.msk [vmem:[#allocation3 + $0x6c] sm:$0xf] %vm3803_vm6, %v11756_v32  ;;  %v11734_v35 = vpack.c.bf16 %v3878_v33, %v3878_v33  ;;  %v11754_v36 = vpack.c.bf16 %v4388_v34, %v4388_v34 }
 0x53d   :  { %3907 = vst.msk [vmem:[#allocation3 + $0x14] sm:$0xf] %vm3803_vm6, %v11734_v35  ;;  %4417 = vst.msk [vmem:[#allocation3 + $0x64] sm:$0xf] %vm3803_vm6, %v11754_v36 }
 0x544   :  { %v12739_v37 = vpop.f32.mrf.mxu1  ;;  %v13602_v16 = vld [vmem:[#allocation3 + $0x10] sm:$0xff]  }
 0x545   :  { %v11739_v38 = vpack.c.bf16 %v12739_v37, %v12739_v37  ;;  %v12811_v39 = vpop.f32.mrf.mxu0 }
 0x546   :  { %v11763_v40 = vpack.c.bf16 %v12811_v39, %v12811_v39  ;;  %v3977_v41 = vpop.f32.mrf.mxu1 }
 0x547   :  { %4010 = vst.msk [vmem:[#allocation3 + $0x28] sm:$0xf] %vm3803_vm6, %v11739_v38  ;;  %v11737_v42 = vpack.c.bf16 %v3977_v41, %v3977_v41  ;;  %v4589_v43 = vpop.f32.mrf.mxu0 }
 0x548   :  { %4622 = vst.msk [vmem:[#allocation3 + $0x88] sm:$0xf] %vm3803_vm6, %v11763_v40  ;;  %v11761_v44 = vpack.c.bf16 %v4589_v43, %v4589_v43  ;;  %v12740_v45 = vpop.f32.mrf.mxu1 }
 0x549   :  { %4008 = vst.msk [vmem:[#allocation3 + $0x20] sm:$0xf] %vm3803_vm6, %v11737_v42  ;;  %v11740_v46 = vpack.c.bf16 %v12740_v45, %v12740_v45  ;;  %v12812_v47 = vpop.f32.mrf.mxu0 }
 0x54a   :  { %4620 = vst.msk [vmem:[#allocation3 + $0x80] sm:$0xf] %vm3803_vm6, %v11761_v44  ;;  %v11764_v48 = vpack.c.bf16 %v12812_v47, %v12812_v47  ;;  %v3980_v49 = vpop.f32.mrf.mxu1 }
 0x54b   :  { %4011 = vst.msk [vmem:[#allocation3 + $0x2c] sm:$0xf] %vm3803_vm6, %v11740_v46  ;;  %v11738_v50 = vpack.c.bf16 %v3980_v49, %v3980_v49  ;;  %v4592_v51 = vpop.f32.mrf.mxu0 }
 0x54c   :  { %4623 = vst.msk [vmem:[#allocation3 + $0x8c] sm:$0xf] %vm3803_vm6, %v11764_v48  ;;  %v11762_v52 = vpack.c.bf16 %v4592_v51, %v4592_v51 }
 0x54d   :  { %4009 = vst.msk [vmem:[#allocation3 + $0x24] sm:$0xf] %vm3803_vm6, %v11738_v50 }
 0x54e   :  { %4621 = vst.msk [vmem:[#allocation3 + $0x84] sm:$0xf] %vm3803_vm6, %v11762_v52 }
 0x554   :  { %v12751_v54 = vpop.f32.mrf.mxu1 }
 0x555   :  { %v11743_v55 = vpack.c.bf16 %v12751_v54, %v12751_v54  ;;  %v12835_v57 = vpop.f32.mrf.mxu0 }
 0x556   :  { %v11771_v60 = vpack.c.bf16 %v12835_v57, %v12835_v57  ;;  %v4079_v1 = vpop.f32.mrf.mxu1 }
 0x557   :  { %4112 = vst.msk [vmem:[#allocation3 + $0x38] sm:$0xf] %vm3803_vm6, %v11743_v55  ;;  %v11741_v53 = vpack.c.bf16 %v4079_v1, %v4079_v1  ;;  %v4793_v59 = vpop.f32.mrf.mxu0 }
 0x558   :  { %4826 = vst.msk [vmem:[#allocation3 + $0xa8] sm:$0xf] %vm3803_vm6, %v11771_v60  ;;  %v11769_v4 = vpack.c.bf16 %v4793_v59, %v4793_v59  ;;  %v12752_v6 = vpop.f32.mrf.mxu1  ;;  %v13595_v60 = vld [vmem:[#allocation3 + $0x68] sm:$0xff]  }
 0x559   :  { %4110 = vst.msk [vmem:[#allocation3 + $0x30] sm:$0xf] %vm3803_vm6, %v11741_v53  ;;  %v11744_v2 = vpack.c.bf16 %v12752_v6, %v12752_v6  ;;  %v12836_v9 = vpop.f32.mrf.mxu0  ;;  %v13597_v6 = vld [vmem:[#allocation3 + $0x60] sm:$0xff]  }
 0x55a   :  { %4824 = vst.msk [vmem:[#allocation3 + $0xa0] sm:$0xf] %vm3803_vm6, %v11769_v4  ;;  %v11772_v10 = vpack.c.bf16 %v12836_v9, %v12836_v9  ;;  %v4082_v11 = vpop.f32.mrf.mxu1  ;;  %v13596_v4 = vld [vmem:[#allocation3 + $0x28] sm:$0xff]  }
 0x55b   :  { %4113 = vst.msk [vmem:[#allocation3 + $0x3c] sm:$0xf] %vm3803_vm6, %v11744_v2  ;;  %v11742_v12 = vpack.c.bf16 %v4082_v11, %v4082_v11  ;;  %v4796_v13 = vpop.f32.mrf.mxu0  ;;  %v13598_v2 = vld [vmem:[#allocation3 + $0x20] sm:$0xff]  }
 0x55c   :  { %4827 = vst.msk [vmem:[#allocation3 + $0xac] sm:$0xf] %vm3803_vm6, %v11772_v10  ;;  %v11770_v14 = vpack.c.bf16 %v4796_v13, %v4796_v13  ;;  %v13600_v10 = vld [vmem:[#allocation3 + $0x18] sm:$0xff]  }
 0x55d   :  { %4111 = vst.msk [vmem:[#allocation3 + $0x34] sm:$0xf] %vm3803_vm6, %v11742_v12 }
 0x55e   :  { %4825 = vst.msk [vmem:[#allocation3 + $0xa4] sm:$0xf] %vm3803_vm6, %v11770_v14 }
 0x562   :  { %v13592_v48 = vld [vmem:[#allocation3 + $0x38] sm:$0xff]  }
 0x564   :  { %v12775_v61 = vpop.f32.mrf.mxu1  ;;  %v13594_v55 = vld [vmem:[#allocation3 + $0x30] sm:$0xff]  }
 0x565   :  { %v11751_v17 = vpack.c.bf16 %v12775_v61, %v12775_v61  ;;  %v12859_v18 = vpop.f32.mrf.mxu0 }
 0x566   :  { %v11779_v19 = vpack.c.bf16 %v12859_v18, %v12859_v18  ;;  %v4283_v20 = vpop.f32.mrf.mxu1 }
 0x567   :  { %4316 = vst.msk [vmem:[#allocation3 + $0x58] sm:$0xf] %vm3803_vm6, %v11751_v17  ;;  %v11749_v58 = vpack.c.bf16 %v4283_v20, %v4283_v20  ;;  %v4997_v21 = vpop.f32.mrf.mxu0  ;;  %v13603_v17 = vld [vmem:[#allocation3 + $0x48] sm:$0xff]  }
 0x568   :  { %5030 = vst.msk [vmem:[#allocation3 + $0xc8] sm:$0xf] %vm3803_vm6, %v11779_v19  ;;  %v11777_v22 = vpack.c.bf16 %v4997_v21, %v4997_v21  ;;  %v12776_v23 = vpop.f32.mrf.mxu1  ;;  %v13605_v21 = vld [vmem:[#allocation3 + $0x40] sm:$0xff]  }
 0x569   :  { %4314 = vst.msk [vmem:[#allocation3 + $0x50] sm:$0xf] %vm3803_vm6, %v11749_v58  ;;  %v11752_v24 = vpack.c.bf16 %v12776_v23, %v12776_v23  ;;  %v12860_v25 = vpop.f32.mrf.mxu0  ;;  %v13604_v58 = vld [vmem:[#allocation3 + $0x8] sm:$0xff]   ;;  %v13620_v23 = vld [vmem:[%s16026_s5] ss:$16 sps:$4 sm:$0xff]  }
 0x56a   :  { %5028 = vst.msk [vmem:[#allocation3 + $0xc0] sm:$0xf] %vm3803_vm6, %v11777_v22  ;;  %v11780_v26 = vpack.c.bf16 %v12860_v25, %v12860_v25  ;;  %v4286_v27 = vpop.f32.mrf.mxu1  ;;  %v13606_v22 = vld [vmem:[#allocation3] sm:$0xff]  }
 0x56b   :  { %4317 = vst.msk [vmem:[#allocation3 + $0x5c] sm:$0xf] %vm3803_vm6, %v11752_v24  ;;  %v11750_v28 = vpack.c.bf16 %v4286_v27, %v4286_v27  ;;  %v5000_v29 = vpop.f32.mrf.mxu0  ;;  %v13629_v24 = vld [vmem:[%s16026_s5 + $0x24] ss:$16 sps:$4 sm:$0xff]  }
 0x56c   :  { %5031 = vst.msk [vmem:[#allocation3 + $0xcc] sm:$0xf] %vm3803_vm6, %v11780_v26  ;;  %v11778_v30 = vpack.c.bf16 %v5000_v29, %v5000_v29 }
 0x56d   :  { %4315 = vst.msk [vmem:[#allocation3 + $0x54] sm:$0xf] %vm3803_vm6, %v11750_v28 }
 0x56e   :  { %5029 = vst.msk [vmem:[#allocation3 + $0xc4] sm:$0xf] %vm3803_vm6, %v11778_v30  ;;  %v13631_v30 = vld [vmem:[%s16026_s5 + $0x20] ss:$16 sps:$4 sm:$0xff]  }
 0x572   :  { %v13599_v9 = vld [vmem:[#allocation3 + $0x58] sm:$0xff]  }
 0x574   :  { %v12799_v31 = vpop.f32.mrf.mxu1  ;;  %v13601_v12 = vld [vmem:[#allocation3 + $0x50] sm:$0xff]  }
 0x575   :  { %v11759_v32 = vpack.c.bf16 %v12799_v31, %v12799_v31  ;;  %v12883_v33 = vpop.f32.mrf.mxu0 }
 0x576   :  { %v11787_v34 = vpack.c.bf16 %v12883_v33, %v12883_v33  ;;  %v4487_v35 = vpop.f32.mrf.mxu1 }
 0x577   :  { %4520 = vst.msk [vmem:[#allocation3 + $0x78] sm:$0xf] %vm3803_vm6, %v11759_v32  ;;  %v11757_v36 = vpack.c.bf16 %v4487_v35, %v4487_v35  ;;  %v5201_v37 = vpop.f32.mrf.mxu0 }
 0x578   :  { %5234 = vst.msk [vmem:[#allocation3 + $0xe8] sm:$0xf] %vm3803_vm6, %v11787_v34  ;;  %v11785_v38 = vpack.c.bf16 %v5201_v37, %v5201_v37  ;;  %v12800_v39 = vpop.f32.mrf.mxu1 }
 0x579   :  { %4518 = vst.msk [vmem:[#allocation3 + $0x70] sm:$0xf] %vm3803_vm6, %v11757_v36  ;;  %v11760_v40 = vpack.c.bf16 %v12800_v39, %v12800_v39  ;;  %v12884_v41 = vpop.f32.mrf.mxu0 }
 0x57a   :  { %5232 = vst.msk [vmem:[#allocation3 + $0xe0] sm:$0xf] %vm3803_vm6, %v11785_v38  ;;  %v11788_v42 = vpack.c.bf16 %v12884_v41, %v12884_v41  ;;  %v4490_v43 = vpop.f32.mrf.mxu1 }
 0x57b   :  { %4521 = vst.msk [vmem:[#allocation3 + $0x7c] sm:$0xf] %vm3803_vm6, %v11760_v40  ;;  %v11758_v44 = vpack.c.bf16 %v4490_v43, %v4490_v43  ;;  %v5204_v45 = vpop.f32.mrf.mxu0 }
 0x57c   :  { %5235 = vst.msk [vmem:[#allocation3 + $0xec] sm:$0xf] %vm3803_vm6, %v11788_v42  ;;  %v11786_v46 = vpack.c.bf16 %v5204_v45, %v5204_v45 }
 0x57d   :  { %4519 = vst.msk [vmem:[#allocation3 + $0x74] sm:$0xf] %vm3803_vm6, %v11758_v44 }
 0x57e   :  { %5233 = vst.msk [vmem:[#allocation3 + $0xe4] sm:$0xf] %vm3803_vm6, %v11786_v46 }
 0x582   :  { %v13591_v47 = vld [vmem:[#allocation3 + $0x78] sm:$0xff]  }
 0x583   :  { %12413 = vmatprep.subr.bf16.mxu0 %v13591_v47  ;;  %v13611_v46 = vld [vmem:[#allocation3 + $0xe8] sm:$0xff]  }
 0x584   :  { %v12823_v49 = vpop.f32.mrf.mxu1  ;;  %v13593_v50 = vld [vmem:[#allocation3 + $0x70] sm:$0xff]   ;;  %12414 = vmatpush3.bf16.msra.mxu0 %v13592_v48  ;;  %v13612_v47 = vld [vmem:[#allocation3 + $0xa8] sm:$0xff]  }
 0x585   :  { %v11767_v51 = vpack.c.bf16 %v12823_v49, %v12823_v49  ;;  %12415 = vmatprep.subr.bf16.mxu0 %v13593_v50  ;;  %v13613_v48 = vld [vmem:[#allocation3 + $0xe0] sm:$0xff]  }
 0x586   :  { %v4691_v52 = vpop.f32.mrf.mxu1  ;;  %v13614_v49 = vld [vmem:[#allocation3 + $0xa0] sm:$0xff]  }
 0x587   :  { %4724 = vst.msk [vmem:[#allocation3 + $0x98] sm:$0xf] %vm3803_vm6, %v11767_v51  ;;  %v11765_v54 = vpack.c.bf16 %v4691_v52, %v4691_v52 }
 0x588   :  { %v12824_v57 = vpop.f32.mrf.mxu1  ;;  %12416 = vmatpush3.bf16.msra.mxu0 %v13594_v55  ;;  %v13619_v55 = vld [vmem:[#allocation3 + $0xc8] sm:$0xff]  }
 0x589   :  { %4722 = vst.msk [vmem:[#allocation3 + $0x90] sm:$0xf] %vm3803_vm6, %v11765_v54  ;;  %v11768_v1 = vpack.c.bf16 %v12824_v57, %v12824_v57  ;;  %12417 = vmatprep.subr.bf16.mxu0 %v13595_v60  ;;  %v13623_v57 = vld [vmem:[#allocation3 + $0x88] sm:$0xff]   ;;  %v13624_v60 = vld [vmem:[#allocation3 + $0xc0] sm:$0xff]  }
 0x58a   :  { %v4694_v53 = vpop.f32.mrf.mxu1 }
 0x58b   :  { %4725 = vst.msk [vmem:[#allocation3 + $0x9c] sm:$0xf] %vm3803_vm6, %v11768_v1  ;;  %v11766_v59 = vpack.c.bf16 %v4694_v53, %v4694_v53  ;;  %v13625_v1 = vld [vmem:[#allocation3 + $0x80] sm:$0xff]   ;;  %v13626_v53 = vld [vmem:[%s16026_s5 + $0x8] ss:$16 sps:$4 sm:$0xff]  }
 0x58c   :  { %12418 = vmatpush3.bf16.msra.mxu0 %v13596_v4  ;;  %v13634_v4 = vld [vmem:[%s16026_s5 + $0x28] ss:$16 sps:$4 sm:$0xff]  }
 0x58d   :  { %4723 = vst.msk [vmem:[#allocation3 + $0x94] sm:$0xf] %vm3803_vm6, %v11766_v59  ;;  %12419 = vmatprep.subr.bf16.mxu0 %v13597_v6  ;;  %v13632_v59 = vld [vmem:[%s16026_s5 + $0x2c] ss:$16 sps:$4 sm:$0xff]  }
 0x590   :  { %12420 = vmatpush3.bf16.msra.mxu0 %v13598_v2 }
 0x591   :  { %12421 = vmatprep.subr.bf16.mxu0 %v13599_v9 }
 0x592   :  { %v13616_v51 = vld [vmem:[#allocation3 + $0x98] sm:$0xff]  }
 0x594   :  { %v12847_v11 = vpop.f32.mrf.mxu1  ;;  %12422 = vmatpush3.bf16.msra.mxu0 %v13600_v10  ;;  %v13618_v54 = vld [vmem:[#allocation3 + $0x90] sm:$0xff]  }
 0x595   :  { %v11775_v13 = vpack.c.bf16 %v12847_v11, %v12847_v11  ;;  %12423 = vmatprep.subr.bf16.mxu0 %v13601_v12 }
 0x596   :  { %v4895_v14 = vpop.f32.mrf.mxu1 }
 0x597   :  { %4928 = vst.msk [vmem:[#allocation3 + $0xb8] sm:$0xf] %vm3803_vm6, %v11775_v13  ;;  %v11773_v15 = vpack.c.bf16 %v4895_v14, %v4895_v14 }
 0x598   :  { %v12848_v61 = vpop.f32.mrf.mxu1  ;;  %12424 = vmatpush3.bf16.msra.mxu0 %v13602_v16 }
 0x599   :  { %4926 = vst.msk [vmem:[#allocation3 + $0xb0] sm:$0xf] %vm3803_vm6, %v11773_v15  ;;  %v11776_v18 = vpack.c.bf16 %v12848_v61, %v12848_v61  ;;  %12425 = vmatprep.subr.bf16.mxu0 %v13603_v17 }
 0x59a   :  { %v4898_v19 = vpop.f32.mrf.mxu1 }
 0x59b   :  { %4929 = vst.msk [vmem:[#allocation3 + $0xbc] sm:$0xf] %vm3803_vm6, %v11776_v18  ;;  %v11774_v20 = vpack.c.bf16 %v4898_v19, %v4898_v19 }
 0x59c   :  { %12426 = vmatpush3.bf16.msra.mxu0 %v13604_v58 }
 0x59d   :  { %4927 = vst.msk [vmem:[#allocation3 + $0xb4] sm:$0xf] %vm3803_vm6, %v11774_v20  ;;  %12427 = vmatprep.subr.bf16.mxu0 %v13605_v21 }
 0x5a0   :  { %12428 = vmatpush3.bf16.msra.mxu0 %v13606_v22 }
 0x5a2   :  { %v13608_v43 = vld [vmem:[#allocation3 + $0xb8] sm:$0xff]  }
 0x5a3   :  { %5675 = vmatmul.mubr.bf16.vlgmr.msra.gmra.mxu0 %v13620_v23 }
 0x5a4   :  { %v12871_v25 = vpop.f32.mrf.mxu1  ;;  %5682 = vmatprep.mubr.bf16.mxu0 %v13629_v24  ;;  %v13610_v45 = vld [vmem:[#allocation3 + $0xb0] sm:$0xff]  }
 0x5a5   :  { %v11783_v26 = vpack.c.bf16 %v12871_v25, %v12871_v25 }
 0x5a6   :  { %v5099_v27 = vpop.f32.mrf.mxu1 }
 0x5a7   :  { %5132 = vst.msk [vmem:[#allocation3 + $0xd8] sm:$0xf] %vm3803_vm6, %v11783_v26  ;;  %v11781_v28 = vpack.c.bf16 %v5099_v27, %v5099_v27 }
 0x5a8   :  { %v12872_v29 = vpop.f32.mrf.mxu1 }
 0x5a9   :  { %5130 = vst.msk [vmem:[#allocation3 + $0xd0] sm:$0xf] %vm3803_vm6, %v11781_v28  ;;  %v11784_v31 = vpack.c.bf16 %v12872_v29, %v12872_v29 }
 0x5aa   :  { %v5102_v32 = vpop.f32.mrf.mxu1 }
 0x5ab   :  { %5133 = vst.msk [vmem:[#allocation3 + $0xdc] sm:$0xf] %vm3803_vm6, %v11784_v31  ;;  %v11782_v33 = vpack.c.bf16 %v5102_v32, %v5102_v32  ;;  %5683 = vmatmul.mubr.bf16.gmra.mxu0 %v13631_v30 }
 0x5ad   :  { %5131 = vst.msk [vmem:[#allocation3 + $0xd4] sm:$0xf] %vm3803_vm6, %v11782_v33 }
 0x5b2   :  { %v13615_v50 = vld [vmem:[#allocation3 + $0xd8] sm:$0xff]  }
 0x5b4   :  { %v12895_v34 = vpop.f32.mrf.mxu1  ;;  %v13617_v52 = vld [vmem:[#allocation3 + $0xd0] sm:$0xff]  }
 0x5b5   :  { %v11791_v35 = vpack.c.bf16 %v12895_v34, %v12895_v34 }
 0x5b6   :  { %v5303_v36 = vpop.f32.mrf.mxu1 }
 0x5b7   :  { %5336 = vst.msk [vmem:[#allocation3 + $0xf8] sm:$0xf] %vm3803_vm6, %v11791_v35  ;;  %v11789_v37 = vpack.c.bf16 %v5303_v36, %v5303_v36 }
 0x5b8   :  { %v12896_v38 = vpop.f32.mrf.mxu1 }
 0x5b9   :  { %5334 = vst.msk [vmem:[#allocation3 + $0xf0] sm:$0xf] %vm3803_vm6, %v11789_v37  ;;  %v11792_v39 = vpack.c.bf16 %v12896_v38, %v12896_v38 }
 0x5ba   :  { %v5306_v40 = vpop.f32.mrf.mxu1 }
 0x5bb   :  { %5337 = vst.msk [vmem:[#allocation3 + $0xfc] sm:$0xf] %vm3803_vm6, %v11792_v39  ;;  %v11790_v41 = vpack.c.bf16 %v5306_v40, %v5306_v40 }
 0x5bd   :  { %5335 = vst.msk [vmem:[#allocation3 + $0xf4] sm:$0xf] %vm3803_vm6, %v11790_v41 }
 0x5c2   :  { %v13607_v42 = vld [vmem:[#allocation3 + $0xf8] sm:$0xff]  }
 0x5c3   :  { %12441 = vmatprep.subr.bf16.mxu1 %v13607_v42 }
 0x5c4   :  { %v13609_v44 = vld [vmem:[#allocation3 + $0xf0] sm:$0xff]   ;;  %12442 = vmatpush3.bf16.msra.mxu1 %v13608_v43 }
 0x5c5   :  { %12443 = vmatprep.subr.bf16.mxu1 %v13609_v44 }
 0x5c8   :  { %12444 = vmatpush3.bf16.msra.mxu1 %v13610_v45  ;;  %v13635_v45 = vld [vmem:[%s16027_s6 + $0x8] sm:$0xff]  }
 0x5c9   :  { %12445 = vmatprep.subr.bf16.mxu1 %v13611_v46  ;;  %v13636_v46 = vld [vmem:[%s16027_s6] sm:$0xff]  }
 0x5ca   :  { %12897 = vmatprep.subr.bf16.mxu0 %v13636_v46 }
 0x5cb   :  { %12898 = vmatpush3.bf16.msra.mxu0 %v13636_v46  ;;  %v13642_v46 = vld [vmem:[%s16027_s6 + $0x30] sm:$0xff]  }
 0x5cc   :  { %12446 = vmatpush3.bf16.msra.mxu1 %v13612_v47  ;;  %v15382_v47 = vld [vmem:[%s16027_s6 + $0x18] sm:$0xff]  }
 0x5cd   :  { %12447 = vmatprep.subr.bf16.mxu1 %v13613_v48  ;;  %v15388_v48 = vld [vmem:[%s16027_s6 + $0x10] sm:$0xff]  }
 0x5ce   :  { %12909 = vmatprep.subr.bf16.mxu0 %v15388_v48 }
 0x5d0   :  { %12448 = vmatpush3.bf16.msra.mxu1 %v13614_v49 }
 0x5d1   :  { %12449 = vmatprep.subr.bf16.mxu1 %v13615_v50 }
 0x5d4   :  { %12450 = vmatpush3.bf16.msra.mxu1 %v13616_v51 }
 0x5d5   :  { %12451 = vmatprep.subr.bf16.mxu1 %v13617_v52 }
 0x5d8   :  { %12452 = vmatpush3.bf16.msra.mxu1 %v13618_v54 }
 0x5d9   :  { %12453 = vmatprep.subr.bf16.mxu1 %v13619_v55 }
 0x5dc   :  { %12454 = vmatpush3.bf16.msra.mxu1 %v13623_v57 }
 0x5dd   :  { %12455 = vmatprep.subr.bf16.mxu1 %v13624_v60 }
 0x5e0   :  { %12456 = vmatpush3.bf16.msra.mxu1 %v13625_v1 }
 0x5e1   :  { %12903 = vmatprep.subr.bf16.mxu1 %v13635_v45 }
 0x5e3   :  { %5724 = vmatmul.mubr.bf16.vlgmr.msra.gmra.mxu1 %v13626_v53 }
 0x5e4   :  { %5731 = vmatprep.mubr.bf16.mxu1 %v13632_v59  ;;  %12904 = vmatpush3.bf16.msra.mxu1 %v13635_v45  ;;  %v13641_v45 = vld [vmem:[%s16027_s6 + $0x38] sm:$0xff]  }
 0x5e5   :  { %12915 = vmatprep.subr.bf16.mxu1 %v15382_v47 }
 0x5eb   :  { %5732 = vmatmul.mubr.bf16.gmra.mxu1 %v13634_v4 }
 0x663   :  { %v12429_v6 = vpop.f32.mrf.mxu0 }
 0x665   :  { %v12430_v2 = vpop.f32.mrf.mxu0 }
 0x666   :  { %v12431_v14 = vadd.f32 %v12430_v2, %v12429_v6 }
 0x667   :  { %v12432_v9 = vpop.f32.mrf.mxu0 }
 0x669   :  { %v12433_v10 = vpop.f32.mrf.mxu0 }
 0x66a   :  { %v12434_v19 = vadd.f32 %v12433_v10, %v12432_v9 }
 0x66b   :  { %v12435_v11 = vpop.f32.mrf.mxu0 }
 0x66d   :  { %v12436_v16 = vpop.f32.mrf.mxu0 }
 0x66e   :  { %v12437_v25 = vadd.f32 %v12436_v16, %v12435_v11 }
 0x66f   :  { %v12438_v20 = vpop.f32.mrf.mxu0 }
 0x671   :  { %v12439_v27 = vpop.f32.mrf.mxu0 }
 0x672   :  { %v12440_v34 = vadd.f32 %v12439_v27, %v12438_v20 }
 0x6a3   :  { %v12457_v12 = vpop.f32.mrf.mxu1 }
 0x6a5   :  { %v12458_v13 = vpop.f32.mrf.mxu1 }
 0x6a6   :  { %v12459_v15 = vadd.f32 %v12458_v13, %v12457_v12 }
 0x6a7   :  { %v12460_v61 = vpop.f32.mrf.mxu1 }
 0x6a8   :  { %v15345_v17 = vadd.f32 %v12459_v15, %v12431_v14 }
 0x6a9   :  { %v12461_v18 = vpop.f32.mrf.mxu1 }
 0x6aa   :  { %v12462_v58 = vadd.f32 %v12461_v18, %v12460_v61  ;;  %v5745_v21 = vsel %vm5744_vm7, %v15345_v17, 0.0  ;;  %v5740_v22 = vmul.f32 %v15345_v17, %v15345_v17 }
 0x6ab   :  { %v12463_v23 = vpop.f32.mrf.mxu1  ;;  %5746 = vadd.xlane.f32.xlu0 %v5745_v21 }
 0x6ac   :  { %v15351_v24 = vadd.f32 %v12462_v58, %v12434_v19  ;;  %v5757_v30 = vsel %vm5744_vm7, %v5740_v22, 0.0 }
 0x6ad   :  { %v12464_v26 = vpop.f32.mrf.mxu1 }
 0x6ae   :  { %v12465_v28 = vadd.f32 %v12464_v26, %v12463_v23  ;;  %v5748_v29 = vsel %vm5744_vm7, %v15351_v24, 0.0  ;;  %v5741_v31 = vmul.f32 %v15351_v24, %v15351_v24 }
 0x6af   :  { %v12466_v32 = vpop.f32.mrf.mxu1  ;;  %5749 = vadd.xlane.f32.xlu1 %v5748_v29  ;;  %5758 = vadd.xlane.f32.xlu0 %v5757_v30 }
 0x6b0   :  { %v15358_v33 = vadd.f32 %v12465_v28, %v12437_v25  ;;  %v5760_v37 = vsel %vm5744_vm7, %v5741_v31, 0.0 }
 0x6b1   :  { %v12467_v35 = vpop.f32.mrf.mxu1 }
 0x6b2   :  { %v12468_v36 = vadd.f32 %v12467_v35, %v12466_v32  ;;  %v5751_v38 = vsel %vm5744_vm7, %v15358_v33, 0.0  ;;  %v5742_v39 = vmul.f32 %v15358_v33, %v15358_v33 }
 0x6b3   :  { %5761 = vadd.xlane.f32.xlu1 %v5760_v37  ;;  %5752 = vadd.xlane.f32.xlu0 %v5751_v38 }
 0x6b4   :  { %v15365_v40 = vadd.f32 %v12468_v36, %v12440_v34  ;;  %v5763_v42 = vsel %vm5744_vm7, %v5742_v39, 0.0 }
 0x6b6   :  { %v5754_v41 = vsel %vm5744_vm7, %v15365_v40, 0.0  ;;  %v5743_v43 = vmul.f32 %v15365_v40, %v15365_v40 }
 0x6b7   :  { %5755 = vadd.xlane.f32.xlu1 %v5754_v41  ;;  %5764 = vadd.xlane.f32.xlu0 %v5763_v42 }
 0x6b8   :  { %v5766_v44 = vsel %vm5744_vm7, %v5743_v43, 0.0 }
 0x6bb   :  { %5767 = vadd.xlane.f32.xlu1 %v5766_v44  ;;  %v13640_v44 = vld [vmem:[%s16027_s6 + $0x20] sm:$0xff]  }
 0x734   :  { %v5747_v49 = vpop.xlane.xlu0 %5746 }
 0x735   :  { %v5770_v50 = vmul.f32 0.0625, %v5747_v49  ;;  %v13666_v49 = vld [vmem:[%s16028_s7 + $0x4] ss:$12 sps:$4 sm:$0xff]  }
 0x737   :  { %v5778_v54 = vmul.f32 %v5770_v50, %v5770_v50  ;;  %v5790_v28 = vsub.f32 %v15345_v17, %v5770_v50 }
 0x738   :  { %v5750_v51 = vpop.xlane.xlu1 %5749  ;;  %v5759_v52 = vpop.xlane.xlu0 %5758 }
 0x739   :  { %v5771_v55 = vmul.f32 0.0625, %v5750_v51  ;;  %v5774_v57 = vmul.f32 0.0625, %v5759_v52 }
 0x73b   :  { %v5782_v60 = vsub.f32 %v5774_v57, %v5778_v54  ;;  %v5779_v59 = vmul.f32 %v5771_v55, %v5771_v55  ;;  %v5791_v29 = vsub.f32 %v15351_v24, %v5771_v55 }
 0x73c   :  { %v5762_v1 = vpop.xlane.xlu1 %5761  ;;  %v5753_v53 = vpop.xlane.xlu0 %5752 }
 0x73d   :  { %v5786_v4 = vmax.f32 %v5782_v60, 0.0  ;;  %v5775_v6 = vmul.f32 0.0625, %v5762_v1  ;;  %v5772_v2 = vmul.f32 0.0625, %v5753_v53 }
 0x73f   :  { %v5794_v9 = vadd.f32 1e-05, %v5786_v4  ;;  %v5783_v10 = vsub.f32 %v5775_v6, %v5779_v59  ;;  %v5780_v11 = vmul.f32 %v5772_v2, %v5772_v2  ;;  %v5792_v38 = vsub.f32 %v15358_v33, %v5772_v2 }
 0x740   :  { %v5756_v12 = vpop.xlane.xlu1 %5755  ;;  %v5765_v13 = vpop.xlane.xlu0 %5764 }
 0x741   :  { %13783 = vrsqrt.f32 %v5794_v9  ;;  %v5787_v14 = vmax.f32 %v5783_v10, 0.0  ;;  %v5773_v15 = vmul.f32 0.0625, %v5756_v12  ;;  %v5776_v16 = vmul.f32 0.0625, %v5765_v13 }
 0x743   :  { %v5795_v61 = vadd.f32 1e-05, %v5787_v14  ;;  %v5784_v18 = vsub.f32 %v5776_v16, %v5780_v11  ;;  %v5781_v20 = vmul.f32 %v5773_v15, %v5773_v15  ;;  %v5793_v17 = vsub.f32 %v15365_v40, %v5773_v15  ;;  %v13639_v40 = vld [vmem:[%s16027_s6 + $0x28] sm:$0xff]  }
 0x744   :  { %v5768_v19 = vpop.xlane.xlu1 %5767 }
 0x745   :  { %13785 = vrsqrt.f32 %v5795_v61  ;;  %v5788_v58 = vmax.f32 %v5784_v18, 0.0  ;;  %v5777_v21 = vmul.f32 0.0625, %v5768_v19 }
 0x747   :  { %v5796_v22 = vadd.f32 1e-05, %v5788_v58  ;;  %v5785_v23 = vsub.f32 %v5777_v21, %v5781_v20 }
 0x749   :  { %13787 = vrsqrt.f32 %v5796_v22  ;;  %v5789_v25 = vmax.f32 %v5785_v23, 0.0 }
 0x74b   :  { %v5797_v26 = vadd.f32 1e-05, %v5789_v25 }
 0x74d   :  { %13789 = vrsqrt.f32 %v5797_v26 }
 0x74e   :  { %v13784_v27 = vpop.eup %13783 }
 0x74f   :  { %v15393_v30 = vmul.f32 %v13784_v27, %v5790_v28 }
 0x751   :  { %v5806_v34 = vmax.f32 %v15393_v30, 0.0 }
 0x752   :  { %v13786_v31 = vpop.eup %13785 }
 0x753   :  { %v15395_v32 = vmul.f32 %v13786_v31, %v5791_v29 }
 0x755   :  { %v5807_v35 = vmax.f32 %v15395_v32, 0.0 }
 0x756   :  { %v13788_v36 = vpop.eup %13787 }
 0x757   :  { %v5810_v37 = vpack.c.bf16 %v5807_v35, %v5806_v34  ;;  %v15405_v24 = vmul.f32 %v13788_v36, %v5792_v38 }
 0x759   :  { %12899 = vmatprep.mubr.msk.bf16.mxu0 %vm5744_vm7, %v5810_v37  ;;  %12905 = vmatprep.mubr.msk.bf16.mxu1 %vm5744_vm7, %v5810_v37  ;;  %v5808_v42 = vmax.f32 %v15405_v24, 0.0  ;;  %v13711_v24 = vld [vmem:[%s16027_s6 + $0x18] sm:$0xff]  }
 0x75a   :  { %v13790_v39 = vpop.eup %13789 }
 0x75b   :  { %v15409_v41 = vmul.f32 %v13790_v39, %v5793_v17 }
 0x75d   :  { %v5809_v43 = vmax.f32 %v15409_v41, 0.0  ;;  %v13712_v41 = vld [vmem:[%s16027_s6 + $0x28] sm:$0xff]  }
 0x75f   :  { %v5811_v33 = vpack.c.bf16 %v5809_v43, %v5808_v42 }
 0x761   :  { %12900 = vmatmul.mubr.msk.bf16.vlgmr.msra.gmra.mxu0 %vm5744_vm7, %v5811_v33  ;;  %12906 = vmatmul.mubr.msk.bf16.vlgmr.msra.gmra.mxu1 %vm5744_vm7, %v5811_v33 }
 0x762   :  { %12916 = vmatpush3.bf16.msra.mxu1 %v15382_v47  ;;  %12911 = vmatprep.mubr.msk.bf16.mxu0 %vm5744_vm7, %v5810_v37  ;;  %v13643_v47 = vld [vmem:[%s16027_s6 + $0x40] sm:$0xff]  }
 0x763   :  { %12917 = vmatprep.mubr.msk.bf16.mxu1 %vm5744_vm7, %v5810_v37  ;;  %12910 = vmatpush3.bf16.msra.mxu0 %v15388_v48  ;;  %v13661_v48 = vld [vmem:[%s16028_s7 + $0x8] ss:$12 sps:$4 sm:$0xff]  }
 0x764   :  { %12927 = vmatprep.subr.bf16.mxu1 %v13639_v40  ;;  %12921 = vmatprep.subr.bf16.mxu0 %v13640_v44 }
 0x769   :  { %12912 = vmatmul.mubr.msk.bf16.vlgmr.msra.gmra.mxu0 %vm5744_vm7, %v5811_v33  ;;  %12918 = vmatmul.mubr.msk.bf16.vlgmr.msra.gmra.mxu1 %vm5744_vm7, %v5811_v33 }
 0x76a   :  { %12928 = vmatpush3.bf16.msra.mxu1 %v13639_v40  ;;  %12923 = vmatprep.mubr.msk.bf16.mxu0 %vm5744_vm7, %v5810_v37 }
 0x76b   :  { %12929 = vmatprep.mubr.msk.bf16.mxu1 %vm5744_vm7, %v5810_v37  ;;  %12922 = vmatpush3.bf16.msra.mxu0 %v13640_v44 }
 0x76c   :  { %12939 = vmatprep.subr.bf16.mxu1 %v13641_v45  ;;  %12933 = vmatprep.subr.bf16.mxu0 %v13642_v46 }
 0x771   :  { %12924 = vmatmul.mubr.msk.bf16.vlgmr.msra.gmra.mxu0 %vm5744_vm7, %v5811_v33  ;;  %12930 = vmatmul.mubr.msk.bf16.vlgmr.msra.gmra.mxu1 %vm5744_vm7, %v5811_v33 }
 0x772   :  { %12940 = vmatpush3.bf16.msra.mxu1 %v13641_v45  ;;  %12935 = vmatprep.mubr.msk.bf16.mxu0 %vm5744_vm7, %v5810_v37 }
 0x773   :  { %12941 = vmatprep.mubr.msk.bf16.mxu1 %vm5744_vm7, %v5810_v37  ;;  %12934 = vmatpush3.bf16.msra.mxu0 %v13642_v46 }
 0x774   :  { %12945 = vmatprep.subr.bf16.mxu0 %v13643_v47 }
 0x779   :  { %12936 = vmatmul.mubr.msk.bf16.vlgmr.msra.gmra.mxu0 %vm5744_vm7, %v5811_v33  ;;  %12942 = vmatmul.mubr.msk.bf16.vlgmr.msra.gmra.mxu1 %vm5744_vm7, %v5811_v33 }
 0x77a   :  { %12947 = vmatprep.mubr.msk.bf16.mxu0 %vm5744_vm7, %v5810_v37  ;;  %12946 = vmatpush3.bf16.msra.mxu0 %v13643_v47 }
 0x77b   :  { %6740 = vmatprep.mubr.bf16.mxu1 %v13666_v49 }
 0x781   :  { %12948 = vmatmul.mubr.msk.bf16.vlgmr.msra.gmra.mxu0 %vm5744_vm7, %v5811_v33 }
 0x782   :  { %12955 = vmatprep.mubr.msk.bf16.mxu0 %vm6701_vm8, %v13661_v48 }
 0x821   :  { %v12901_v50 = vpop.f32.mrf.mxu0  ;;  %v12907_v51 = vpop.f32.mrf.mxu1 }
 0x822   :  { %v11795_v52 = vpack.c.bf16 %v12901_v50, %v12901_v50  ;;  %v11799_v54 = vpack.c.bf16 %v12907_v51, %v12907_v51 }
 0x823   :  { %v5860_v55 = vpop.f32.mrf.mxu0  ;;  %v5938_v57 = vpop.f32.mrf.mxu1 }
 0x824   :  { %5893 = vst.msk [vmem:[#allocation4 + $0x8] sm:$0xf] %vm3803_vm6, %v11795_v52  ;;  %5971 = vst.msk [vmem:[#allocation4 + $0x18] sm:$0xf] %vm3803_vm6, %v11799_v54  ;;  %v11793_v60 = vpack.c.bf16 %v5860_v55, %v5860_v55  ;;  %v11797_v1 = vpack.c.bf16 %v5938_v57, %v5938_v57 }
 0x825   :  { %v12902_v53 = vpop.f32.mrf.mxu0  ;;  %v12908_v59 = vpop.f32.mrf.mxu1 }
 0x826   :  { %5891 = vst.msk [vmem:[#allocation4] sm:$0xf] %vm3803_vm6, %v11793_v60  ;;  %5969 = vst.msk [vmem:[#allocation4 + $0x10] sm:$0xf] %vm3803_vm6, %v11797_v1  ;;  %v11796_v4 = vpack.c.bf16 %v12902_v53, %v12902_v53  ;;  %v11800_v6 = vpack.c.bf16 %v12908_v59, %v12908_v59 }
 0x827   :  { %v5863_v2 = vpop.f32.mrf.mxu0  ;;  %v5941_v9 = vpop.f32.mrf.mxu1 }
 0x828   :  { %5894 = vst.msk [vmem:[#allocation4 + $0xc] sm:$0xf] %vm3803_vm6, %v11796_v4  ;;  %5972 = vst.msk [vmem:[#allocation4 + $0x1c] sm:$0xf] %vm3803_vm6, %v11800_v6  ;;  %v11794_v10 = vpack.c.bf16 %v5863_v2, %v5863_v2  ;;  %v11798_v11 = vpack.c.bf16 %v5941_v9, %v5941_v9 }
 0x829   :  { %v12913_v12 = vpop.f32.mrf.mxu0  ;;  %v12919_v13 = vpop.f32.mrf.mxu1 }
 0x82a   :  { %5892 = vst.msk [vmem:[#allocation4 + $0x4] sm:$0xf] %vm3803_vm6, %v11794_v10  ;;  %5970 = vst.msk [vmem:[#allocation4 + $0x14] sm:$0xf] %vm3803_vm6, %v11798_v11  ;;  %v11803_v14 = vpack.c.bf16 %v12913_v12, %v12913_v12  ;;  %v11807_v15 = vpack.c.bf16 %v12919_v13, %v12919_v13 }
 0x82b   :  { %v6016_v16 = vpop.f32.mrf.mxu0  ;;  %v6094_v61 = vpop.f32.mrf.mxu1 }
 0x82c   :  { %6049 = vst.msk [vmem:[#allocation4 + $0x28] sm:$0xf] %vm3803_vm6, %v11803_v14  ;;  %6127 = vst.msk [vmem:[#allocation4 + $0x38] sm:$0xf] %vm3803_vm6, %v11807_v15  ;;  %v11801_v18 = vpack.c.bf16 %v6016_v16, %v6016_v16  ;;  %v11805_v19 = vpack.c.bf16 %v6094_v61, %v6094_v61 }
 0x82d   :  { %v12914_v20 = vpop.f32.mrf.mxu0  ;;  %v12920_v58 = vpop.f32.mrf.mxu1 }
 0x82e   :  { %6047 = vst.msk [vmem:[#allocation4 + $0x20] sm:$0xf] %vm3803_vm6, %v11801_v18  ;;  %6125 = vst.msk [vmem:[#allocation4 + $0x30] sm:$0xf] %vm3803_vm6, %v11805_v19  ;;  %v11804_v21 = vpack.c.bf16 %v12914_v20, %v12914_v20  ;;  %v11808_v22 = vpack.c.bf16 %v12920_v58, %v12920_v58 }
 0x82f   :  { %v6019_v23 = vpop.f32.mrf.mxu0  ;;  %v6097_v25 = vpop.f32.mrf.mxu1 }
 0x830   :  { %6050 = vst.msk [vmem:[#allocation4 + $0x2c] sm:$0xf] %vm3803_vm6, %v11804_v21  ;;  %6128 = vst.msk [vmem:[#allocation4 + $0x3c] sm:$0xf] %vm3803_vm6, %v11808_v22  ;;  %v11802_v26 = vpack.c.bf16 %v6019_v23, %v6019_v23  ;;  %v11806_v27 = vpack.c.bf16 %v6097_v25, %v6097_v25 }
 0x831   :  { %v12925_v28 = vpop.f32.mrf.mxu0  ;;  %v12931_v29 = vpop.f32.mrf.mxu1 }
 0x832   :  { %6048 = vst.msk [vmem:[#allocation4 + $0x24] sm:$0xf] %vm3803_vm6, %v11802_v26  ;;  %6126 = vst.msk [vmem:[#allocation4 + $0x34] sm:$0xf] %vm3803_vm6, %v11806_v27  ;;  %v11811_v31 = vpack.c.bf16 %v12925_v28, %v12925_v28  ;;  %v11815_v36 = vpack.c.bf16 %v12931_v29, %v12931_v29 }
 0x833   :  { %v6172_v37 = vpop.f32.mrf.mxu0  ;;  %v6250_v38 = vpop.f32.mrf.mxu1 }
 0x834   :  { %6205 = vst.msk [vmem:[#allocation4 + $0x48] sm:$0xf] %vm3803_vm6, %v11811_v31  ;;  %6283 = vst.msk [vmem:[#allocation4 + $0x58] sm:$0xf] %vm3803_vm6, %v11815_v36  ;;  %v11809_v17 = vpack.c.bf16 %v6172_v37, %v6172_v37  ;;  %v11813_v39 = vpack.c.bf16 %v6250_v38, %v6250_v38  ;;  %v13662_v36 = vld [vmem:[%s16028_s7 + $0x20] ss:$12 sps:$4 sm:$0xff]  }
 0x835   :  { %v12926_v33 = vpop.f32.mrf.mxu0  ;;  %v12932_v40 = vpop.f32.mrf.mxu1  ;;  %v13655_v37 = vld [vmem:[#allocation4 + $0x18] sm:$0xff]  }
 0x836   :  { %6203 = vst.msk [vmem:[#allocation4 + $0x40] sm:$0xf] %vm3803_vm6, %v11809_v17  ;;  %6281 = vst.msk [vmem:[#allocation4 + $0x50] sm:$0xf] %vm3803_vm6, %v11813_v39  ;;  %v11812_v44 = vpack.c.bf16 %v12926_v33, %v12926_v33  ;;  %v11816_v45 = vpack.c.bf16 %v12932_v40, %v12932_v40  ;;  %v13657_v17 = vld [vmem:[#allocation4 + $0x10] sm:$0xff]   ;;  %v13659_v33 = vld [vmem:[#allocation4 + $0x8] sm:$0xff]  }
 0x837   :  { %v6175_v46 = vpop.f32.mrf.mxu0  ;;  %v6253_v47 = vpop.f32.mrf.mxu1  ;;  %v13645_v58 = vld [vmem:[#allocation4 + $0x38] sm:$0xff]   ;;  %v13650_v26 = vld [vmem:[#allocation4 + $0x28] sm:$0xff]  }
 0x838   :  { %6206 = vst.msk [vmem:[#allocation4 + $0x4c] sm:$0xf] %vm3803_vm6, %v11812_v44  ;;  %6284 = vst.msk [vmem:[#allocation4 + $0x5c] sm:$0xf] %vm3803_vm6, %v11816_v45  ;;  %v11810_v48 = vpack.c.bf16 %v6175_v46, %v6175_v46  ;;  %v11814_v49 = vpack.c.bf16 %v6253_v47, %v6253_v47  ;;  %v13663_v44 = vld [vmem:[#allocation4] sm:$0xff]  }
 0x839   :  { %v12937_v50 = vpop.f32.mrf.mxu0  ;;  %v12943_v51 = vpop.f32.mrf.mxu1  ;;  %v13647_v22 = vld [vmem:[#allocation4 + $0x30] sm:$0xff]   ;;  %v13653_v29 = vld [vmem:[#allocation4 + $0x20] sm:$0xff]   ;;  %v13667_v46 = vld [vmem:[%s16028_s7 + $0x1c] ss:$12 sps:$4 sm:$0xff]  }
 0x83a   :  { %6204 = vst.msk [vmem:[#allocation4 + $0x44] sm:$0xf] %vm3803_vm6, %v11810_v48  ;;  %6282 = vst.msk [vmem:[#allocation4 + $0x54] sm:$0xf] %vm3803_vm6, %v11814_v49  ;;  %v11819_v52 = vpack.c.bf16 %v12937_v50, %v12937_v50  ;;  %v11823_v54 = vpack.c.bf16 %v12943_v51, %v12943_v51  ;;  %v13664_v45 = vld [vmem:[%s16028_s7] ss:$12 sps:$4 sm:$0xff]  }
 0x83b   :  { %v6328_v55 = vpop.f32.mrf.mxu0  ;;  %v6406_v57 = vpop.f32.mrf.mxu1  ;;  %v13669_v47 = vld [vmem:[%s16028_s7 + $0x18] ss:$12 sps:$4 sm:$0xff]  }
 0x83c   :  { %6361 = vst.msk [vmem:[#allocation4 + $0x68] sm:$0xf] %vm3803_vm6, %v11819_v52  ;;  %6439 = vst.msk [vmem:[#allocation4 + $0x78] sm:$0xf] %vm3803_vm6, %v11823_v54  ;;  %v11817_v60 = vpack.c.bf16 %v6328_v55, %v6328_v55  ;;  %v11821_v1 = vpack.c.bf16 %v6406_v57, %v6406_v57 }
 0x83d   :  { %v12938_v53 = vpop.f32.mrf.mxu0  ;;  %v12944_v59 = vpop.f32.mrf.mxu1 }
 0x83e   :  { %6359 = vst.msk [vmem:[#allocation4 + $0x60] sm:$0xf] %vm3803_vm6, %v11817_v60  ;;  %6437 = vst.msk [vmem:[#allocation4 + $0x70] sm:$0xf] %vm3803_vm6, %v11821_v1  ;;  %v11820_v4 = vpack.c.bf16 %v12938_v53, %v12938_v53  ;;  %v11824_v6 = vpack.c.bf16 %v12944_v59, %v12944_v59 }
 0x83f   :  { %v6331_v2 = vpop.f32.mrf.mxu0  ;;  %v6409_v9 = vpop.f32.mrf.mxu1  ;;  %v13654_v31 = vld [vmem:[#allocation4 + $0x58] sm:$0xff]   ;;  %v13658_v39 = vld [vmem:[#allocation4 + $0x48] sm:$0xff]  }
 0x840   :  { %6362 = vst.msk [vmem:[#allocation4 + $0x6c] sm:$0xf] %vm3803_vm6, %v11820_v4  ;;  %6440 = vst.msk [vmem:[#allocation4 + $0x7c] sm:$0xf] %vm3803_vm6, %v11824_v6  ;;  %v11818_v10 = vpack.c.bf16 %v6331_v2, %v6331_v2  ;;  %v11822_v11 = vpack.c.bf16 %v6409_v9, %v6409_v9 }
 0x841   :  { %v12949_v12 = vpop.f32.mrf.mxu0  ;;  %v13656_v38 = vld [vmem:[#allocation4 + $0x50] sm:$0xff]   ;;  %v13660_v40 = vld [vmem:[#allocation4 + $0x40] sm:$0xff]  }
 0x842   :  { %6360 = vst.msk [vmem:[#allocation4 + $0x64] sm:$0xf] %vm3803_vm6, %v11818_v10  ;;  %6438 = vst.msk [vmem:[#allocation4 + $0x74] sm:$0xf] %vm3803_vm6, %v11822_v11  ;;  %v11827_v13 = vpack.c.bf16 %v12949_v12, %v12949_v12 }
 0x843   :  { %v6484_v14 = vpop.f32.mrf.mxu0 }
 0x844   :  { %6517 = vst.msk [vmem:[#allocation4 + $0x88] sm:$0xf] %vm3803_vm6, %v11827_v13  ;;  %v11825_v15 = vpack.c.bf16 %v6484_v14, %v6484_v14 }
 0x845   :  { %v12950_v16 = vpop.f32.mrf.mxu0 }
 0x846   :  { %6515 = vst.msk [vmem:[#allocation4 + $0x80] sm:$0xf] %vm3803_vm6, %v11825_v15  ;;  %v11828_v61 = vpack.c.bf16 %v12950_v16, %v12950_v16 }
 0x847   :  { %v6487_v18 = vpop.f32.mrf.mxu0  ;;  %v13644_v19 = vld [vmem:[#allocation4 + $0x78] sm:$0xff]   ;;  %v13648_v23 = vld [vmem:[#allocation4 + $0x68] sm:$0xff]  }
 0x848   :  { %6518 = vst.msk [vmem:[#allocation4 + $0x8c] sm:$0xf] %vm3803_vm6, %v11828_v61  ;;  %v11826_v20 = vpack.c.bf16 %v6487_v18, %v6487_v18  ;;  %12496 = vmatprep.subr.bf16.mxu1 %v13644_v19 }
 0x849   :  { %v13646_v21 = vld [vmem:[#allocation4 + $0x70] sm:$0xff]   ;;  %12497 = vmatpush3.bf16.msra.mxu1 %v13645_v58  ;;  %v13651_v27 = vld [vmem:[#allocation4 + $0x60] sm:$0xff]  }
 0x84a   :  { %6516 = vst.msk [vmem:[#allocation4 + $0x84] sm:$0xf] %vm3803_vm6, %v11826_v20  ;;  %12498 = vmatprep.subr.bf16.mxu1 %v13646_v21 }
 0x84d   :  { %12499 = vmatpush3.bf16.msra.mxu1 %v13647_v22 }
 0x84e   :  { %12500 = vmatprep.subr.bf16.mxu1 %v13648_v23 }
 0x84f   :  { %v13649_v25 = vld [vmem:[#allocation4 + $0x88] sm:$0xff]  }
 0x850   :  { %12951 = vmatprep.subr.bf16.mxu0 %v13649_v25 }
 0x851   :  { %v13652_v28 = vld [vmem:[#allocation4 + $0x80] sm:$0xff]   ;;  %12501 = vmatpush3.bf16.msra.mxu1 %v13650_v26  ;;  %12952 = vmatpush3.bf16.msra.mxu0 %v13649_v25 }
 0x852   :  { %12502 = vmatprep.subr.bf16.mxu1 %v13651_v27  ;;  %12953 = vmatprep.subr.bf16.mxu0 %v13652_v28  ;;  %v13670_v26 = vld [vmem:[%s16027_s6] sm:$0xff]  }
 0x853   :  { %v13671_v27 = vld [vmem:[%s16027_s6 + $0x20] sm:$0xff]  }
 0x855   :  { %12503 = vmatpush3.bf16.msra.mxu1 %v13653_v29  ;;  %12954 = vmatpush3.bf16.msra.mxu0 %v13652_v28  ;;  %v15543_v28 = vld [vmem:[%s16027_s6 + $0x8] sm:$0xff]   ;;  %v15549_v29 = vld [vmem:[%s16027_s6 + $0x30] sm:$0xff]  }
 0x856   :  { %12504 = vmatprep.subr.bf16.mxu1 %v13654_v31  ;;  %12959 = vmatprep.subr.bf16.mxu0 %v13670_v26 }
 0x858   :  { %12956 = vmatmul.mubr.msk.bf16.vlgmr.msra.gmra.mxu0 %vm6701_vm8, %v13662_v36 }
 0x859   :  { %12505 = vmatpush3.bf16.msra.mxu1 %v13655_v37  ;;  %12960 = vmatpush3.bf16.msra.mxu0 %v13670_v26 }
 0x85a   :  { %12506 = vmatprep.subr.bf16.mxu1 %v13656_v38  ;;  %12965 = vmatprep.subr.bf16.mxu0 %v15543_v28 }
 0x85d   :  { %12507 = vmatpush3.bf16.msra.mxu1 %v13657_v17 }
 0x85e   :  { %12508 = vmatprep.subr.bf16.mxu1 %v13658_v39 }
 0x861   :  { %12509 = vmatpush3.bf16.msra.mxu1 %v13659_v33 }
 0x862   :  { %12510 = vmatprep.subr.bf16.mxu1 %v13660_v40 }
 0x865   :  { %12511 = vmatpush3.bf16.msra.mxu1 %v13663_v44 }
 0x866   :  { %12983 = vmatprep.subr.bf16.mxu1 %v13671_v27 }
 0x868   :  { %6741 = vmatmul.mubr.bf16.vlgmr.msra.gmra.mxu1 %v13664_v45 }
 0x869   :  { %6748 = vmatprep.mubr.bf16.mxu1 %v13667_v46  ;;  %12984 = vmatpush3.bf16.msra.mxu1 %v13671_v27 }
 0x86a   :  { %12995 = vmatprep.subr.bf16.mxu1 %v15549_v29 }
 0x870   :  { %6749 = vmatmul.mubr.bf16.gmra.mxu1 %v13669_v47 }
 0x918   :  { %v12957_v48 = vpop.f32.mrf.mxu0 }
 0x91a   :  { %v6791_v49 = vpop.f32.mrf.mxu0 }
 0x91c   :  { %v12958_v54 = vpop.f32.mrf.mxu0 }
 0x91e   :  { %v6794_v4 = vpop.f32.mrf.mxu0 }
 0x928   :  { %v12512_v50 = vpop.f32.mrf.mxu1 }
 0x92a   :  { %v12513_v51 = vpop.f32.mrf.mxu1 }
 0x92b   :  { %v12514_v52 = vadd.f32 %v12513_v51, %v12512_v50 }
 0x92c   :  { %v12515_v55 = vpop.f32.mrf.mxu1 }
 0x92d   :  { %v15506_v57 = vadd.f32 %v12514_v52, %v6791_v49 }
 0x92e   :  { %v12516_v60 = vpop.f32.mrf.mxu1 }
 0x92f   :  { %v12517_v1 = vadd.f32 %v12516_v60, %v12515_v55  ;;  %v6810_v53 = vsel %vm5744_vm7, %v15506_v57, 0.0  ;;  %v6806_v59 = vmul.f32 %v15506_v57, %v15506_v57 }
 0x930   :  { %v12518_v6 = vpop.f32.mrf.mxu1  ;;  %6811 = vadd.xlane.f32.xlu0 %v6810_v53 }
 0x931   :  { %v15512_v2 = vadd.f32 %v12517_v1, %v6794_v4  ;;  %v6822_v12 = vsel %vm5744_vm7, %v6806_v59, 0.0 }
 0x932   :  { %v12519_v9 = vpop.f32.mrf.mxu1 }
 0x933   :  { %v12520_v10 = vadd.f32 %v12519_v9, %v12518_v6  ;;  %v6813_v11 = vsel %vm5744_vm7, %v15512_v2, 0.0  ;;  %v6807_v13 = vmul.f32 %v15512_v2, %v15512_v2 }
 0x934   :  { %v12521_v14 = vpop.f32.mrf.mxu1  ;;  %6814 = vadd.xlane.f32.xlu1 %v6813_v11  ;;  %6823 = vadd.xlane.f32.xlu0 %v6822_v12 }
 0x935   :  { %v15519_v15 = vadd.f32 %v12957_v48, %v12520_v10  ;;  %v6825_v18 = vsel %vm5744_vm7, %v6807_v13, 0.0 }
 0x936   :  { %v12522_v16 = vpop.f32.mrf.mxu1 }
 0x937   :  { %v12523_v61 = vadd.f32 %v12522_v16, %v12521_v14  ;;  %v6816_v19 = vsel %vm5744_vm7, %v15519_v15, 0.0  ;;  %v6808_v20 = vmul.f32 %v15519_v15, %v15519_v15 }
 0x938   :  { %6826 = vadd.xlane.f32.xlu1 %v6825_v18  ;;  %6817 = vadd.xlane.f32.xlu0 %v6816_v19 }
 0x939   :  { %v15526_v58 = vadd.f32 %v12958_v54, %v12523_v61  ;;  %v6828_v22 = vsel %vm5744_vm7, %v6808_v20, 0.0 }
 0x93b   :  { %v6819_v21 = vsel %vm5744_vm7, %v15526_v58, 0.0  ;;  %v6809_v23 = vmul.f32 %v15526_v58, %v15526_v58 }
 0x93c   :  { %6820 = vadd.xlane.f32.xlu1 %v6819_v21  ;;  %6829 = vadd.xlane.f32.xlu0 %v6828_v22 }
 0x93d   :  { %v6831_v25 = vsel %vm5744_vm7, %v6809_v23, 0.0 }
 0x940   :  { %6832 = vadd.xlane.f32.xlu1 %v6831_v25 }
 0x9b9   :  { %v6812_v31 = vpop.xlane.xlu0 %6811 }
 0x9ba   :  { %v6834_v36 = vmul.f32 0.0625, %v6812_v31 }
 0x9bc   :  { %v6842_v17 = vmul.f32 %v6834_v36, %v6834_v36  ;;  %v6854_v18 = vsub.f32 %v15506_v57, %v6834_v36 }
 0x9bd   :  { %v6815_v37 = vpop.xlane.xlu1 %6814  ;;  %v6824_v38 = vpop.xlane.xlu0 %6823 }
 0x9be   :  { %v6835_v39 = vmul.f32 0.0625, %v6815_v37  ;;  %v6838_v33 = vmul.f32 0.0625, %v6824_v38 }
 0x9c0   :  { %v6846_v40 = vsub.f32 %v6838_v33, %v6842_v17  ;;  %v6843_v46 = vmul.f32 %v6835_v39, %v6835_v39  ;;  %v6855_v19 = vsub.f32 %v15512_v2, %v6835_v39  ;;  %v13674_v33 = vld [vmem:[%s16027_s6 + $0x10] sm:$0xff]  }
 0x9c1   :  { %v6827_v44 = vpop.xlane.xlu1 %6826  ;;  %v6818_v45 = vpop.xlane.xlu0 %6817 }
 0x9c2   :  { %v6850_v47 = vmax.f32 %v6846_v40, 0.0  ;;  %v6839_v48 = vmul.f32 0.0625, %v6827_v44  ;;  %v6836_v49 = vmul.f32 0.0625, %v6818_v45  ;;  %v13696_v40 = vld [vmem:[%s16029_s8 + $0x8] ss:$12 sps:$4 sm:$0xff]  }
 0x9c3   :  { %v13701_v44 = vld [vmem:[%s16029_s8 + $0x4] ss:$12 sps:$4 sm:$0xff]  }
 0x9c4   :  { %v6858_v50 = vadd.f32 1e-05, %v6850_v47  ;;  %v6847_v51 = vsub.f32 %v6839_v48, %v6843_v46  ;;  %v6844_v52 = vmul.f32 %v6836_v49, %v6836_v49  ;;  %v6856_v31 = vsub.f32 %v15519_v15, %v6836_v49  ;;  %v13675_v15 = vld [vmem:[%s16027_s6 + $0x40] sm:$0xff]  }
 0x9c5   :  { %v6821_v54 = vpop.xlane.xlu1 %6820  ;;  %v6830_v55 = vpop.xlane.xlu0 %6829 }
 0x9c6   :  { %13791 = vrsqrt.f32 %v6858_v50  ;;  %v6851_v60 = vmax.f32 %v6847_v51, 0.0  ;;  %v6837_v1 = vmul.f32 0.0625, %v6821_v54  ;;  %v6840_v53 = vmul.f32 0.0625, %v6830_v55 }
 0x9c8   :  { %v6859_v59 = vadd.f32 1e-05, %v6851_v60  ;;  %v6848_v4 = vsub.f32 %v6840_v53, %v6844_v52  ;;  %v6845_v9 = vmul.f32 %v6837_v1, %v6837_v1  ;;  %v6857_v37 = vsub.f32 %v15526_v58, %v6837_v1  ;;  %v13676_v58 = vld [vmem:[%s16027_s6 + $0x18] sm:$0xff]  }
 0x9c9   :  { %v6833_v6 = vpop.xlane.xlu1 %6832 }
 0x9ca   :  { %13793 = vrsqrt.f32 %v6859_v59  ;;  %v6852_v10 = vmax.f32 %v6848_v4, 0.0  ;;  %v6841_v11 = vmul.f32 0.0625, %v6833_v6 }
 0x9cc   :  { %v6860_v12 = vadd.f32 1e-05, %v6852_v10  ;;  %v6849_v13 = vsub.f32 %v6841_v11, %v6845_v9 }
 0x9ce   :  { %13795 = vrsqrt.f32 %v6860_v12  ;;  %v6853_v14 = vmax.f32 %v6849_v13, 0.0 }
 0x9d0   :  { %v6861_v16 = vadd.f32 1e-05, %v6853_v14 }
 0x9d2   :  { %13797 = vrsqrt.f32 %v6861_v16 }
 0x9d3   :  { %v13792_v61 = vpop.eup %13791 }
 0x9d4   :  { %v6866_v20 = vmul.f32 %v13792_v61, %v6854_v18 }
 0x9d6   :  { %v6870_v23 = vmax.f32 %v6866_v20, 0.0 }
 0x9d7   :  { %v13794_v21 = vpop.eup %13793 }
 0x9d8   :  { %v6867_v22 = vmul.f32 %v13794_v21, %v6855_v19 }
 0x9da   :  { %v6871_v25 = vmax.f32 %v6867_v22, 0.0 }
 0x9db   :  { %v13796_v26 = vpop.eup %13795 }
 0x9dc   :  { %v6874_v27 = vpack.c.bf16 %v6871_v25, %v6870_v23  ;;  %v6868_v38 = vmul.f32 %v13796_v26, %v6856_v31 }
 0x9de   :  { %12961 = vmatprep.mubr.msk.bf16.mxu0 %vm5744_vm7, %v6874_v27  ;;  %12985 = vmatprep.mubr.msk.bf16.mxu1 %vm5744_vm7, %v6874_v27  ;;  %v6872_v36 = vmax.f32 %v6868_v38, 0.0 }
 0x9df   :  { %v13798_v17 = vpop.eup %13797 }
 0x9e0   :  { %v6869_v57 = vmul.f32 %v13798_v17, %v6857_v37 }
 0x9e2   :  { %v6873_v2 = vmax.f32 %v6869_v57, 0.0 }
 0x9e4   :  { %v6875_v39 = vpack.c.bf16 %v6873_v2, %v6872_v36 }
 0x9e6   :  { %12962 = vmatmul.mubr.msk.bf16.vlgmr.msra.gmra.mxu0 %vm5744_vm7, %v6875_v39  ;;  %12986 = vmatmul.mubr.msk.bf16.vlgmr.msra.gmra.mxu1 %vm5744_vm7, %v6875_v39 }
 0x9e7   :  { %12966 = vmatpush3.bf16.msra.mxu0 %v15543_v28  ;;  %12967 = vmatprep.mubr.msk.bf16.mxu0 %vm5744_vm7, %v6874_v27  ;;  %v13677_v28 = vld [vmem:[%s16027_s6 + $0x28] sm:$0xff]  }
 0x9e8   :  { %12997 = vmatprep.mubr.msk.bf16.mxu1 %vm5744_vm7, %v6874_v27  ;;  %12996 = vmatpush3.bf16.msra.mxu1 %v15549_v29  ;;  %v13678_v29 = vld [vmem:[%s16027_s6 + $0x38] sm:$0xff]  }
 0x9e9   :  { %12971 = vmatprep.subr.bf16.mxu0 %v13674_v33  ;;  %13007 = vmatprep.subr.bf16.mxu1 %v13675_v15 }
 0x9ee   :  { %12968 = vmatmul.mubr.msk.bf16.vlgmr.msra.gmra.mxu0 %vm5744_vm7, %v6875_v39  ;;  %12998 = vmatmul.mubr.msk.bf16.vlgmr.msra.gmra.mxu1 %vm5744_vm7, %v6875_v39 }
 0x9ef   :  { %12972 = vmatpush3.bf16.msra.mxu0 %v13674_v33  ;;  %12973 = vmatprep.mubr.msk.bf16.mxu0 %vm5744_vm7, %v6874_v27 }
 0x9f0   :  { %13009 = vmatprep.mubr.msk.bf16.mxu1 %vm5744_vm7, %v6874_v27  ;;  %13008 = vmatpush3.bf16.msra.mxu1 %v13675_v15 }
 0x9f1   :  { %12977 = vmatprep.subr.bf16.mxu0 %v13676_v58 }
 0x9f6   :  { %12974 = vmatmul.mubr.msk.bf16.vlgmr.msra.gmra.mxu0 %vm5744_vm7, %v6875_v39  ;;  %13010 = vmatmul.mubr.msk.bf16.vlgmr.msra.gmra.mxu1 %vm5744_vm7, %v6875_v39 }
 0x9f7   :  { %12978 = vmatpush3.bf16.msra.mxu0 %v13676_v58  ;;  %12979 = vmatprep.mubr.msk.bf16.mxu0 %vm5744_vm7, %v6874_v27 }
 0x9f8   :  { %12989 = vmatprep.subr.bf16.mxu0 %v13677_v28  ;;  %13017 = vmatprep.mubr.msk.bf16.mxu1 %vm6701_vm8, %v13696_v40 }
 0x9fe   :  { %12980 = vmatmul.mubr.msk.bf16.vlgmr.msra.gmra.mxu0 %vm5744_vm7, %v6875_v39 }
 0x9ff   :  { %12990 = vmatpush3.bf16.msra.mxu0 %v13677_v28  ;;  %12991 = vmatprep.mubr.msk.bf16.mxu0 %vm5744_vm7, %v6874_v27 }
 0xa00   :  { %13001 = vmatprep.subr.bf16.mxu0 %v13678_v29 }
 0xa06   :  { %12992 = vmatmul.mubr.msk.bf16.vlgmr.msra.gmra.mxu0 %vm5744_vm7, %v6875_v39 }
 0xa07   :  { %13002 = vmatpush3.bf16.msra.mxu0 %v13678_v29  ;;  %13003 = vmatprep.mubr.msk.bf16.mxu0 %vm5744_vm7, %v6874_v27 }
 0xa0e   :  { %13004 = vmatmul.mubr.msk.bf16.vlgmr.msra.gmra.mxu0 %vm5744_vm7, %v6875_v39 }
 0xa0f   :  { %7795 = vmatprep.mubr.bf16.mxu0 %v13701_v44 }
 0xaa6   :  { %v12963_v45 = vpop.f32.mrf.mxu0  ;;  %v12987_v46 = vpop.f32.mrf.mxu1 }
 0xaa7   :  { %v11831_v47 = vpack.c.bf16 %v12963_v45, %v12963_v45  ;;  %v11847_v48 = vpack.c.bf16 %v12987_v46, %v12987_v46 }
 0xaa8   :  { %v6924_v49 = vpop.f32.mrf.mxu0  ;;  %v7232_v50 = vpop.f32.mrf.mxu1 }
 0xaa9   :  { %6957 = vst.msk [vmem:[#allocation4 + $0x8] sm:$0xf] %vm3803_vm6, %v11831_v47  ;;  %7265 = vst.msk [vmem:[#allocation4 + $0x48] sm:$0xf] %vm3803_vm6, %v11847_v48  ;;  %v11829_v51 = vpack.c.bf16 %v6924_v49, %v6924_v49  ;;  %v11845_v52 = vpack.c.bf16 %v7232_v50, %v7232_v50 }
 0xaaa   :  { %v12964_v54 = vpop.f32.mrf.mxu0  ;;  %v12988_v55 = vpop.f32.mrf.mxu1 }
 0xaab   :  { %6955 = vst.msk [vmem:[#allocation4] sm:$0xf] %vm3803_vm6, %v11829_v51  ;;  %7263 = vst.msk [vmem:[#allocation4 + $0x40] sm:$0xf] %vm3803_vm6, %v11845_v52  ;;  %v11832_v60 = vpack.c.bf16 %v12964_v54, %v12964_v54  ;;  %v11848_v1 = vpack.c.bf16 %v12988_v55, %v12988_v55 }
 0xaac   :  { %v6927_v53 = vpop.f32.mrf.mxu0  ;;  %v7235_v59 = vpop.f32.mrf.mxu1 }
 0xaad   :  { %6958 = vst.msk [vmem:[#allocation4 + $0xc] sm:$0xf] %vm3803_vm6, %v11832_v60  ;;  %7266 = vst.msk [vmem:[#allocation4 + $0x4c] sm:$0xf] %vm3803_vm6, %v11848_v1  ;;  %v11830_v4 = vpack.c.bf16 %v6927_v53, %v6927_v53  ;;  %v11846_v6 = vpack.c.bf16 %v7235_v59, %v7235_v59 }
 0xaae   :  { %v12969_v9 = vpop.f32.mrf.mxu0  ;;  %v12999_v10 = vpop.f32.mrf.mxu1 }
 0xaaf   :  { %6956 = vst.msk [vmem:[#allocation4 + $0x4] sm:$0xf] %vm3803_vm6, %v11830_v4  ;;  %7264 = vst.msk [vmem:[#allocation4 + $0x44] sm:$0xf] %vm3803_vm6, %v11846_v6  ;;  %v11835_v11 = vpack.c.bf16 %v12969_v9, %v12969_v9  ;;  %v11855_v12 = vpack.c.bf16 %v12999_v10, %v12999_v10  ;;  %v13697_v6 = vld [vmem:[%s16029_s8 + $0x20] ss:$12 sps:$4 sm:$0xff]  }
 0xab0   :  { %v7001_v13 = vpop.f32.mrf.mxu0  ;;  %v7386_v14 = vpop.f32.mrf.mxu1 }
 0xab1   :  { %7034 = vst.msk [vmem:[#allocation4 + $0x18] sm:$0xf] %vm3803_vm6, %v11835_v11  ;;  %7419 = vst.msk [vmem:[#allocation4 + $0x68] sm:$0xf] %vm3803_vm6, %v11855_v12  ;;  %v11833_v16 = vpack.c.bf16 %v7001_v13, %v7001_v13  ;;  %v11853_v61 = vpack.c.bf16 %v7386_v14, %v7386_v14 }
 0xab2   :  { %v12970_v18 = vpop.f32.mrf.mxu0  ;;  %v13000_v19 = vpop.f32.mrf.mxu1 }
 0xab3   :  { %7032 = vst.msk [vmem:[#allocation4 + $0x10] sm:$0xf] %vm3803_vm6, %v11833_v16  ;;  %7417 = vst.msk [vmem:[#allocation4 + $0x60] sm:$0xf] %vm3803_vm6, %v11853_v61  ;;  %v11836_v20 = vpack.c.bf16 %v12970_v18, %v12970_v18  ;;  %v11856_v21 = vpack.c.bf16 %v13000_v19, %v13000_v19 }
 0xab4   :  { %v7004_v22 = vpop.f32.mrf.mxu0  ;;  %v7389_v23 = vpop.f32.mrf.mxu1 }
 0xab5   :  { %7035 = vst.msk [vmem:[#allocation4 + $0x1c] sm:$0xf] %vm3803_vm6, %v11836_v20  ;;  %7420 = vst.msk [vmem:[#allocation4 + $0x6c] sm:$0xf] %vm3803_vm6, %v11856_v21  ;;  %v11834_v25 = vpack.c.bf16 %v7004_v22, %v7004_v22  ;;  %v11854_v26 = vpack.c.bf16 %v7389_v23, %v7389_v23 }
 0xab6   :  { %v12975_v27 = vpop.f32.mrf.mxu0  ;;  %v13011_v31 = vpop.f32.mrf.mxu1 }
 0xab7   :  { %7033 = vst.msk [vmem:[#allocation4 + $0x14] sm:$0xf] %vm3803_vm6, %v11834_v25  ;;  %7418 = vst.msk [vmem:[#allocation4 + $0x64] sm:$0xf] %vm3803_vm6, %v11854_v26  ;;  %v11839_v37 = vpack.c.bf16 %v12975_v27, %v12975_v27  ;;  %v11863_v38 = vpack.c.bf16 %v13011_v31, %v13011_v31 }
 0xab8   :  { %v7078_v17 = vpop.f32.mrf.mxu0  ;;  %v7540_v57 = vpop.f32.mrf.mxu1 }
 0xab9   :  { %7111 = vst.msk [vmem:[#allocation4 + $0x28] sm:$0xf] %vm3803_vm6, %v11839_v37  ;;  %7573 = vst.msk [vmem:[#allocation4 + $0x88] sm:$0xf] %vm3803_vm6, %v11863_v38  ;;  %v11837_v36 = vpack.c.bf16 %v7078_v17, %v7078_v17  ;;  %v11861_v2 = vpack.c.bf16 %v7540_v57, %v7540_v57 }
 0xaba   :  { %v12976_v39 = vpop.f32.mrf.mxu0  ;;  %v13012_v33 = vpop.f32.mrf.mxu1 }
 0xabb   :  { %7109 = vst.msk [vmem:[#allocation4 + $0x20] sm:$0xf] %vm3803_vm6, %v11837_v36  ;;  %7571 = vst.msk [vmem:[#allocation4 + $0x80] sm:$0xf] %vm3803_vm6, %v11861_v2  ;;  %v11840_v15 = vpack.c.bf16 %v12976_v39, %v12976_v39  ;;  %v11864_v58 = vpack.c.bf16 %v13012_v33, %v13012_v33  ;;  %v13693_v2 = vld [vmem:[#allocation4 + $0x48] sm:$0xff]   ;;  %v13695_v33 = vld [vmem:[#allocation4 + $0x40] sm:$0xff]  }
 0xabc   :  { %v7081_v28 = vpop.f32.mrf.mxu0  ;;  %v7543_v29 = vpop.f32.mrf.mxu1  ;;  %v13685_v26 = vld [vmem:[#allocation4 + $0x68] sm:$0xff]   ;;  %v13690_v17 = vld [vmem:[#allocation4 + $0x18] sm:$0xff]  }
 0xabd   :  { %7112 = vst.msk [vmem:[#allocation4 + $0x2c] sm:$0xf] %vm3803_vm6, %v11840_v15  ;;  %7574 = vst.msk [vmem:[#allocation4 + $0x8c] sm:$0xf] %vm3803_vm6, %v11864_v58  ;;  %v11838_v40 = vpack.c.bf16 %v7081_v28, %v7081_v28  ;;  %v11862_v44 = vpack.c.bf16 %v7543_v29, %v7543_v29  ;;  %v13694_v39 = vld [vmem:[#allocation4 + $0x8] sm:$0xff]   ;;  %v13698_v15 = vld [vmem:[#allocation4] sm:$0xff]  }
 0xabe   :  { %v12981_v45 = vpop.f32.mrf.mxu0  ;;  %v13687_v31 = vld [vmem:[#allocation4 + $0x60] sm:$0xff]   ;;  %v13692_v36 = vld [vmem:[#allocation4 + $0x10] sm:$0xff]   ;;  %v13704_v28 = vld [vmem:[%s16029_s8 + $0x1c] ss:$12 sps:$4 sm:$0xff]  }
 0xabf   :  { %7110 = vst.msk [vmem:[#allocation4 + $0x24] sm:$0xf] %vm3803_vm6, %v11838_v40  ;;  %7572 = vst.msk [vmem:[#allocation4 + $0x84] sm:$0xf] %vm3803_vm6, %v11862_v44  ;;  %v11843_v46 = vpack.c.bf16 %v12981_v45, %v12981_v45  ;;  %v13699_v58 = vld [vmem:[%s16029_s8] ss:$12 sps:$4 sm:$0xff]  }
 0xac0   :  { %v7155_v47 = vpop.f32.mrf.mxu0  ;;  %v13702_v29 = vld [vmem:[%s16029_s8 + $0x18] ss:$12 sps:$4 sm:$0xff]  }
 0xac1   :  { %7188 = vst.msk [vmem:[#allocation4 + $0x38] sm:$0xf] %vm3803_vm6, %v11843_v46  ;;  %v11841_v48 = vpack.c.bf16 %v7155_v47, %v7155_v47 }
 0xac2   :  { %v12982_v49 = vpop.f32.mrf.mxu0 }
 0xac3   :  { %7186 = vst.msk [vmem:[#allocation4 + $0x30] sm:$0xf] %vm3803_vm6, %v11841_v48  ;;  %v11844_v50 = vpack.c.bf16 %v12982_v49, %v12982_v49 }
 0xac4   :  { %v7158_v51 = vpop.f32.mrf.mxu0  ;;  %v13679_v52 = vld [vmem:[#allocation4 + $0x88] sm:$0xff]  }
 0xac5   :  { %7189 = vst.msk [vmem:[#allocation4 + $0x3c] sm:$0xf] %vm3803_vm6, %v11844_v50  ;;  %v11842_v54 = vpack.c.bf16 %v7158_v51, %v7158_v51  ;;  %13013 = vmatprep.subr.bf16.mxu1 %v13679_v52  ;;  %v13686_v27 = vld [vmem:[#allocation4 + $0x28] sm:$0xff]  }
 0xac6   :  { %v12993_v55 = vpop.f32.mrf.mxu0  ;;  %v13680_v60 = vld [vmem:[#allocation4 + $0x80] sm:$0xff]   ;;  %13014 = vmatpush3.bf16.msra.mxu1 %v13679_v52 }
 0xac7   :  { %7187 = vst.msk [vmem:[#allocation4 + $0x34] sm:$0xf] %vm3803_vm6, %v11842_v54  ;;  %v11851_v1 = vpack.c.bf16 %v12993_v55, %v12993_v55  ;;  %13015 = vmatprep.subr.bf16.mxu1 %v13680_v60  ;;  %v13688_v37 = vld [vmem:[#allocation4 + $0x20] sm:$0xff]  }
 0xac8   :  { %v7309_v53 = vpop.f32.mrf.mxu0 }
 0xac9   :  { %7342 = vst.msk [vmem:[#allocation4 + $0x58] sm:$0xf] %vm3803_vm6, %v11851_v1  ;;  %v11849_v59 = vpack.c.bf16 %v7309_v53, %v7309_v53 }
 0xaca   :  { %v12994_v4 = vpop.f32.mrf.mxu0  ;;  %13016 = vmatpush3.bf16.msra.mxu1 %v13680_v60 }
 0xacb   :  { %7340 = vst.msk [vmem:[#allocation4 + $0x50] sm:$0xf] %vm3803_vm6, %v11849_v59  ;;  %v11852_v9 = vpack.c.bf16 %v12994_v4, %v12994_v4 }
 0xacc   :  { %v7312_v10 = vpop.f32.mrf.mxu0  ;;  %v13682_v22 = vld [vmem:[#allocation4 + $0x38] sm:$0xff]  }
 0xacd   :  { %7343 = vst.msk [vmem:[#allocation4 + $0x5c] sm:$0xf] %vm3803_vm6, %v11852_v9  ;;  %v11850_v11 = vpack.c.bf16 %v7312_v10, %v7312_v10  ;;  %13018 = vmatmul.mubr.msk.bf16.vlgmr.msra.gmra.mxu1 %vm6701_vm8, %v13697_v6 }
 0xace   :  { %v13005_v12 = vpop.f32.mrf.mxu0  ;;  %v13684_v25 = vld [vmem:[#allocation4 + $0x30] sm:$0xff]  }
 0xacf   :  { %7341 = vst.msk [vmem:[#allocation4 + $0x54] sm:$0xf] %vm3803_vm6, %v11850_v11  ;;  %v11859_v13 = vpack.c.bf16 %v13005_v12, %v13005_v12 }
 0xad0   :  { %v7463_v14 = vpop.f32.mrf.mxu0 }
 0xad1   :  { %7496 = vst.msk [vmem:[#allocation4 + $0x78] sm:$0xf] %vm3803_vm6, %v11859_v13  ;;  %v11857_v16 = vpack.c.bf16 %v7463_v14, %v7463_v14 }
 0xad2   :  { %v13006_v61 = vpop.f32.mrf.mxu0 }
 0xad3   :  { %7494 = vst.msk [vmem:[#allocation4 + $0x70] sm:$0xf] %vm3803_vm6, %v11857_v16  ;;  %v11860_v18 = vpack.c.bf16 %v13006_v61, %v13006_v61 }
 0xad4   :  { %v7466_v19 = vpop.f32.mrf.mxu0  ;;  %v13689_v38 = vld [vmem:[#allocation4 + $0x58] sm:$0xff]  }
 0xad5   :  { %7497 = vst.msk [vmem:[#allocation4 + $0x7c] sm:$0xf] %vm3803_vm6, %v11860_v18  ;;  %v11858_v20 = vpack.c.bf16 %v7466_v19, %v7466_v19 }
 0xad6   :  { %v13691_v57 = vld [vmem:[#allocation4 + $0x50] sm:$0xff]  }
 0xad7   :  { %7495 = vst.msk [vmem:[#allocation4 + $0x74] sm:$0xf] %vm3803_vm6, %v11858_v20 }
 0xadc   :  { %v13681_v21 = vld [vmem:[#allocation4 + $0x78] sm:$0xff]  }
 0xadd   :  { %12555 = vmatprep.subr.bf16.mxu0 %v13681_v21 }
 0xade   :  { %v13683_v23 = vld [vmem:[#allocation4 + $0x70] sm:$0xff]   ;;  %12556 = vmatpush3.bf16.msra.mxu0 %v13682_v22 }
 0xadf   :  { %12557 = vmatprep.subr.bf16.mxu0 %v13683_v23 }
 0xae2   :  { %12558 = vmatpush3.bf16.msra.mxu0 %v13684_v25  ;;  %v13705_v25 = vld [vmem:[%s16027_s6] sm:$0xff]  }
 0xae3   :  { %12559 = vmatprep.subr.bf16.mxu0 %v13685_v26  ;;  %v13706_v26 = vld [vmem:[%s16027_s6 + $0x20] sm:$0xff]   ;;  %13021 = vmatprep.subr.bf16.mxu1 %v13705_v25 }
 0xae4   :  { %13022 = vmatpush3.bf16.msra.mxu1 %v13705_v25 }
 0xae6   :  { %12560 = vmatpush3.bf16.msra.mxu0 %v13686_v27  ;;  %v15684_v27 = vld [vmem:[%s16027_s6 + $0x8] sm:$0xff]  }
 0xae7   :  { %12561 = vmatprep.subr.bf16.mxu0 %v13687_v31  ;;  %13027 = vmatprep.subr.bf16.mxu1 %v15684_v27  ;;  %v15690_v31 = vld [vmem:[%s16027_s6 + $0x30] sm:$0xff]  }
 0xaea   :  { %12562 = vmatpush3.bf16.msra.mxu0 %v13688_v37 }
 0xaeb   :  { %12563 = vmatprep.subr.bf16.mxu0 %v13689_v38 }
 0xaee   :  { %12564 = vmatpush3.bf16.msra.mxu0 %v13690_v17 }
 0xaef   :  { %12565 = vmatprep.subr.bf16.mxu0 %v13691_v57 }
 0xaf2   :  { %12566 = vmatpush3.bf16.msra.mxu0 %v13692_v36 }
 0xaf3   :  { %12567 = vmatprep.subr.bf16.mxu0 %v13693_v2 }
 0xaf6   :  { %12568 = vmatpush3.bf16.msra.mxu0 %v13694_v39 }
 0xaf7   :  { %12569 = vmatprep.subr.bf16.mxu0 %v13695_v33 }
 0xafa   :  { %12570 = vmatpush3.bf16.msra.mxu0 %v13698_v15 }
 0xafb   :  { %13045 = vmatprep.subr.bf16.mxu0 %v13706_v26 }
 0xafd   :  { %7796 = vmatmul.mubr.bf16.vlgmr.msra.gmra.mxu0 %v13699_v58 }
 0xafe   :  { %7803 = vmatprep.mubr.bf16.mxu0 %v13704_v28  ;;  %13046 = vmatpush3.bf16.msra.mxu0 %v13706_v26 }
 0xaff   :  { %13057 = vmatprep.subr.bf16.mxu0 %v15690_v31 }
 0xb05   :  { %7804 = vmatmul.mubr.bf16.gmra.mxu0 %v13702_v29 }
 0xb8d   :  { %v13019_v40 = vpop.f32.mrf.mxu1 }
 0xb8f   :  { %v7846_v44 = vpop.f32.mrf.mxu1 }
 0xb91   :  { %v13020_v48 = vpop.f32.mrf.mxu1 }
 0xb93   :  { %v7849_v60 = vpop.f32.mrf.mxu1 }
 0xbbd   :  { %v12571_v45 = vpop.f32.mrf.mxu0 }
 0xbbf   :  { %v12572_v46 = vpop.f32.mrf.mxu0 }
 0xbc0   :  { %v12573_v47 = vadd.f32 %v12572_v46, %v12571_v45 }
 0xbc1   :  { %v12574_v49 = vpop.f32.mrf.mxu0 }
 0xbc2   :  { %v15647_v50 = vadd.f32 %v12573_v47, %v7846_v44 }
 0xbc3   :  { %v12575_v51 = vpop.f32.mrf.mxu0 }
 0xbc4   :  { %v12576_v52 = vadd.f32 %v12575_v51, %v12574_v49  ;;  %v7865_v54 = vsel %vm5744_vm7, %v15647_v50, 0.0  ;;  %v7861_v55 = vmul.f32 %v15647_v50, %v15647_v50 }
 0xbc5   :  { %v12577_v1 = vpop.f32.mrf.mxu0  ;;  %7866 = vadd.xlane.f32.xlu0 %v7865_v54 }
 0xbc6   :  { %v15653_v53 = vadd.f32 %v12576_v52, %v7849_v60  ;;  %v7877_v9 = vsel %vm5744_vm7, %v7861_v55, 0.0 }
 0xbc7   :  { %v12578_v59 = vpop.f32.mrf.mxu0 }
 0xbc8   :  { %v12579_v4 = vadd.f32 %v12578_v59, %v12577_v1  ;;  %v7868_v6 = vsel %vm5744_vm7, %v15653_v53, 0.0  ;;  %v7862_v10 = vmul.f32 %v15653_v53, %v15653_v53 }
 0xbc9   :  { %v12580_v11 = vpop.f32.mrf.mxu0  ;;  %7869 = vadd.xlane.f32.xlu1 %v7868_v6  ;;  %7878 = vadd.xlane.f32.xlu0 %v7877_v9 }
 0xbca   :  { %v15660_v12 = vadd.f32 %v13019_v40, %v12579_v4  ;;  %v7880_v16 = vsel %vm5744_vm7, %v7862_v10, 0.0 }
 0xbcb   :  { %v12581_v13 = vpop.f32.mrf.mxu0 }
 0xbcc   :  { %v12582_v14 = vadd.f32 %v12581_v13, %v12580_v11  ;;  %v7871_v61 = vsel %vm5744_vm7, %v15660_v12, 0.0  ;;  %v7863_v18 = vmul.f32 %v15660_v12, %v15660_v12 }
 0xbcd   :  { %7881 = vadd.xlane.f32.xlu1 %v7880_v16  ;;  %7872 = vadd.xlane.f32.xlu0 %v7871_v61 }
 0xbce   :  { %v15667_v19 = vadd.f32 %v13020_v48, %v12582_v14  ;;  %v7883_v21 = vsel %vm5744_vm7, %v7863_v18, 0.0 }
 0xbd0   :  { %v7874_v20 = vsel %vm5744_vm7, %v15667_v19, 0.0  ;;  %v7864_v22 = vmul.f32 %v15667_v19, %v15667_v19 }
 0xbd1   :  { %7875 = vadd.xlane.f32.xlu1 %v7874_v20  ;;  %7884 = vadd.xlane.f32.xlu0 %v7883_v21 }
 0xbd2   :  { %v7886_v23 = vsel %vm5744_vm7, %v7864_v22, 0.0 }
 0xbd5   :  { %7887 = vadd.xlane.f32.xlu1 %v7886_v23 }
 0xc4e   :  { %v7867_v37 = vpop.xlane.xlu0 %7866 }
 0xc4f   :  { %v7889_v38 = vmul.f32 0.0625, %v7867_v37 }
 0xc51   :  { %v7897_v36 = vmul.f32 %v7889_v38, %v7889_v38  ;;  %v7909_v16 = vsub.f32 %v15647_v50, %v7889_v38  ;;  %v13710_v38 = vld [vmem:[%s16027_s6 + $0x40] sm:$0xff]  }
 0xc52   :  { %v7870_v17 = vpop.xlane.xlu1 %7869  ;;  %v7879_v57 = vpop.xlane.xlu0 %7878 }
 0xc53   :  { %v7890_v2 = vmul.f32 0.0625, %v7870_v17  ;;  %v7893_v39 = vmul.f32 0.0625, %v7879_v57 }
 0xc55   :  { %v7901_v33 = vsub.f32 %v7893_v39, %v7897_v36  ;;  %v7898_v28 = vmul.f32 %v7890_v2, %v7890_v2  ;;  %v7910_v61 = vsub.f32 %v15653_v53, %v7890_v2 }
 0xc56   :  { %v7882_v15 = vpop.xlane.xlu1 %7881  ;;  %v7873_v58 = vpop.xlane.xlu0 %7872 }
 0xc57   :  { %v7905_v29 = vmax.f32 %v7901_v33, 0.0  ;;  %v7894_v40 = vmul.f32 0.0625, %v7882_v15  ;;  %v7891_v44 = vmul.f32 0.0625, %v7873_v58 }
 0xc59   :  { %v7913_v45 = vadd.f32 1e-05, %v7905_v29  ;;  %v7902_v46 = vsub.f32 %v7894_v40, %v7898_v28  ;;  %v7899_v47 = vmul.f32 %v7891_v44, %v7891_v44  ;;  %v7911_v37 = vsub.f32 %v15660_v12, %v7891_v44 }
 0xc5a   :  { %v7876_v48 = vpop.xlane.xlu1 %7875  ;;  %v7885_v49 = vpop.xlane.xlu0 %7884 }
 0xc5b   :  { %13799 = vrsqrt.f32 %v7913_v45  ;;  %v7906_v51 = vmax.f32 %v7902_v46, 0.0  ;;  %v7892_v52 = vmul.f32 0.0625, %v7876_v48  ;;  %v7895_v54 = vmul.f32 0.0625, %v7885_v49 }
 0xc5d   :  { %v7914_v55 = vadd.f32 1e-05, %v7906_v51  ;;  %v7903_v60 = vsub.f32 %v7895_v54, %v7899_v47  ;;  %v7900_v59 = vmul.f32 %v7892_v52, %v7892_v52  ;;  %v7912_v50 = vsub.f32 %v15667_v19, %v7892_v52  ;;  %v13709_v19 = vld [vmem:[%s16027_s6 + $0x10] sm:$0xff]  }
 0xc5e   :  { %v7888_v1 = vpop.xlane.xlu1 %7887 }
 0xc5f   :  { %13801 = vrsqrt.f32 %v7914_v55  ;;  %v7907_v4 = vmax.f32 %v7903_v60, 0.0  ;;  %v7896_v6 = vmul.f32 0.0625, %v7888_v1 }
 0xc61   :  { %v7915_v9 = vadd.f32 1e-05, %v7907_v4  ;;  %v7904_v10 = vsub.f32 %v7896_v6, %v7900_v59 }
 0xc63   :  { %13803 = vrsqrt.f32 %v7915_v9  ;;  %v7908_v11 = vmax.f32 %v7904_v10, 0.0 }
 0xc65   :  { %v7916_v13 = vadd.f32 1e-05, %v7908_v11 }
 0xc67   :  { %13805 = vrsqrt.f32 %v7916_v13 }
 0xc68   :  { %v13800_v14 = vpop.eup %13799 }
 0xc69   :  { %v7921_v18 = vmul.f32 %v13800_v14, %v7909_v16 }
 0xc6b   :  { %v15697_v22 = vadd.f32 %v7921_v18, %v5806_v34 }
 0xc6c   :  { %v13802_v20 = vpop.eup %13801 }
 0xc6d   :  { %v7922_v21 = vmul.f32 %v13802_v20, %v7910_v61 }
 0xc6f   :  { %v15701_v23 = vadd.f32 %v7922_v21, %v5807_v35 }
 0xc70   :  { %v13804_v25 = vpop.eup %13803 }
 0xc71   :  { %v7929_v26 = vpack.c.bf16 %v15701_v23, %v15697_v22  ;;  %v7923_v53 = vmul.f32 %v13804_v25, %v7911_v37 }
 0xc73   :  { %13023 = vmatprep.mubr.msk.bf16.mxu1 %vm5744_vm7, %v7929_v26  ;;  %13047 = vmatprep.mubr.msk.bf16.mxu0 %vm5744_vm7, %v7929_v26  ;;  %v15711_v32 = vadd.f32 %v7923_v53, %v5808_v42  ;;  %v13713_v42 = vld [vmem:[%s16027_s6 + $0x38] sm:$0xff]  }
 0xc74   :  { %v13806_v30 = vpop.eup %13805 }
 0xc75   :  { %v7924_v34 = vmul.f32 %v13806_v30, %v7912_v50 }
 0xc77   :  { %v15715_v35 = vadd.f32 %v7924_v34, %v5809_v43  ;;  %v13731_v43 = vld [vmem:[%s16030_s9 + $0x8] ss:$12 sps:$4 sm:$0xff]  }
 0xc79   :  { %v7930_v12 = vpack.c.bf16 %v15715_v35, %v15711_v32 }
 0xc7b   :  { %13024 = vmatmul.mubr.msk.bf16.vlgmr.msra.gmra.mxu1 %vm5744_vm7, %v7930_v12  ;;  %13048 = vmatmul.mubr.msk.bf16.vlgmr.msra.gmra.mxu0 %vm5744_vm7, %v7930_v12 }
 0xc7c   :  { %13028 = vmatpush3.bf16.msra.mxu1 %v15684_v27  ;;  %13029 = vmatprep.mubr.msk.bf16.mxu1 %vm5744_vm7, %v7929_v26  ;;  %v13736_v27 = vld [vmem:[%s16030_s9 + $0x4] ss:$12 sps:$4 sm:$0xff]  }
 0xc7d   :  { %13059 = vmatprep.mubr.msk.bf16.mxu0 %vm5744_vm7, %v7929_v26  ;;  %13058 = vmatpush3.bf16.msra.mxu0 %v15690_v31 }
 0xc7e   :  { %13033 = vmatprep.subr.bf16.mxu1 %v13709_v19  ;;  %13069 = vmatprep.subr.bf16.mxu0 %v13710_v38 }
 0xc83   :  { %13030 = vmatmul.mubr.msk.bf16.vlgmr.msra.gmra.mxu1 %vm5744_vm7, %v7930_v12  ;;  %13060 = vmatmul.mubr.msk.bf16.vlgmr.msra.gmra.mxu0 %vm5744_vm7, %v7930_v12 }
 0xc84   :  { %13034 = vmatpush3.bf16.msra.mxu1 %v13709_v19  ;;  %13035 = vmatprep.mubr.msk.bf16.mxu1 %vm5744_vm7, %v7929_v26 }
 0xc85   :  { %13071 = vmatprep.mubr.msk.bf16.mxu0 %vm5744_vm7, %v7929_v26  ;;  %13070 = vmatpush3.bf16.msra.mxu0 %v13710_v38 }
 0xc86   :  { %13039 = vmatprep.subr.bf16.mxu1 %v13711_v24 }
 0xc8b   :  { %13036 = vmatmul.mubr.msk.bf16.vlgmr.msra.gmra.mxu1 %vm5744_vm7, %v7930_v12  ;;  %13072 = vmatmul.mubr.msk.bf16.vlgmr.msra.gmra.mxu0 %vm5744_vm7, %v7930_v12 }
 0xc8c   :  { %13040 = vmatpush3.bf16.msra.mxu1 %v13711_v24  ;;  %13041 = vmatprep.mubr.msk.bf16.mxu1 %vm5744_vm7, %v7929_v26 }
 0xc8d   :  { %13051 = vmatprep.subr.bf16.mxu1 %v13712_v41  ;;  %13079 = vmatprep.mubr.msk.bf16.mxu0 %vm6701_vm8, %v13731_v43 }
 0xc93   :  { %13042 = vmatmul.mubr.msk.bf16.vlgmr.msra.gmra.mxu1 %vm5744_vm7, %v7930_v12 }
 0xc94   :  { %13052 = vmatpush3.bf16.msra.mxu1 %v13712_v41  ;;  %13053 = vmatprep.mubr.msk.bf16.mxu1 %vm5744_vm7, %v7929_v26 }
 0xc95   :  { %13063 = vmatprep.subr.bf16.mxu1 %v13713_v42 }
 0xc9b   :  { %13054 = vmatmul.mubr.msk.bf16.vlgmr.msra.gmra.mxu1 %vm5744_vm7, %v7930_v12 }
 0xc9c   :  { %13064 = vmatpush3.bf16.msra.mxu1 %v13713_v42  ;;  %13065 = vmatprep.mubr.msk.bf16.mxu1 %vm5744_vm7, %v7929_v26 }
 0xca3   :  { %13066 = vmatmul.mubr.msk.bf16.vlgmr.msra.gmra.mxu1 %vm5744_vm7, %v7930_v12 }
 0xca4   :  { %8850 = vmatprep.mubr.bf16.mxu1 %v13736_v27 }
 0xd3b   :  { %v13025_v31 = vpop.f32.mrf.mxu1  ;;  %v13049_v17 = vpop.f32.mrf.mxu0 }
 0xd3c   :  { %v11867_v57 = vpack.c.bf16 %v13025_v31, %v13025_v31  ;;  %v11883_v36 = vpack.c.bf16 %v13049_v17, %v13049_v17 }
 0xd3d   :  { %v7979_v2 = vpop.f32.mrf.mxu1  ;;  %v8287_v39 = vpop.f32.mrf.mxu0 }
 0xd3e   :  { %8012 = vst.msk [vmem:[#allocation4 + $0x8] sm:$0xf] %vm3803_vm6, %v11867_v57  ;;  %8320 = vst.msk [vmem:[#allocation4 + $0x48] sm:$0xf] %vm3803_vm6, %v11883_v36  ;;  %v11865_v33 = vpack.c.bf16 %v7979_v2, %v7979_v2  ;;  %v11881_v15 = vpack.c.bf16 %v8287_v39, %v8287_v39 }
 0xd3f   :  { %v13026_v58 = vpop.f32.mrf.mxu1  ;;  %v13050_v28 = vpop.f32.mrf.mxu0 }
 0xd40   :  { %8010 = vst.msk [vmem:[#allocation4] sm:$0xf] %vm3803_vm6, %v11865_v33  ;;  %8318 = vst.msk [vmem:[#allocation4 + $0x40] sm:$0xf] %vm3803_vm6, %v11881_v15  ;;  %v11868_v29 = vpack.c.bf16 %v13026_v58, %v13026_v58  ;;  %v11884_v40 = vpack.c.bf16 %v13050_v28, %v13050_v28 }
 0xd41   :  { %v7982_v44 = vpop.f32.mrf.mxu1  ;;  %v8290_v45 = vpop.f32.mrf.mxu0 }
 0xd42   :  { %8013 = vst.msk [vmem:[#allocation4 + $0xc] sm:$0xf] %vm3803_vm6, %v11868_v29  ;;  %8321 = vst.msk [vmem:[#allocation4 + $0x4c] sm:$0xf] %vm3803_vm6, %v11884_v40  ;;  %v11866_v46 = vpack.c.bf16 %v7982_v44, %v7982_v44  ;;  %v11882_v47 = vpack.c.bf16 %v8290_v45, %v8290_v45  ;;  %v13732_v40 = vld [vmem:[%s16030_s9 + $0x20] ss:$12 sps:$4 sm:$0xff]  }
 0xd43   :  { %v13031_v48 = vpop.f32.mrf.mxu1  ;;  %v13061_v49 = vpop.f32.mrf.mxu0 }
 0xd44   :  { %8011 = vst.msk [vmem:[#allocation4 + $0x4] sm:$0xf] %vm3803_vm6, %v11866_v46  ;;  %8319 = vst.msk [vmem:[#allocation4 + $0x44] sm:$0xf] %vm3803_vm6, %v11882_v47  ;;  %v11871_v51 = vpack.c.bf16 %v13031_v48, %v13031_v48  ;;  %v11891_v52 = vpack.c.bf16 %v13061_v49, %v13061_v49 }
 0xd45   :  { %v8056_v54 = vpop.f32.mrf.mxu1  ;;  %v8441_v55 = vpop.f32.mrf.mxu0 }
 0xd46   :  { %8089 = vst.msk [vmem:[#allocation4 + $0x18] sm:$0xf] %vm3803_vm6, %v11871_v51  ;;  %8474 = vst.msk [vmem:[#allocation4 + $0x68] sm:$0xf] %vm3803_vm6, %v11891_v52  ;;  %v11869_v60 = vpack.c.bf16 %v8056_v54, %v8056_v54  ;;  %v11889_v1 = vpack.c.bf16 %v8441_v55, %v8441_v55 }
 0xd47   :  { %v13032_v59 = vpop.f32.mrf.mxu1  ;;  %v13062_v4 = vpop.f32.mrf.mxu0 }
 0xd48   :  { %8087 = vst.msk [vmem:[#allocation4 + $0x10] sm:$0xf] %vm3803_vm6, %v11869_v60  ;;  %8472 = vst.msk [vmem:[#allocation4 + $0x60] sm:$0xf] %vm3803_vm6, %v11889_v1  ;;  %v11872_v6 = vpack.c.bf16 %v13032_v59, %v13032_v59  ;;  %v11892_v9 = vpack.c.bf16 %v13062_v4, %v13062_v4 }
 0xd49   :  { %v8059_v10 = vpop.f32.mrf.mxu1  ;;  %v8444_v11 = vpop.f32.mrf.mxu0 }
 0xd4a   :  { %8090 = vst.msk [vmem:[#allocation4 + $0x1c] sm:$0xf] %vm3803_vm6, %v11872_v6  ;;  %8475 = vst.msk [vmem:[#allocation4 + $0x6c] sm:$0xf] %vm3803_vm6, %v11892_v9  ;;  %v11870_v13 = vpack.c.bf16 %v8059_v10, %v8059_v10  ;;  %v11890_v14 = vpack.c.bf16 %v8444_v11, %v8444_v11 }
 0xd4b   :  { %v13037_v16 = vpop.f32.mrf.mxu1  ;;  %v13073_v61 = vpop.f32.mrf.mxu0 }
 0xd4c   :  { %8088 = vst.msk [vmem:[#allocation4 + $0x14] sm:$0xf] %vm3803_vm6, %v11870_v13  ;;  %8473 = vst.msk [vmem:[#allocation4 + $0x64] sm:$0xf] %vm3803_vm6, %v11890_v14  ;;  %v11875_v18 = vpack.c.bf16 %v13037_v16, %v13037_v16  ;;  %v11899_v20 = vpack.c.bf16 %v13073_v61, %v13073_v61 }
 0xd4d   :  { %v8133_v21 = vpop.f32.mrf.mxu1  ;;  %v8595_v25 = vpop.f32.mrf.mxu0 }
 0xd4e   :  { %8166 = vst.msk [vmem:[#allocation4 + $0x28] sm:$0xf] %vm3803_vm6, %v11875_v18  ;;  %8628 = vst.msk [vmem:[#allocation4 + $0x88] sm:$0xf] %vm3803_vm6, %v11899_v20  ;;  %v11873_v26 = vpack.c.bf16 %v8133_v21, %v8133_v21  ;;  %v11897_v37 = vpack.c.bf16 %v8595_v25, %v8595_v25  ;;  %v13728_v20 = vld [vmem:[#allocation4 + $0x48] sm:$0xff]   ;;  %v13730_v25 = vld [vmem:[#allocation4 + $0x40] sm:$0xff]  }
 0xd4f   :  { %v13038_v50 = vpop.f32.mrf.mxu1  ;;  %v13074_v53 = vpop.f32.mrf.mxu0  ;;  %v13729_v21 = vld [vmem:[#allocation4 + $0x8] sm:$0xff]  }
 0xd50   :  { %8164 = vst.msk [vmem:[#allocation4 + $0x20] sm:$0xf] %vm3803_vm6, %v11873_v26  ;;  %8626 = vst.msk [vmem:[#allocation4 + $0x80] sm:$0xf] %vm3803_vm6, %v11897_v37  ;;  %v11876_v30 = vpack.c.bf16 %v13038_v50, %v13038_v50  ;;  %v11900_v34 = vpack.c.bf16 %v13074_v53, %v13074_v53  ;;  %v13733_v26 = vld [vmem:[#allocation4] sm:$0xff]  }
 0xd51   :  { %v8136_v12 = vpop.f32.mrf.mxu1  ;;  %v8598_v19 = vpop.f32.mrf.mxu0  ;;  %v13720_v9 = vld [vmem:[#allocation4 + $0x68] sm:$0xff]   ;;  %v13725_v16 = vld [vmem:[#allocation4 + $0x18] sm:$0xff]  }
 0xd52   :  { %8167 = vst.msk [vmem:[#allocation4 + $0x2c] sm:$0xf] %vm3803_vm6, %v11876_v30  ;;  %8629 = vst.msk [vmem:[#allocation4 + $0x8c] sm:$0xf] %vm3803_vm6, %v11900_v34  ;;  %v11874_v38 = vpack.c.bf16 %v8136_v12, %v8136_v12  ;;  %v11898_v24 = vpack.c.bf16 %v8598_v19, %v8598_v19  ;;  %v13734_v37 = vld [vmem:[%s16030_s9] ss:$12 sps:$4 sm:$0xff]  }
 0xd53   :  { %v13043_v41 = vpop.f32.mrf.mxu1  ;;  %v13722_v11 = vld [vmem:[#allocation4 + $0x60] sm:$0xff]   ;;  %v13727_v18 = vld [vmem:[#allocation4 + $0x10] sm:$0xff]   ;;  %v13739_v50 = vld [vmem:[%s16030_s9 + $0x1c] ss:$12 sps:$4 sm:$0xff]  }
 0xd54   :  { %8165 = vst.msk [vmem:[#allocation4 + $0x24] sm:$0xf] %vm3803_vm6, %v11874_v38  ;;  %8627 = vst.msk [vmem:[#allocation4 + $0x84] sm:$0xf] %vm3803_vm6, %v11898_v24  ;;  %v11879_v42 = vpack.c.bf16 %v13043_v41, %v13043_v41  ;;  %v13737_v53 = vld [vmem:[%s16030_s9 + $0x18] ss:$12 sps:$4 sm:$0xff]  }
 0xd55   :  { %v8210_v43 = vpop.f32.mrf.mxu1 }
 0xd56   :  { %8243 = vst.msk [vmem:[#allocation4 + $0x38] sm:$0xf] %vm3803_vm6, %v11879_v42  ;;  %v11877_v27 = vpack.c.bf16 %v8210_v43, %v8210_v43 }
 0xd57   :  { %v13044_v31 = vpop.f32.mrf.mxu1 }
 0xd58   :  { %8241 = vst.msk [vmem:[#allocation4 + $0x30] sm:$0xf] %vm3803_vm6, %v11877_v27  ;;  %v11880_v17 = vpack.c.bf16 %v13044_v31, %v13044_v31 }
 0xd59   :  { %v8213_v57 = vpop.f32.mrf.mxu1  ;;  %v13714_v36 = vld [vmem:[#allocation4 + $0x88] sm:$0xff]  }
 0xd5a   :  { %8244 = vst.msk [vmem:[#allocation4 + $0x3c] sm:$0xf] %vm3803_vm6, %v11880_v17  ;;  %v11878_v2 = vpack.c.bf16 %v8213_v57, %v8213_v57  ;;  %13075 = vmatprep.subr.bf16.mxu0 %v13714_v36  ;;  %v13721_v10 = vld [vmem:[#allocation4 + $0x28] sm:$0xff]  }
 0xd5b   :  { %v13055_v39 = vpop.f32.mrf.mxu1  ;;  %v13715_v33 = vld [vmem:[#allocation4 + $0x80] sm:$0xff]   ;;  %13076 = vmatpush3.bf16.msra.mxu0 %v13714_v36 }
 0xd5c   :  { %8242 = vst.msk [vmem:[#allocation4 + $0x34] sm:$0xf] %vm3803_vm6, %v11878_v2  ;;  %v11887_v15 = vpack.c.bf16 %v13055_v39, %v13055_v39  ;;  %13077 = vmatprep.subr.bf16.mxu0 %v13715_v33  ;;  %v13723_v13 = vld [vmem:[#allocation4 + $0x20] sm:$0xff]  }
 0xd5d   :  { %v8364_v58 = vpop.f32.mrf.mxu1 }
 0xd5e   :  { %8397 = vst.msk [vmem:[#allocation4 + $0x58] sm:$0xf] %vm3803_vm6, %v11887_v15  ;;  %v11885_v28 = vpack.c.bf16 %v8364_v58, %v8364_v58 }
 0xd5f   :  { %v13056_v29 = vpop.f32.mrf.mxu1  ;;  %13078 = vmatpush3.bf16.msra.mxu0 %v13715_v33 }
 0xd60   :  { %8395 = vst.msk [vmem:[#allocation4 + $0x50] sm:$0xf] %vm3803_vm6, %v11885_v28  ;;  %v11888_v44 = vpack.c.bf16 %v13056_v29, %v13056_v29 }
 0xd61   :  { %v8367_v45 = vpop.f32.mrf.mxu1  ;;  %v13717_v59 = vld [vmem:[#allocation4 + $0x38] sm:$0xff]  }
 0xd62   :  { %8398 = vst.msk [vmem:[#allocation4 + $0x5c] sm:$0xf] %vm3803_vm6, %v11888_v44  ;;  %v11886_v46 = vpack.c.bf16 %v8367_v45, %v8367_v45  ;;  %13080 = vmatmul.mubr.msk.bf16.vlgmr.msra.gmra.mxu0 %vm6701_vm8, %v13732_v40 }
 0xd63   :  { %v13067_v47 = vpop.f32.mrf.mxu1  ;;  %v13719_v6 = vld [vmem:[#allocation4 + $0x30] sm:$0xff]  }
 0xd64   :  { %8396 = vst.msk [vmem:[#allocation4 + $0x54] sm:$0xf] %vm3803_vm6, %v11886_v46  ;;  %v11895_v48 = vpack.c.bf16 %v13067_v47, %v13067_v47 }
 0xd65   :  { %v8518_v49 = vpop.f32.mrf.mxu1 }
 0xd66   :  { %8551 = vst.msk [vmem:[#allocation4 + $0x78] sm:$0xf] %vm3803_vm6, %v11895_v48  ;;  %v11893_v51 = vpack.c.bf16 %v8518_v49, %v8518_v49 }
 0xd67   :  { %v13068_v52 = vpop.f32.mrf.mxu1 }
 0xd68   :  { %8549 = vst.msk [vmem:[#allocation4 + $0x70] sm:$0xf] %vm3803_vm6, %v11893_v51  ;;  %v11896_v54 = vpack.c.bf16 %v13068_v52, %v13068_v52 }
 0xd69   :  { %v8521_v55 = vpop.f32.mrf.mxu1  ;;  %v13724_v14 = vld [vmem:[#allocation4 + $0x58] sm:$0xff]  }
 0xd6a   :  { %8552 = vst.msk [vmem:[#allocation4 + $0x7c] sm:$0xf] %vm3803_vm6, %v11896_v54  ;;  %v11894_v60 = vpack.c.bf16 %v8521_v55, %v8521_v55 }
 0xd6b   :  { %v13726_v61 = vld [vmem:[#allocation4 + $0x50] sm:$0xff]  }
 0xd6c   :  { %8550 = vst.msk [vmem:[#allocation4 + $0x74] sm:$0xf] %vm3803_vm6, %v11894_v60  ;;  %v13740_v60 = vld [vmem:[%s16027_s6] sm:$0xff]  }
 0xd6d   :  { %13083 = vmatprep.subr.bf16.mxu0 %v13740_v60 }
 0xd6e   :  { %13084 = vmatpush3.bf16.msra.mxu0 %v13740_v60 }
 0xd71   :  { %v13716_v1 = vld [vmem:[#allocation4 + $0x78] sm:$0xff]  }
 0xd72   :  { %12614 = vmatprep.subr.bf16.mxu1 %v13716_v1  ;;  %v13741_v1 = vld [vmem:[%s16027_s6 + $0x20] sm:$0xff]  }
 0xd73   :  { %v13718_v4 = vld [vmem:[#allocation4 + $0x70] sm:$0xff]   ;;  %12615 = vmatpush3.bf16.msra.mxu1 %v13717_v59  ;;  %v15845_v59 = vld [vmem:[%s16027_s6 + $0x8] sm:$0xff]  }
 0xd74   :  { %12616 = vmatprep.subr.bf16.mxu1 %v13718_v4  ;;  %13089 = vmatprep.subr.bf16.mxu0 %v15845_v59  ;;  %v15851_v4 = vld [vmem:[%s16027_s6 + $0x30] sm:$0xff]  }
 0xd77   :  { %12617 = vmatpush3.bf16.msra.mxu1 %v13719_v6 }
 0xd78   :  { %12618 = vmatprep.subr.bf16.mxu1 %v13720_v9 }
 0xd7b   :  { %12619 = vmatpush3.bf16.msra.mxu1 %v13721_v10 }
 0xd7c   :  { %12620 = vmatprep.subr.bf16.mxu1 %v13722_v11 }
 0xd7f   :  { %12621 = vmatpush3.bf16.msra.mxu1 %v13723_v13 }
 0xd80   :  { %12622 = vmatprep.subr.bf16.mxu1 %v13724_v14 }
 0xd83   :  { %12623 = vmatpush3.bf16.msra.mxu1 %v13725_v16 }
 0xd84   :  { %12624 = vmatprep.subr.bf16.mxu1 %v13726_v61 }
 0xd87   :  { %12625 = vmatpush3.bf16.msra.mxu1 %v13727_v18 }
 0xd88   :  { %12626 = vmatprep.subr.bf16.mxu1 %v13728_v20 }
 0xd8b   :  { %12627 = vmatpush3.bf16.msra.mxu1 %v13729_v21 }
 0xd8c   :  { %12628 = vmatprep.subr.bf16.mxu1 %v13730_v25 }
 0xd8f   :  { %12629 = vmatpush3.bf16.msra.mxu1 %v13733_v26 }
 0xd90   :  { %13107 = vmatprep.subr.bf16.mxu1 %v13741_v1 }
 0xd92   :  { %8851 = vmatmul.mubr.bf16.vlgmr.msra.gmra.mxu1 %v13734_v37 }
 0xd93   :  { %8858 = vmatprep.mubr.bf16.mxu1 %v13739_v50  ;;  %13108 = vmatpush3.bf16.msra.mxu1 %v13741_v1 }
 0xd94   :  { %13119 = vmatprep.subr.bf16.mxu1 %v15851_v4 }
 0xd9a   :  { %8859 = vmatmul.mubr.bf16.gmra.mxu1 %v13737_v53 }
 0xe22   :  { %v13081_v30 = vpop.f32.mrf.mxu0 }
 0xe24   :  { %v8901_v34 = vpop.f32.mrf.mxu0 }
 0xe26   :  { %v13082_v24 = vpop.f32.mrf.mxu0 }
 0xe28   :  { %v8904_v57 = vpop.f32.mrf.mxu0 }
 0xe52   :  { %v12630_v12 = vpop.f32.mrf.mxu1 }
 0xe54   :  { %v12631_v19 = vpop.f32.mrf.mxu1 }
 0xe55   :  { %v12632_v38 = vadd.f32 %v12631_v19, %v12630_v12 }
 0xe56   :  { %v12633_v41 = vpop.f32.mrf.mxu1 }
 0xe57   :  { %v15808_v42 = vadd.f32 %v12632_v38, %v8901_v34 }
 0xe58   :  { %v12634_v43 = vpop.f32.mrf.mxu1 }
 0xe59   :  { %v12635_v27 = vadd.f32 %v12634_v43, %v12633_v41  ;;  %v8920_v31 = vsel %vm5744_vm7, %v15808_v42, 0.0  ;;  %v8916_v17 = vmul.f32 %v15808_v42, %v15808_v42 }
 0xe5a   :  { %v12636_v36 = vpop.f32.mrf.mxu1  ;;  %8921 = vadd.xlane.f32.xlu0 %v8920_v31 }
 0xe5b   :  { %v15814_v2 = vadd.f32 %v12635_v27, %v8904_v57  ;;  %v8932_v58 = vsel %vm5744_vm7, %v8916_v17, 0.0 }
 0xe5c   :  { %v12637_v39 = vpop.f32.mrf.mxu1 }
 0xe5d   :  { %v12638_v33 = vadd.f32 %v12637_v39, %v12636_v36  ;;  %v8923_v15 = vsel %vm5744_vm7, %v15814_v2, 0.0  ;;  %v8917_v28 = vmul.f32 %v15814_v2, %v15814_v2 }
 0xe5e   :  { %v12639_v29 = vpop.f32.mrf.mxu1  ;;  %8924 = vadd.xlane.f32.xlu1 %v8923_v15  ;;  %8933 = vadd.xlane.f32.xlu0 %v8932_v58 }
 0xe5f   :  { %v15821_v40 = vadd.f32 %v13081_v30, %v12638_v33  ;;  %v8935_v46 = vsel %vm5744_vm7, %v8917_v28, 0.0 }
 0xe60   :  { %v12640_v44 = vpop.f32.mrf.mxu1 }
 0xe61   :  { %v12641_v45 = vadd.f32 %v12640_v44, %v12639_v29  ;;  %v8926_v47 = vsel %vm5744_vm7, %v15821_v40, 0.0  ;;  %v8918_v48 = vmul.f32 %v15821_v40, %v15821_v40 }
 0xe62   :  { %8936 = vadd.xlane.f32.xlu1 %v8935_v46  ;;  %8927 = vadd.xlane.f32.xlu0 %v8926_v47 }
 0xe63   :  { %v15828_v49 = vadd.f32 %v13082_v24, %v12641_v45  ;;  %v8938_v52 = vsel %vm5744_vm7, %v8918_v48, 0.0 }
 0xe65   :  { %v8929_v51 = vsel %vm5744_vm7, %v15828_v49, 0.0  ;;  %v8919_v54 = vmul.f32 %v15828_v49, %v15828_v49 }
 0xe66   :  { %8930 = vadd.xlane.f32.xlu1 %v8929_v51  ;;  %8939 = vadd.xlane.f32.xlu0 %v8938_v52 }
 0xe67   :  { %v8941_v55 = vsel %vm5744_vm7, %v8919_v54, 0.0 }
 0xe6a   :  { %8942 = vadd.xlane.f32.xlu1 %v8941_v55 }
 0xee3   :  { %v8922_v6 = vpop.xlane.xlu0 %8921 }
 0xee4   :  { %v8944_v9 = vmul.f32 0.0625, %v8922_v6 }
 0xee6   :  { %v8952_v13 = vmul.f32 %v8944_v9, %v8944_v9  ;;  %v8964_v58 = vsub.f32 %v15808_v42, %v8944_v9 }
 0xee7   :  { %v8925_v10 = vpop.xlane.xlu1 %8924  ;;  %v8934_v11 = vpop.xlane.xlu0 %8933 }
 0xee8   :  { %v8945_v14 = vmul.f32 0.0625, %v8925_v10  ;;  %v8948_v16 = vmul.f32 0.0625, %v8934_v11 }
 0xeea   :  { %v8956_v61 = vsub.f32 %v8948_v16, %v8952_v13  ;;  %v8953_v21 = vmul.f32 %v8945_v14, %v8945_v14  ;;  %v8965_v44 = vsub.f32 %v15814_v2, %v8945_v14  ;;  %v13744_v14 = vld [vmem:[%s16027_s6 + $0x10] sm:$0xff]   ;;  %v13746_v16 = vld [vmem:[%s16027_s6 + $0x18] sm:$0xff]  }
 0xeeb   :  { %v8937_v18 = vpop.xlane.xlu1 %8936  ;;  %v8928_v20 = vpop.xlane.xlu0 %8927 }
 0xeec   :  { %v8960_v25 = vmax.f32 %v8956_v61, 0.0  ;;  %v8949_v26 = vmul.f32 0.0625, %v8937_v18  ;;  %v8946_v37 = vmul.f32 0.0625, %v8928_v20  ;;  %v13766_v61 = vld [vmem:[%s16031_s10 + $0x8] ss:$12 sps:$4 sm:$0xff]  }
 0xeed   :  { %v13771_v18 = vld [vmem:[%s16031_s10 + $0x4] ss:$12 sps:$4 sm:$0xff]  }
 0xeee   :  { %v8968_v50 = vadd.f32 1e-05, %v8960_v25  ;;  %v8957_v53 = vsub.f32 %v8949_v26, %v8953_v21  ;;  %v8954_v30 = vmul.f32 %v8946_v37, %v8946_v37  ;;  %v8966_v51 = vsub.f32 %v15821_v40, %v8946_v37 }
 0xeef   :  { %v8931_v34 = vpop.xlane.xlu1 %8930  ;;  %v8940_v12 = vpop.xlane.xlu0 %8939 }
 0xef0   :  { %13807 = vrsqrt.f32 %v8968_v50  ;;  %v8961_v19 = vmax.f32 %v8957_v53, 0.0  ;;  %v8947_v38 = vmul.f32 0.0625, %v8931_v34  ;;  %v8950_v24 = vmul.f32 0.0625, %v8940_v12 }
 0xef2   :  { %v8969_v41 = vadd.f32 1e-05, %v8961_v19  ;;  %v8958_v43 = vsub.f32 %v8950_v24, %v8954_v30  ;;  %v8955_v31 = vmul.f32 %v8947_v38, %v8947_v38  ;;  %v8967_v42 = vsub.f32 %v15828_v49, %v8947_v38  ;;  %v13745_v49 = vld [vmem:[%s16027_s6 + $0x40] sm:$0xff]  }
 0xef3   :  { %v8943_v27 = vpop.xlane.xlu1 %8942 }
 0xef4   :  { %13809 = vrsqrt.f32 %v8969_v41  ;;  %v8962_v17 = vmax.f32 %v8958_v43, 0.0  ;;  %v8951_v57 = vmul.f32 0.0625, %v8943_v27 }
 0xef6   :  { %v8970_v36 = vadd.f32 1e-05, %v8962_v17  ;;  %v8959_v39 = vsub.f32 %v8951_v57, %v8955_v31 }
 0xef8   :  { %13811 = vrsqrt.f32 %v8970_v36  ;;  %v8963_v33 = vmax.f32 %v8959_v39, 0.0 }
 0xefa   :  { %v8971_v15 = vadd.f32 1e-05, %v8963_v33 }
 0xefc   :  { %13813 = vrsqrt.f32 %v8971_v15 }
 0xefd   :  { %v13808_v28 = vpop.eup %13807 }
 0xefe   :  { %v8976_v29 = vmul.f32 %v13808_v28, %v8964_v58 }
 0xf00   :  { %v8984_v46 = vmul.f32 0.2, %v8976_v29  ;;  %vm8980_vm9 = vcmp.ge.f32.partialorder %v8976_v29, 0.0 }
 0xf01   :  { %v13810_v45 = vpop.eup %13809 }
 0xf02   :  { %v8977_v47 = vmul.f32 %v13810_v45, %v8965_v44  ;;  %v8988_v54 = vsel %vm8980_vm9, %v8976_v29, %v8984_v46 }
 0xf04   :  { %vm8981_vm10 = vcmp.ge.f32.partialorder %v8977_v47, 0.0  ;;  %v8985_v48 = vmul.f32 0.2, %v8977_v47 }
 0xf05   :  { %v13812_v52 = vpop.eup %13811 }
 0xf06   :  { %v8989_v55 = vsel %vm8981_vm10, %v8977_v47, %v8985_v48  ;;  %v8978_v60 = vmul.f32 %v13812_v52, %v8966_v51 }
 0xf07   :  { %v8992_v1 = vpack.c.bf16 %v8989_v55, %v8988_v54 }
 0xf08   :  { %v8986_v2 = vmul.f32 0.2, %v8978_v60  ;;  %vm8982_vm11 = vcmp.ge.f32.partialorder %v8978_v60, 0.0 }
 0xf09   :  { %v13814_v6 = vpop.eup %13813  ;;  %13085 = vmatprep.mubr.msk.bf16.mxu0 %vm5744_vm7, %v8992_v1  ;;  %13109 = vmatprep.mubr.msk.bf16.mxu1 %vm5744_vm7, %v8992_v1 }
 0xf0a   :  { %v8979_v9 = vmul.f32 %v13814_v6, %v8967_v42  ;;  %v8990_v11 = vsel %vm8982_vm11, %v8978_v60, %v8986_v2 }
 0xf0c   :  { %vm8983_vm12 = vcmp.ge.f32.partialorder %v8979_v9, 0.0  ;;  %v8987_v10 = vmul.f32 0.2, %v8979_v9 }
 0xf0e   :  { %v8991_v13 = vsel %vm8983_vm12, %v8979_v9, %v8987_v10 }
 0xf0f   :  { %v8993_v40 = vpack.c.bf16 %v8991_v13, %v8990_v11 }
 0xf11   :  { %13086 = vmatmul.mubr.msk.bf16.vlgmr.msra.gmra.mxu0 %vm5744_vm7, %v8993_v40  ;;  %13110 = vmatmul.mubr.msk.bf16.vlgmr.msra.gmra.mxu1 %vm5744_vm7, %v8993_v40 }
 0xf12   :  { %13090 = vmatpush3.bf16.msra.mxu0 %v15845_v59  ;;  %13091 = vmatprep.mubr.msk.bf16.mxu0 %vm5744_vm7, %v8992_v1  ;;  %v13747_v59 = vld [vmem:[%s16027_s6 + $0x28] sm:$0xff]  }
 0xf13   :  { %13121 = vmatprep.mubr.msk.bf16.mxu1 %vm5744_vm7, %v8992_v1  ;;  %13120 = vmatpush3.bf16.msra.mxu1 %v15851_v4  ;;  %v13748_v4 = vld [vmem:[%s16027_s6 + $0x38] sm:$0xff]  }
 0xf14   :  { %13095 = vmatprep.subr.bf16.mxu0 %v13744_v14  ;;  %13131 = vmatprep.subr.bf16.mxu1 %v13745_v49 }
 0xf19   :  { %13092 = vmatmul.mubr.msk.bf16.vlgmr.msra.gmra.mxu0 %vm5744_vm7, %v8993_v40  ;;  %13122 = vmatmul.mubr.msk.bf16.vlgmr.msra.gmra.mxu1 %vm5744_vm7, %v8993_v40 }
 0xf1a   :  { %13096 = vmatpush3.bf16.msra.mxu0 %v13744_v14  ;;  %13097 = vmatprep.mubr.msk.bf16.mxu0 %vm5744_vm7, %v8992_v1 }
 0xf1b   :  { %13133 = vmatprep.mubr.msk.bf16.mxu1 %vm5744_vm7, %v8992_v1  ;;  %13132 = vmatpush3.bf16.msra.mxu1 %v13745_v49 }
 0xf1c   :  { %13101 = vmatprep.subr.bf16.mxu0 %v13746_v16 }
 0xf21   :  { %13098 = vmatmul.mubr.msk.bf16.vlgmr.msra.gmra.mxu0 %vm5744_vm7, %v8993_v40  ;;  %13134 = vmatmul.mubr.msk.bf16.vlgmr.msra.gmra.mxu1 %vm5744_vm7, %v8993_v40 }
 0xf22   :  { %13102 = vmatpush3.bf16.msra.mxu0 %v13746_v16  ;;  %13103 = vmatprep.mubr.msk.bf16.mxu0 %vm5744_vm7, %v8992_v1 }
 0xf23   :  { %13113 = vmatprep.subr.bf16.mxu0 %v13747_v59  ;;  %13141 = vmatprep.mubr.msk.bf16.mxu1 %vm6701_vm8, %v13766_v61 }
 0xf29   :  { %13104 = vmatmul.mubr.msk.bf16.vlgmr.msra.gmra.mxu0 %vm5744_vm7, %v8993_v40 }
 0xf2a   :  { %13114 = vmatpush3.bf16.msra.mxu0 %v13747_v59  ;;  %13115 = vmatprep.mubr.msk.bf16.mxu0 %vm5744_vm7, %v8992_v1 }
 0xf2b   :  { %13125 = vmatprep.subr.bf16.mxu0 %v13748_v4 }
 0xf31   :  { %13116 = vmatmul.mubr.msk.bf16.vlgmr.msra.gmra.mxu0 %vm5744_vm7, %v8993_v40 }
 0xf32   :  { %13126 = vmatpush3.bf16.msra.mxu0 %v13748_v4  ;;  %13127 = vmatprep.mubr.msk.bf16.mxu0 %vm5744_vm7, %v8992_v1 }
 0xf39   :  { %13128 = vmatmul.mubr.msk.bf16.vlgmr.msra.gmra.mxu0 %vm5744_vm7, %v8993_v40 }
 0xf3a   :  { %9913 = vmatprep.mubr.bf16.mxu0 %v13771_v18 }
 0xfd1   :  { %v13087_v20 = vpop.f32.mrf.mxu0  ;;  %v13111_v21 = vpop.f32.mrf.mxu1 }
 0xfd2   :  { %v11903_v25 = vpack.c.bf16 %v13087_v20, %v13087_v20  ;;  %v11919_v26 = vpack.c.bf16 %v13111_v21, %v13111_v21 }
 0xfd3   :  { %v9042_v37 = vpop.f32.mrf.mxu0  ;;  %v9350_v50 = vpop.f32.mrf.mxu1 }
 0xfd4   :  { %9075 = vst.msk [vmem:[#allocation4 + $0x8] sm:$0xf] %vm3803_vm6, %v11903_v25  ;;  %9383 = vst.msk [vmem:[#allocation4 + $0x48] sm:$0xf] %vm3803_vm6, %v11919_v26  ;;  %v11901_v53 = vpack.c.bf16 %v9042_v37, %v9042_v37  ;;  %v11917_v30 = vpack.c.bf16 %v9350_v50, %v9350_v50 }
 0xfd5   :  { %v13088_v34 = vpop.f32.mrf.mxu0  ;;  %v13112_v12 = vpop.f32.mrf.mxu1 }
 0xfd6   :  { %9073 = vst.msk [vmem:[#allocation4] sm:$0xf] %vm3803_vm6, %v11901_v53  ;;  %9381 = vst.msk [vmem:[#allocation4 + $0x40] sm:$0xf] %vm3803_vm6, %v11917_v30  ;;  %v11904_v19 = vpack.c.bf16 %v13088_v34, %v13088_v34  ;;  %v11920_v38 = vpack.c.bf16 %v13112_v12, %v13112_v12 }
 0xfd7   :  { %v9045_v24 = vpop.f32.mrf.mxu0  ;;  %v9353_v41 = vpop.f32.mrf.mxu1 }
 0xfd8   :  { %9076 = vst.msk [vmem:[#allocation4 + $0xc] sm:$0xf] %vm3803_vm6, %v11904_v19  ;;  %9384 = vst.msk [vmem:[#allocation4 + $0x4c] sm:$0xf] %vm3803_vm6, %v11920_v38  ;;  %v11902_v43 = vpack.c.bf16 %v9045_v24, %v9045_v24  ;;  %v11918_v27 = vpack.c.bf16 %v9353_v41, %v9353_v41  ;;  %v13767_v38 = vld [vmem:[%s16031_s10 + $0x20] ss:$12 sps:$4 sm:$0xff]  }
 0xfd9   :  { %v13093_v31 = vpop.f32.mrf.mxu0  ;;  %v13123_v17 = vpop.f32.mrf.mxu1 }
 0xfda   :  { %9074 = vst.msk [vmem:[#allocation4 + $0x4] sm:$0xf] %vm3803_vm6, %v11902_v43  ;;  %9382 = vst.msk [vmem:[#allocation4 + $0x44] sm:$0xf] %vm3803_vm6, %v11918_v27  ;;  %v11907_v57 = vpack.c.bf16 %v13093_v31, %v13093_v31  ;;  %v11927_v36 = vpack.c.bf16 %v13123_v17, %v13123_v17 }
 0xfdb   :  { %v9119_v39 = vpop.f32.mrf.mxu0  ;;  %v9504_v33 = vpop.f32.mrf.mxu1 }
 0xfdc   :  { %9152 = vst.msk [vmem:[#allocation4 + $0x18] sm:$0xf] %vm3803_vm6, %v11907_v57  ;;  %9537 = vst.msk [vmem:[#allocation4 + $0x68] sm:$0xf] %vm3803_vm6, %v11927_v36  ;;  %v11905_v15 = vpack.c.bf16 %v9119_v39, %v9119_v39  ;;  %v11925_v58 = vpack.c.bf16 %v9504_v33, %v9504_v33 }
 0xfdd   :  { %v13094_v28 = vpop.f32.mrf.mxu0  ;;  %v13124_v29 = vpop.f32.mrf.mxu1 }
 0xfde   :  { %9150 = vst.msk [vmem:[#allocation4 + $0x10] sm:$0xf] %vm3803_vm6, %v11905_v15  ;;  %9535 = vst.msk [vmem:[#allocation4 + $0x60] sm:$0xf] %vm3803_vm6, %v11925_v58  ;;  %v11908_v44 = vpack.c.bf16 %v13094_v28, %v13094_v28  ;;  %v11928_v45 = vpack.c.bf16 %v13124_v29, %v13124_v29 }
 0xfdf   :  { %v9122_v46 = vpop.f32.mrf.mxu0  ;;  %v9507_v47 = vpop.f32.mrf.mxu1 }
 0xfe0   :  { %9153 = vst.msk [vmem:[#allocation4 + $0x1c] sm:$0xf] %vm3803_vm6, %v11908_v44  ;;  %9538 = vst.msk [vmem:[#allocation4 + $0x6c] sm:$0xf] %vm3803_vm6, %v11928_v45  ;;  %v11906_v48 = vpack.c.bf16 %v9122_v46, %v9122_v46  ;;  %v11926_v51 = vpack.c.bf16 %v9507_v47, %v9507_v47 }
 0xfe1   :  { %v13099_v52 = vpop.f32.mrf.mxu0  ;;  %v13135_v54 = vpop.f32.mrf.mxu1 }
 0xfe2   :  { %9151 = vst.msk [vmem:[#allocation4 + $0x14] sm:$0xf] %vm3803_vm6, %v11906_v48  ;;  %9536 = vst.msk [vmem:[#allocation4 + $0x64] sm:$0xf] %vm3803_vm6, %v11926_v51  ;;  %v11911_v55 = vpack.c.bf16 %v13099_v52, %v13099_v52  ;;  %v11935_v60 = vpack.c.bf16 %v13135_v54, %v13135_v54 }
 0xfe3   :  { %v9196_v1 = vpop.f32.mrf.mxu0  ;;  %v9658_v42 = vpop.f32.mrf.mxu1 }
 0xfe4   :  { %9229 = vst.msk [vmem:[#allocation4 + $0x28] sm:$0xf] %vm3803_vm6, %v11911_v55  ;;  %9691 = vst.msk [vmem:[#allocation4 + $0x88] sm:$0xf] %vm3803_vm6, %v11935_v60  ;;  %v11909_v6 = vpack.c.bf16 %v9196_v1, %v9196_v1  ;;  %v11933_v2 = vpack.c.bf16 %v9658_v42, %v9658_v42  ;;  %v13763_v60 = vld [vmem:[#allocation4 + $0x48] sm:$0xff]   ;;  %v13765_v42 = vld [vmem:[#allocation4 + $0x40] sm:$0xff]  }
 0xfe5   :  { %v13100_v9 = vpop.f32.mrf.mxu0  ;;  %v13136_v10 = vpop.f32.mrf.mxu1  ;;  %v13764_v1 = vld [vmem:[#allocation4 + $0x8] sm:$0xff]  }
 0xfe6   :  { %9227 = vst.msk [vmem:[#allocation4 + $0x20] sm:$0xf] %vm3803_vm6, %v11909_v6  ;;  %9689 = vst.msk [vmem:[#allocation4 + $0x80] sm:$0xf] %vm3803_vm6, %v11933_v2  ;;  %v11912_v11 = vpack.c.bf16 %v13100_v9, %v13100_v9  ;;  %v11936_v13 = vpack.c.bf16 %v13136_v10, %v13136_v10  ;;  %v13768_v6 = vld [vmem:[#allocation4] sm:$0xff]  }
 0xfe7   :  { %v9199_v40 = vpop.f32.mrf.mxu0  ;;  %v9661_v14 = vpop.f32.mrf.mxu1  ;;  %v13755_v45 = vld [vmem:[#allocation4 + $0x68] sm:$0xff]   ;;  %v13760_v52 = vld [vmem:[#allocation4 + $0x18] sm:$0xff]  }
 0xfe8   :  { %9230 = vst.msk [vmem:[#allocation4 + $0x2c] sm:$0xf] %vm3803_vm6, %v11912_v11  ;;  %9692 = vst.msk [vmem:[#allocation4 + $0x8c] sm:$0xf] %vm3803_vm6, %v11936_v13  ;;  %v11910_v49 = vpack.c.bf16 %v9199_v40, %v9199_v40  ;;  %v11934_v16 = vpack.c.bf16 %v9661_v14, %v9661_v14  ;;  %v13769_v2 = vld [vmem:[%s16031_s10] ss:$12 sps:$4 sm:$0xff]  }
 0xfe9   :  { %v13105_v59 = vpop.f32.mrf.mxu0  ;;  %v13757_v47 = vld [vmem:[#allocation4 + $0x60] sm:$0xff]   ;;  %v13762_v55 = vld [vmem:[#allocation4 + $0x10] sm:$0xff]   ;;  %v13774_v9 = vld [vmem:[%s16031_s10 + $0x1c] ss:$12 sps:$4 sm:$0xff]  }
 0xfea   :  { %9228 = vst.msk [vmem:[#allocation4 + $0x24] sm:$0xf] %vm3803_vm6, %v11910_v49  ;;  %9690 = vst.msk [vmem:[#allocation4 + $0x84] sm:$0xf] %vm3803_vm6, %v11934_v16  ;;  %v11915_v4 = vpack.c.bf16 %v13105_v59, %v13105_v59  ;;  %v13772_v10 = vld [vmem:[%s16031_s10 + $0x18] ss:$12 sps:$4 sm:$0xff]  }
 0xfeb   :  { %v9273_v61 = vpop.f32.mrf.mxu0  ;;  %s13823_s10 = smov 64  }
 0xfec   :  { %9306 = vst.msk [vmem:[#allocation4 + $0x38] sm:$0xf] %vm3803_vm6, %v11915_v4  ;;  %v11913_v18 = vpack.c.bf16 %v9273_v61, %v9273_v61 }
 0xfed   :  { %v13106_v20 = vpop.f32.mrf.mxu0 }
 0xfee   :  { %9304 = vst.msk [vmem:[#allocation4 + $0x30] sm:$0xf] %vm3803_vm6, %v11913_v18  ;;  %v11916_v21 = vpack.c.bf16 %v13106_v20, %v13106_v20 }
 0xfef   :  { %v9276_v25 = vpop.f32.mrf.mxu0  ;;  %v13749_v26 = vld [vmem:[#allocation4 + $0x88] sm:$0xff]  }
 0xff0   :  { %9307 = vst.msk [vmem:[#allocation4 + $0x3c] sm:$0xf] %vm3803_vm6, %v11916_v21  ;;  %v11914_v37 = vpack.c.bf16 %v9276_v25, %v9276_v25  ;;  %13137 = vmatprep.subr.bf16.mxu1 %v13749_v26  ;;  %v13756_v46 = vld [vmem:[#allocation4 + $0x28] sm:$0xff]  }
 0xff1   :  { %v13117_v50 = vpop.f32.mrf.mxu0  ;;  %v13750_v53 = vld [vmem:[#allocation4 + $0x80] sm:$0xff]   ;;  %13138 = vmatpush3.bf16.msra.mxu1 %v13749_v26 }
 0xff2   :  { %9305 = vst.msk [vmem:[#allocation4 + $0x34] sm:$0xf] %vm3803_vm6, %v11914_v37  ;;  %v11923_v30 = vpack.c.bf16 %v13117_v50, %v13117_v50  ;;  %13139 = vmatprep.subr.bf16.mxu1 %v13750_v53  ;;  %v13758_v48 = vld [vmem:[#allocation4 + $0x20] sm:$0xff]  }
 0xff3   :  { %v9427_v34 = vpop.f32.mrf.mxu0 }
 0xff4   :  { %9460 = vst.msk [vmem:[#allocation4 + $0x58] sm:$0xf] %vm3803_vm6, %v11923_v30  ;;  %v11921_v12 = vpack.c.bf16 %v9427_v34, %v9427_v34 }
 0xff5   :  { %v13118_v19 = vpop.f32.mrf.mxu0  ;;  %13140 = vmatpush3.bf16.msra.mxu1 %v13750_v53 }
 0xff6   :  { %9458 = vst.msk [vmem:[#allocation4 + $0x50] sm:$0xf] %vm3803_vm6, %v11921_v12  ;;  %v11924_v24 = vpack.c.bf16 %v13118_v19, %v13118_v19 }
 0xff7   :  { %v9430_v41 = vpop.f32.mrf.mxu0  ;;  %v13752_v28 = vld [vmem:[#allocation4 + $0x38] sm:$0xff]  }
 0xff8   :  { %9461 = vst.msk [vmem:[#allocation4 + $0x5c] sm:$0xf] %vm3803_vm6, %v11924_v24  ;;  %v11922_v43 = vpack.c.bf16 %v9430_v41, %v9430_v41  ;;  %13142 = vmatmul.mubr.msk.bf16.vlgmr.msra.gmra.mxu1 %vm6701_vm8, %v13767_v38 }
 0xff9   :  { %v13129_v27 = vpop.f32.mrf.mxu0  ;;  %v13754_v44 = vld [vmem:[#allocation4 + $0x30] sm:$0xff]  }
 0xffa   :  { %9459 = vst.msk [vmem:[#allocation4 + $0x54] sm:$0xf] %vm3803_vm6, %v11922_v43  ;;  %v11931_v31 = vpack.c.bf16 %v13129_v27, %v13129_v27 }
 0xffb   :  { %v9581_v17 = vpop.f32.mrf.mxu0 }
 0xffc   :  { %9614 = vst.msk [vmem:[#allocation4 + $0x78] sm:$0xf] %vm3803_vm6, %v11931_v31  ;;  %v11929_v57 = vpack.c.bf16 %v9581_v17, %v9581_v17 }
 0xffd   :  { %v13130_v36 = vpop.f32.mrf.mxu0 }
 0xffe   :  { %9612 = vst.msk [vmem:[#allocation4 + $0x70] sm:$0xf] %vm3803_vm6, %v11929_v57  ;;  %v11932_v39 = vpack.c.bf16 %v13130_v36, %v13130_v36 }
 0xfff   :  { %v9584_v33 = vpop.f32.mrf.mxu0  ;;  %v13759_v51 = vld [vmem:[#allocation4 + $0x58] sm:$0xff]  }
0x1000   :  { %9615 = vst.msk [vmem:[#allocation4 + $0x7c] sm:$0xf] %vm3803_vm6, %v11932_v39  ;;  %v11930_v15 = vpack.c.bf16 %v9584_v33, %v9584_v33 }
0x1001   :  { %v13761_v54 = vld [vmem:[#allocation4 + $0x50] sm:$0xff]  }
0x1002   :  { %9613 = vst.msk [vmem:[#allocation4 + $0x74] sm:$0xf] %vm3803_vm6, %v11930_v15 }
0x1007   :  { %v13751_v58 = vld [vmem:[#allocation4 + $0x78] sm:$0xff]  }
0x1008   :  { %12673 = vmatprep.subr.bf16.mxu0 %v13751_v58 }
0x1009   :  { %v13753_v29 = vld [vmem:[#allocation4 + $0x70] sm:$0xff]   ;;  %12674 = vmatpush3.bf16.msra.mxu0 %v13752_v28 }
0x100a   :  { %12675 = vmatprep.subr.bf16.mxu0 %v13753_v29 }
0x100d   :  { %12676 = vmatpush3.bf16.msra.mxu0 %v13754_v44 }
0x100e   :  { %12677 = vmatprep.subr.bf16.mxu0 %v13755_v45 }
0x1011   :  { %12678 = vmatpush3.bf16.msra.mxu0 %v13756_v46 }
0x1012   :  { %12679 = vmatprep.subr.bf16.mxu0 %v13757_v47 }
0x1015   :  { %12680 = vmatpush3.bf16.msra.mxu0 %v13758_v48 }
0x1016   :  { %12681 = vmatprep.subr.bf16.mxu0 %v13759_v51 }
0x1019   :  { %12682 = vmatpush3.bf16.msra.mxu0 %v13760_v52 }
0x101a   :  { %12683 = vmatprep.subr.bf16.mxu0 %v13761_v54 }
0x101d   :  { %12684 = vmatpush3.bf16.msra.mxu0 %v13762_v55 }
0x101e   :  { %12685 = vmatprep.subr.bf16.mxu0 %v13763_v60 }
0x1021   :  { %12686 = vmatpush3.bf16.msra.mxu0 %v13764_v1 }
0x1022   :  { %12687 = vmatprep.subr.bf16.mxu0 %v13765_v42 }
0x1025   :  { %12688 = vmatpush3.bf16.msra.mxu0 %v13768_v6 }
0x1028   :  { %9914 = vmatmul.mubr.bf16.vlgmr.msra.gmra.mxu0 %v13769_v2 }
0x1029   :  { %9921 = vmatprep.mubr.bf16.mxu0 %v13774_v9 }
0x1030   :  { %9922 = vmatmul.mubr.bf16.gmra.mxu0 %v13772_v10 }
0x10b8   :  { %v13143_v11 = vpop.f32.mrf.mxu1 }
0x10ba   :  { %v9964_v13 = vpop.f32.mrf.mxu1 }
0x10bc   :  { %v13144_v16 = vpop.f32.mrf.mxu1 }
0x10be   :  { %v9967_v25 = vpop.f32.mrf.mxu1 }
0x10e8   :  { %v12689_v40 = vpop.f32.mrf.mxu0 }
0x10ea   :  { %v12690_v14 = vpop.f32.mrf.mxu0 }
0x10eb   :  { %v12691_v49 = vadd.f32 %v12690_v14, %v12689_v40 }
0x10ec   :  { %v12692_v59 = vpop.f32.mrf.mxu0 }
0x10ed   :  { %v15949_v4 = vadd.f32 %v12691_v49, %v9964_v13 }
0x10ee   :  { %v12693_v61 = vpop.f32.mrf.mxu0 }
0x10ef   :  { %v12694_v18 = vadd.f32 %v12693_v61, %v12692_v59  ;;  %v9983_v20 = vsel %vm5744_vm7, %v15949_v4, 0.0  ;;  %v9979_v21 = vmul.f32 %v15949_v4, %v15949_v4 }
0x10f0   :  { %v12695_v26 = vpop.f32.mrf.mxu0  ;;  %9984 = vadd.xlane.f32.xlu0 %v9983_v20 }
0x10f1   :  { %v15955_v37 = vadd.f32 %v12694_v18, %v9967_v25  ;;  %v9995_v34 = vsel %vm5744_vm7, %v9979_v21, 0.0 }
0x10f2   :  { %v12696_v50 = vpop.f32.mrf.mxu0 }
0x10f3   :  { %v12697_v53 = vadd.f32 %v12696_v50, %v12695_v26  ;;  %v9986_v30 = vsel %vm5744_vm7, %v15955_v37, 0.0  ;;  %v9980_v12 = vmul.f32 %v15955_v37, %v15955_v37 }
0x10f4   :  { %v12698_v19 = vpop.f32.mrf.mxu0  ;;  %9987 = vadd.xlane.f32.xlu1 %v9986_v30  ;;  %9996 = vadd.xlane.f32.xlu0 %v9995_v34 }
0x10f5   :  { %v15962_v38 = vadd.f32 %v13143_v11, %v12697_v53  ;;  %v9998_v43 = vsel %vm5744_vm7, %v9980_v12, 0.0 }
0x10f6   :  { %v12699_v24 = vpop.f32.mrf.mxu0 }
0x10f7   :  { %v12700_v41 = vadd.f32 %v12699_v24, %v12698_v19  ;;  %v9989_v27 = vsel %vm5744_vm7, %v15962_v38, 0.0  ;;  %v9981_v31 = vmul.f32 %v15962_v38, %v15962_v38 }
0x10f8   :  { %9999 = vadd.xlane.f32.xlu1 %v9998_v43  ;;  %9990 = vadd.xlane.f32.xlu0 %v9989_v27 }
0x10f9   :  { %v15969_v17 = vadd.f32 %v13144_v16, %v12700_v41  ;;  %v10001_v36 = vsel %vm5744_vm7, %v9981_v31, 0.0 }
0x10fb   :  { %v9992_v57 = vsel %vm5744_vm7, %v15969_v17, 0.0  ;;  %v9982_v39 = vmul.f32 %v15969_v17, %v15969_v17 }
0x10fc   :  { %9993 = vadd.xlane.f32.xlu1 %v9992_v57  ;;  %10002 = vadd.xlane.f32.xlu0 %v10001_v36 }
0x10fd   :  { %v10004_v33 = vsel %vm5744_vm7, %v9982_v39, 0.0 }
0x1100   :  { %10005 = vadd.xlane.f32.xlu1 %v10004_v33 }
0x1111   :  { %10053 = vrot.lane.b32.xlu1 %v15701_v23, %s13823_s10 }
0x1112   :  { %10051 = vrot.lane.b32.xlu0 %v15697_v22, %s13823_s10 }
0x1115   :  { %10055 = vrot.lane.b32.xlu1 %v15711_v32, %s13823_s10 }
0x1119   :  { %10057 = vrot.lane.b32.xlu1 %v15715_v35, %s13823_s10 }
0x1179   :  { %v9985_v15 = vpop.xlane.xlu0 %9984 }
0x117a   :  { %v10007_v58 = vmul.f32 0.0625, %v9985_v15 }
0x117c   :  { %v10015_v44 = vmul.f32 %v10007_v58, %v10007_v58  ;;  %v10027_v26 = vsub.f32 %v15949_v4, %v10007_v58 }
0x117d   :  { %v9988_v28 = vpop.xlane.xlu1 %9987  ;;  %v9997_v29 = vpop.xlane.xlu0 %9996 }
0x117e   :  { %v10008_v45 = vmul.f32 0.0625, %v9988_v28  ;;  %v10011_v46 = vmul.f32 0.0625, %v9997_v29 }
0x1180   :  { %v10019_v47 = vsub.f32 %v10011_v46, %v10015_v44  ;;  %v10016_v52 = vmul.f32 %v10008_v45, %v10008_v45  ;;  %v10028_v30 = vsub.f32 %v15955_v37, %v10008_v45 }
0x1181   :  { %v10000_v48 = vpop.xlane.xlu1 %9999  ;;  %v9991_v51 = vpop.xlane.xlu0 %9990 }
0x1182   :  { %v10023_v54 = vmax.f32 %v10019_v47, 0.0  ;;  %v10012_v55 = vmul.f32 0.0625, %v10000_v48  ;;  %v10009_v60 = vmul.f32 0.0625, %v9991_v51 }
0x1184   :  { %v10031_v1 = vadd.f32 1e-05, %v10023_v54  ;;  %v10020_v42 = vsub.f32 %v10012_v55, %v10016_v52  ;;  %v10017_v6 = vmul.f32 %v10009_v60, %v10009_v60  ;;  %v10029_v24 = vsub.f32 %v15962_v38, %v10009_v60 }
0x1185   :  { %v9994_v2 = vpop.xlane.xlu1 %9993  ;;  %v10003_v9 = vpop.xlane.xlu0 %10002 }
0x1186   :  { %13815 = vrsqrt.f32 %v10031_v1  ;;  %v10024_v10 = vmax.f32 %v10020_v42, 0.0  ;;  %v10010_v11 = vmul.f32 0.0625, %v9994_v2  ;;  %v10013_v13 = vmul.f32 0.0625, %v10003_v9 }
0x1188   :  { %v10032_v40 = vadd.f32 1e-05, %v10024_v10  ;;  %v10021_v14 = vsub.f32 %v10013_v13, %v10017_v6  ;;  %v10018_v16 = vmul.f32 %v10010_v11, %v10010_v11  ;;  %v10030_v4 = vsub.f32 %v15969_v17, %v10010_v11 }
0x1189   :  { %v10006_v49 = vpop.xlane.xlu1 %10005  ;;  %v10052_v33 = vpop.permute.xlu0 %10051 }
0x118a   :  { %13817 = vrsqrt.f32 %v10032_v40  ;;  %v10025_v59 = vmax.f32 %v10021_v14, 0.0  ;;  %v10014_v61 = vmul.f32 0.0625, %v10006_v49 }
0x118c   :  { %v10033_v18 = vadd.f32 1e-05, %v10025_v59  ;;  %v10022_v20 = vsub.f32 %v10014_v61, %v10018_v16 }
0x118d   :  { %v10054_v36 = vpop.permute.xlu1 %10053 }
0x118e   :  { %13819 = vrsqrt.f32 %v10033_v18  ;;  %v10026_v21 = vmax.f32 %v10022_v20, 0.0 }
0x1190   :  { %v10034_v25 = vadd.f32 1e-05, %v10026_v21 }
0x1191   :  { %v10056_v39 = vpop.permute.xlu1 %10055 }
0x1192   :  { %13821 = vrsqrt.f32 %v10034_v25 }
0x1193   :  { %v13816_v50 = vpop.eup %13815 }
0x1194   :  { %v10039_v53 = vmul.f32 %v13816_v50, %v10027_v26 }
0x1195   :  { %v10058_v38 = vpop.permute.xlu1 %10057 }
0x1196   :  { %v10043_v34 = vadd.f32 %v10039_v53, %v15697_v22 }
0x1197   :  { %v13818_v12 = vpop.eup %13817 }
0x1198   :  { %10067 = vrot.lane.b32.xlu0 %v10043_v34, %s13824_s25  ;;  %v10040_v19 = vmul.f32 %v13818_v12, %v10028_v30 }
0x119a   :  { %v10044_v41 = vadd.f32 %v10040_v19, %v15701_v23  ;;  %v10079_v23 = vsel %vm3632_vm5, %v3694_v63, %v10052_v33  ;;  %v10081_v63 = vsel %vm3632_vm5, %v3696_v7, %v10056_v39 }
0x119b   :  { %v13820_v43 = vpop.eup %13819 }
0x119c   :  { %10069 = vrot.lane.b32.xlu1 %v10044_v41, %s13824_s25  ;;  %v10041_v27 = vmul.f32 %v13820_v43, %v10029_v24 }
0x119e   :  { %v10045_v31 = vadd.f32 %v10041_v27, %v15711_v32 }
0x119f   :  { %v13822_v57 = vpop.eup %13821 }
0x11a0   :  { %10071 = vrot.lane.b32.xlu0 %v10045_v31, %s13824_s25  ;;  %v10042_v37 = vmul.f32 %v13822_v57, %v10030_v4 }
0x11a2   :  { %v10046_v22 = vadd.f32 %v10042_v37, %v15715_v35  ;;  %v10080_v35 = vsel %vm3632_vm5, %v3695_v0, %v10054_v36  ;;  %v10082_v0 = vsel %vm3632_vm5, %v3697_v8, %v10058_v38 }
0x11a4   :  { %10073 = vrot.lane.b32.xlu1 %v10046_v22, %s13824_s25 }
0x120a   :  { %v10068_v15 = vpop.permute.xlu0 %10067 }
0x120b   :  { %v10084_v17 = vsel %vm10083_vm13, %v10079_v23, %v10068_v15 }
0x120c   :  { %v10089_v32 = vsel %vm10088_vm14, %v10084_v17, 0.0 }
0x120d   :  { %10093 = vst [vmem:[%s16032_s11] sm:$0xff] %v10089_v32 }
0x120e   :  { %v10070_v58 = vpop.permute.xlu1 %10069 }
0x120f   :  { %v10085_v28 = vsel %vm10083_vm13, %v10080_v35, %v10070_v58 }
0x1210   :  { %v10090_v56 = vsel %vm10088_vm14, %v10085_v28, 0.0 }
0x1211   :  { %10094 = vst [vmem:[%s16032_s11 + $0x8] sm:$0xff] %v10090_v56 }
0x1212   :  { %v10072_v29 = vpop.permute.xlu0 %10071 }
0x1213   :  { %v10086_v44 = vsel %vm10083_vm13, %v10081_v63, %v10072_v29 }
0x1214   :  { %v10091_v62 = vsel %vm10088_vm14, %v10086_v44, 0.0 }
0x1215   :  { %10095 = vst [vmem:[%s16032_s11 + $0x10] sm:$0xff] %v10091_v62 }
0x1216   :  { %v10074_v45 = vpop.permute.xlu1 %10073 }
0x1217   :  { %v10087_v46 = vsel %vm10083_vm13, %v10082_v0, %v10074_v45 }
0x1218   :  { %v10092_v3 = vsel %vm10088_vm14, %v10087_v46, 0.0 }
0x1219   :  { %10096 = vst [vmem:[%s16032_s11 + $0x18] sm:$0xff] %v10092_v3 }

</bundles_post_ra>
